<compile_context>
chip_gen: v5e
topology: v5e:2x2
jax: 0.10.0
libtpu: 0.0.40
codegen_flags: <defaults>
</compile_context>

<pallas_src>
import jax
import jax.numpy as jnp
from jax.experimental import pallas as pl
from jax.experimental.pallas import tpu as pltpu

_F_IN = 28 * 28          # 784
_F_PAD = 896             # 784 padded up to a multiple of 128


def _round_up(n, m):
    return ((n + m - 1) // m) * m


# Feature test: pipeline_mode=pl.Buffered(1) (single-buffering of constant
# operands).  Falls back to default double-buffering on older JAX.
try:
    pl.BlockSpec((8, 128), lambda i: (0, 0), pipeline_mode=pl.Buffered(1))
    _HAS_PIPELINE_MODE = True
except TypeError:          # pragma: no cover - older JAX without pipeline_mode
    _HAS_PIPELINE_MODE = False


def _const_spec(shape):
    """BlockSpec for an operand that is identical for every grid step."""
    index_map = lambda i: (0,) * len(shape)
    if _HAS_PIPELINE_MODE:
        return pl.BlockSpec(shape, index_map, pipeline_mode=pl.Buffered(1))
    return pl.BlockSpec(shape, index_map)


def _leaky_relu(x, slope=0.2):
    # max-form: 2 VALU ops instead of cmp+mul+select.
    return jnp.maximum(x, slope * x)


def discriminator_kernel(x_ref,                     # [896, T]  bf16 (features x batch; row 784 == 1)
                         w0_ref,                    # [1024, 896] bf16 (b0 folded into col 784)
                         w1_ref, b1_ref,            # [512, 1024] bf16, [512, 1] f32
                         w2_ref, b2_ref,            # [256, 512]  bf16, [256, 1] f32
                         w3_ref, b3_ref,            # [256, 1] f32,     [1, 1]  f32
                         o_ref):                    # [1, T] f32 (lane-dense)
    xb = x_ref[...]                                               # bf16 [896, T]

    # layer0: Linear(784->1024) + LeakyReLU(0.2)  [bias folded; Dropout = id]
    h = jnp.dot(w0_ref[...], xb, preferred_element_type=jnp.float32)
    h = _leaky_relu(h)                                            # f32 [1024, T]

    # layer1: Linear(1024->512) + LeakyReLU(0.2)
    h = jnp.dot(w1_ref[...], h.astype(jnp.bfloat16),
                preferred_element_type=jnp.float32)
    h = _leaky_relu(h + b1_ref[...])                              # f32 [512, T]

    # layer2: Linear(512->256) + LeakyReLU(0.2)
    h = jnp.dot(w2_ref[...], h.astype(jnp.bfloat16),
                preferred_element_type=jnp.float32)
    h = _leaky_relu(h + b2_ref[...])                              # f32 [256, T]

    # out: Linear(256->1) + Sigmoid.  Done as VPU multiply + XLU sublane
    # reduce (keeps the MXU free and the [1,T] store lane-dense); exp and the
    # reciprocal both run on the EUP slot.
    logits = jnp.sum(h * w3_ref[...], axis=0, keepdims=True) + b3_ref[...]  # [1, T]
    o_ref[...] = pl.reciprocal(1.0 + jnp.exp(-logits),
                               approx=True).astype(o_ref.dtype)


def prepare_params(params):
    """One-time weight preprocessing (do NOT call per forward).

    params: torch-layout [(w [out,in], b [out]) x 4], float32.
    Returns kernel-ready operands: padded bf16 weights, b0 folded into w0's
    first padded column, remaining biases as [out, 1] f32.
    """
    (w0, b0), (w1, b1), (w2, b2), (w3, b3) = params

    w0p = jnp.pad(w0, ((0, 0), (0, _F_PAD - _F_IN)))               # [1024, 896]
    w0p = w0p.at[:, _F_IN].set(b0)        # fold b0 into the (zero) pad column
    return {
        "w0": w0p.astype(jnp.bfloat16),                            # [1024, 896]
        "w1": w1.astype(jnp.bfloat16),                             # [512, 1024]
        "b1": b1.reshape(-1, 1).astype(jnp.float32),               # [512, 1]
        "w2": w2.astype(jnp.bfloat16),                             # [256, 512]
        "b2": b2.reshape(-1, 1).astype(jnp.float32),               # [256, 1]
        "w3": w3.reshape(-1, 1).astype(jnp.float32),               # [256, 1]
        "b3": b3.reshape(1, 1).astype(jnp.float32),                # [1, 1]
    }


def _vmem_limit_bytes(tile):
    """Actual VMEM footprint for the chosen tile, with 2x headroom, <= 48 MiB."""
    weights_bf16 = (1024 * _F_PAD + 512 * 1024 + 256 * 512) * 2    # single-buffered
    small_f32 = (512 + 256 + 256 + 1) * 128 * 4                    # lane-padded biases/w3
    x_tiles = _F_PAD * tile * 2 * 2                                # bf16, double-buffered
    out_tiles = tile * 4 * 2                                       # f32, double-buffered
    acts_f32 = (1024 + 512 + 256) * tile * 4
    acts_bf16 = (1024 + 512) * tile * 2
    need = weights_bf16 + small_f32 + x_tiles + out_tiles + acts_f32 + acts_bf16
    return int(min(max(2 * need, 16 << 20), 48 << 20))             # < v7x's 64 MiB


def discriminator_forward(x, prepared, *, batch_tile=512):
    """x: [B, 784] float32.  prepared: prepare_params(...) output.

    Returns [B, 1] float32 probabilities.
    """
    assert batch_tile % 128 == 0
    B, F = x.shape
    assert F == _F_IN

    # Tile selection: big enough to amortize the ~0.35 us/grid-step overhead,
    # but aim for >= 2 grid steps when B allows so v7x's two TensorCores both
    # get work; never pad tiny batches past 128.
    b_rounded = _round_up(B, 128)
    tile = min(batch_tile, max(128, _round_up((B + 1) // 2, 128)), b_rounded)
    b_pad = _round_up(B, tile)
    grid = (b_pad // tile,)

    # Kernel input: features x batch, zero-padded, bf16 (cast BEFORE the
    # transpose/pad so the wrapper-side HBM pass is half-width).  Row 784 is
    # set to 1.0 — it multiplies the b0 column folded into w0.
    xt = jnp.pad(x.astype(jnp.bfloat16).T, ((0, _F_PAD - F), (0, b_pad - B)))
    xt = xt.at[_F_IN, :].set(1.0)

    # Cost estimate (advisory): 3 MXU matmuls + output dot, weights + x + out.
    flops = 2 * b_pad * (_F_PAD * 1024 + 1024 * 512 + 512 * 256 + 256)
    bytes_accessed = (
        (1024 * _F_PAD + 512 * 1024 + 256 * 512) * 2      # bf16 weights
        + (512 + 256 + 256 + 1) * 4                        # f32 biases / w3
        + _F_PAD * b_pad * 2                               # x (bf16)
        + b_pad * 4                                        # out (f32)
    )
    cost = pl.CostEstimate(flops=flops, transcendentals=b_pad,
                           bytes_accessed=bytes_accessed)

    out = pl.pallas_call(
        discriminator_kernel,
        out_shape=jax.ShapeDtypeStruct((1, b_pad), jnp.float32),
        grid_spec=pltpu.PrefetchScalarGridSpec(
            num_scalar_prefetch=0,
            grid=grid,
            in_specs=[
                pl.BlockSpec((_F_PAD, tile), lambda i: (0, i)),    # x tile
                _const_spec(prepared["w0"].shape),
                _const_spec(prepared["w1"].shape),
                _const_spec(prepared["b1"].shape),
                _const_spec(prepared["w2"].shape),
                _const_spec(prepared["b2"].shape),
                _const_spec(prepared["w3"].shape),
                _const_spec(prepared["b3"].shape),
            ],
            out_specs=pl.BlockSpec((1, tile), lambda i: (0, i)),   # lane-dense
        ),
        compiler_params=pltpu.CompilerParams(
            dimension_semantics=("parallel",),
            vmem_limit_bytes=_vmem_limit_bytes(tile),
        ),
        cost_estimate=cost,
    )(xt, prepared["w0"], prepared["w1"], prepared["b1"],
      prepared["w2"], prepared["b2"], prepared["w3"], prepared["b3"])

    return out[0, :B].reshape(B, 1)


def init_params(key):
    """nn.Linear-style init (uniform +-1/sqrt(fan_in)), torch layout w:[out,in]."""
    dims = [(_F_IN, 1024), (1024, 512), (512, 256), (256, 1)]
    params = []
    for fan_in, fan_out in dims:
        key, kw, kb = jax.random.split(key, 3)
        bound = 1.0 / jnp.sqrt(jnp.float32(fan_in))
        w = jax.random.uniform(kw, (fan_out, fan_in), jnp.float32, -bound, bound)
        b = jax.random.uniform(kb, (fan_out,), jnp.float32, -bound, bound)
        params.append((w, b))
    return params


def reference_forward(x, params):
    """Plain-JAX f32 reference of the same forward pass (dropout = identity)."""
    h = x
    for i, (w, b) in enumerate(params):
        h = h @ w.T + b
        if i < 3:
            h = jnp.where(h > 0, h, 0.2 * h)
    return 1.0 / (1.0 + jnp.exp(-h))


if __name__ == "__main__":
    key = jax.random.PRNGKey(0)
    kx, kp = jax.random.split(key)

    B = 8                      # small smoke-test batch (padded to 128 inside)
    x = jax.random.normal(kx, (B, _F_IN), jnp.float32)
    params = init_params(kp)
    prepared = prepare_params(params)    # one-time weight prep (cache & reuse)

    out = discriminator_forward(x, prepared)
    out = jax.block_until_ready(out)

    ref = reference_forward(x, params)
    assert out.shape == (B, 1)
    # Kernel matmuls/activations run in bf16 (f32 accumulation) and the
    # sigmoid uses the EUP approx reciprocal; compare with relaxed tolerance
    # against the pure-f32 reference (not bit-exact with PyTorch).
    assert jnp.allclose(out, ref, atol=2e-2, rtol=0.0), "mismatch vs reference"

    print("KERNEL_OK")
</pallas_src>

<mosaic_0001>
module attributes {stable_mosaic.version = 11 : i64} {
  func.func @discriminator_kernel(%arg0: i32, %arg1: memref<896x128xbf16, #tpu.memory_space<vmem>>, %arg2: memref<1024x896xbf16, #tpu.memory_space<vmem>>, %arg3: memref<512x1024xbf16, #tpu.memory_space<vmem>>, %arg4: memref<512x1xf32, #tpu.memory_space<vmem>>, %arg5: memref<256x512xbf16, #tpu.memory_space<vmem>>, %arg6: memref<256x1xf32, #tpu.memory_space<vmem>>, %arg7: memref<256x1xf32, #tpu.memory_space<vmem>>, %arg8: memref<1x1xf32, #tpu.memory_space<vmem>>, %arg9: memref<1x128xf32, #tpu.memory_space<vmem>>) attributes {dimension_semantics = [#tpu.dimension_semantics<parallel>], iteration_bounds = array<i64: 1>, scalar_prefetch = 0 : i64, scratch_operands = 0 : i64, tpu.core_type = #tpu.core_type<tc>, window_params = [{transform_indices = @transform_0, window_bounds = array<i64: 896, 128>}, {pipeline_mode = #tpu.pipeline_mode<synchronous>, transform_indices = @transform_1, window_bounds = array<i64: 1024, 896>}, {pipeline_mode = #tpu.pipeline_mode<synchronous>, transform_indices = @transform_2, window_bounds = array<i64: 512, 1024>}, {pipeline_mode = #tpu.pipeline_mode<synchronous>, transform_indices = @transform_3, window_bounds = array<i64: 512, 1>}, {pipeline_mode = #tpu.pipeline_mode<synchronous>, transform_indices = @transform_4, window_bounds = array<i64: 256, 512>}, {pipeline_mode = #tpu.pipeline_mode<synchronous>, transform_indices = @transform_5, window_bounds = array<i64: 256, 1>}, {pipeline_mode = #tpu.pipeline_mode<synchronous>, transform_indices = @transform_6, window_bounds = array<i64: 256, 1>}, {pipeline_mode = #tpu.pipeline_mode<synchronous>, transform_indices = @transform_7, window_bounds = array<i64: 1, 1>}, {transform_indices = @transform_8, window_bounds = array<i64: 1, 128>}]} {
    %c0 = arith.constant 0 : index
    %c0_0 = arith.constant 0 : index
    %0 = vector.load %arg1[%c0, %c0_0] : memref<896x128xbf16, #tpu.memory_space<vmem>>, vector<896x128xbf16>
    %c0_1 = arith.constant 0 : index
    %c0_2 = arith.constant 0 : index
    %1 = vector.load %arg2[%c0_1, %c0_2] : memref<1024x896xbf16, #tpu.memory_space<vmem>>, vector<1024x896xbf16>
    %cst = arith.constant dense<0.000000e+00> : vector<1024x128xf32>
    %2 = tpu.matmul %1, %0, %cst {dimension_numbers = #tpu.dot_dimension_numbers<[1], [0], [0], [1], [0, 0, 1, 1], [], []>} : vector<1024x896xbf16>, vector<896x128xbf16>, vector<1024x128xf32> -> vector<1024x128xf32>
    %cst_3 = arith.constant 2.000000e-01 : f32
    %3 = vector.broadcast %cst_3 : f32 to vector<1024x128xf32>
    %4 = arith.mulf %3, %2 : vector<1024x128xf32>
    %5 = arith.maximumf %2, %4 : vector<1024x128xf32>
    %c0_4 = arith.constant 0 : index
    %c0_5 = arith.constant 0 : index
    %6 = vector.load %arg3[%c0_4, %c0_5] : memref<512x1024xbf16, #tpu.memory_space<vmem>>, vector<512x1024xbf16>
    %7 = arith.truncf %5 : vector<1024x128xf32> to vector<1024x128xbf16>
    %cst_6 = arith.constant dense<0.000000e+00> : vector<512x128xf32>
    %8 = tpu.matmul %6, %7, %cst_6 {dimension_numbers = #tpu.dot_dimension_numbers<[1], [0], [0], [1], [0, 0, 1, 1], [], []>} : vector<512x1024xbf16>, vector<1024x128xbf16>, vector<512x128xf32> -> vector<512x128xf32>
    %c0_7 = arith.constant 0 : index
    %c0_8 = arith.constant 0 : index
    %9 = vector.load %arg4[%c0_7, %c0_8] : memref<512x1xf32, #tpu.memory_space<vmem>>, vector<512x1xf32>
    %10 = vector.broadcast %9 : vector<512x1xf32> to vector<512x128xf32>
    %11 = arith.addf %8, %10 : vector<512x128xf32>
    %cst_9 = arith.constant 2.000000e-01 : f32
    %12 = vector.broadcast %cst_9 : f32 to vector<512x128xf32>
    %13 = arith.mulf %12, %11 : vector<512x128xf32>
    %14 = arith.maximumf %11, %13 : vector<512x128xf32>
    %c0_10 = arith.constant 0 : index
    %c0_11 = arith.constant 0 : index
    %15 = vector.load %arg5[%c0_10, %c0_11] : memref<256x512xbf16, #tpu.memory_space<vmem>>, vector<256x512xbf16>
    %16 = arith.truncf %14 : vector<512x128xf32> to vector<512x128xbf16>
    %cst_12 = arith.constant dense<0.000000e+00> : vector<256x128xf32>
    %17 = tpu.matmul %15, %16, %cst_12 {dimension_numbers = #tpu.dot_dimension_numbers<[1], [0], [0], [1], [0, 0, 1, 1], [], []>} : vector<256x512xbf16>, vector<512x128xbf16>, vector<256x128xf32> -> vector<256x128xf32>
    %c0_13 = arith.constant 0 : index
    %c0_14 = arith.constant 0 : index
    %18 = vector.load %arg6[%c0_13, %c0_14] : memref<256x1xf32, #tpu.memory_space<vmem>>, vector<256x1xf32>
    %19 = vector.broadcast %18 : vector<256x1xf32> to vector<256x128xf32>
    %20 = arith.addf %17, %19 : vector<256x128xf32>
    %cst_15 = arith.constant 2.000000e-01 : f32
    %21 = vector.broadcast %cst_15 : f32 to vector<256x128xf32>
    %22 = arith.mulf %21, %20 : vector<256x128xf32>
    %23 = arith.maximumf %20, %22 : vector<256x128xf32>
    %c0_16 = arith.constant 0 : index
    %c0_17 = arith.constant 0 : index
    %24 = vector.load %arg7[%c0_16, %c0_17] : memref<256x1xf32, #tpu.memory_space<vmem>>, vector<256x1xf32>
    %25 = vector.broadcast %24 : vector<256x1xf32> to vector<256x128xf32>
    %26 = arith.mulf %23, %25 : vector<256x128xf32>
    %cst_18 = arith.constant dense<0.000000e+00> : vector<128xf32>
    %27 = vector.multi_reduction <add>, %26, %cst_18 [0] : vector<256x128xf32> to vector<128xf32>
    %28 = vector.shape_cast %27 : vector<128xf32> to vector<1x128xf32>
    %c0_19 = arith.constant 0 : index
    %c0_20 = arith.constant 0 : index
    %29 = vector.load %arg8[%c0_19, %c0_20] : memref<1x1xf32, #tpu.memory_space<vmem>>, vector<1x1xf32>
    %30 = vector.broadcast %29 : vector<1x1xf32> to vector<1x128xf32>
    %31 = arith.addf %28, %30 : vector<1x128xf32>
    %cst_21 = arith.constant 0.000000e+00 : f32
    %32 = vector.broadcast %cst_21 : f32 to vector<1x128xf32>
    %33 = arith.subf %32, %31 : vector<1x128xf32>
    %34 = math.exp %33 : vector<1x128xf32>
    %cst_22 = arith.constant 1.000000e+00 : f32
    %35 = vector.broadcast %cst_22 : f32 to vector<1x128xf32>
    %36 = arith.addf %35, %34 : vector<1x128xf32>
    %37 = tpu.reciprocal %36 {approx = true} : vector<1x128xf32> -> vector<1x128xf32>
    %c0_23 = arith.constant 0 : index
    %c0_24 = arith.constant 0 : index
    %38 = vector.load %arg9[%c0_23, %c0_24] : memref<1x128xf32, #tpu.memory_space<vmem>>, vector<1x128xf32>
    tpu.vector_store %arg9[%c0_23, %c0_24], %37 {strides = array<i32>} : memref<1x128xf32, #tpu.memory_space<vmem>>, vector<1x128xf32>,
    return
  }
  func.func @transform_0(%arg0: i32) -> (i32, i32) {
    %c0_i32 = arith.constant 0 : i32
    %c0_i32_0 = arith.constant 0 : i32
    return %c0_i32, %arg0 : i32, i32
  }
  func.func @transform_1(%arg0: i32) -> (i32, i32) {
    %c0_i32 = arith.constant 0 : i32
    %c0_i32_0 = arith.constant 0 : i32
    %c0_i32_1 = arith.constant 0 : i32
    return %c0_i32, %c0_i32_0 : i32, i32
  }
  func.func @transform_2(%arg0: i32) -> (i32, i32) {
    %c0_i32 = arith.constant 0 : i32
    %c0_i32_0 = arith.constant 0 : i32
    %c0_i32_1 = arith.constant 0 : i32
    return %c0_i32, %c0_i32_0 : i32, i32
  }
  func.func @transform_3(%arg0: i32) -> (i32, i32) {
    %c0_i32 = arith.constant 0 : i32
    %c0_i32_0 = arith.constant 0 : i32
    %c0_i32_1 = arith.constant 0 : i32
    return %c0_i32, %c0_i32_0 : i32, i32
  }
  func.func @transform_4(%arg0: i32) -> (i32, i32) {
    %c0_i32 = arith.constant 0 : i32
    %c0_i32_0 = arith.constant 0 : i32
    %c0_i32_1 = arith.constant 0 : i32
    return %c0_i32, %c0_i32_0 : i32, i32
  }
  func.func @transform_5(%arg0: i32) -> (i32, i32) {
    %c0_i32 = arith.constant 0 : i32
    %c0_i32_0 = arith.constant 0 : i32
    %c0_i32_1 = arith.constant 0 : i32
    return %c0_i32, %c0_i32_0 : i32, i32
  }
  func.func @transform_6(%arg0: i32) -> (i32, i32) {
    %c0_i32 = arith.constant 0 : i32
    %c0_i32_0 = arith.constant 0 : i32
    %c0_i32_1 = arith.constant 0 : i32
    return %c0_i32, %c0_i32_0 : i32, i32
  }
  func.func @transform_7(%arg0: i32) -> (i32, i32) {
    %c0_i32 = arith.constant 0 : i32
    %c0_i32_0 = arith.constant 0 : i32
    %c0_i32_1 = arith.constant 0 : i32
    return %c0_i32, %c0_i32_0 : i32, i32
  }
  func.func @transform_8(%arg0: i32) -> (i32, i32) {
    %c0_i32 = arith.constant 0 : i32
    %c0_i32_0 = arith.constant 0 : i32
    return %c0_i32, %arg0 : i32, i32
  }
}

</mosaic_0001>

<bundles_post_ra>
// kernel: tpu_custom_call.1
= control target key start
LH: loop header
LB: loop body
LE: loop exit
PB: predicated region body
PF: predicated region fallthrough
CT: control target
= control target key end

     0   :  { %s17255_s0 = inlined_call_operand.hbm [shape: bf16[896,128], index: 0, kind: input, shape index: {}]   ;;  %s17256_s1 = inlined_call_operand.hbm [shape: bf16[1024,896], index: 1, kind: input, shape index: {}]   ;;  %s17257_s2 = inlined_call_operand.hbm [shape: bf16[512,1024], index: 2, kind: input, shape index: {}]   ;;  %s17258_s3 = inlined_call_operand.vmem [shape: f32[512,1], index: 3, kind: input, shape index: {}]   ;;  %s17259_s4 = inlined_call_operand.hbm [shape: bf16[256,512], index: 4, kind: input, shape index: {}]   ;;  %s17260_s5 = inlined_call_operand.vmem [shape: f32[256,1], index: 5, kind: input, shape index: {}]   ;;  %s17261_s6 = inlined_call_operand.vmem [shape: f32[256,1], index: 6, kind: input, shape index: {}]   ;;  %s17262_s7 = inlined_call_operand.<no memory space> [shape: f32[1,1], index: 7, kind: input, shape index: {}]   ;;  %s17263_s8 = inlined_call_operand.hbm [shape: f32[1,128], index: 8, kind: output, shape index: {}]  }
   0x1   :  { %v13_v0 = vstv %s17262_s7 }
   0x2   :  { %14 = vst [vmem:[#allocation2] sm:$0x1] %v13_v0 }
   0x3   :  { %15 = vsyncpa [#allocation4], 0 }
   0x4   :  { %16 = vsyncpa [#allocation7], 0 }
   0x5   :  { %17 = vsyncpa [#allocation10], 0  ;;  %s36_s9 = sshll.u32 %s17256_s1, 4  ;;  %s37_s9 = int_to_ptr.hbm [resolvable:$true] %s36_s9 }
   0x6   :  { %18 = vsyncpa [#allocation5], 0  ;;  %s14973_s10 = smov [#allocation6]   ;;  %s23_s14 = sshll.u32 %s17255_s0, 4  ;;  %s24_s14 = int_to_ptr.hbm [resolvable:$true] %s23_s14 }
   0x7   :  { %s38_s11 = sshll.u32 %s14973_s10, 4  ;;  %s14974_s15 = smov 448   ;;  %s39_s11 = int_to_ptr.vmem [resolvable:$true] %s38_s11 }
   0x8   :  { %s14975_s16 = smov 28   ;;  %s14976_s7 = smov [#allocation3]  }
   0x9   :  { %44 = dma.hbm_to_vmem [thread:$0]  %s37_s9, 57344, %s39_s11, [#allocation7], %s14974_s15, %s14974_s15, %s14975_s16  }
   0xa   :  { %s25_s17 = sshll.u32 %s14976_s7, 4  ;;  %s14977_s18 = smov 64   ;;  %s26_s17 = int_to_ptr.vmem [resolvable:$true] %s25_s17 }
   0xb   :  { %s14978_s19 = smov 4   ;;  %s49_s21 = sshll.u32 %s17257_s2, 4  ;;  %s50_s21 = int_to_ptr.hbm [resolvable:$true] %s49_s21 }
   0xc   :  { %31 = dma.hbm_to_vmem [thread:$0]  %s24_s14, 7168, %s26_s17, [#allocation4], %s14977_s18, %s14977_s18, %s14978_s19  }
   0xd   :  { %s14979_s22 = smov [#allocation8]   ;;  %s64_s25 = sshll.u32 %s17259_s4, 4  ;;  %s65_s25 = int_to_ptr.hbm [resolvable:$true] %s64_s25 }
   0xe   :  { %s51_s23 = sshll.u32 %s14979_s22, 4  ;;  %s14980_s26 = smov 512   ;;  %s52_s23 = int_to_ptr.vmem [resolvable:$true] %s51_s23 }
   0xf   :  { %s14981_s27 = smov 32   ;;  %s14982_s28 = smov [#allocation9]  }
  0x10   :  { %57 = dma.hbm_to_vmem [thread:$0]  %s50_s21, 32768, %s52_s23, [#allocation7], %s14980_s26, %s14980_s26, %s14981_s27  }
  0x11   :  { %s66_s29 = sshll.u32 %s14982_s28, 4  ;;  %s14983_s30 = smov 256   ;;  %s67_s29 = int_to_ptr.vmem [resolvable:$true] %s66_s29 }
  0x12   :  { %s14984_s9 = smov 16  }
  0x13   :  { %72 = dma.hbm_to_vmem [thread:$0]  %s65_s25, 8192, %s67_s29, [#allocation10], %s14983_s30, %s14983_s30, %s14984_s9  }
  0x14   :  { %14965 = dma.done.wait [#allocation4], 7168  }
  0x15   :  { %14966 = vsyncadd [#allocation4], 4294960128 }
  0x16   :  { %14967 = dma.done.wait [#allocation7], 90112  }
  0x17   :  { %14968 = vsyncadd [#allocation7], 4294877184 }
  0x18   :  { %14969 = dma.done.wait [#allocation10], 8192  }
  0x19   :  { %14970 = vsyncadd [#allocation10], 4294959104  ;;  %v14007_v1 = vld [vmem:[#allocation3 + $0x38] sm:$0xff]  ;;  %v14006_v5 = vld [vmem:[#allocation3 + $0x30] sm:$0xff]  ;;  %s10692_s7 = sshll.u32 %s17263_s8, 4  ;;  %s10693_s7 = int_to_ptr.hbm [resolvable:$true] %s10692_s7 }
  0x1a   :  { %v14015_v2 = vld [vmem:[#allocation3 + $0x78] sm:$0xff]  ;;  %3359 = vmatpush.bf16.msra.mxu0 %v14007_v1  ;;  %v14014_v6 = vld [vmem:[#allocation3 + $0x70] sm:$0xff]  ;;  %v14005_v9 = vld [vmem:[#allocation3 + $0x28] sm:$0xff] }
  0x1b   :  { %v14023_v3 = vld [vmem:[#allocation3 + $0xb8] sm:$0xff]  ;;  %3688 = vmatpush.bf16.msra.mxu1 %v14015_v2  ;;  %v14022_v7 = vld [vmem:[#allocation3 + $0xb0] sm:$0xff]  ;;  %v14013_v10 = vld [vmem:[#allocation3 + $0x68] sm:$0xff] }
  0x1c   :  { %v14031_v4 = vld [vmem:[#allocation3 + $0xf8] sm:$0xff]  ;;  %4017 = vmatpush.bf16.msra.mxu2 %v14023_v3  ;;  %v14030_v8 = vld [vmem:[#allocation3 + $0xf0] sm:$0xff]  ;;  %v14021_v11 = vld [vmem:[#allocation3 + $0xa8] sm:$0xff] }
  0x1d   :  { %4346 = vmatpush.bf16.msra.mxu3 %v14031_v4  ;;  %v14029_v12 = vld [vmem:[#allocation3 + $0xe8] sm:$0xff]  ;;  %v14004_v13 = vld [vmem:[#allocation3 + $0x20] sm:$0xff]  ;;  %v14003_v17 = vld [vmem:[#allocation3 + $0x18] sm:$0xff] }
  0x1e   :  { %3360 = vmatpush.bf16.msra.mxu0 %v14006_v5  ;;  %v14012_v14 = vld [vmem:[#allocation3 + $0x60] sm:$0xff]  ;;  %v14011_v18 = vld [vmem:[#allocation3 + $0x58] sm:$0xff]  ;;  %v14002_v21 = vld [vmem:[#allocation3 + $0x10] sm:$0xff] }
  0x1f   :  { %3689 = vmatpush.bf16.msra.mxu1 %v14014_v6  ;;  %v14020_v15 = vld [vmem:[#allocation3 + $0xa0] sm:$0xff]  ;;  %v14019_v19 = vld [vmem:[#allocation3 + $0x98] sm:$0xff]  ;;  %v14010_v22 = vld [vmem:[#allocation3 + $0x50] sm:$0xff] }
  0x20   :  { %4018 = vmatpush.bf16.msra.mxu2 %v14022_v7  ;;  %v14028_v16 = vld [vmem:[#allocation3 + $0xe0] sm:$0xff]  ;;  %v14027_v20 = vld [vmem:[#allocation3 + $0xd8] sm:$0xff]  ;;  %v14018_v23 = vld [vmem:[#allocation3 + $0x90] sm:$0xff] }
  0x21   :  { %4347 = vmatpush.bf16.msra.mxu3 %v14030_v8  ;;  %v14026_v24 = vld [vmem:[#allocation3 + $0xd0] sm:$0xff]  ;;  %v14001_v25 = vld [vmem:[#allocation3 + $0x8] sm:$0xff]  ;;  %v14000_v29 = vld [vmem:[#allocation3] sm:$0xff] }
  0x22   :  { %3361 = vmatpush.bf16.msra.mxu0 %v14005_v9  ;;  %v14009_v26 = vld [vmem:[#allocation3 + $0x48] sm:$0xff]  ;;  %v14008_v30 = vld [vmem:[#allocation3 + $0x40] sm:$0xff]  ;;  %v14059_v34 = vld [vmem:[#allocation6 + $0x18] sm:$0xf0] }
  0x23   :  { %3690 = vmatpush.bf16.msra.mxu1 %v14013_v10  ;;  %v14017_v27 = vld [vmem:[#allocation3 + $0x88] sm:$0xff]  ;;  %v14016_v31 = vld [vmem:[#allocation3 + $0x80] sm:$0xff]  ;;  %v10734_v45 = vld [vmem:[#allocation6 + $0x38] sm:$0xf] }
  0x24   :  { %4019 = vmatpush.bf16.msra.mxu2 %v14021_v11  ;;  %v14025_v28 = vld [vmem:[#allocation3 + $0xc8] sm:$0xff]  ;;  %v14024_v32 = vld [vmem:[#allocation3 + $0xc0] sm:$0xff]  ;;  %v14066_v46 = vld [vmem:[#allocation6 + $0x50] sm:$0xf0] }
  0x25   :  { %4348 = vmatpush.bf16.msra.mxu3 %v14029_v12  ;;  %v10706_v33 = vld [vmem:[#allocation6] sm:$0xf]  ;;  %v14056_v35 = vld [vmem:[#allocation6 + $0x4] sm:$0xf]  ;;  %v10714_v37 = vld [vmem:[#allocation6 + $0x8] sm:$0xf]  ;;  %v10735_v53 = vor.u32 %v14066_v46, %v10734_v45 }
  0x26   :  { %3362 = vmatpush.bf16.msra.mxu0 %v14004_v13  ;;  %v10708_v36 = vld [vmem:[#allocation6 + $0x1c] sm:$0xf0]  ;;  %v14060_v38 = vld [vmem:[#allocation6 + $0x20] sm:$0xf0]  ;;  %v14057_v39 = vld [vmem:[#allocation6 + $0xc] sm:$0xf]  ;;  %v10707_v41 = vor.u32 %v14059_v34, %v10706_v33 }
  0x27   :  { %3691 = vmatpush.bf16.msra.mxu1 %v14012_v14  ;;  %v10716_v40 = vld [vmem:[#allocation6 + $0x24] sm:$0xf0]  ;;  %v10711_v42 = vor.u32 %v14056_v35, %v10708_v36  ;;  %v10715_v43 = vor.u32 %v14060_v38, %v10714_v37  ;;  %v14063_v47 = vld [vmem:[#allocation6 + $0x3c] sm:$0xf]  ;;  %v10736_v48 = vld [vmem:[#allocation6 + $0x54] sm:$0xf0] }
  0x28   :  { %4020 = vmatpush.bf16.msra.mxu2 %v14020_v15  ;;  %v10719_v44 = vor.u32 %v14057_v39, %v10716_v40  ;;  %v10742_v49 = vld [vmem:[#allocation6 + $0x40] sm:$0xf]  ;;  %v14067_v50 = vld [vmem:[#allocation6 + $0x58] sm:$0xf0]  ;;  %v14064_v51 = vld [vmem:[#allocation6 + $0x44] sm:$0xf]  ;;  %v10739_v54 = vor.u32 %v14063_v47, %v10736_v48 }
  0x29   :  { %4349 = vmatpush.bf16.msra.mxu3 %v14028_v16  ;;  %v10744_v52 = vld [vmem:[#allocation6 + $0x5c] sm:$0xf0]  ;;  %v10743_v55 = vor.u32 %v14067_v50, %v10742_v49  ;;  %v10762_v57 = vld [vmem:[#allocation6 + $0x70] sm:$0xf]  ;;  %v14073_v58 = vld [vmem:[#allocation6 + $0x88] sm:$0xf0] }
  0x2a   :  { %3363 = vmatpush.bf16.msra.mxu0 %v14003_v17  ;;  %v10747_v56 = vor.u32 %v14064_v51, %v10744_v52  ;;  %v14070_v59 = vld [vmem:[#allocation6 + $0x74] sm:$0xf]  ;;  %v10764_v60 = vld [vmem:[#allocation6 + $0x8c] sm:$0xf0]  ;;  %v10770_v61 = vld [vmem:[#allocation6 + $0x78] sm:$0xf]  ;;  %v10763_v1 = vor.u32 %v14073_v58, %v10762_v57 }
  0x2b   :  { %3692 = vmatpush.bf16.msra.mxu1 %v14011_v18  ;;  %v14074_v62 = vld [vmem:[#allocation6 + $0x90] sm:$0xf0]  ;;  %v14071_v63 = vld [vmem:[#allocation6 + $0x7c] sm:$0xf]  ;;  %v10772_v0 = vld [vmem:[#allocation6 + $0x94] sm:$0xf0]  ;;  %v10767_v2 = vor.u32 %v14070_v59, %v10764_v60 }
  0x2c   :  { %4021 = vmatpush.bf16.msra.mxu2 %v14019_v19  ;;  %v10771_v3 = vor.u32 %v14074_v62, %v10770_v61  ;;  %v10775_v4 = vor.u32 %v14071_v63, %v10772_v0  ;;  %v10790_v5 = vld [vmem:[#allocation6 + $0xa8] sm:$0xf]  ;;  %v14080_v6 = vld [vmem:[#allocation6 + $0xc0] sm:$0xf0]  ;;  %v14077_v7 = vld [vmem:[#allocation6 + $0xac] sm:$0xf] }
  0x2d   :  { %4350 = vmatpush.bf16.msra.mxu3 %v14027_v20  ;;  %v10792_v8 = vld [vmem:[#allocation6 + $0xc4] sm:$0xf0]  ;;  %v10798_v9 = vld [vmem:[#allocation6 + $0xb0] sm:$0xf]  ;;  %v14081_v10 = vld [vmem:[#allocation6 + $0xc8] sm:$0xf0]  ;;  %v10791_v13 = vor.u32 %v14080_v6, %v10790_v5 }
  0x2e   :  { %3364 = vmatpush.bf16.msra.mxu0 %v14002_v21  ;;  %v14078_v11 = vld [vmem:[#allocation6 + $0xb4] sm:$0xf]  ;;  %v10800_v12 = vld [vmem:[#allocation6 + $0xcc] sm:$0xf0]  ;;  %v10795_v14 = vor.u32 %v14077_v7, %v10792_v8  ;;  %v10799_v15 = vor.u32 %v14081_v10, %v10798_v9  ;;  %v10818_v17 = vld [vmem:[#allocation6 + $0xe0] sm:$0xf] }
  0x2f   :  { %3693 = vmatpush.bf16.msra.mxu1 %v14010_v22  ;;  %v10803_v16 = vor.u32 %v14078_v11, %v10800_v12  ;;  %v14087_v18 = vld [vmem:[#allocation6 + $0xf8] sm:$0xf0]  ;;  %v14084_v19 = vld [vmem:[#allocation6 + $0xe4] sm:$0xf]  ;;  %v10820_v20 = vld [vmem:[#allocation6 + $0xfc] sm:$0xf0] }
  0x30   :  { %4022 = vmatpush.bf16.msra.mxu2 %v14018_v23  ;;  %v10826_v21 = vld [vmem:[#allocation6 + $0xe8] sm:$0xf]  ;;  %v14088_v22 = vld [vmem:[#allocation6 + $0x100] sm:$0xf0]  ;;  %v14085_v23 = vld [vmem:[#allocation6 + $0xec] sm:$0xf] }
  0x31   :  { %4351 = vmatpush.bf16.msra.mxu3 %v14026_v24  ;;  %v10828_v24 = vld [vmem:[#allocation6 + $0x104] sm:$0xf0]  ;;  %v10854_v33 = vld [vmem:[#allocation6 + $0x120] sm:$0xf]  ;;  %v14095_v34 = vld [vmem:[#allocation6 + $0x138] sm:$0xf0] }
  0x32   :  { %3365 = vmatpush.bf16.msra.mxu0 %v14001_v25  ;;  %v10819_v25 = vor.u32 %v14087_v18, %v10818_v17  ;;  %v14092_v35 = vld [vmem:[#allocation6 + $0x124] sm:$0xf]  ;;  %v10856_v36 = vld [vmem:[#allocation6 + $0x13c] sm:$0xf0]  ;;  %v10855_v39 = vor.u32 %v14095_v34, %v10854_v33  ;;  %v10882_v45 = vld [vmem:[#allocation6 + $0x158] sm:$0xf] }
  0x33   :  { %3694 = vmatpush.bf16.msra.mxu1 %v14009_v26  ;;  %v10823_v26 = vor.u32 %v14084_v19, %v10820_v20  ;;  %v10859_v40 = vor.u32 %v14092_v35, %v10856_v36  ;;  %v14102_v46 = vld [vmem:[#allocation6 + $0x170] sm:$0xf0]  ;;  %v14099_v47 = vld [vmem:[#allocation6 + $0x15c] sm:$0xf]  ;;  %v10884_v48 = vld [vmem:[#allocation6 + $0x174] sm:$0xf0] }
  0x34   :  { %4023 = vmatpush.bf16.msra.mxu2 %v14017_v27  ;;  %v10827_v27 = vor.u32 %v14088_v22, %v10826_v21  ;;  %v10883_v51 = vor.u32 %v14102_v46, %v10882_v45  ;;  %v10887_v52 = vor.u32 %v14099_v47, %v10884_v48  ;;  %v10910_v57 = vld [vmem:[#allocation6 + $0x190] sm:$0xf]  ;;  %v14109_v58 = vld [vmem:[#allocation6 + $0x1a8] sm:$0xf0]  ;;  %v14106_v59 = vld [vmem:[#allocation6 + $0x194] sm:$0xf] }
  0x35   :  { %4352 = vmatpush.bf16.msra.mxu3 %v14025_v28  ;;  %v10831_v28 = vor.u32 %v14085_v23, %v10828_v24  ;;  %v10912_v60 = vld [vmem:[#allocation6 + $0x1ac] sm:$0xf0]  ;;  %v10911_v63 = vor.u32 %v14109_v58, %v10910_v57  ;;  %v10938_v5 = vld [vmem:[#allocation6 + $0x1c8] sm:$0xf]  ;;  %v14116_v6 = vld [vmem:[#allocation6 + $0x1e0] sm:$0xf0] }
  0x36   :  { %3366 = vmatpush.bf16.msra.mxu0 %v14000_v29  ;;  %v10846_v29 = vld [vmem:[#allocation6 + $0x118] sm:$0xf]  ;;  %v10915_v0 = vor.u32 %v14106_v59, %v10912_v60  ;;  %v14113_v7 = vld [vmem:[#allocation6 + $0x1cc] sm:$0xf]  ;;  %v10940_v8 = vld [vmem:[#allocation6 + $0x1e4] sm:$0xf0] }
  0x37   :  { %3695 = vmatpush.bf16.msra.mxu1 %v14008_v30  ;;  %v14094_v30 = vld [vmem:[#allocation6 + $0x130] sm:$0xf0]  ;;  %v10958_v23 = vld [vmem:[#allocation6 + $0x1f8] sm:$0xf] }
  0x38   :  { %4024 = vmatpush.bf16.msra.mxu2 %v14016_v31  ;;  %v14091_v31 = vld [vmem:[#allocation6 + $0x11c] sm:$0xf]  ;;  %v10847_v37 = vor.u32 %v14094_v30, %v10846_v29  ;;  %v14122_v24 = vld [vmem:[#allocation6 + $0x210] sm:$0xf0]  ;;  %v14120_v29 = vld [vmem:[#allocation6 + $0x204] sm:$0xf] }
  0x39   :  { %4353 = vmatpush.bf16.msra.mxu3 %v14024_v32  ;;  %3367 = vmatmul.bf16.vlgmr.msra.gmra.mxu0 %v10707_v41  ;;  %v10848_v32 = vld [vmem:[#allocation6 + $0x134] sm:$0xf0]  ;;  %v10874_v41 = vld [vmem:[#allocation6 + $0x150] sm:$0xf]  ;;  %v10968_v30 = vld [vmem:[#allocation6 + $0x21c] sm:$0xf0]  ;;  %v10959_v33 = vor.u32 %v14122_v24, %v10958_v23 }
  0x3a   :  { %3696 = vmatmul.bf16.vlgmr.msra.gmra.mxu1 %v10711_v42  ;;  %v10851_v38 = vor.u32 %v14091_v31, %v10848_v32  ;;  %v14101_v42 = vld [vmem:[#allocation6 + $0x168] sm:$0xf0] }
  0x3b   :  { %4025 = vmatmul.bf16.vlgmr.msra.gmra.mxu2 %v10715_v43  ;;  %v14098_v43 = vld [vmem:[#allocation6 + $0x154] sm:$0xf]  ;;  %v10875_v49 = vor.u32 %v14101_v42, %v10874_v41 }
  0x3c   :  { %4354 = vmatmul.bf16.vlgmr.msra.gmra.mxu3 %v10719_v44  ;;  %v10876_v44 = vld [vmem:[#allocation6 + $0x16c] sm:$0xf0] }
  0x3d   :  { %v10879_v50 = vor.u32 %v14098_v43, %v10876_v44 }
  0x49   :  { %3372 = vmatmul.bf16.gmra.mxu0 %v10735_v53  ;;  %v10902_v53 = vld [vmem:[#allocation6 + $0x188] sm:$0xf] }
  0x4a   :  { %3701 = vmatmul.bf16.gmra.mxu1 %v10739_v54  ;;  %v14108_v54 = vld [vmem:[#allocation6 + $0x1a0] sm:$0xf0] }
  0x4b   :  { %4030 = vmatmul.bf16.gmra.mxu2 %v10743_v55  ;;  %v14105_v55 = vld [vmem:[#allocation6 + $0x18c] sm:$0xf]  ;;  %v10903_v61 = vor.u32 %v14108_v54, %v10902_v53  ;;  %v10994_v53 = vld [vmem:[#allocation6 + $0x238] sm:$0xf]  ;;  %v14130_v54 = vld [vmem:[#allocation6 + $0x250] sm:$0xf0] }
  0x4c   :  { %4359 = vmatmul.bf16.gmra.mxu3 %v10747_v56  ;;  %v10904_v56 = vld [vmem:[#allocation6 + $0x1a4] sm:$0xf0] }
  0x4d   :  { %v10907_v62 = vor.u32 %v14105_v55, %v10904_v56  ;;  %v14127_v55 = vld [vmem:[#allocation6 + $0x23c] sm:$0xf]  ;;  %v10996_v56 = vld [vmem:[#allocation6 + $0x254] sm:$0xf0] }
  0x59   :  { %3377 = vmatmul.bf16.gmra.mxu0 %v10763_v1  ;;  %v10930_v1 = vld [vmem:[#allocation6 + $0x1c0] sm:$0xf] }
  0x5a   :  { %3706 = vmatmul.bf16.gmra.mxu1 %v10767_v2  ;;  %v14115_v2 = vld [vmem:[#allocation6 + $0x1d8] sm:$0xf0] }
  0x5b   :  { %4035 = vmatmul.bf16.gmra.mxu2 %v10771_v3  ;;  %v14112_v3 = vld [vmem:[#allocation6 + $0x1c4] sm:$0xf]  ;;  %v10931_v9 = vor.u32 %v14115_v2, %v10930_v1  ;;  %v10999_v1 = vor.u32 %v14127_v55, %v10996_v56 }
  0x5c   :  { %4364 = vmatmul.bf16.gmra.mxu3 %v10775_v4  ;;  %v10932_v4 = vld [vmem:[#allocation6 + $0x1dc] sm:$0xf0] }
  0x5d   :  { %v10935_v10 = vor.u32 %v14112_v3, %v10932_v4 }
  0x69   :  { %3382 = vmatmul.bf16.gmra.mxu0 %v10791_v13  ;;  %v10939_v13 = vor.u32 %v14116_v6, %v10938_v5 }
  0x6a   :  { %3711 = vmatmul.bf16.gmra.mxu1 %v10795_v14  ;;  %v10943_v14 = vor.u32 %v14113_v7, %v10940_v8 }
  0x6b   :  { %4040 = vmatmul.bf16.gmra.mxu2 %v10799_v15 }
  0x6c   :  { %4369 = vmatmul.bf16.gmra.mxu3 %v10803_v16 }
  0x79   :  { %3387 = vmatmul.bf16.gmra.mxu0 %v10819_v25  ;;  %v14119_v25 = vld [vmem:[#allocation6 + $0x1fc] sm:$0xf] }
  0x7a   :  { %3716 = vmatmul.bf16.gmra.mxu1 %v10823_v26  ;;  %v10960_v26 = vld [vmem:[#allocation6 + $0x214] sm:$0xf0] }
  0x7b   :  { %4045 = vmatmul.bf16.gmra.mxu2 %v10827_v27  ;;  %v10966_v27 = vld [vmem:[#allocation6 + $0x200] sm:$0xf]  ;;  %v10963_v34 = vor.u32 %v14119_v25, %v10960_v26 }
  0x7c   :  { %4374 = vmatmul.bf16.gmra.mxu3 %v10831_v28  ;;  %v14123_v28 = vld [vmem:[#allocation6 + $0x218] sm:$0xf0] }
  0x89   :  { %3392 = vmatmul.bf16.gmra.mxu0 %v10847_v37 }
  0x8a   :  { %3721 = vmatmul.bf16.gmra.mxu1 %v10851_v38  ;;  %v10967_v38 = vor.u32 %v14123_v28, %v10966_v27 }
  0x8b   :  { %4050 = vmatmul.bf16.gmra.mxu2 %v10855_v39  ;;  %v10971_v39 = vor.u32 %v14120_v29, %v10968_v30 }
  0x8c   :  { %4379 = vmatmul.bf16.gmra.mxu3 %v10859_v40 }
  0x99   :  { %3397 = vmatmul.bf16.gmra.mxu0 %v10875_v49  ;;  %v10986_v49 = vld [vmem:[#allocation6 + $0x230] sm:$0xf] }
  0x9a   :  { %3726 = vmatmul.bf16.gmra.mxu1 %v10879_v50  ;;  %v14129_v50 = vld [vmem:[#allocation6 + $0x248] sm:$0xf0] }
  0x9b   :  { %4055 = vmatmul.bf16.gmra.mxu2 %v10883_v51  ;;  %v14126_v51 = vld [vmem:[#allocation6 + $0x234] sm:$0xf]  ;;  %v10987_v59 = vor.u32 %v14129_v50, %v10986_v49 }
  0x9c   :  { %4384 = vmatmul.bf16.gmra.mxu3 %v10887_v52  ;;  %v10988_v52 = vld [vmem:[#allocation6 + $0x24c] sm:$0xf0] }
  0x9d   :  { %v10991_v60 = vor.u32 %v14126_v51, %v10988_v52 }
  0xa9   :  { %3402 = vmatmul.bf16.gmra.mxu0 %v10903_v61 }
  0xaa   :  { %3731 = vmatmul.bf16.gmra.mxu1 %v10907_v62 }
  0xab   :  { %4060 = vmatmul.bf16.gmra.mxu2 %v10911_v63 }
  0xac   :  { %4389 = vmatmul.bf16.gmra.mxu3 %v10915_v0  ;;  %v10995_v0 = vor.u32 %v14130_v54, %v10994_v53 }
  0xb6   :  { %v3368_v11 = vpop.f32.mrf.mxu0 }
  0xb7   :  { %v3697_v12 = vpop.f32.mrf.mxu1 }
  0xb8   :  { %v3698_v15 = vadd.f32 %v3697_v12, %v3368_v11  ;;  %v11014_v11 = vld [vmem:[#allocation6 + $0x268] sm:$0xf]  ;;  %v14136_v12 = vld [vmem:[#allocation6 + $0x280] sm:$0xf0] }
  0xb9   :  { %3407 = vmatmul.bf16.gmra.mxu0 %v10931_v9 }
  0xba   :  { %3736 = vmatmul.bf16.gmra.mxu1 %v10935_v10 }
  0xbb   :  { %4065 = vmatmul.bf16.gmra.mxu2 %v10939_v13  ;;  %v14133_v13 = vld [vmem:[#allocation6 + $0x26c] sm:$0xf] }
  0xbc   :  { %4394 = vmatmul.bf16.gmra.mxu3 %v10943_v14  ;;  %v11016_v14 = vld [vmem:[#allocation6 + $0x284] sm:$0xf0] }
  0xbd   :  { %v11019_v23 = vor.u32 %v14133_v13, %v11016_v14 }
  0xbe   :  { %v4026_v16 = vpop.f32.mrf.mxu2  ;;  %v3370_v19 = vpop.f32.mrf.mxu0 }
  0xbf   :  { %v4355_v17 = vpop.f32.mrf.mxu3  ;;  %v4027_v18 = vadd.f32 %v4026_v16, %v3698_v15  ;;  %v3699_v20 = vpop.f32.mrf.mxu1  ;;  %v11022_v15 = vld [vmem:[#allocation6 + $0x270] sm:$0xf]  ;;  %v14137_v16 = vld [vmem:[#allocation6 + $0x288] sm:$0xf0] }
  0xc0   :  { %v3700_v21 = vadd.f32 %v3699_v20, %v3370_v19  ;;  %v11023_v27 = vor.u32 %v14137_v16, %v11022_v15 }
  0xc1   :  { %v15047_v22 = vadd.f32 %v4355_v17, %v4027_v18  ;;  %v14134_v17 = vld [vmem:[#allocation6 + $0x274] sm:$0xf]  ;;  %v11024_v18 = vld [vmem:[#allocation6 + $0x28c] sm:$0xf0] }
  0xc2   :  { %v11027_v28 = vor.u32 %v14134_v17, %v11024_v18 }
  0xc6   :  { %v4028_v31 = vpop.f32.mrf.mxu2  ;;  %v3373_v36 = vpop.f32.mrf.mxu0 }
  0xc7   :  { %v4357_v32 = vpop.f32.mrf.mxu3  ;;  %v4029_v35 = vadd.f32 %v4028_v31, %v3700_v21  ;;  %v3702_v37 = vpop.f32.mrf.mxu1  ;;  %v11015_v21 = vor.u32 %v14136_v12, %v11014_v11  ;;  %v11080_v11 = vld [vmem:[#allocation6 + $0x2fc] sm:$0xf0] }
  0xc8   :  { %v3703_v40 = vadd.f32 %v3702_v37, %v3373_v36 }
  0xc9   :  { %v15049_v41 = vadd.f32 %v4357_v32, %v4029_v35  ;;  %3412 = vmatmul.bf16.gmra.mxu0 %v10959_v33 }
  0xca   :  { %3741 = vmatmul.bf16.gmra.mxu1 %v10963_v34 }
  0xcb   :  { %4070 = vmatmul.bf16.gmra.mxu2 %v10967_v38  ;;  %v11042_v38 = vld [vmem:[#allocation6 + $0x2a0] sm:$0xf] }
  0xcc   :  { %4399 = vmatmul.bf16.gmra.mxu3 %v10971_v39  ;;  %v14143_v39 = vld [vmem:[#allocation6 + $0x2b8] sm:$0xf0] }
  0xcd   :  { %v11043_v50 = vor.u32 %v14143_v39, %v11042_v38  ;;  %v14158_v38 = vld [vmem:[#allocation6 + $0x330] sm:$0xf0]  ;;  %v14155_v39 = vld [vmem:[#allocation6 + $0x31c] sm:$0xf] }
  0xce   :  { %v4031_v42 = vpop.f32.mrf.mxu2  ;;  %v3375_v45 = vpop.f32.mrf.mxu0 }
  0xcf   :  { %v4360_v43 = vpop.f32.mrf.mxu3  ;;  %v4032_v44 = vadd.f32 %v4031_v42, %v3703_v40  ;;  %v3704_v46 = vpop.f32.mrf.mxu1  ;;  %v14140_v40 = vld [vmem:[#allocation6 + $0x2a4] sm:$0xf]  ;;  %v11044_v42 = vld [vmem:[#allocation6 + $0x2bc] sm:$0xf0] }
  0xd0   :  { %v3705_v47 = vadd.f32 %v3704_v46, %v3375_v45  ;;  %v14141_v45 = vld [vmem:[#allocation6 + $0x2ac] sm:$0xf]  ;;  %v11052_v46 = vld [vmem:[#allocation6 + $0x2c4] sm:$0xf0]  ;;  %v11047_v51 = vor.u32 %v14140_v40, %v11044_v42  ;;  %v11108_v40 = vld [vmem:[#allocation6 + $0x334] sm:$0xf0] }
  0xd1   :  { %v15051_v48 = vadd.f32 %v4360_v43, %v4032_v44  ;;  %v11050_v43 = vld [vmem:[#allocation6 + $0x2a8] sm:$0xf]  ;;  %v14144_v44 = vld [vmem:[#allocation6 + $0x2c0] sm:$0xf0]  ;;  %v11055_v56 = vor.u32 %v14141_v45, %v11052_v46 }
  0xd2   :  { %v11051_v55 = vor.u32 %v14144_v44, %v11050_v43 }
  0xd6   :  { %v4033_v57 = vpop.f32.mrf.mxu2  ;;  %v3378_v62 = vpop.f32.mrf.mxu0 }
  0xd7   :  { %v4362_v58 = vpop.f32.mrf.mxu3  ;;  %v4034_v61 = vadd.f32 %v4033_v57, %v3705_v47  ;;  %v3707_v63 = vpop.f32.mrf.mxu1 }
  0xd8   :  { %v3708_v2 = vadd.f32 %v3707_v63, %v3378_v62 }
  0xd9   :  { %v15053_v3 = vadd.f32 %v4362_v58, %v4034_v61  ;;  %3417 = vmatmul.bf16.gmra.mxu0 %v10987_v59 }
  0xda   :  { %3746 = vmatmul.bf16.gmra.mxu1 %v10991_v60 }
  0xdb   :  { %4075 = vmatmul.bf16.gmra.mxu2 %v10995_v0 }
  0xdc   :  { %4404 = vmatmul.bf16.gmra.mxu3 %v10999_v1 }
  0xde   :  { %v4036_v4 = vpop.f32.mrf.mxu2  ;;  %v3380_v7 = vpop.f32.mrf.mxu0 }
  0xdf   :  { %v4365_v5 = vpop.f32.mrf.mxu3  ;;  %v4037_v6 = vadd.f32 %v4036_v4, %v3708_v2  ;;  %v3709_v8 = vpop.f32.mrf.mxu1  ;;  %v11070_v2 = vld [vmem:[#allocation6 + $0x2d8] sm:$0xf]  ;;  %v14150_v4 = vld [vmem:[#allocation6 + $0x2f0] sm:$0xf0] }
  0xe0   :  { %v3710_v9 = vadd.f32 %v3709_v8, %v3380_v7  ;;  %v11078_v7 = vld [vmem:[#allocation6 + $0x2e0] sm:$0xf]  ;;  %v14151_v8 = vld [vmem:[#allocation6 + $0x2f8] sm:$0xf0]  ;;  %v11071_v14 = vor.u32 %v14150_v4, %v11070_v2  ;;  %v11128_v2 = vld [vmem:[#allocation6 + $0x364] sm:$0xf0] }
  0xe1   :  { %v15055_v10 = vadd.f32 %v4365_v5, %v4037_v6  ;;  %v14147_v5 = vld [vmem:[#allocation6 + $0x2dc] sm:$0xf]  ;;  %v11072_v6 = vld [vmem:[#allocation6 + $0x2f4] sm:$0xf0]  ;;  %v11134_v4 = vld [vmem:[#allocation6 + $0x350] sm:$0xf] }
  0xe2   :  { %v11075_v15 = vor.u32 %v14147_v5, %v11072_v6  ;;  %v14165_v5 = vld [vmem:[#allocation6 + $0x368] sm:$0xf0]  ;;  %v14162_v6 = vld [vmem:[#allocation6 + $0x354] sm:$0xf] }
  0xe6   :  { %v4038_v19 = vpop.f32.mrf.mxu2  ;;  %v3383_v25 = vpop.f32.mrf.mxu0 }
  0xe7   :  { %v4367_v20 = vpop.f32.mrf.mxu3  ;;  %v4039_v24 = vadd.f32 %v4038_v19, %v3710_v9  ;;  %v3712_v26 = vpop.f32.mrf.mxu1  ;;  %v14148_v9 = vld [vmem:[#allocation6 + $0x2e4] sm:$0xf]  ;;  %v11079_v19 = vor.u32 %v14151_v8, %v11078_v7  ;;  %v11136_v7 = vld [vmem:[#allocation6 + $0x36c] sm:$0xf0] }
  0xe8   :  { %v3713_v29 = vadd.f32 %v3712_v26, %v3383_v25 }
  0xe9   :  { %v15057_v30 = vadd.f32 %v4367_v20, %v4039_v24  ;;  %3422 = vmatmul.bf16.gmra.mxu0 %v11015_v21  ;;  %v11083_v20 = vor.u32 %v14148_v9, %v11080_v11 }
  0xea   :  { %3751 = vmatmul.bf16.gmra.mxu1 %v11019_v23 }
  0xeb   :  { %4080 = vmatmul.bf16.gmra.mxu2 %v11023_v27 }
  0xec   :  { %4409 = vmatmul.bf16.gmra.mxu3 %v11027_v28 }
  0xee   :  { %v4041_v31 = vpop.f32.mrf.mxu2  ;;  %v3385_v34 = vpop.f32.mrf.mxu0 }
  0xef   :  { %v4370_v32 = vpop.f32.mrf.mxu3  ;;  %v4042_v33 = vadd.f32 %v4041_v31, %v3713_v29  ;;  %v3714_v35 = vpop.f32.mrf.mxu1 }
  0xf0   :  { %v3715_v36 = vadd.f32 %v3714_v35, %v3385_v34  ;;  %v14154_v34 = vld [vmem:[#allocation6 + $0x314] sm:$0xf]  ;;  %v11100_v35 = vld [vmem:[#allocation6 + $0x32c] sm:$0xf0] }
  0xf1   :  { %v15059_v37 = vadd.f32 %v4370_v32, %v4042_v33  ;;  %v11098_v32 = vld [vmem:[#allocation6 + $0x310] sm:$0xf]  ;;  %v14157_v33 = vld [vmem:[#allocation6 + $0x328] sm:$0xf0]  ;;  %v11103_v45 = vor.u32 %v14154_v34, %v11100_v35  ;;  %v11156_v34 = vld [vmem:[#allocation6 + $0x39c] sm:$0xf0] }
  0xf2   :  { %v11099_v44 = vor.u32 %v14157_v33, %v11098_v32  ;;  %v14171_v32 = vld [vmem:[#allocation6 + $0x398] sm:$0xf0]  ;;  %v14168_v33 = vld [vmem:[#allocation6 + $0x384] sm:$0xf]  ;;  %v11162_v35 = vld [vmem:[#allocation6 + $0x388] sm:$0xf] }
  0xf6   :  { %v4043_v47 = vpop.f32.mrf.mxu2  ;;  %v3388_v53 = vpop.f32.mrf.mxu0 }
  0xf7   :  { %v4372_v49 = vpop.f32.mrf.mxu3  ;;  %v4044_v52 = vadd.f32 %v4043_v47, %v3715_v36  ;;  %v3717_v54 = vpop.f32.mrf.mxu1  ;;  %v11106_v36 = vld [vmem:[#allocation6 + $0x318] sm:$0xf] }
  0xf8   :  { %v3718_v57 = vadd.f32 %v3717_v54, %v3388_v53 }
  0xf9   :  { %v15061_v58 = vadd.f32 %v4372_v49, %v4044_v52  ;;  %3427 = vmatmul.bf16.gmra.mxu0 %v11043_v50  ;;  %v11107_v50 = vor.u32 %v14158_v38, %v11106_v36  ;;  %v14172_v36 = vld [vmem:[#allocation6 + $0x3a0] sm:$0xf0]  ;;  %v14169_v38 = vld [vmem:[#allocation6 + $0x38c] sm:$0xf] }
  0xfa   :  { %3756 = vmatmul.bf16.gmra.mxu1 %v11047_v51  ;;  %v11111_v51 = vor.u32 %v14155_v39, %v11108_v40  ;;  %v11164_v39 = vld [vmem:[#allocation6 + $0x3a4] sm:$0xf0] }
  0xfb   :  { %4085 = vmatmul.bf16.gmra.mxu2 %v11051_v55 }
  0xfc   :  { %4414 = vmatmul.bf16.gmra.mxu3 %v11055_v56 }
  0xfe   :  { %v4046_v59 = vpop.f32.mrf.mxu2  ;;  %v3390_v62 = vpop.f32.mrf.mxu0 }
  0xff   :  { %v4375_v60 = vpop.f32.mrf.mxu3  ;;  %v4047_v61 = vadd.f32 %v4046_v59, %v3718_v57  ;;  %v3719_v63 = vpop.f32.mrf.mxu1 }
 0x100   :  { %v3720_v0 = vadd.f32 %v3719_v63, %v3390_v62  ;;  %v11126_v62 = vld [vmem:[#allocation6 + $0x348] sm:$0xf]  ;;  %v14164_v63 = vld [vmem:[#allocation6 + $0x360] sm:$0xf0] }
 0x101   :  { %v15063_v1 = vadd.f32 %v4375_v60, %v4047_v61  ;;  %v11127_v11 = vor.u32 %v14164_v63, %v11126_v62  ;;  %v11182_v63 = vld [vmem:[#allocation6 + $0x3b8] sm:$0xf] }
 0x106   :  { %v4048_v12 = vpop.f32.mrf.mxu2  ;;  %v3393_v17 = vpop.f32.mrf.mxu0 }
 0x107   :  { %v4377_v13 = vpop.f32.mrf.mxu3  ;;  %v4049_v16 = vadd.f32 %v4048_v12, %v3720_v0  ;;  %v3722_v18 = vpop.f32.mrf.mxu1  ;;  %v14161_v0 = vld [vmem:[#allocation6 + $0x34c] sm:$0xf] }
 0x108   :  { %v3723_v21 = vadd.f32 %v3722_v18, %v3393_v17  ;;  %v11131_v12 = vor.u32 %v14161_v0, %v11128_v2  ;;  %v11139_v17 = vor.u32 %v14162_v6, %v11136_v7  ;;  %v14178_v0 = vld [vmem:[#allocation6 + $0x3d0] sm:$0xf0]  ;;  %v14175_v2 = vld [vmem:[#allocation6 + $0x3bc] sm:$0xf]  ;;  %v14176_v7 = vld [vmem:[#allocation6 + $0x3c4] sm:$0xf] }
 0x109   :  { %v15065_v23 = vadd.f32 %v4377_v13, %v4049_v16  ;;  %3432 = vmatmul.bf16.gmra.mxu0 %v11071_v14  ;;  %v11135_v16 = vor.u32 %v14165_v5, %v11134_v4  ;;  %v11184_v4 = vld [vmem:[#allocation6 + $0x3d4] sm:$0xf0]  ;;  %v11190_v5 = vld [vmem:[#allocation6 + $0x3c0] sm:$0xf]  ;;  %v14179_v6 = vld [vmem:[#allocation6 + $0x3d8] sm:$0xf0] }
 0x10a   :  { %3761 = vmatmul.bf16.gmra.mxu1 %v11075_v15 }
 0x10b   :  { %4090 = vmatmul.bf16.gmra.mxu2 %v11079_v19 }
 0x10c   :  { %4419 = vmatmul.bf16.gmra.mxu3 %v11083_v20 }
 0x10e   :  { %v4051_v24 = vpop.f32.mrf.mxu2  ;;  %v3395_v27 = vpop.f32.mrf.mxu0 }
 0x10f   :  { %v4380_v25 = vpop.f32.mrf.mxu3  ;;  %v4052_v26 = vadd.f32 %v4051_v24, %v3723_v21  ;;  %v3724_v28 = vpop.f32.mrf.mxu1 }
 0x110   :  { %v3725_v29 = vadd.f32 %v3724_v28, %v3395_v27 }
 0x111   :  { %v15067_v31 = vadd.f32 %v4380_v25, %v4052_v26 }
 0x116   :  { %v4053_v42 = vpop.f32.mrf.mxu2  ;;  %v3398_v47 = vpop.f32.mrf.mxu0 }
 0x117   :  { %v4382_v43 = vpop.f32.mrf.mxu3  ;;  %v4054_v46 = vadd.f32 %v4053_v42, %v3725_v29  ;;  %v3727_v49 = vpop.f32.mrf.mxu1  ;;  %v11154_v29 = vld [vmem:[#allocation6 + $0x380] sm:$0xf] }
 0x118   :  { %v3728_v52 = vadd.f32 %v3727_v49, %v3398_v47  ;;  %v11163_v49 = vor.u32 %v14172_v36, %v11162_v35  ;;  %v14185_v35 = vld [vmem:[#allocation6 + $0x408] sm:$0xf0]  ;;  %v14182_v36 = vld [vmem:[#allocation6 + $0x3f4] sm:$0xf] }
 0x119   :  { %v15069_v53 = vadd.f32 %v4382_v43, %v4054_v46  ;;  %3437 = vmatmul.bf16.gmra.mxu0 %v11099_v44  ;;  %v11155_v43 = vor.u32 %v14171_v32, %v11154_v29  ;;  %v11159_v44 = vor.u32 %v14168_v33, %v11156_v34  ;;  %v11210_v34 = vld [vmem:[#allocation6 + $0x3f0] sm:$0xf] }
 0x11a   :  { %3766 = vmatmul.bf16.gmra.mxu1 %v11103_v45 }
 0x11b   :  { %4095 = vmatmul.bf16.gmra.mxu2 %v11107_v50  ;;  %v11167_v50 = vor.u32 %v14169_v38, %v11164_v39  ;;  %v11212_v38 = vld [vmem:[#allocation6 + $0x40c] sm:$0xf0]  ;;  %v11218_v39 = vld [vmem:[#allocation6 + $0x3f8] sm:$0xf] }
 0x11c   :  { %4424 = vmatmul.bf16.gmra.mxu3 %v11111_v51 }
 0x11e   :  { %v4056_v54 = vpop.f32.mrf.mxu2  ;;  %v3400_v57 = vpop.f32.mrf.mxu0 }
 0x11f   :  { %v4385_v55 = vpop.f32.mrf.mxu3  ;;  %v4057_v56 = vadd.f32 %v4056_v54, %v3728_v52  ;;  %v3729_v59 = vpop.f32.mrf.mxu1 }
 0x120   :  { %v3730_v60 = vadd.f32 %v3729_v59, %v3400_v57 }
 0x121   :  { %v15071_v61 = vadd.f32 %v4385_v55, %v4057_v56 }
 0x126   :  { %v4058_v8 = vpop.f32.mrf.mxu2  ;;  %v3403_v14 = vpop.f32.mrf.mxu0 }
 0x127   :  { %v4387_v9 = vpop.f32.mrf.mxu3  ;;  %v4059_v13 = vadd.f32 %v4058_v8, %v3730_v60  ;;  %v3732_v15 = vpop.f32.mrf.mxu1  ;;  %v11192_v8 = vld [vmem:[#allocation6 + $0x3dc] sm:$0xf0] }
 0x128   :  { %v3733_v18 = vadd.f32 %v3732_v15, %v3403_v14 }
 0x129   :  { %v15073_v19 = vadd.f32 %v4387_v9, %v4059_v13  ;;  %3442 = vmatmul.bf16.gmra.mxu0 %v11127_v11  ;;  %v11187_v13 = vor.u32 %v14175_v2, %v11184_v4 }
 0x12a   :  { %3771 = vmatmul.bf16.gmra.mxu1 %v11131_v12  ;;  %v11183_v12 = vor.u32 %v14178_v0, %v11182_v63 }
 0x12b   :  { %4100 = vmatmul.bf16.gmra.mxu2 %v11135_v16 }
 0x12c   :  { %4429 = vmatmul.bf16.gmra.mxu3 %v11139_v17  ;;  %v11191_v17 = vor.u32 %v14179_v6, %v11190_v5  ;;  %v11238_v6 = vld [vmem:[#allocation6 + $0x428] sm:$0xf] }
 0x12e   :  { %v4061_v20 = vpop.f32.mrf.mxu2  ;;  %v3405_v25 = vpop.f32.mrf.mxu0 }
 0x12f   :  { %v4390_v21 = vpop.f32.mrf.mxu3  ;;  %v4062_v24 = vadd.f32 %v4061_v20, %v3733_v18  ;;  %v3734_v26 = vpop.f32.mrf.mxu1  ;;  %v11195_v18 = vor.u32 %v14176_v7, %v11192_v8  ;;  %v14192_v7 = vld [vmem:[#allocation6 + $0x440] sm:$0xf0]  ;;  %v14189_v8 = vld [vmem:[#allocation6 + $0x42c] sm:$0xf] }
 0x130   :  { %v3735_v27 = vadd.f32 %v3734_v26, %v3405_v25 }
 0x131   :  { %v15075_v28 = vadd.f32 %v4390_v21, %v4062_v24 }
 0x136   :  { %v4063_v40 = vpop.f32.mrf.mxu2  ;;  %v3408_v46 = vpop.f32.mrf.mxu0 }
 0x137   :  { %v4392_v42 = vpop.f32.mrf.mxu3  ;;  %v4064_v45 = vadd.f32 %v4063_v40, %v3735_v27  ;;  %v3737_v47 = vpop.f32.mrf.mxu1  ;;  %v14186_v40 = vld [vmem:[#allocation6 + $0x410] sm:$0xf0] }
 0x138   :  { %v3738_v51 = vadd.f32 %v3737_v47, %v3408_v46  ;;  %v11211_v46 = vor.u32 %v14185_v35, %v11210_v34  ;;  %v11215_v47 = vor.u32 %v14182_v36, %v11212_v38 }
 0x139   :  { %v15077_v52 = vadd.f32 %v4392_v42, %v4064_v45  ;;  %3447 = vmatmul.bf16.gmra.mxu0 %v11155_v43  ;;  %v14183_v42 = vld [vmem:[#allocation6 + $0x3fc] sm:$0xf]  ;;  %v11220_v43 = vld [vmem:[#allocation6 + $0x414] sm:$0xf0] }
 0x13a   :  { %3776 = vmatmul.bf16.gmra.mxu1 %v11159_v44 }
 0x13b   :  { %4105 = vmatmul.bf16.gmra.mxu2 %v11163_v49 }
 0x13c   :  { %4434 = vmatmul.bf16.gmra.mxu3 %v11167_v50 }
 0x13e   :  { %v4066_v54 = vpop.f32.mrf.mxu2  ;;  %v3410_v57 = vpop.f32.mrf.mxu0 }
 0x13f   :  { %v4395_v55 = vpop.f32.mrf.mxu3  ;;  %v4067_v56 = vadd.f32 %v4066_v54, %v3738_v51  ;;  %v3739_v59 = vpop.f32.mrf.mxu1  ;;  %v11219_v54 = vor.u32 %v14186_v40, %v11218_v39 }
 0x140   :  { %v3740_v60 = vadd.f32 %v3739_v59, %v3410_v57 }
 0x141   :  { %v15079_v62 = vadd.f32 %v4395_v55, %v4067_v56  ;;  %v11223_v55 = vor.u32 %v14183_v42, %v11220_v43  ;;  %v11266_v43 = vld [vmem:[#allocation6 + $0x460] sm:$0xf] }
 0x146   :  { %v4068_v9 = vpop.f32.mrf.mxu2  ;;  %v3413_v15 = vpop.f32.mrf.mxu0 }
 0x147   :  { %v4397_v11 = vpop.f32.mrf.mxu3  ;;  %v4069_v14 = vadd.f32 %v4068_v9, %v3740_v60  ;;  %v3742_v16 = vpop.f32.mrf.mxu1  ;;  %v11240_v9 = vld [vmem:[#allocation6 + $0x444] sm:$0xf0] }
 0x148   :  { %v3743_v20 = vadd.f32 %v3742_v16, %v3413_v15 }
 0x149   :  { %v15081_v21 = vadd.f32 %v4397_v11, %v4069_v14  ;;  %3452 = vmatmul.bf16.gmra.mxu0 %v11183_v12  ;;  %v11246_v11 = vld [vmem:[#allocation6 + $0x430] sm:$0xf]  ;;  %v14193_v12 = vld [vmem:[#allocation6 + $0x448] sm:$0xf0] }
 0x14a   :  { %3781 = vmatmul.bf16.gmra.mxu1 %v11187_v13  ;;  %v14190_v13 = vld [vmem:[#allocation6 + $0x434] sm:$0xf]  ;;  %v11248_v14 = vld [vmem:[#allocation6 + $0x44c] sm:$0xf0] }
 0x14b   :  { %4110 = vmatmul.bf16.gmra.mxu2 %v11191_v17  ;;  %v11239_v17 = vor.u32 %v14192_v7, %v11238_v6 }
 0x14c   :  { %4439 = vmatmul.bf16.gmra.mxu3 %v11195_v18  ;;  %v11243_v18 = vor.u32 %v14189_v8, %v11240_v9 }
 0x14e   :  { %v4071_v24 = vpop.f32.mrf.mxu2  ;;  %v3415_v27 = vpop.f32.mrf.mxu0 }
 0x14f   :  { %v4400_v25 = vpop.f32.mrf.mxu3  ;;  %v4072_v26 = vadd.f32 %v4071_v24, %v3743_v20  ;;  %v3744_v29 = vpop.f32.mrf.mxu1 }
 0x150   :  { %v3745_v32 = vadd.f32 %v3744_v29, %v3415_v27  ;;  %v11251_v27 = vor.u32 %v14190_v13, %v11248_v14 }
 0x151   :  { %v15083_v33 = vadd.f32 %v4400_v25, %v4072_v26  ;;  %v11247_v26 = vor.u32 %v14193_v12, %v11246_v11 }
 0x156   :  { %v4073_v44 = vpop.f32.mrf.mxu2  ;;  %v3418_v50 = vpop.f32.mrf.mxu0 }
 0x157   :  { %v4402_v45 = vpop.f32.mrf.mxu3  ;;  %v4074_v49 = vadd.f32 %v4073_v44, %v3745_v32  ;;  %v3747_v51 = vpop.f32.mrf.mxu1  ;;  %v14199_v44 = vld [vmem:[#allocation6 + $0x478] sm:$0xf0] }
 0x158   :  { %v3748_v56 = vadd.f32 %v3747_v51, %v3418_v50  ;;  %v14197_v50 = vld [vmem:[#allocation6 + $0x46c] sm:$0xf]  ;;  %v11276_v51 = vld [vmem:[#allocation6 + $0x484] sm:$0xf0] }
 0x159   :  { %v15085_v57 = vadd.f32 %v4402_v45, %v4074_v49  ;;  %3457 = vmatmul.bf16.gmra.mxu0 %v11211_v46  ;;  %v14196_v45 = vld [vmem:[#allocation6 + $0x464] sm:$0xf]  ;;  %v11268_v46 = vld [vmem:[#allocation6 + $0x47c] sm:$0xf0] }
 0x15a   :  { %3786 = vmatmul.bf16.gmra.mxu1 %v11215_v47  ;;  %v11274_v47 = vld [vmem:[#allocation6 + $0x468] sm:$0xf]  ;;  %v14200_v49 = vld [vmem:[#allocation6 + $0x480] sm:$0xf0] }
 0x15b   :  { %4115 = vmatmul.bf16.gmra.mxu2 %v11219_v54 }
 0x15c   :  { %4444 = vmatmul.bf16.gmra.mxu3 %v11223_v55 }
 0x15e   :  { %v4076_v59 = vpop.f32.mrf.mxu2  ;;  %v3420_v0 = vpop.f32.mrf.mxu0 }
 0x15f   :  { %v4405_v60 = vpop.f32.mrf.mxu3  ;;  %v4077_v63 = vadd.f32 %v4076_v59, %v3748_v56  ;;  %v3749_v2 = vpop.f32.mrf.mxu1  ;;  %v11267_v56 = vor.u32 %v14199_v44, %v11266_v43  ;;  %v11271_v59 = vor.u32 %v14196_v45, %v11268_v46 }
 0x160   :  { %v3750_v4 = vadd.f32 %v3749_v2, %v3420_v0  ;;  %v11275_v2 = vor.u32 %v14200_v49, %v11274_v47 }
 0x161   :  { %v15087_v5 = vadd.f32 %v4405_v60, %v4077_v63 }
 0x166   :  { %v4078_v15 = vpop.f32.mrf.mxu2  ;;  %v3423_v24 = vpop.f32.mrf.mxu0 }
 0x167   :  { %v4407_v16 = vpop.f32.mrf.mxu3  ;;  %v4079_v20 = vadd.f32 %v4078_v15, %v3750_v4  ;;  %v3752_v25 = vpop.f32.mrf.mxu1  ;;  %v11279_v4 = vor.u32 %v14197_v50, %v11276_v51 }
 0x168   :  { %v3753_v29 = vadd.f32 %v3752_v25, %v3423_v24  ;;  %v11302_v24 = vld [vmem:[#allocation6 + $0x4a0] sm:$0xf]  ;;  %v14207_v25 = vld [vmem:[#allocation6 + $0x4b8] sm:$0xf0] }
 0x169   :  { %v15089_v32 = vadd.f32 %v4407_v16, %v4079_v20  ;;  %3462 = vmatmul.bf16.gmra.mxu0 %v11239_v17  ;;  %v11294_v16 = vld [vmem:[#allocation6 + $0x498] sm:$0xf]  ;;  %v14206_v17 = vld [vmem:[#allocation6 + $0x4b0] sm:$0xf0]  ;;  %v11303_v43 = vor.u32 %v14207_v25, %v11302_v24 }
 0x16a   :  { %3791 = vmatmul.bf16.gmra.mxu1 %v11243_v18  ;;  %v14203_v18 = vld [vmem:[#allocation6 + $0x49c] sm:$0xf]  ;;  %v11296_v20 = vld [vmem:[#allocation6 + $0x4b4] sm:$0xf0] }
 0x16b   :  { %4120 = vmatmul.bf16.gmra.mxu2 %v11247_v26  ;;  %v14204_v26 = vld [vmem:[#allocation6 + $0x4a4] sm:$0xf] }
 0x16c   :  { %4449 = vmatmul.bf16.gmra.mxu3 %v11251_v27  ;;  %v11304_v27 = vld [vmem:[#allocation6 + $0x4bc] sm:$0xf0] }
 0x16d   :  { %v11307_v44 = vor.u32 %v14204_v26, %v11304_v27 }
 0x16e   :  { %v4081_v34 = vpop.f32.mrf.mxu2  ;;  %v3425_v38 = vpop.f32.mrf.mxu0 }
 0x16f   :  { %v4410_v35 = vpop.f32.mrf.mxu3  ;;  %v4082_v36 = vadd.f32 %v4081_v34, %v3753_v29  ;;  %v3754_v39 = vpop.f32.mrf.mxu1 }
 0x170   :  { %v3755_v40 = vadd.f32 %v3754_v39, %v3425_v38 }
 0x171   :  { %v15091_v42 = vadd.f32 %v4410_v35, %v4082_v36  ;;  %v11295_v35 = vor.u32 %v14206_v17, %v11294_v16  ;;  %v11299_v36 = vor.u32 %v14203_v18, %v11296_v20 }
 0x176   :  { %v4083_v54 = vpop.f32.mrf.mxu2  ;;  %v3428_v63 = vpop.f32.mrf.mxu0 }
 0x177   :  { %v4412_v55 = vpop.f32.mrf.mxu3  ;;  %v4084_v60 = vadd.f32 %v4083_v54, %v3755_v40  ;;  %v3757_v0 = vpop.f32.mrf.mxu1 }
 0x178   :  { %v3758_v6 = vadd.f32 %v3757_v0, %v3428_v63  ;;  %v14210_v63 = vld [vmem:[#allocation6 + $0x4d4] sm:$0xf]  ;;  %v11324_v0 = vld [vmem:[#allocation6 + $0x4ec] sm:$0xf0] }
 0x179   :  { %v15093_v7 = vadd.f32 %v4412_v55, %v4084_v60  ;;  %3467 = vmatmul.bf16.gmra.mxu0 %v11267_v56  ;;  %v14213_v60 = vld [vmem:[#allocation6 + $0x4e8] sm:$0xf0] }
 0x17a   :  { %3796 = vmatmul.bf16.gmra.mxu1 %v11271_v59  ;;  %v11322_v59 = vld [vmem:[#allocation6 + $0x4d0] sm:$0xf] }
 0x17b   :  { %4125 = vmatmul.bf16.gmra.mxu2 %v11275_v2  ;;  %v11330_v2 = vld [vmem:[#allocation6 + $0x4d8] sm:$0xf] }
 0x17c   :  { %4454 = vmatmul.bf16.gmra.mxu3 %v11279_v4  ;;  %v14214_v4 = vld [vmem:[#allocation6 + $0x4f0] sm:$0xf0] }
 0x17d   :  { %v11331_v18 = vor.u32 %v14214_v4, %v11330_v2 }
 0x17e   :  { %v4086_v8 = vpop.f32.mrf.mxu2  ;;  %v3430_v12 = vpop.f32.mrf.mxu0 }
 0x17f   :  { %v4415_v9 = vpop.f32.mrf.mxu3  ;;  %v4087_v11 = vadd.f32 %v4086_v8, %v3758_v6  ;;  %v3759_v13 = vpop.f32.mrf.mxu1  ;;  %v14211_v6 = vld [vmem:[#allocation6 + $0x4dc] sm:$0xf]  ;;  %v11332_v8 = vld [vmem:[#allocation6 + $0x4f4] sm:$0xf0] }
 0x180   :  { %v3760_v14 = vadd.f32 %v3759_v13, %v3430_v12  ;;  %v11323_v12 = vor.u32 %v14213_v60, %v11322_v59  ;;  %v11327_v13 = vor.u32 %v14210_v63, %v11324_v0  ;;  %v11335_v20 = vor.u32 %v14211_v6, %v11332_v8 }
 0x181   :  { %v15095_v15 = vadd.f32 %v4415_v9, %v4087_v11 }
 0x186   :  { %v4088_v29 = vpop.f32.mrf.mxu2  ;;  %v3433_v39 = vpop.f32.mrf.mxu0 }
 0x187   :  { %v4417_v34 = vpop.f32.mrf.mxu3  ;;  %v4089_v38 = vadd.f32 %v4088_v29, %v3760_v14  ;;  %v3762_v40 = vpop.f32.mrf.mxu1 }
 0x188   :  { %v3763_v45 = vadd.f32 %v3762_v40, %v3433_v39  ;;  %v11350_v39 = vld [vmem:[#allocation6 + $0x508] sm:$0xf]  ;;  %v14220_v40 = vld [vmem:[#allocation6 + $0x520] sm:$0xf0] }
 0x189   :  { %v15097_v46 = vadd.f32 %v4417_v34, %v4089_v38  ;;  %3472 = vmatmul.bf16.gmra.mxu0 %v11295_v35 }
 0x18a   :  { %3801 = vmatmul.bf16.gmra.mxu1 %v11299_v36 }
 0x18b   :  { %4130 = vmatmul.bf16.gmra.mxu2 %v11303_v43  ;;  %v14217_v43 = vld [vmem:[#allocation6 + $0x50c] sm:$0xf] }
 0x18c   :  { %4459 = vmatmul.bf16.gmra.mxu3 %v11307_v44  ;;  %v11352_v44 = vld [vmem:[#allocation6 + $0x524] sm:$0xf0] }
 0x18d   :  { %v11355_v59 = vor.u32 %v14217_v43, %v11352_v44 }
 0x18e   :  { %v4091_v47 = vpop.f32.mrf.mxu2  ;;  %v3435_v51 = vpop.f32.mrf.mxu0 }
 0x18f   :  { %v4420_v49 = vpop.f32.mrf.mxu3  ;;  %v4092_v50 = vadd.f32 %v4091_v47, %v3763_v45  ;;  %v3764_v54 = vpop.f32.mrf.mxu1  ;;  %v11358_v45 = vld [vmem:[#allocation6 + $0x510] sm:$0xf]  ;;  %v14221_v47 = vld [vmem:[#allocation6 + $0x528] sm:$0xf0] }
 0x190   :  { %v3765_v55 = vadd.f32 %v3764_v54, %v3435_v51  ;;  %v11359_v2 = vor.u32 %v14221_v47, %v11358_v45 }
 0x191   :  { %v15099_v56 = vadd.f32 %v4420_v49, %v4092_v50  ;;  %v14218_v49 = vld [vmem:[#allocation6 + $0x514] sm:$0xf]  ;;  %v11360_v50 = vld [vmem:[#allocation6 + $0x52c] sm:$0xf0] }
 0x192   :  { %v11363_v4 = vor.u32 %v14218_v49, %v11360_v50 }
 0x196   :  { %v4093_v9 = vpop.f32.mrf.mxu2  ;;  %v3438_v16 = vpop.f32.mrf.mxu0 }
 0x197   :  { %v4422_v11 = vpop.f32.mrf.mxu3  ;;  %v4094_v14 = vadd.f32 %v4093_v9, %v3765_v55  ;;  %v3767_v17 = vpop.f32.mrf.mxu1  ;;  %v11351_v55 = vor.u32 %v14220_v40, %v11350_v39 }
 0x198   :  { %v3768_v24 = vadd.f32 %v3767_v17, %v3438_v16 }
 0x199   :  { %v15101_v25 = vadd.f32 %v4422_v11, %v4094_v14  ;;  %3477 = vmatmul.bf16.gmra.mxu0 %v11323_v12 }
 0x19a   :  { %3806 = vmatmul.bf16.gmra.mxu1 %v11327_v13 }
 0x19b   :  { %4135 = vmatmul.bf16.gmra.mxu2 %v11331_v18  ;;  %v11378_v18 = vld [vmem:[#allocation6 + $0x540] sm:$0xf] }
 0x19c   :  { %4464 = vmatmul.bf16.gmra.mxu3 %v11335_v20  ;;  %v14227_v20 = vld [vmem:[#allocation6 + $0x558] sm:$0xf0] }
 0x19d   :  { %v11379_v40 = vor.u32 %v14227_v20, %v11378_v18  ;;  %v11416_v18 = vld [vmem:[#allocation6 + $0x59c] sm:$0xf0] }
 0x19e   :  { %v4096_v26 = vpop.f32.mrf.mxu2  ;;  %v3440_v34 = vpop.f32.mrf.mxu0 }
 0x19f   :  { %v4425_v27 = vpop.f32.mrf.mxu3  ;;  %v4097_v29 = vadd.f32 %v4096_v26, %v3768_v24  ;;  %v3769_v35 = vpop.f32.mrf.mxu1  ;;  %v14224_v24 = vld [vmem:[#allocation6 + $0x544] sm:$0xf]  ;;  %v11380_v26 = vld [vmem:[#allocation6 + $0x55c] sm:$0xf0] }
 0x1a0   :  { %v3770_v36 = vadd.f32 %v3769_v35, %v3440_v34  ;;  %v14225_v34 = vld [vmem:[#allocation6 + $0x54c] sm:$0xf]  ;;  %v11388_v35 = vld [vmem:[#allocation6 + $0x564] sm:$0xf0]  ;;  %v11383_v43 = vor.u32 %v14224_v24, %v11380_v26 }
 0x1a1   :  { %v15103_v38 = vadd.f32 %v4425_v27, %v4097_v29  ;;  %v11386_v27 = vld [vmem:[#allocation6 + $0x548] sm:$0xf]  ;;  %v14228_v29 = vld [vmem:[#allocation6 + $0x560] sm:$0xf0]  ;;  %v11391_v50 = vor.u32 %v14225_v34, %v11388_v35 }
 0x1a2   :  { %v11387_v49 = vor.u32 %v14228_v29, %v11386_v27 }
 0x1a6   :  { %v4098_v51 = vpop.f32.mrf.mxu2  ;;  %v3443_v63 = vpop.f32.mrf.mxu0 }
 0x1a7   :  { %v4427_v54 = vpop.f32.mrf.mxu3  ;;  %v4099_v60 = vadd.f32 %v4098_v51, %v3770_v36  ;;  %v3772_v0 = vpop.f32.mrf.mxu1 }
 0x1a8   :  { %v3773_v6 = vadd.f32 %v3772_v0, %v3443_v63 }
 0x1a9   :  { %v15105_v8 = vadd.f32 %v4427_v54, %v4099_v60  ;;  %3482 = vmatmul.bf16.gmra.mxu0 %v11351_v55 }
 0x1aa   :  { %3811 = vmatmul.bf16.gmra.mxu1 %v11355_v59 }
 0x1ab   :  { %4140 = vmatmul.bf16.gmra.mxu2 %v11359_v2 }
 0x1ac   :  { %4469 = vmatmul.bf16.gmra.mxu3 %v11363_v4 }
 0x1ae   :  { %v4101_v9 = vpop.f32.mrf.mxu2  ;;  %v3445_v13 = vpop.f32.mrf.mxu0 }
 0x1af   :  { %v4430_v11 = vpop.f32.mrf.mxu3  ;;  %v4102_v12 = vadd.f32 %v4101_v9, %v3773_v6  ;;  %v3774_v14 = vpop.f32.mrf.mxu1  ;;  %v11406_v6 = vld [vmem:[#allocation6 + $0x578] sm:$0xf]  ;;  %v14234_v9 = vld [vmem:[#allocation6 + $0x590] sm:$0xf0] }
 0x1b0   :  { %v3775_v16 = vadd.f32 %v3774_v14, %v3445_v13  ;;  %v11414_v13 = vld [vmem:[#allocation6 + $0x580] sm:$0xf]  ;;  %v14235_v14 = vld [vmem:[#allocation6 + $0x598] sm:$0xf0]  ;;  %v11407_v26 = vor.u32 %v14234_v9, %v11406_v6  ;;  %v14242_v6 = vld [vmem:[#allocation6 + $0x5d0] sm:$0xf0] }
 0x1b1   :  { %v15107_v17 = vadd.f32 %v4430_v11, %v4102_v12  ;;  %v14231_v11 = vld [vmem:[#allocation6 + $0x57c] sm:$0xf]  ;;  %v11408_v12 = vld [vmem:[#allocation6 + $0x594] sm:$0xf0] }
 0x1b2   :  { %v11411_v27 = vor.u32 %v14231_v11, %v11408_v12  ;;  %v14239_v9 = vld [vmem:[#allocation6 + $0x5bc] sm:$0xf]  ;;  %v11444_v11 = vld [vmem:[#allocation6 + $0x5d4] sm:$0xf0] }
 0x1b6   :  { %v4103_v36 = vpop.f32.mrf.mxu2  ;;  %v3448_v45 = vpop.f32.mrf.mxu0 }
 0x1b7   :  { %v4432_v39 = vpop.f32.mrf.mxu3  ;;  %v4104_v44 = vadd.f32 %v4103_v36, %v3775_v16  ;;  %v3777_v47 = vpop.f32.mrf.mxu1  ;;  %v14232_v16 = vld [vmem:[#allocation6 + $0x584] sm:$0xf]  ;;  %v11415_v36 = vor.u32 %v14235_v14, %v11414_v13 }
 0x1b8   :  { %v3778_v51 = vadd.f32 %v3777_v47, %v3448_v45 }
 0x1b9   :  { %v15109_v54 = vadd.f32 %v4432_v39, %v4104_v44  ;;  %3487 = vmatmul.bf16.gmra.mxu0 %v11379_v40  ;;  %v11419_v39 = vor.u32 %v14232_v16, %v11416_v18 }
 0x1ba   :  { %3816 = vmatmul.bf16.gmra.mxu1 %v11383_v43 }
 0x1bb   :  { %4145 = vmatmul.bf16.gmra.mxu2 %v11387_v49 }
 0x1bc   :  { %4474 = vmatmul.bf16.gmra.mxu3 %v11391_v50 }
 0x1be   :  { %v4106_v55 = vpop.f32.mrf.mxu2  ;;  %v3450_v63 = vpop.f32.mrf.mxu0 }
 0x1bf   :  { %v4435_v59 = vpop.f32.mrf.mxu3  ;;  %v4107_v60 = vadd.f32 %v4106_v55, %v3778_v51  ;;  %v3779_v0 = vpop.f32.mrf.mxu1 }
 0x1c0   :  { %v3780_v2 = vadd.f32 %v3779_v0, %v3450_v63  ;;  %v14238_v63 = vld [vmem:[#allocation6 + $0x5b4] sm:$0xf]  ;;  %v11436_v0 = vld [vmem:[#allocation6 + $0x5cc] sm:$0xf0] }
 0x1c1   :  { %v15111_v4 = vadd.f32 %v4435_v59, %v4107_v60  ;;  %v11434_v59 = vld [vmem:[#allocation6 + $0x5b0] sm:$0xf]  ;;  %v14241_v60 = vld [vmem:[#allocation6 + $0x5c8] sm:$0xf0]  ;;  %v11439_v16 = vor.u32 %v14238_v63, %v11436_v0  ;;  %v14246_v0 = vld [vmem:[#allocation6 + $0x5f4] sm:$0xf] }
 0x1c2   :  { %v11435_v14 = vor.u32 %v14241_v60, %v11434_v59  ;;  %v11464_v59 = vld [vmem:[#allocation6 + $0x604] sm:$0xf0]  ;;  %v11470_v60 = vld [vmem:[#allocation6 + $0x5f0] sm:$0xf]  ;;  %v14249_v63 = vld [vmem:[#allocation6 + $0x608] sm:$0xf0] }
 0x1c6   :  { %v4108_v20 = vpop.f32.mrf.mxu2  ;;  %v3453_v34 = vpop.f32.mrf.mxu0 }
 0x1c7   :  { %v4437_v24 = vpop.f32.mrf.mxu3  ;;  %v4109_v29 = vadd.f32 %v4108_v20, %v3780_v2  ;;  %v3782_v35 = vpop.f32.mrf.mxu1  ;;  %v11442_v2 = vld [vmem:[#allocation6 + $0x5b8] sm:$0xf] }
 0x1c8   :  { %v3783_v40 = vadd.f32 %v3782_v35, %v3453_v34 }
 0x1c9   :  { %v15113_v43 = vadd.f32 %v4437_v24, %v4109_v29  ;;  %3492 = vmatmul.bf16.gmra.mxu0 %v11407_v26  ;;  %v11443_v26 = vor.u32 %v14242_v6, %v11442_v2  ;;  %v11472_v2 = vld [vmem:[#allocation6 + $0x60c] sm:$0xf0] }
 0x1ca   :  { %3821 = vmatmul.bf16.gmra.mxu1 %v11411_v27  ;;  %v11447_v27 = vor.u32 %v14239_v9, %v11444_v11 }
 0x1cb   :  { %4150 = vmatmul.bf16.gmra.mxu2 %v11415_v36 }
 0x1cc   :  { %4479 = vmatmul.bf16.gmra.mxu3 %v11419_v39 }
 0x1ce   :  { %v4111_v44 = vpop.f32.mrf.mxu2  ;;  %v3455_v49 = vpop.f32.mrf.mxu0 }
 0x1cf   :  { %v4440_v45 = vpop.f32.mrf.mxu3  ;;  %v4112_v47 = vadd.f32 %v4111_v44, %v3783_v40  ;;  %v3784_v50 = vpop.f32.mrf.mxu1 }
 0x1d0   :  { %v3785_v51 = vadd.f32 %v3784_v50, %v3455_v49  ;;  %v11462_v49 = vld [vmem:[#allocation6 + $0x5e8] sm:$0xf]  ;;  %v14248_v50 = vld [vmem:[#allocation6 + $0x600] sm:$0xf0] }
 0x1d1   :  { %v15115_v55 = vadd.f32 %v4440_v45, %v4112_v47  ;;  %v11463_v11 = vor.u32 %v14248_v50, %v11462_v49  ;;  %v14255_v49 = vld [vmem:[#allocation6 + $0x638] sm:$0xf0]  ;;  %v14252_v50 = vld [vmem:[#allocation6 + $0x624] sm:$0xf] }
 0x1d6   :  { %v4113_v12 = vpop.f32.mrf.mxu2  ;;  %v3458_v20 = vpop.f32.mrf.mxu0 }
 0x1d7   :  { %v4442_v13 = vpop.f32.mrf.mxu3  ;;  %v4114_v18 = vadd.f32 %v4113_v12, %v3785_v51  ;;  %v3787_v24 = vpop.f32.mrf.mxu1  ;;  %v14245_v51 = vld [vmem:[#allocation6 + $0x5ec] sm:$0xf] }
 0x1d8   :  { %v3788_v29 = vadd.f32 %v3787_v24, %v3458_v20  ;;  %v11467_v12 = vor.u32 %v14245_v51, %v11464_v59  ;;  %v11475_v20 = vor.u32 %v14246_v0, %v11472_v2  ;;  %v11492_v51 = vld [vmem:[#allocation6 + $0x63c] sm:$0xf0]  ;;  %v11498_v59 = vld [vmem:[#allocation6 + $0x628] sm:$0xf] }
 0x1d9   :  { %v15117_v34 = vadd.f32 %v4442_v13, %v4114_v18  ;;  %3497 = vmatmul.bf16.gmra.mxu0 %v11435_v14  ;;  %v11471_v18 = vor.u32 %v14249_v63, %v11470_v60  ;;  %v14256_v60 = vld [vmem:[#allocation6 + $0x640] sm:$0xf0]  ;;  %v14253_v63 = vld [vmem:[#allocation6 + $0x62c] sm:$0xf]  ;;  %v11500_v0 = vld [vmem:[#allocation6 + $0x644] sm:$0xf0] }
 0x1da   :  { %3826 = vmatmul.bf16.gmra.mxu1 %v11439_v16 }
 0x1db   :  { %4155 = vmatmul.bf16.gmra.mxu2 %v11443_v26 }
 0x1dc   :  { %4484 = vmatmul.bf16.gmra.mxu3 %v11447_v27 }
 0x1de   :  { %v4116_v35 = vpop.f32.mrf.mxu2  ;;  %v3460_v40 = vpop.f32.mrf.mxu0 }
 0x1df   :  { %v4445_v36 = vpop.f32.mrf.mxu3  ;;  %v4117_v39 = vadd.f32 %v4116_v35, %v3788_v29  ;;  %v3789_v44 = vpop.f32.mrf.mxu1 }
 0x1e0   :  { %v3790_v45 = vadd.f32 %v3789_v44, %v3460_v40 }
 0x1e1   :  { %v15119_v47 = vadd.f32 %v4445_v36, %v4117_v39 }
 0x1e6   :  { %v4118_v6 = vpop.f32.mrf.mxu2  ;;  %v3463_v14 = vpop.f32.mrf.mxu0 }
 0x1e7   :  { %v4447_v9 = vpop.f32.mrf.mxu3  ;;  %v4119_v13 = vadd.f32 %v4118_v6, %v3790_v45  ;;  %v3792_v16 = vpop.f32.mrf.mxu1  ;;  %v11490_v45 = vld [vmem:[#allocation6 + $0x620] sm:$0xf] }
 0x1e8   :  { %v3793_v24 = vadd.f32 %v3792_v16, %v3463_v14  ;;  %v11499_v16 = vor.u32 %v14256_v60, %v11498_v59  ;;  %v11526_v59 = vld [vmem:[#allocation6 + $0x660] sm:$0xf]  ;;  %v14263_v60 = vld [vmem:[#allocation6 + $0x678] sm:$0xf0] }
 0x1e9   :  { %v15121_v26 = vadd.f32 %v4447_v9, %v4119_v13  ;;  %3502 = vmatmul.bf16.gmra.mxu0 %v11463_v11  ;;  %v11491_v9 = vor.u32 %v14255_v49, %v11490_v45  ;;  %v11495_v11 = vor.u32 %v14252_v50, %v11492_v51  ;;  %v14262_v49 = vld [vmem:[#allocation6 + $0x670] sm:$0xf0]  ;;  %v14259_v50 = vld [vmem:[#allocation6 + $0x65c] sm:$0xf]  ;;  %v11520_v51 = vld [vmem:[#allocation6 + $0x674] sm:$0xf0] }
 0x1ea   :  { %3831 = vmatmul.bf16.gmra.mxu1 %v11467_v12 }
 0x1eb   :  { %4160 = vmatmul.bf16.gmra.mxu2 %v11471_v18  ;;  %v11503_v18 = vor.u32 %v14253_v63, %v11500_v0  ;;  %v14260_v63 = vld [vmem:[#allocation6 + $0x664] sm:$0xf]  ;;  %v11528_v0 = vld [vmem:[#allocation6 + $0x67c] sm:$0xf0] }
 0x1ec   :  { %4489 = vmatmul.bf16.gmra.mxu3 %v11475_v20 }
 0x1ee   :  { %v4121_v27 = vpop.f32.mrf.mxu2  ;;  %v3465_v36 = vpop.f32.mrf.mxu0 }
 0x1ef   :  { %v4450_v29 = vpop.f32.mrf.mxu3  ;;  %v4122_v35 = vadd.f32 %v4121_v27, %v3793_v24  ;;  %v3794_v39 = vpop.f32.mrf.mxu1 }
 0x1f0   :  { %v3795_v40 = vadd.f32 %v3794_v39, %v3465_v36 }
 0x1f1   :  { %v15123_v44 = vadd.f32 %v4450_v29, %v4122_v35 }
 0x1f3   :  { %17264 = vst [vmem:[#allocation16_spill] sm:$0xff] %v15123_v44 }
 0x1f6   :  { %v4123_v2 = vpop.f32.mrf.mxu2  ;;  %v3468_v13 = vpop.f32.mrf.mxu0 }
 0x1f7   :  { %v4452_v6 = vpop.f32.mrf.mxu3  ;;  %v4124_v12 = vadd.f32 %v4123_v2, %v3795_v40  ;;  %v3797_v14 = vpop.f32.mrf.mxu1  ;;  %v11518_v40 = vld [vmem:[#allocation6 + $0x658] sm:$0xf] }
 0x1f8   :  { %v3798_v20 = vadd.f32 %v3797_v14, %v3468_v13 }
 0x1f9   :  { %v15125_v24 = vadd.f32 %v4452_v6, %v4124_v12  ;;  %3507 = vmatmul.bf16.gmra.mxu0 %v11491_v9  ;;  %v11519_v9 = vor.u32 %v14262_v49, %v11518_v40  ;;  %v14269_v49 = vld [vmem:[#allocation6 + $0x6a8] sm:$0xf0] }
 0x1fa   :  { %3836 = vmatmul.bf16.gmra.mxu1 %v11495_v11  ;;  %v11523_v11 = vor.u32 %v14259_v50, %v11520_v51  ;;  %v14266_v50 = vld [vmem:[#allocation6 + $0x694] sm:$0xf]  ;;  %v11548_v51 = vld [vmem:[#allocation6 + $0x6ac] sm:$0xf0] }
 0x1fb   :  { %17265 = vst [vmem:[#allocation17_spill] sm:$0xff] %v15125_v24  ;;  %4165 = vmatmul.bf16.gmra.mxu2 %v11499_v16  ;;  %v11527_v16 = vor.u32 %v14263_v60, %v11526_v59  ;;  %v11554_v59 = vld [vmem:[#allocation6 + $0x698] sm:$0xf]  ;;  %v14270_v60 = vld [vmem:[#allocation6 + $0x6b0] sm:$0xf0] }
 0x1fc   :  { %4494 = vmatmul.bf16.gmra.mxu3 %v11503_v18  ;;  %v11531_v18 = vor.u32 %v14260_v63, %v11528_v0  ;;  %v14267_v63 = vld [vmem:[#allocation6 + $0x69c] sm:$0xf]  ;;  %v11556_v0 = vld [vmem:[#allocation6 + $0x6b4] sm:$0xf0] }
 0x1fe   :  { %v4126_v27 = vpop.f32.mrf.mxu2  ;;  %v3470_v36 = vpop.f32.mrf.mxu0 }
 0x1ff   :  { %v4455_v29 = vpop.f32.mrf.mxu3  ;;  %v4127_v35 = vadd.f32 %v4126_v27, %v3798_v20  ;;  %v3799_v39 = vpop.f32.mrf.mxu1 }
 0x200   :  { %v3800_v44 = vadd.f32 %v3799_v39, %v3470_v36 }
 0x201   :  { %v15127_v45 = vadd.f32 %v4455_v29, %v4127_v35 }
 0x203   :  { %17266 = vst [vmem:[#allocation18_spill] sm:$0xff] %v15127_v45 }
 0x206   :  { %v4128_v2 = vpop.f32.mrf.mxu2  ;;  %v3473_v13 = vpop.f32.mrf.mxu0 }
 0x207   :  { %v4457_v6 = vpop.f32.mrf.mxu3  ;;  %v4129_v12 = vadd.f32 %v4128_v2, %v3800_v44  ;;  %v3802_v14 = vpop.f32.mrf.mxu1  ;;  %v11546_v44 = vld [vmem:[#allocation6 + $0x690] sm:$0xf] }
 0x208   :  { %v3803_v20 = vadd.f32 %v3802_v14, %v3473_v13 }
 0x209   :  { %v15129_v27 = vadd.f32 %v4457_v6, %v4129_v12  ;;  %3512 = vmatmul.bf16.gmra.mxu0 %v11519_v9  ;;  %v11547_v9 = vor.u32 %v14269_v49, %v11546_v44  ;;  %v14276_v49 = vld [vmem:[#allocation6 + $0x6e0] sm:$0xf0] }
 0x20a   :  { %3841 = vmatmul.bf16.gmra.mxu1 %v11523_v11  ;;  %v11551_v11 = vor.u32 %v14266_v50, %v11548_v51  ;;  %v14273_v50 = vld [vmem:[#allocation6 + $0x6cc] sm:$0xf]  ;;  %v11576_v51 = vld [vmem:[#allocation6 + $0x6e4] sm:$0xf0] }
 0x20b   :  { %17267 = vst [vmem:[#allocation19_spill] sm:$0xff] %v15129_v27  ;;  %4170 = vmatmul.bf16.gmra.mxu2 %v11527_v16  ;;  %v11555_v16 = vor.u32 %v14270_v60, %v11554_v59  ;;  %v11582_v59 = vld [vmem:[#allocation6 + $0x6d0] sm:$0xf]  ;;  %v14277_v60 = vld [vmem:[#allocation6 + $0x6e8] sm:$0xf0] }
 0x20c   :  { %4499 = vmatmul.bf16.gmra.mxu3 %v11531_v18  ;;  %v11559_v18 = vor.u32 %v14267_v63, %v11556_v0  ;;  %v14274_v63 = vld [vmem:[#allocation6 + $0x6d4] sm:$0xf]  ;;  %v11584_v0 = vld [vmem:[#allocation6 + $0x6ec] sm:$0xf0] }
 0x20e   :  { %v4131_v29 = vpop.f32.mrf.mxu2  ;;  %v3475_v39 = vpop.f32.mrf.mxu0 }
 0x20f   :  { %v4460_v35 = vpop.f32.mrf.mxu3  ;;  %v4132_v36 = vadd.f32 %v4131_v29, %v3803_v20  ;;  %v3804_v45 = vpop.f32.mrf.mxu1 }
 0x210   :  { %v3805_v24 = vadd.f32 %v3804_v45, %v3475_v39 }
 0x211   :  { %v15131_v40 = vadd.f32 %v4460_v35, %v4132_v36 }
 0x213   :  { %17268 = vst [vmem:[#allocation20_spill] sm:$0xff] %v15131_v40 }
 0x216   :  { %v4133_v2 = vpop.f32.mrf.mxu2  ;;  %v3478_v13 = vpop.f32.mrf.mxu0 }
 0x217   :  { %v4462_v6 = vpop.f32.mrf.mxu3  ;;  %v4134_v12 = vadd.f32 %v4133_v2, %v3805_v24  ;;  %v3807_v14 = vpop.f32.mrf.mxu1  ;;  %v11574_v24 = vld [vmem:[#allocation6 + $0x6c8] sm:$0xf] }
 0x218   :  { %v3808_v45 = vadd.f32 %v3807_v14, %v3478_v13 }
 0x219   :  { %v15133_v20 = vadd.f32 %v4462_v6, %v4134_v12  ;;  %3517 = vmatmul.bf16.gmra.mxu0 %v11547_v9  ;;  %v11575_v9 = vor.u32 %v14276_v49, %v11574_v24  ;;  %v14283_v49 = vld [vmem:[#allocation6 + $0x718] sm:$0xf0] }
 0x21a   :  { %3846 = vmatmul.bf16.gmra.mxu1 %v11551_v11  ;;  %v11579_v11 = vor.u32 %v14273_v50, %v11576_v51  ;;  %v14280_v50 = vld [vmem:[#allocation6 + $0x704] sm:$0xf]  ;;  %v11604_v51 = vld [vmem:[#allocation6 + $0x71c] sm:$0xf0] }
 0x21b   :  { %17269 = vst [vmem:[#allocation21_spill] sm:$0xff] %v15133_v20  ;;  %4175 = vmatmul.bf16.gmra.mxu2 %v11555_v16  ;;  %v11583_v16 = vor.u32 %v14277_v60, %v11582_v59  ;;  %v11610_v59 = vld [vmem:[#allocation6 + $0x708] sm:$0xf]  ;;  %v14284_v60 = vld [vmem:[#allocation6 + $0x720] sm:$0xf0] }
 0x21c   :  { %4504 = vmatmul.bf16.gmra.mxu3 %v11559_v18  ;;  %v11587_v18 = vor.u32 %v14274_v63, %v11584_v0  ;;  %v14281_v63 = vld [vmem:[#allocation6 + $0x70c] sm:$0xf]  ;;  %v11612_v0 = vld [vmem:[#allocation6 + $0x724] sm:$0xf0] }
 0x21e   :  { %v4136_v29 = vpop.f32.mrf.mxu2  ;;  %v3480_v39 = vpop.f32.mrf.mxu0 }
 0x21f   :  { %v4465_v35 = vpop.f32.mrf.mxu3  ;;  %v4137_v36 = vadd.f32 %v4136_v29, %v3808_v45  ;;  %v3809_v40 = vpop.f32.mrf.mxu1 }
 0x220   :  { %v3810_v27 = vadd.f32 %v3809_v40, %v3480_v39 }
 0x221   :  { %v15135_v44 = vadd.f32 %v4465_v35, %v4137_v36 }
 0x223   :  { %17270 = vst [vmem:[#allocation22_spill] sm:$0xff] %v15135_v44 }
 0x226   :  { %v4138_v2 = vpop.f32.mrf.mxu2  ;;  %v3483_v13 = vpop.f32.mrf.mxu0 }
 0x227   :  { %v4467_v6 = vpop.f32.mrf.mxu3  ;;  %v4139_v12 = vadd.f32 %v4138_v2, %v3810_v27  ;;  %v3812_v14 = vpop.f32.mrf.mxu1  ;;  %v11602_v27 = vld [vmem:[#allocation6 + $0x700] sm:$0xf] }
 0x228   :  { %v3813_v40 = vadd.f32 %v3812_v14, %v3483_v13 }
 0x229   :  { %v15137_v45 = vadd.f32 %v4467_v6, %v4139_v12  ;;  %3522 = vmatmul.bf16.gmra.mxu0 %v11575_v9  ;;  %v11603_v9 = vor.u32 %v14283_v49, %v11602_v27  ;;  %v14290_v49 = vld [vmem:[#allocation6 + $0x750] sm:$0xf0] }
 0x22a   :  { %3851 = vmatmul.bf16.gmra.mxu1 %v11579_v11  ;;  %v11607_v11 = vor.u32 %v14280_v50, %v11604_v51  ;;  %v14287_v50 = vld [vmem:[#allocation6 + $0x73c] sm:$0xf]  ;;  %v11632_v51 = vld [vmem:[#allocation6 + $0x754] sm:$0xf0] }
 0x22b   :  { %17271 = vst [vmem:[#allocation23_spill] sm:$0xff] %v15137_v45  ;;  %4180 = vmatmul.bf16.gmra.mxu2 %v11583_v16  ;;  %v11611_v16 = vor.u32 %v14284_v60, %v11610_v59  ;;  %v11638_v59 = vld [vmem:[#allocation6 + $0x740] sm:$0xf]  ;;  %v14291_v60 = vld [vmem:[#allocation6 + $0x758] sm:$0xf0] }
 0x22c   :  { %4509 = vmatmul.bf16.gmra.mxu3 %v11587_v18  ;;  %v11615_v18 = vor.u32 %v14281_v63, %v11612_v0  ;;  %v14288_v63 = vld [vmem:[#allocation6 + $0x744] sm:$0xf]  ;;  %v11640_v0 = vld [vmem:[#allocation6 + $0x75c] sm:$0xf0] }
 0x22e   :  { %v4141_v29 = vpop.f32.mrf.mxu2  ;;  %v3485_v39 = vpop.f32.mrf.mxu0 }
 0x22f   :  { %v4470_v35 = vpop.f32.mrf.mxu3  ;;  %v4142_v36 = vadd.f32 %v4141_v29, %v3813_v40  ;;  %v3814_v44 = vpop.f32.mrf.mxu1 }
 0x230   :  { %v3815_v20 = vadd.f32 %v3814_v44, %v3485_v39 }
 0x231   :  { %v15139_v24 = vadd.f32 %v4470_v35, %v4142_v36 }
 0x233   :  { %17272 = vst [vmem:[#allocation24_spill] sm:$0xff] %v15139_v24 }
 0x236   :  { %v4143_v2 = vpop.f32.mrf.mxu2  ;;  %v3488_v13 = vpop.f32.mrf.mxu0 }
 0x237   :  { %v4472_v6 = vpop.f32.mrf.mxu3  ;;  %v4144_v12 = vadd.f32 %v4143_v2, %v3815_v20  ;;  %v3817_v14 = vpop.f32.mrf.mxu1  ;;  %v11630_v20 = vld [vmem:[#allocation6 + $0x738] sm:$0xf] }
 0x238   :  { %v3818_v44 = vadd.f32 %v3817_v14, %v3488_v13 }
 0x239   :  { %v15141_v40 = vadd.f32 %v4472_v6, %v4144_v12  ;;  %3527 = vmatmul.bf16.gmra.mxu0 %v11603_v9  ;;  %v11631_v9 = vor.u32 %v14290_v49, %v11630_v20  ;;  %v14297_v49 = vld [vmem:[#allocation6 + $0x788] sm:$0xf0] }
 0x23a   :  { %3856 = vmatmul.bf16.gmra.mxu1 %v11607_v11  ;;  %v11635_v11 = vor.u32 %v14287_v50, %v11632_v51  ;;  %v14294_v50 = vld [vmem:[#allocation6 + $0x774] sm:$0xf]  ;;  %v11660_v51 = vld [vmem:[#allocation6 + $0x78c] sm:$0xf0] }
 0x23b   :  { %17273 = vst [vmem:[#allocation25_spill] sm:$0xff] %v15141_v40  ;;  %4185 = vmatmul.bf16.gmra.mxu2 %v11611_v16  ;;  %v11639_v16 = vor.u32 %v14291_v60, %v11638_v59  ;;  %v11666_v59 = vld [vmem:[#allocation6 + $0x778] sm:$0xf]  ;;  %v14298_v60 = vld [vmem:[#allocation6 + $0x790] sm:$0xf0] }
 0x23c   :  { %4514 = vmatmul.bf16.gmra.mxu3 %v11615_v18  ;;  %v11643_v18 = vor.u32 %v14288_v63, %v11640_v0  ;;  %v14295_v63 = vld [vmem:[#allocation6 + $0x77c] sm:$0xf]  ;;  %v11668_v0 = vld [vmem:[#allocation6 + $0x794] sm:$0xf0] }
 0x23e   :  { %v4146_v29 = vpop.f32.mrf.mxu2  ;;  %v3490_v39 = vpop.f32.mrf.mxu0 }
 0x23f   :  { %v4475_v35 = vpop.f32.mrf.mxu3  ;;  %v4147_v36 = vadd.f32 %v4146_v29, %v3818_v44  ;;  %v3819_v24 = vpop.f32.mrf.mxu1 }
 0x240   :  { %v3820_v45 = vadd.f32 %v3819_v24, %v3490_v39 }
 0x241   :  { %v15143_v27 = vadd.f32 %v4475_v35, %v4147_v36 }
 0x243   :  { %17274 = vst [vmem:[#allocation26_spill] sm:$0xff] %v15143_v27 }
 0x246   :  { %v4148_v2 = vpop.f32.mrf.mxu2  ;;  %v3493_v13 = vpop.f32.mrf.mxu0 }
 0x247   :  { %v4477_v6 = vpop.f32.mrf.mxu3  ;;  %v4149_v12 = vadd.f32 %v4148_v2, %v3820_v45  ;;  %v3822_v14 = vpop.f32.mrf.mxu1  ;;  %v11658_v45 = vld [vmem:[#allocation6 + $0x770] sm:$0xf] }
 0x248   :  { %v3823_v24 = vadd.f32 %v3822_v14, %v3493_v13 }
 0x249   :  { %v15145_v44 = vadd.f32 %v4477_v6, %v4149_v12  ;;  %3532 = vmatmul.bf16.gmra.mxu0 %v11631_v9  ;;  %v11659_v9 = vor.u32 %v14297_v49, %v11658_v45  ;;  %v14304_v49 = vld [vmem:[#allocation6 + $0x7c0] sm:$0xf0] }
 0x24a   :  { %3861 = vmatmul.bf16.gmra.mxu1 %v11635_v11  ;;  %v11663_v11 = vor.u32 %v14294_v50, %v11660_v51  ;;  %v14301_v50 = vld [vmem:[#allocation6 + $0x7ac] sm:$0xf]  ;;  %v11688_v51 = vld [vmem:[#allocation6 + $0x7c4] sm:$0xf0] }
 0x24b   :  { %17275 = vst [vmem:[#allocation27_spill] sm:$0xff] %v15145_v44  ;;  %4190 = vmatmul.bf16.gmra.mxu2 %v11639_v16  ;;  %v11667_v16 = vor.u32 %v14298_v60, %v11666_v59  ;;  %v11694_v59 = vld [vmem:[#allocation6 + $0x7b0] sm:$0xf]  ;;  %v14305_v60 = vld [vmem:[#allocation6 + $0x7c8] sm:$0xf0] }
 0x24c   :  { %4519 = vmatmul.bf16.gmra.mxu3 %v11643_v18  ;;  %v11671_v18 = vor.u32 %v14295_v63, %v11668_v0  ;;  %v14302_v63 = vld [vmem:[#allocation6 + $0x7b4] sm:$0xf]  ;;  %v11696_v0 = vld [vmem:[#allocation6 + $0x7cc] sm:$0xf0] }
 0x24e   :  { %v4151_v29 = vpop.f32.mrf.mxu2  ;;  %v3495_v39 = vpop.f32.mrf.mxu0 }
 0x24f   :  { %v4480_v35 = vpop.f32.mrf.mxu3  ;;  %v4152_v36 = vadd.f32 %v4151_v29, %v3823_v24  ;;  %v3824_v27 = vpop.f32.mrf.mxu1 }
 0x250   :  { %v3825_v40 = vadd.f32 %v3824_v27, %v3495_v39 }
 0x251   :  { %v15147_v20 = vadd.f32 %v4480_v35, %v4152_v36 }
 0x253   :  { %17276 = vst [vmem:[#allocation28_spill] sm:$0xff] %v15147_v20 }
 0x256   :  { %v4153_v2 = vpop.f32.mrf.mxu2  ;;  %v3498_v13 = vpop.f32.mrf.mxu0 }
 0x257   :  { %v4482_v6 = vpop.f32.mrf.mxu3  ;;  %v4154_v12 = vadd.f32 %v4153_v2, %v3825_v40  ;;  %v3827_v14 = vpop.f32.mrf.mxu1  ;;  %v11686_v40 = vld [vmem:[#allocation6 + $0x7a8] sm:$0xf] }
 0x258   :  { %v3828_v27 = vadd.f32 %v3827_v14, %v3498_v13 }
 0x259   :  { %v15149_v24 = vadd.f32 %v4482_v6, %v4154_v12  ;;  %3537 = vmatmul.bf16.gmra.mxu0 %v11659_v9  ;;  %v11687_v9 = vor.u32 %v14304_v49, %v11686_v40  ;;  %v14311_v49 = vld [vmem:[#allocation6 + $0x7f8] sm:$0xf0] }
 0x25a   :  { %3866 = vmatmul.bf16.gmra.mxu1 %v11663_v11  ;;  %v11691_v11 = vor.u32 %v14301_v50, %v11688_v51  ;;  %v14308_v50 = vld [vmem:[#allocation6 + $0x7e4] sm:$0xf]  ;;  %v11716_v51 = vld [vmem:[#allocation6 + $0x7fc] sm:$0xf0] }
 0x25b   :  { %17277 = vst [vmem:[#allocation29_spill] sm:$0xff] %v15149_v24  ;;  %4195 = vmatmul.bf16.gmra.mxu2 %v11667_v16  ;;  %v11695_v16 = vor.u32 %v14305_v60, %v11694_v59  ;;  %v11722_v59 = vld [vmem:[#allocation6 + $0x7e8] sm:$0xf]  ;;  %v14312_v60 = vld [vmem:[#allocation6 + $0x800] sm:$0xf0] }
 0x25c   :  { %4524 = vmatmul.bf16.gmra.mxu3 %v11671_v18  ;;  %v11699_v18 = vor.u32 %v14302_v63, %v11696_v0  ;;  %v14309_v63 = vld [vmem:[#allocation6 + $0x7ec] sm:$0xf]  ;;  %v11724_v0 = vld [vmem:[#allocation6 + $0x804] sm:$0xf0] }
 0x25e   :  { %v4156_v29 = vpop.f32.mrf.mxu2  ;;  %v3500_v39 = vpop.f32.mrf.mxu0 }
 0x25f   :  { %v4485_v35 = vpop.f32.mrf.mxu3  ;;  %v4157_v36 = vadd.f32 %v4156_v29, %v3828_v27  ;;  %v3829_v20 = vpop.f32.mrf.mxu1 }
 0x260   :  { %v3830_v44 = vadd.f32 %v3829_v20, %v3500_v39 }
 0x261   :  { %v15151_v45 = vadd.f32 %v4485_v35, %v4157_v36 }
 0x263   :  { %17278 = vst [vmem:[#allocation30_spill] sm:$0xff] %v15151_v45 }
 0x266   :  { %v4158_v2 = vpop.f32.mrf.mxu2  ;;  %v3503_v13 = vpop.f32.mrf.mxu0 }
 0x267   :  { %v4487_v6 = vpop.f32.mrf.mxu3  ;;  %v4159_v12 = vadd.f32 %v4158_v2, %v3830_v44  ;;  %v3832_v14 = vpop.f32.mrf.mxu1  ;;  %v11714_v44 = vld [vmem:[#allocation6 + $0x7e0] sm:$0xf] }
 0x268   :  { %v3833_v20 = vadd.f32 %v3832_v14, %v3503_v13 }
 0x269   :  { %v15153_v27 = vadd.f32 %v4487_v6, %v4159_v12  ;;  %3542 = vmatmul.bf16.gmra.mxu0 %v11687_v9  ;;  %v11715_v9 = vor.u32 %v14311_v49, %v11714_v44  ;;  %v14318_v49 = vld [vmem:[#allocation6 + $0x830] sm:$0xf0] }
 0x26a   :  { %3871 = vmatmul.bf16.gmra.mxu1 %v11691_v11  ;;  %v11719_v11 = vor.u32 %v14308_v50, %v11716_v51  ;;  %v14315_v50 = vld [vmem:[#allocation6 + $0x81c] sm:$0xf]  ;;  %v11744_v51 = vld [vmem:[#allocation6 + $0x834] sm:$0xf0] }
 0x26b   :  { %17279 = vst [vmem:[#allocation31_spill] sm:$0xff] %v15153_v27  ;;  %4200 = vmatmul.bf16.gmra.mxu2 %v11695_v16  ;;  %v11723_v16 = vor.u32 %v14312_v60, %v11722_v59  ;;  %v11750_v59 = vld [vmem:[#allocation6 + $0x820] sm:$0xf]  ;;  %v14319_v60 = vld [vmem:[#allocation6 + $0x838] sm:$0xf0] }
 0x26c   :  { %4529 = vmatmul.bf16.gmra.mxu3 %v11699_v18  ;;  %v11727_v18 = vor.u32 %v14309_v63, %v11724_v0  ;;  %v14316_v63 = vld [vmem:[#allocation6 + $0x824] sm:$0xf]  ;;  %v11752_v0 = vld [vmem:[#allocation6 + $0x83c] sm:$0xf0] }
 0x26e   :  { %v4161_v29 = vpop.f32.mrf.mxu2  ;;  %v3505_v39 = vpop.f32.mrf.mxu0 }
 0x26f   :  { %v4490_v35 = vpop.f32.mrf.mxu3  ;;  %v4162_v36 = vadd.f32 %v4161_v29, %v3833_v20  ;;  %v3834_v45 = vpop.f32.mrf.mxu1 }
 0x270   :  { %v3835_v24 = vadd.f32 %v3834_v45, %v3505_v39 }
 0x271   :  { %v15155_v40 = vadd.f32 %v4490_v35, %v4162_v36 }
 0x273   :  { %17280 = vst [vmem:[#allocation32_spill] sm:$0xff] %v15155_v40 }
 0x276   :  { %v4163_v2 = vpop.f32.mrf.mxu2  ;;  %v3508_v13 = vpop.f32.mrf.mxu0 }
 0x277   :  { %v4492_v6 = vpop.f32.mrf.mxu3  ;;  %v4164_v12 = vadd.f32 %v4163_v2, %v3835_v24  ;;  %v3837_v14 = vpop.f32.mrf.mxu1  ;;  %v11742_v24 = vld [vmem:[#allocation6 + $0x818] sm:$0xf] }
 0x278   :  { %v3838_v45 = vadd.f32 %v3837_v14, %v3508_v13 }
 0x279   :  { %v15157_v20 = vadd.f32 %v4492_v6, %v4164_v12  ;;  %3547 = vmatmul.bf16.gmra.mxu0 %v11715_v9  ;;  %v11743_v9 = vor.u32 %v14318_v49, %v11742_v24  ;;  %v14325_v49 = vld [vmem:[#allocation6 + $0x868] sm:$0xf0] }
 0x27a   :  { %3876 = vmatmul.bf16.gmra.mxu1 %v11719_v11  ;;  %v11747_v11 = vor.u32 %v14315_v50, %v11744_v51  ;;  %v14322_v50 = vld [vmem:[#allocation6 + $0x854] sm:$0xf]  ;;  %v11772_v51 = vld [vmem:[#allocation6 + $0x86c] sm:$0xf0] }
 0x27b   :  { %17281 = vst [vmem:[#allocation33_spill] sm:$0xff] %v15157_v20  ;;  %4205 = vmatmul.bf16.gmra.mxu2 %v11723_v16  ;;  %v11751_v16 = vor.u32 %v14319_v60, %v11750_v59  ;;  %v11778_v59 = vld [vmem:[#allocation6 + $0x858] sm:$0xf]  ;;  %v14326_v60 = vld [vmem:[#allocation6 + $0x870] sm:$0xf0] }
 0x27c   :  { %4534 = vmatmul.bf16.gmra.mxu3 %v11727_v18  ;;  %v11755_v18 = vor.u32 %v14316_v63, %v11752_v0  ;;  %v14323_v63 = vld [vmem:[#allocation6 + $0x85c] sm:$0xf]  ;;  %v11780_v0 = vld [vmem:[#allocation6 + $0x874] sm:$0xf0] }
 0x27e   :  { %v4166_v29 = vpop.f32.mrf.mxu2  ;;  %v3510_v39 = vpop.f32.mrf.mxu0 }
 0x27f   :  { %v4495_v35 = vpop.f32.mrf.mxu3  ;;  %v4167_v36 = vadd.f32 %v4166_v29, %v3838_v45  ;;  %v3839_v40 = vpop.f32.mrf.mxu1 }
 0x280   :  { %v3840_v27 = vadd.f32 %v3839_v40, %v3510_v39 }
 0x281   :  { %v15159_v44 = vadd.f32 %v4495_v35, %v4167_v36 }
 0x283   :  { %17282 = vst [vmem:[#allocation34_spill] sm:$0xff] %v15159_v44 }
 0x286   :  { %v4168_v2 = vpop.f32.mrf.mxu2  ;;  %v3513_v13 = vpop.f32.mrf.mxu0 }
 0x287   :  { %v4497_v6 = vpop.f32.mrf.mxu3  ;;  %v4169_v12 = vadd.f32 %v4168_v2, %v3840_v27  ;;  %v3842_v14 = vpop.f32.mrf.mxu1  ;;  %v11770_v27 = vld [vmem:[#allocation6 + $0x850] sm:$0xf] }
 0x288   :  { %v3843_v40 = vadd.f32 %v3842_v14, %v3513_v13 }
 0x289   :  { %v15161_v45 = vadd.f32 %v4497_v6, %v4169_v12  ;;  %3552 = vmatmul.bf16.gmra.mxu0 %v11743_v9  ;;  %v11771_v9 = vor.u32 %v14325_v49, %v11770_v27  ;;  %v14332_v49 = vld [vmem:[#allocation6 + $0x8a0] sm:$0xf0] }
 0x28a   :  { %3881 = vmatmul.bf16.gmra.mxu1 %v11747_v11  ;;  %v11775_v11 = vor.u32 %v14322_v50, %v11772_v51  ;;  %v14329_v50 = vld [vmem:[#allocation6 + $0x88c] sm:$0xf]  ;;  %v11800_v51 = vld [vmem:[#allocation6 + $0x8a4] sm:$0xf0] }
 0x28b   :  { %17283 = vst [vmem:[#allocation35_spill] sm:$0xff] %v15161_v45  ;;  %4210 = vmatmul.bf16.gmra.mxu2 %v11751_v16  ;;  %v11779_v16 = vor.u32 %v14326_v60, %v11778_v59  ;;  %v11806_v59 = vld [vmem:[#allocation6 + $0x890] sm:$0xf]  ;;  %v14333_v60 = vld [vmem:[#allocation6 + $0x8a8] sm:$0xf0] }
 0x28c   :  { %4539 = vmatmul.bf16.gmra.mxu3 %v11755_v18  ;;  %v11783_v18 = vor.u32 %v14323_v63, %v11780_v0  ;;  %v14330_v63 = vld [vmem:[#allocation6 + $0x894] sm:$0xf]  ;;  %v11808_v0 = vld [vmem:[#allocation6 + $0x8ac] sm:$0xf0] }
 0x28e   :  { %v4171_v29 = vpop.f32.mrf.mxu2  ;;  %v3515_v39 = vpop.f32.mrf.mxu0 }
 0x28f   :  { %v4500_v35 = vpop.f32.mrf.mxu3  ;;  %v4172_v36 = vadd.f32 %v4171_v29, %v3843_v40  ;;  %v3844_v44 = vpop.f32.mrf.mxu1 }
 0x290   :  { %v3845_v20 = vadd.f32 %v3844_v44, %v3515_v39 }
 0x291   :  { %v15163_v24 = vadd.f32 %v4500_v35, %v4172_v36 }
 0x293   :  { %17284 = vst [vmem:[#allocation36_spill] sm:$0xff] %v15163_v24 }
 0x296   :  { %v4173_v2 = vpop.f32.mrf.mxu2  ;;  %v3518_v13 = vpop.f32.mrf.mxu0 }
 0x297   :  { %v4502_v6 = vpop.f32.mrf.mxu3  ;;  %v4174_v12 = vadd.f32 %v4173_v2, %v3845_v20  ;;  %v3847_v14 = vpop.f32.mrf.mxu1  ;;  %v11798_v20 = vld [vmem:[#allocation6 + $0x888] sm:$0xf] }
 0x298   :  { %v3848_v44 = vadd.f32 %v3847_v14, %v3518_v13 }
 0x299   :  { %v15165_v40 = vadd.f32 %v4502_v6, %v4174_v12  ;;  %3557 = vmatmul.bf16.gmra.mxu0 %v11771_v9  ;;  %v11799_v9 = vor.u32 %v14332_v49, %v11798_v20  ;;  %v14339_v49 = vld [vmem:[#allocation6 + $0x8d8] sm:$0xf0] }
 0x29a   :  { %3886 = vmatmul.bf16.gmra.mxu1 %v11775_v11  ;;  %v11803_v11 = vor.u32 %v14329_v50, %v11800_v51  ;;  %v14336_v50 = vld [vmem:[#allocation6 + $0x8c4] sm:$0xf]  ;;  %v11828_v51 = vld [vmem:[#allocation6 + $0x8dc] sm:$0xf0] }
 0x29b   :  { %17285 = vst [vmem:[#allocation37_spill] sm:$0xff] %v15165_v40  ;;  %4215 = vmatmul.bf16.gmra.mxu2 %v11779_v16  ;;  %v11807_v16 = vor.u32 %v14333_v60, %v11806_v59  ;;  %v11834_v59 = vld [vmem:[#allocation6 + $0x8c8] sm:$0xf]  ;;  %v14340_v60 = vld [vmem:[#allocation6 + $0x8e0] sm:$0xf0] }
 0x29c   :  { %4544 = vmatmul.bf16.gmra.mxu3 %v11783_v18  ;;  %v11811_v18 = vor.u32 %v14330_v63, %v11808_v0  ;;  %v14337_v63 = vld [vmem:[#allocation6 + $0x8cc] sm:$0xf]  ;;  %v11836_v0 = vld [vmem:[#allocation6 + $0x8e4] sm:$0xf0] }
 0x29e   :  { %v4176_v29 = vpop.f32.mrf.mxu2  ;;  %v3520_v39 = vpop.f32.mrf.mxu0 }
 0x29f   :  { %v4505_v35 = vpop.f32.mrf.mxu3  ;;  %v4177_v36 = vadd.f32 %v4176_v29, %v3848_v44  ;;  %v3849_v24 = vpop.f32.mrf.mxu1 }
 0x2a0   :  { %v3850_v45 = vadd.f32 %v3849_v24, %v3520_v39 }
 0x2a1   :  { %v15167_v27 = vadd.f32 %v4505_v35, %v4177_v36 }
 0x2a3   :  { %17286 = vst [vmem:[#allocation38_spill] sm:$0xff] %v15167_v27 }
 0x2a6   :  { %v4178_v2 = vpop.f32.mrf.mxu2  ;;  %v3523_v13 = vpop.f32.mrf.mxu0 }
 0x2a7   :  { %v4507_v6 = vpop.f32.mrf.mxu3  ;;  %v4179_v12 = vadd.f32 %v4178_v2, %v3850_v45  ;;  %v3852_v14 = vpop.f32.mrf.mxu1  ;;  %v11826_v45 = vld [vmem:[#allocation6 + $0x8c0] sm:$0xf] }
 0x2a8   :  { %v3853_v24 = vadd.f32 %v3852_v14, %v3523_v13 }
 0x2a9   :  { %v15169_v44 = vadd.f32 %v4507_v6, %v4179_v12  ;;  %3562 = vmatmul.bf16.gmra.mxu0 %v11799_v9  ;;  %v11827_v9 = vor.u32 %v14339_v49, %v11826_v45  ;;  %v14346_v49 = vld [vmem:[#allocation6 + $0x910] sm:$0xf0] }
 0x2aa   :  { %3891 = vmatmul.bf16.gmra.mxu1 %v11803_v11  ;;  %v11831_v11 = vor.u32 %v14336_v50, %v11828_v51  ;;  %v14343_v50 = vld [vmem:[#allocation6 + $0x8fc] sm:$0xf]  ;;  %v11856_v51 = vld [vmem:[#allocation6 + $0x914] sm:$0xf0] }
 0x2ab   :  { %17287 = vst [vmem:[#allocation39_spill] sm:$0xff] %v15169_v44  ;;  %4220 = vmatmul.bf16.gmra.mxu2 %v11807_v16  ;;  %v11835_v16 = vor.u32 %v14340_v60, %v11834_v59  ;;  %v11862_v59 = vld [vmem:[#allocation6 + $0x900] sm:$0xf]  ;;  %v14347_v60 = vld [vmem:[#allocation6 + $0x918] sm:$0xf0] }
 0x2ac   :  { %4549 = vmatmul.bf16.gmra.mxu3 %v11811_v18  ;;  %v11839_v18 = vor.u32 %v14337_v63, %v11836_v0  ;;  %v14344_v63 = vld [vmem:[#allocation6 + $0x904] sm:$0xf]  ;;  %v11864_v0 = vld [vmem:[#allocation6 + $0x91c] sm:$0xf0] }
 0x2ae   :  { %v4181_v29 = vpop.f32.mrf.mxu2  ;;  %v3525_v39 = vpop.f32.mrf.mxu0 }
 0x2af   :  { %v4510_v35 = vpop.f32.mrf.mxu3  ;;  %v4182_v36 = vadd.f32 %v4181_v29, %v3853_v24  ;;  %v3854_v27 = vpop.f32.mrf.mxu1 }
 0x2b0   :  { %v3855_v40 = vadd.f32 %v3854_v27, %v3525_v39 }
 0x2b1   :  { %v15171_v20 = vadd.f32 %v4510_v35, %v4182_v36 }
 0x2b3   :  { %17288 = vst [vmem:[#allocation40_spill] sm:$0xff] %v15171_v20 }
 0x2b6   :  { %v4183_v2 = vpop.f32.mrf.mxu2  ;;  %v3528_v13 = vpop.f32.mrf.mxu0 }
 0x2b7   :  { %v4512_v6 = vpop.f32.mrf.mxu3  ;;  %v4184_v12 = vadd.f32 %v4183_v2, %v3855_v40  ;;  %v3857_v14 = vpop.f32.mrf.mxu1  ;;  %v11854_v40 = vld [vmem:[#allocation6 + $0x8f8] sm:$0xf] }
 0x2b8   :  { %v3858_v27 = vadd.f32 %v3857_v14, %v3528_v13 }
 0x2b9   :  { %v15173_v24 = vadd.f32 %v4512_v6, %v4184_v12  ;;  %3567 = vmatmul.bf16.gmra.mxu0 %v11827_v9  ;;  %v11855_v9 = vor.u32 %v14346_v49, %v11854_v40  ;;  %v14353_v49 = vld [vmem:[#allocation6 + $0x948] sm:$0xf0] }
 0x2ba   :  { %3896 = vmatmul.bf16.gmra.mxu1 %v11831_v11  ;;  %v11859_v11 = vor.u32 %v14343_v50, %v11856_v51  ;;  %v14350_v50 = vld [vmem:[#allocation6 + $0x934] sm:$0xf]  ;;  %v11884_v51 = vld [vmem:[#allocation6 + $0x94c] sm:$0xf0] }
 0x2bb   :  { %17289 = vst [vmem:[#allocation41_spill] sm:$0xff] %v15173_v24  ;;  %4225 = vmatmul.bf16.gmra.mxu2 %v11835_v16  ;;  %v11863_v16 = vor.u32 %v14347_v60, %v11862_v59  ;;  %v11890_v59 = vld [vmem:[#allocation6 + $0x938] sm:$0xf]  ;;  %v14354_v60 = vld [vmem:[#allocation6 + $0x950] sm:$0xf0] }
 0x2bc   :  { %4554 = vmatmul.bf16.gmra.mxu3 %v11839_v18  ;;  %v11867_v18 = vor.u32 %v14344_v63, %v11864_v0  ;;  %v14351_v63 = vld [vmem:[#allocation6 + $0x93c] sm:$0xf]  ;;  %v11892_v0 = vld [vmem:[#allocation6 + $0x954] sm:$0xf0] }
 0x2be   :  { %v4186_v29 = vpop.f32.mrf.mxu2  ;;  %v3530_v39 = vpop.f32.mrf.mxu0 }
 0x2bf   :  { %v4515_v35 = vpop.f32.mrf.mxu3  ;;  %v4187_v36 = vadd.f32 %v4186_v29, %v3858_v27  ;;  %v3859_v20 = vpop.f32.mrf.mxu1 }
 0x2c0   :  { %v3860_v44 = vadd.f32 %v3859_v20, %v3530_v39 }
 0x2c1   :  { %v15175_v45 = vadd.f32 %v4515_v35, %v4187_v36 }
 0x2c3   :  { %17290 = vst [vmem:[#allocation42_spill] sm:$0xff] %v15175_v45 }
 0x2c6   :  { %v4188_v2 = vpop.f32.mrf.mxu2  ;;  %v3533_v13 = vpop.f32.mrf.mxu0 }
 0x2c7   :  { %v4517_v6 = vpop.f32.mrf.mxu3  ;;  %v4189_v12 = vadd.f32 %v4188_v2, %v3860_v44  ;;  %v3862_v14 = vpop.f32.mrf.mxu1  ;;  %v11882_v44 = vld [vmem:[#allocation6 + $0x930] sm:$0xf] }
 0x2c8   :  { %v3863_v20 = vadd.f32 %v3862_v14, %v3533_v13 }
 0x2c9   :  { %v15177_v27 = vadd.f32 %v4517_v6, %v4189_v12  ;;  %3572 = vmatmul.bf16.gmra.mxu0 %v11855_v9  ;;  %v11883_v9 = vor.u32 %v14353_v49, %v11882_v44  ;;  %v14360_v49 = vld [vmem:[#allocation6 + $0x980] sm:$0xf0] }
 0x2ca   :  { %3901 = vmatmul.bf16.gmra.mxu1 %v11859_v11  ;;  %v11887_v11 = vor.u32 %v14350_v50, %v11884_v51  ;;  %v14357_v50 = vld [vmem:[#allocation6 + $0x96c] sm:$0xf]  ;;  %v11912_v51 = vld [vmem:[#allocation6 + $0x984] sm:$0xf0] }
 0x2cb   :  { %17291 = vst [vmem:[#allocation43_spill] sm:$0xff] %v15177_v27  ;;  %4230 = vmatmul.bf16.gmra.mxu2 %v11863_v16  ;;  %v11891_v16 = vor.u32 %v14354_v60, %v11890_v59  ;;  %v11918_v59 = vld [vmem:[#allocation6 + $0x970] sm:$0xf]  ;;  %v14361_v60 = vld [vmem:[#allocation6 + $0x988] sm:$0xf0] }
 0x2cc   :  { %4559 = vmatmul.bf16.gmra.mxu3 %v11867_v18  ;;  %v11895_v18 = vor.u32 %v14351_v63, %v11892_v0  ;;  %v14358_v63 = vld [vmem:[#allocation6 + $0x974] sm:$0xf]  ;;  %v11920_v0 = vld [vmem:[#allocation6 + $0x98c] sm:$0xf0] }
 0x2ce   :  { %v4191_v29 = vpop.f32.mrf.mxu2  ;;  %v3535_v39 = vpop.f32.mrf.mxu0 }
 0x2cf   :  { %v4520_v35 = vpop.f32.mrf.mxu3  ;;  %v4192_v36 = vadd.f32 %v4191_v29, %v3863_v20  ;;  %v3864_v45 = vpop.f32.mrf.mxu1 }
 0x2d0   :  { %v3865_v24 = vadd.f32 %v3864_v45, %v3535_v39 }
 0x2d1   :  { %v15179_v40 = vadd.f32 %v4520_v35, %v4192_v36 }
 0x2d3   :  { %17292 = vst [vmem:[#allocation44_spill] sm:$0xff] %v15179_v40 }
 0x2d6   :  { %v4193_v2 = vpop.f32.mrf.mxu2  ;;  %v3538_v13 = vpop.f32.mrf.mxu0 }
 0x2d7   :  { %v4522_v6 = vpop.f32.mrf.mxu3  ;;  %v4194_v12 = vadd.f32 %v4193_v2, %v3865_v24  ;;  %v3867_v14 = vpop.f32.mrf.mxu1  ;;  %v11910_v24 = vld [vmem:[#allocation6 + $0x968] sm:$0xf] }
 0x2d8   :  { %v3868_v45 = vadd.f32 %v3867_v14, %v3538_v13 }
 0x2d9   :  { %v15181_v20 = vadd.f32 %v4522_v6, %v4194_v12  ;;  %3577 = vmatmul.bf16.gmra.mxu0 %v11883_v9  ;;  %v11911_v9 = vor.u32 %v14360_v49, %v11910_v24  ;;  %v14367_v49 = vld [vmem:[#allocation6 + $0x9b8] sm:$0xf0] }
 0x2da   :  { %3906 = vmatmul.bf16.gmra.mxu1 %v11887_v11  ;;  %v11915_v11 = vor.u32 %v14357_v50, %v11912_v51  ;;  %v14364_v50 = vld [vmem:[#allocation6 + $0x9a4] sm:$0xf]  ;;  %v11940_v51 = vld [vmem:[#allocation6 + $0x9bc] sm:$0xf0] }
 0x2db   :  { %17293 = vst [vmem:[#allocation45_spill] sm:$0xff] %v15181_v20  ;;  %4235 = vmatmul.bf16.gmra.mxu2 %v11891_v16  ;;  %v11919_v16 = vor.u32 %v14361_v60, %v11918_v59  ;;  %v11946_v59 = vld [vmem:[#allocation6 + $0x9a8] sm:$0xf]  ;;  %v14368_v60 = vld [vmem:[#allocation6 + $0x9c0] sm:$0xf0] }
 0x2dc   :  { %4564 = vmatmul.bf16.gmra.mxu3 %v11895_v18  ;;  %v11923_v18 = vor.u32 %v14358_v63, %v11920_v0  ;;  %v14365_v63 = vld [vmem:[#allocation6 + $0x9ac] sm:$0xf]  ;;  %v11948_v0 = vld [vmem:[#allocation6 + $0x9c4] sm:$0xf0] }
 0x2de   :  { %v4196_v29 = vpop.f32.mrf.mxu2  ;;  %v3540_v39 = vpop.f32.mrf.mxu0 }
 0x2df   :  { %v4525_v35 = vpop.f32.mrf.mxu3  ;;  %v4197_v36 = vadd.f32 %v4196_v29, %v3868_v45  ;;  %v3869_v40 = vpop.f32.mrf.mxu1 }
 0x2e0   :  { %v3870_v27 = vadd.f32 %v3869_v40, %v3540_v39 }
 0x2e1   :  { %v15183_v44 = vadd.f32 %v4525_v35, %v4197_v36 }
 0x2e3   :  { %17294 = vst [vmem:[#allocation46_spill] sm:$0xff] %v15183_v44 }
 0x2e6   :  { %v4198_v2 = vpop.f32.mrf.mxu2  ;;  %v3543_v13 = vpop.f32.mrf.mxu0 }
 0x2e7   :  { %v4527_v6 = vpop.f32.mrf.mxu3  ;;  %v4199_v12 = vadd.f32 %v4198_v2, %v3870_v27  ;;  %v3872_v14 = vpop.f32.mrf.mxu1  ;;  %v11938_v27 = vld [vmem:[#allocation6 + $0x9a0] sm:$0xf] }
 0x2e8   :  { %v3873_v40 = vadd.f32 %v3872_v14, %v3543_v13 }
 0x2e9   :  { %v15185_v45 = vadd.f32 %v4527_v6, %v4199_v12  ;;  %3582 = vmatmul.bf16.gmra.mxu0 %v11911_v9  ;;  %v11939_v9 = vor.u32 %v14367_v49, %v11938_v27  ;;  %v14374_v49 = vld [vmem:[#allocation6 + $0x9f0] sm:$0xf0] }
 0x2ea   :  { %3911 = vmatmul.bf16.gmra.mxu1 %v11915_v11  ;;  %v11943_v11 = vor.u32 %v14364_v50, %v11940_v51  ;;  %v14371_v50 = vld [vmem:[#allocation6 + $0x9dc] sm:$0xf]  ;;  %v11968_v51 = vld [vmem:[#allocation6 + $0x9f4] sm:$0xf0] }
 0x2eb   :  { %17295 = vst [vmem:[#allocation47_spill] sm:$0xff] %v15185_v45  ;;  %4240 = vmatmul.bf16.gmra.mxu2 %v11919_v16  ;;  %v11947_v16 = vor.u32 %v14368_v60, %v11946_v59  ;;  %v11974_v59 = vld [vmem:[#allocation6 + $0x9e0] sm:$0xf]  ;;  %v14375_v60 = vld [vmem:[#allocation6 + $0x9f8] sm:$0xf0] }
 0x2ec   :  { %4569 = vmatmul.bf16.gmra.mxu3 %v11923_v18  ;;  %v11951_v18 = vor.u32 %v14365_v63, %v11948_v0  ;;  %v14372_v63 = vld [vmem:[#allocation6 + $0x9e4] sm:$0xf]  ;;  %v11976_v0 = vld [vmem:[#allocation6 + $0x9fc] sm:$0xf0] }
 0x2ee   :  { %v4201_v29 = vpop.f32.mrf.mxu2  ;;  %v3545_v39 = vpop.f32.mrf.mxu0 }
 0x2ef   :  { %v4530_v35 = vpop.f32.mrf.mxu3  ;;  %v4202_v36 = vadd.f32 %v4201_v29, %v3873_v40  ;;  %v3874_v44 = vpop.f32.mrf.mxu1 }
 0x2f0   :  { %v3875_v20 = vadd.f32 %v3874_v44, %v3545_v39 }
 0x2f1   :  { %v15187_v24 = vadd.f32 %v4530_v35, %v4202_v36 }
 0x2f3   :  { %17296 = vst [vmem:[#allocation48_spill] sm:$0xff] %v15187_v24 }
 0x2f6   :  { %v4203_v2 = vpop.f32.mrf.mxu2  ;;  %v3548_v13 = vpop.f32.mrf.mxu0 }
 0x2f7   :  { %v4532_v6 = vpop.f32.mrf.mxu3  ;;  %v4204_v12 = vadd.f32 %v4203_v2, %v3875_v20  ;;  %v3877_v14 = vpop.f32.mrf.mxu1  ;;  %v11966_v20 = vld [vmem:[#allocation6 + $0x9d8] sm:$0xf] }
 0x2f8   :  { %v3878_v44 = vadd.f32 %v3877_v14, %v3548_v13 }
 0x2f9   :  { %v15189_v40 = vadd.f32 %v4532_v6, %v4204_v12  ;;  %3587 = vmatmul.bf16.gmra.mxu0 %v11939_v9  ;;  %v11967_v9 = vor.u32 %v14374_v49, %v11966_v20  ;;  %v14381_v49 = vld [vmem:[#allocation6 + $0xa28] sm:$0xf0] }
 0x2fa   :  { %3916 = vmatmul.bf16.gmra.mxu1 %v11943_v11  ;;  %v11971_v11 = vor.u32 %v14371_v50, %v11968_v51  ;;  %v14378_v50 = vld [vmem:[#allocation6 + $0xa14] sm:$0xf]  ;;  %v11996_v51 = vld [vmem:[#allocation6 + $0xa2c] sm:$0xf0] }
 0x2fb   :  { %17297 = vst [vmem:[#allocation49_spill] sm:$0xff] %v15189_v40  ;;  %4245 = vmatmul.bf16.gmra.mxu2 %v11947_v16  ;;  %v11975_v16 = vor.u32 %v14375_v60, %v11974_v59  ;;  %v12002_v59 = vld [vmem:[#allocation6 + $0xa18] sm:$0xf]  ;;  %v14382_v60 = vld [vmem:[#allocation6 + $0xa30] sm:$0xf0] }
 0x2fc   :  { %4574 = vmatmul.bf16.gmra.mxu3 %v11951_v18  ;;  %v11979_v18 = vor.u32 %v14372_v63, %v11976_v0  ;;  %v14379_v63 = vld [vmem:[#allocation6 + $0xa1c] sm:$0xf]  ;;  %v12004_v0 = vld [vmem:[#allocation6 + $0xa34] sm:$0xf0] }
 0x2fe   :  { %v4206_v29 = vpop.f32.mrf.mxu2  ;;  %v3550_v39 = vpop.f32.mrf.mxu0 }
 0x2ff   :  { %v4535_v35 = vpop.f32.mrf.mxu3  ;;  %v4207_v36 = vadd.f32 %v4206_v29, %v3878_v44  ;;  %v3879_v24 = vpop.f32.mrf.mxu1 }
 0x300   :  { %v3880_v45 = vadd.f32 %v3879_v24, %v3550_v39 }
 0x301   :  { %v15191_v27 = vadd.f32 %v4535_v35, %v4207_v36 }
 0x303   :  { %17298 = vst [vmem:[#allocation50_spill] sm:$0xff] %v15191_v27 }
 0x306   :  { %v4208_v2 = vpop.f32.mrf.mxu2  ;;  %v3553_v13 = vpop.f32.mrf.mxu0 }
 0x307   :  { %v4537_v6 = vpop.f32.mrf.mxu3  ;;  %v4209_v12 = vadd.f32 %v4208_v2, %v3880_v45  ;;  %v3882_v14 = vpop.f32.mrf.mxu1  ;;  %v11994_v45 = vld [vmem:[#allocation6 + $0xa10] sm:$0xf] }
 0x308   :  { %v3883_v24 = vadd.f32 %v3882_v14, %v3553_v13 }
 0x309   :  { %v15193_v44 = vadd.f32 %v4537_v6, %v4209_v12  ;;  %3592 = vmatmul.bf16.gmra.mxu0 %v11967_v9  ;;  %v11995_v9 = vor.u32 %v14381_v49, %v11994_v45  ;;  %v14388_v49 = vld [vmem:[#allocation6 + $0xa60] sm:$0xf0] }
 0x30a   :  { %3921 = vmatmul.bf16.gmra.mxu1 %v11971_v11  ;;  %v11999_v11 = vor.u32 %v14378_v50, %v11996_v51  ;;  %v14385_v50 = vld [vmem:[#allocation6 + $0xa4c] sm:$0xf]  ;;  %v12024_v51 = vld [vmem:[#allocation6 + $0xa64] sm:$0xf0] }
 0x30b   :  { %17299 = vst [vmem:[#allocation51_spill] sm:$0xff] %v15193_v44  ;;  %4250 = vmatmul.bf16.gmra.mxu2 %v11975_v16  ;;  %v12003_v16 = vor.u32 %v14382_v60, %v12002_v59  ;;  %v12030_v59 = vld [vmem:[#allocation6 + $0xa50] sm:$0xf]  ;;  %v14389_v60 = vld [vmem:[#allocation6 + $0xa68] sm:$0xf0] }
 0x30c   :  { %4579 = vmatmul.bf16.gmra.mxu3 %v11979_v18  ;;  %v12007_v18 = vor.u32 %v14379_v63, %v12004_v0  ;;  %v14386_v63 = vld [vmem:[#allocation6 + $0xa54] sm:$0xf]  ;;  %v12032_v0 = vld [vmem:[#allocation6 + $0xa6c] sm:$0xf0] }
 0x30e   :  { %v4211_v29 = vpop.f32.mrf.mxu2  ;;  %v3555_v39 = vpop.f32.mrf.mxu0 }
 0x30f   :  { %v4540_v35 = vpop.f32.mrf.mxu3  ;;  %v4212_v36 = vadd.f32 %v4211_v29, %v3883_v24  ;;  %v3884_v27 = vpop.f32.mrf.mxu1 }
 0x310   :  { %v3885_v40 = vadd.f32 %v3884_v27, %v3555_v39 }
 0x311   :  { %v15195_v20 = vadd.f32 %v4540_v35, %v4212_v36 }
 0x313   :  { %17300 = vst [vmem:[#allocation52_spill] sm:$0xff] %v15195_v20 }
 0x316   :  { %v4213_v2 = vpop.f32.mrf.mxu2  ;;  %v3558_v13 = vpop.f32.mrf.mxu0 }
 0x317   :  { %v4542_v6 = vpop.f32.mrf.mxu3  ;;  %v4214_v12 = vadd.f32 %v4213_v2, %v3885_v40  ;;  %v3887_v14 = vpop.f32.mrf.mxu1  ;;  %v12022_v40 = vld [vmem:[#allocation6 + $0xa48] sm:$0xf] }
 0x318   :  { %v3888_v27 = vadd.f32 %v3887_v14, %v3558_v13 }
 0x319   :  { %v15197_v24 = vadd.f32 %v4542_v6, %v4214_v12  ;;  %3597 = vmatmul.bf16.gmra.mxu0 %v11995_v9  ;;  %v12023_v9 = vor.u32 %v14388_v49, %v12022_v40  ;;  %v14395_v49 = vld [vmem:[#allocation6 + $0xa98] sm:$0xf0] }
 0x31a   :  { %3926 = vmatmul.bf16.gmra.mxu1 %v11999_v11  ;;  %v12027_v11 = vor.u32 %v14385_v50, %v12024_v51  ;;  %v14392_v50 = vld [vmem:[#allocation6 + $0xa84] sm:$0xf]  ;;  %v12052_v51 = vld [vmem:[#allocation6 + $0xa9c] sm:$0xf0] }
 0x31b   :  { %17301 = vst [vmem:[#allocation53_spill] sm:$0xff] %v15197_v24  ;;  %4255 = vmatmul.bf16.gmra.mxu2 %v12003_v16  ;;  %v12031_v16 = vor.u32 %v14389_v60, %v12030_v59  ;;  %v12058_v59 = vld [vmem:[#allocation6 + $0xa88] sm:$0xf]  ;;  %v14396_v60 = vld [vmem:[#allocation6 + $0xaa0] sm:$0xf0] }
 0x31c   :  { %4584 = vmatmul.bf16.gmra.mxu3 %v12007_v18  ;;  %v12035_v18 = vor.u32 %v14386_v63, %v12032_v0  ;;  %v14393_v63 = vld [vmem:[#allocation6 + $0xa8c] sm:$0xf]  ;;  %v12060_v0 = vld [vmem:[#allocation6 + $0xaa4] sm:$0xf0] }
 0x31e   :  { %v4216_v29 = vpop.f32.mrf.mxu2  ;;  %v3560_v39 = vpop.f32.mrf.mxu0 }
 0x31f   :  { %v4545_v35 = vpop.f32.mrf.mxu3  ;;  %v4217_v36 = vadd.f32 %v4216_v29, %v3888_v27  ;;  %v3889_v20 = vpop.f32.mrf.mxu1 }
 0x320   :  { %v3890_v44 = vadd.f32 %v3889_v20, %v3560_v39 }
 0x321   :  { %v15199_v45 = vadd.f32 %v4545_v35, %v4217_v36 }
 0x323   :  { %17302 = vst [vmem:[#allocation54_spill] sm:$0xff] %v15199_v45 }
 0x326   :  { %v4218_v2 = vpop.f32.mrf.mxu2  ;;  %v3563_v13 = vpop.f32.mrf.mxu0 }
 0x327   :  { %v4547_v6 = vpop.f32.mrf.mxu3  ;;  %v4219_v12 = vadd.f32 %v4218_v2, %v3890_v44  ;;  %v3892_v14 = vpop.f32.mrf.mxu1  ;;  %v12050_v44 = vld [vmem:[#allocation6 + $0xa80] sm:$0xf] }
 0x328   :  { %v3893_v20 = vadd.f32 %v3892_v14, %v3563_v13 }
 0x329   :  { %v15201_v27 = vadd.f32 %v4547_v6, %v4219_v12  ;;  %3602 = vmatmul.bf16.gmra.mxu0 %v12023_v9  ;;  %v12051_v9 = vor.u32 %v14395_v49, %v12050_v44  ;;  %v14402_v49 = vld [vmem:[#allocation6 + $0xad0] sm:$0xf0] }
 0x32a   :  { %3931 = vmatmul.bf16.gmra.mxu1 %v12027_v11  ;;  %v12055_v11 = vor.u32 %v14392_v50, %v12052_v51  ;;  %v14399_v50 = vld [vmem:[#allocation6 + $0xabc] sm:$0xf]  ;;  %v12080_v51 = vld [vmem:[#allocation6 + $0xad4] sm:$0xf0] }
 0x32b   :  { %17303 = vst [vmem:[#allocation55_spill] sm:$0xff] %v15201_v27  ;;  %4260 = vmatmul.bf16.gmra.mxu2 %v12031_v16  ;;  %v12059_v16 = vor.u32 %v14396_v60, %v12058_v59  ;;  %v12086_v59 = vld [vmem:[#allocation6 + $0xac0] sm:$0xf]  ;;  %v14403_v60 = vld [vmem:[#allocation6 + $0xad8] sm:$0xf0] }
 0x32c   :  { %4589 = vmatmul.bf16.gmra.mxu3 %v12035_v18  ;;  %v12063_v18 = vor.u32 %v14393_v63, %v12060_v0  ;;  %v14400_v63 = vld [vmem:[#allocation6 + $0xac4] sm:$0xf]  ;;  %v12088_v0 = vld [vmem:[#allocation6 + $0xadc] sm:$0xf0] }
 0x32e   :  { %v4221_v29 = vpop.f32.mrf.mxu2  ;;  %v3565_v39 = vpop.f32.mrf.mxu0 }
 0x32f   :  { %v4550_v35 = vpop.f32.mrf.mxu3  ;;  %v4222_v36 = vadd.f32 %v4221_v29, %v3893_v20  ;;  %v3894_v45 = vpop.f32.mrf.mxu1 }
 0x330   :  { %v3895_v24 = vadd.f32 %v3894_v45, %v3565_v39 }
 0x331   :  { %v15203_v40 = vadd.f32 %v4550_v35, %v4222_v36 }
 0x333   :  { %17304 = vst [vmem:[#allocation56_spill] sm:$0xff] %v15203_v40 }
 0x336   :  { %v4223_v2 = vpop.f32.mrf.mxu2  ;;  %v3568_v13 = vpop.f32.mrf.mxu0 }
 0x337   :  { %v4552_v6 = vpop.f32.mrf.mxu3  ;;  %v4224_v12 = vadd.f32 %v4223_v2, %v3895_v24  ;;  %v3897_v14 = vpop.f32.mrf.mxu1  ;;  %v12078_v24 = vld [vmem:[#allocation6 + $0xab8] sm:$0xf] }
 0x338   :  { %v3898_v45 = vadd.f32 %v3897_v14, %v3568_v13 }
 0x339   :  { %v15205_v20 = vadd.f32 %v4552_v6, %v4224_v12  ;;  %3607 = vmatmul.bf16.gmra.mxu0 %v12051_v9  ;;  %v12079_v9 = vor.u32 %v14402_v49, %v12078_v24  ;;  %v14409_v49 = vld [vmem:[#allocation6 + $0xb08] sm:$0xf0] }
 0x33a   :  { %3936 = vmatmul.bf16.gmra.mxu1 %v12055_v11  ;;  %v12083_v11 = vor.u32 %v14399_v50, %v12080_v51  ;;  %v14406_v50 = vld [vmem:[#allocation6 + $0xaf4] sm:$0xf]  ;;  %v12108_v51 = vld [vmem:[#allocation6 + $0xb0c] sm:$0xf0] }
 0x33b   :  { %17305 = vst [vmem:[#allocation57_spill] sm:$0xff] %v15205_v20  ;;  %4265 = vmatmul.bf16.gmra.mxu2 %v12059_v16  ;;  %v12087_v16 = vor.u32 %v14403_v60, %v12086_v59  ;;  %v12114_v59 = vld [vmem:[#allocation6 + $0xaf8] sm:$0xf]  ;;  %v14410_v60 = vld [vmem:[#allocation6 + $0xb10] sm:$0xf0] }
 0x33c   :  { %4594 = vmatmul.bf16.gmra.mxu3 %v12063_v18  ;;  %v12091_v18 = vor.u32 %v14400_v63, %v12088_v0  ;;  %v14407_v63 = vld [vmem:[#allocation6 + $0xafc] sm:$0xf]  ;;  %v12116_v0 = vld [vmem:[#allocation6 + $0xb14] sm:$0xf0] }
 0x33e   :  { %v4226_v29 = vpop.f32.mrf.mxu2  ;;  %v3570_v39 = vpop.f32.mrf.mxu0 }
 0x33f   :  { %v4555_v35 = vpop.f32.mrf.mxu3  ;;  %v4227_v36 = vadd.f32 %v4226_v29, %v3898_v45  ;;  %v3899_v40 = vpop.f32.mrf.mxu1 }
 0x340   :  { %v3900_v27 = vadd.f32 %v3899_v40, %v3570_v39 }
 0x341   :  { %v15207_v44 = vadd.f32 %v4555_v35, %v4227_v36 }
 0x343   :  { %17306 = vst [vmem:[#allocation58_spill] sm:$0xff] %v15207_v44 }
 0x346   :  { %v4228_v2 = vpop.f32.mrf.mxu2  ;;  %v3573_v13 = vpop.f32.mrf.mxu0 }
 0x347   :  { %v4557_v6 = vpop.f32.mrf.mxu3  ;;  %v4229_v12 = vadd.f32 %v4228_v2, %v3900_v27  ;;  %v3902_v14 = vpop.f32.mrf.mxu1  ;;  %v12106_v27 = vld [vmem:[#allocation6 + $0xaf0] sm:$0xf] }
 0x348   :  { %v3903_v40 = vadd.f32 %v3902_v14, %v3573_v13 }
 0x349   :  { %v15209_v45 = vadd.f32 %v4557_v6, %v4229_v12  ;;  %3612 = vmatmul.bf16.gmra.mxu0 %v12079_v9  ;;  %v12107_v9 = vor.u32 %v14409_v49, %v12106_v27  ;;  %v14416_v49 = vld [vmem:[#allocation6 + $0xb40] sm:$0xf0] }
 0x34a   :  { %3941 = vmatmul.bf16.gmra.mxu1 %v12083_v11  ;;  %v12111_v11 = vor.u32 %v14406_v50, %v12108_v51  ;;  %v14413_v50 = vld [vmem:[#allocation6 + $0xb2c] sm:$0xf]  ;;  %v12136_v51 = vld [vmem:[#allocation6 + $0xb44] sm:$0xf0] }
 0x34b   :  { %17307 = vst [vmem:[#allocation59_spill] sm:$0xff] %v15209_v45  ;;  %4270 = vmatmul.bf16.gmra.mxu2 %v12087_v16  ;;  %v12115_v16 = vor.u32 %v14410_v60, %v12114_v59  ;;  %v12142_v59 = vld [vmem:[#allocation6 + $0xb30] sm:$0xf]  ;;  %v14417_v60 = vld [vmem:[#allocation6 + $0xb48] sm:$0xf0] }
 0x34c   :  { %4599 = vmatmul.bf16.gmra.mxu3 %v12091_v18  ;;  %v12119_v18 = vor.u32 %v14407_v63, %v12116_v0  ;;  %v14414_v63 = vld [vmem:[#allocation6 + $0xb34] sm:$0xf]  ;;  %v12144_v0 = vld [vmem:[#allocation6 + $0xb4c] sm:$0xf0] }
 0x34e   :  { %v4231_v29 = vpop.f32.mrf.mxu2  ;;  %v3575_v39 = vpop.f32.mrf.mxu0 }
 0x34f   :  { %v4560_v35 = vpop.f32.mrf.mxu3  ;;  %v4232_v36 = vadd.f32 %v4231_v29, %v3903_v40  ;;  %v3904_v44 = vpop.f32.mrf.mxu1 }
 0x350   :  { %v3905_v20 = vadd.f32 %v3904_v44, %v3575_v39 }
 0x351   :  { %v15211_v24 = vadd.f32 %v4560_v35, %v4232_v36 }
 0x353   :  { %17308 = vst [vmem:[#allocation60_spill] sm:$0xff] %v15211_v24 }
 0x356   :  { %v4233_v2 = vpop.f32.mrf.mxu2  ;;  %v3578_v13 = vpop.f32.mrf.mxu0 }
 0x357   :  { %v4562_v6 = vpop.f32.mrf.mxu3  ;;  %v4234_v12 = vadd.f32 %v4233_v2, %v3905_v20  ;;  %v3907_v14 = vpop.f32.mrf.mxu1  ;;  %v12134_v20 = vld [vmem:[#allocation6 + $0xb28] sm:$0xf] }
 0x358   :  { %v3908_v44 = vadd.f32 %v3907_v14, %v3578_v13 }
 0x359   :  { %v15213_v40 = vadd.f32 %v4562_v6, %v4234_v12  ;;  %3617 = vmatmul.bf16.gmra.mxu0 %v12107_v9  ;;  %v12135_v9 = vor.u32 %v14416_v49, %v12134_v20  ;;  %v14423_v49 = vld [vmem:[#allocation6 + $0xb78] sm:$0xf0] }
 0x35a   :  { %3946 = vmatmul.bf16.gmra.mxu1 %v12111_v11  ;;  %v12139_v11 = vor.u32 %v14413_v50, %v12136_v51  ;;  %v14420_v50 = vld [vmem:[#allocation6 + $0xb64] sm:$0xf]  ;;  %v12164_v51 = vld [vmem:[#allocation6 + $0xb7c] sm:$0xf0] }
 0x35b   :  { %17309 = vst [vmem:[#allocation61_spill] sm:$0xff] %v15213_v40  ;;  %4275 = vmatmul.bf16.gmra.mxu2 %v12115_v16  ;;  %v12143_v16 = vor.u32 %v14417_v60, %v12142_v59  ;;  %v12170_v59 = vld [vmem:[#allocation6 + $0xb68] sm:$0xf]  ;;  %v14424_v60 = vld [vmem:[#allocation6 + $0xb80] sm:$0xf0] }
 0x35c   :  { %4604 = vmatmul.bf16.gmra.mxu3 %v12119_v18  ;;  %v12147_v18 = vor.u32 %v14414_v63, %v12144_v0  ;;  %v14421_v63 = vld [vmem:[#allocation6 + $0xb6c] sm:$0xf]  ;;  %v12172_v0 = vld [vmem:[#allocation6 + $0xb84] sm:$0xf0] }
 0x35e   :  { %v4236_v29 = vpop.f32.mrf.mxu2  ;;  %v3580_v39 = vpop.f32.mrf.mxu0 }
 0x35f   :  { %v4565_v35 = vpop.f32.mrf.mxu3  ;;  %v4237_v36 = vadd.f32 %v4236_v29, %v3908_v44  ;;  %v3909_v24 = vpop.f32.mrf.mxu1 }
 0x360   :  { %v3910_v45 = vadd.f32 %v3909_v24, %v3580_v39 }
 0x361   :  { %v15215_v27 = vadd.f32 %v4565_v35, %v4237_v36 }
 0x363   :  { %17310 = vst [vmem:[#allocation62_spill] sm:$0xff] %v15215_v27 }
 0x366   :  { %v4238_v2 = vpop.f32.mrf.mxu2  ;;  %v3583_v13 = vpop.f32.mrf.mxu0 }
 0x367   :  { %v4567_v6 = vpop.f32.mrf.mxu3  ;;  %v4239_v12 = vadd.f32 %v4238_v2, %v3910_v45  ;;  %v3912_v14 = vpop.f32.mrf.mxu1  ;;  %v12162_v45 = vld [vmem:[#allocation6 + $0xb60] sm:$0xf] }
 0x368   :  { %v3913_v24 = vadd.f32 %v3912_v14, %v3583_v13 }
 0x369   :  { %v15217_v44 = vadd.f32 %v4567_v6, %v4239_v12  ;;  %3622 = vmatmul.bf16.gmra.mxu0 %v12135_v9  ;;  %v12163_v9 = vor.u32 %v14423_v49, %v12162_v45  ;;  %v14047_v49 = vld [vmem:[#allocation3 + $0x178] sm:$0xff] }
 0x36a   :  { %3951 = vmatmul.bf16.gmra.mxu1 %v12139_v11  ;;  %v12167_v11 = vor.u32 %v14420_v50, %v12164_v51  ;;  %v12190_v50 = vld [vmem:[#allocation6 + $0xb98] sm:$0xf]  ;;  %v14430_v51 = vld [vmem:[#allocation6 + $0xbb0] sm:$0xf0] }
 0x36b   :  { %17311 = vst [vmem:[#allocation63_spill] sm:$0xff] %v15217_v44  ;;  %4280 = vmatmul.bf16.gmra.mxu2 %v12143_v16  ;;  %v12171_v16 = vor.u32 %v14424_v60, %v12170_v59  ;;  %v14427_v59 = vld [vmem:[#allocation6 + $0xb9c] sm:$0xf]  ;;  %v12192_v60 = vld [vmem:[#allocation6 + $0xbb4] sm:$0xf0]  ;;  %5004 = vmatpush.bf16.msrb.mxu1 %v14047_v49 }
 0x36c   :  { %4609 = vmatmul.bf16.gmra.mxu3 %v12147_v18  ;;  %v12175_v18 = vor.u32 %v14421_v63, %v12172_v0  ;;  %v12198_v63 = vld [vmem:[#allocation6 + $0xba0] sm:$0xf]  ;;  %v14431_v0 = vld [vmem:[#allocation6 + $0xbb8] sm:$0xf0] }
 0x36e   :  { %v4241_v29 = vpop.f32.mrf.mxu2  ;;  %v3585_v39 = vpop.f32.mrf.mxu0 }
 0x36f   :  { %v4570_v35 = vpop.f32.mrf.mxu3  ;;  %v4242_v36 = vadd.f32 %v4241_v29, %v3913_v24  ;;  %v3914_v27 = vpop.f32.mrf.mxu1 }
 0x370   :  { %v3915_v40 = vadd.f32 %v3914_v27, %v3585_v39 }
 0x371   :  { %v15219_v20 = vadd.f32 %v4570_v35, %v4242_v36 }
 0x373   :  { %17312 = vst [vmem:[#allocation64_spill] sm:$0xff] %v15219_v20 }
 0x376   :  { %v4243_v2 = vpop.f32.mrf.mxu2  ;;  %v3588_v13 = vpop.f32.mrf.mxu0 }
 0x377   :  { %v4572_v6 = vpop.f32.mrf.mxu3  ;;  %v4244_v12 = vadd.f32 %v4243_v2, %v3915_v40  ;;  %v3917_v14 = vpop.f32.mrf.mxu1  ;;  %v14039_v40 = vld [vmem:[#allocation3 + $0x138] sm:$0xff]  ;;  %v14428_v2 = vld [vmem:[#allocation6 + $0xba4] sm:$0xf] }
 0x378   :  { %v3918_v27 = vadd.f32 %v3917_v14, %v3588_v13  ;;  %4675 = vmatpush.bf16.msrb.mxu0 %v14039_v40  ;;  %v12195_v13 = vor.u32 %v14427_v59, %v12192_v60  ;;  %v14434_v59 = vld [vmem:[#allocation6 + $0xbd4] sm:$0xf]  ;;  %v12220_v60 = vld [vmem:[#allocation6 + $0xbec] sm:$0xf0] }
 0x379   :  { %v15221_v24 = vadd.f32 %v4572_v6, %v4244_v12  ;;  %3627 = vmatmul.bf16.gmra.mxu0 %v12163_v9  ;;  %v12200_v6 = vld [vmem:[#allocation6 + $0xbbc] sm:$0xf0]  ;;  %v12191_v12 = vor.u32 %v14430_v51, %v12190_v50  ;;  %v14437_v51 = vld [vmem:[#allocation6 + $0xbe8] sm:$0xf0] }
 0x37a   :  { %3956 = vmatmul.bf16.gmra.mxu1 %v12167_v11 }
 0x37b   :  { %17313 = vst [vmem:[#allocation65_spill] sm:$0xff] %v15221_v24  ;;  %4285 = vmatmul.bf16.gmra.mxu2 %v12171_v16 }
 0x37c   :  { %4614 = vmatmul.bf16.gmra.mxu3 %v12175_v18  ;;  %v12199_v18 = vor.u32 %v14431_v0, %v12198_v63  ;;  %v12226_v63 = vld [vmem:[#allocation6 + $0xbd8] sm:$0xf]  ;;  %v14438_v0 = vld [vmem:[#allocation6 + $0xbf0] sm:$0xf0] }
 0x37e   :  { %v4246_v29 = vpop.f32.mrf.mxu2  ;;  %v3590_v39 = vpop.f32.mrf.mxu0 }
 0x37f   :  { %v4575_v35 = vpop.f32.mrf.mxu3  ;;  %v4247_v36 = vadd.f32 %v4246_v29, %v3918_v27  ;;  %v3919_v20 = vpop.f32.mrf.mxu1  ;;  %v12203_v27 = vor.u32 %v14428_v2, %v12200_v6  ;;  %v14435_v2 = vld [vmem:[#allocation6 + $0xbdc] sm:$0xf]  ;;  %v12228_v6 = vld [vmem:[#allocation6 + $0xbf4] sm:$0xf0] }
 0x380   :  { %v3920_v44 = vadd.f32 %v3919_v20, %v3590_v39 }
 0x381   :  { %v15223_v45 = vadd.f32 %v4575_v35, %v4247_v36 }
 0x383   :  { %17314 = vst [vmem:[#allocation66_spill] sm:$0xff] %v15223_v45 }
 0x386   :  { %v4248_v9 = vpop.f32.mrf.mxu2  ;;  %v3593_v20 = vpop.f32.mrf.mxu0 }
 0x387   :  { %v4577_v11 = vpop.f32.mrf.mxu3  ;;  %v4249_v14 = vadd.f32 %v4248_v9, %v3920_v44  ;;  %v3922_v16 = vpop.f32.mrf.mxu1  ;;  %v12218_v44 = vld [vmem:[#allocation6 + $0xbd0] sm:$0xf] }
 0x388   :  { %v3923_v29 = vadd.f32 %v3922_v16, %v3593_v20 }
 0x389   :  { %v15225_v35 = vadd.f32 %v4577_v11, %v4249_v14  ;;  %3632 = vmatmul.bf16.gmra.mxu0 %v12191_v12  ;;  %v12219_v12 = vor.u32 %v14437_v51, %v12218_v44  ;;  %v14444_v51 = vld [vmem:[#allocation6 + $0xc20] sm:$0xf0] }
 0x38a   :  { %3961 = vmatmul.bf16.gmra.mxu1 %v12195_v13  ;;  %v12223_v13 = vor.u32 %v14434_v59, %v12220_v60  ;;  %v14441_v59 = vld [vmem:[#allocation6 + $0xc0c] sm:$0xf]  ;;  %v12248_v60 = vld [vmem:[#allocation6 + $0xc24] sm:$0xf0] }
 0x38b   :  { %17315 = vst [vmem:[#allocation67_spill] sm:$0xff] %v15225_v35  ;;  %4290 = vmatmul.bf16.gmra.mxu2 %v12199_v18  ;;  %v12227_v18 = vor.u32 %v14438_v0, %v12226_v63  ;;  %v12254_v63 = vld [vmem:[#allocation6 + $0xc10] sm:$0xf]  ;;  %v14445_v0 = vld [vmem:[#allocation6 + $0xc28] sm:$0xf0] }
 0x38c   :  { %4619 = vmatmul.bf16.gmra.mxu3 %v12203_v27  ;;  %v12231_v27 = vor.u32 %v14435_v2, %v12228_v6  ;;  %v14442_v2 = vld [vmem:[#allocation6 + $0xc14] sm:$0xf]  ;;  %v12256_v6 = vld [vmem:[#allocation6 + $0xc2c] sm:$0xf0] }
 0x38e   :  { %v4251_v36 = vpop.f32.mrf.mxu2  ;;  %v3595_v49 = vpop.f32.mrf.mxu0 }
 0x38f   :  { %v4580_v39 = vpop.f32.mrf.mxu3  ;;  %v4252_v40 = vadd.f32 %v4251_v36, %v3923_v29  ;;  %v3924_v45 = vpop.f32.mrf.mxu1 }
 0x390   :  { %v3925_v24 = vadd.f32 %v3924_v45, %v3595_v49 }
 0x391   :  { %v15227_v50 = vadd.f32 %v4580_v39, %v4252_v40 }
 0x393   :  { %17316 = vst [vmem:[#allocation68_spill] sm:$0xff] %v15227_v50 }
 0x396   :  { %v4253_v9 = vpop.f32.mrf.mxu2  ;;  %v3598_v20 = vpop.f32.mrf.mxu0 }
 0x397   :  { %v4582_v11 = vpop.f32.mrf.mxu3  ;;  %v4254_v14 = vadd.f32 %v4253_v9, %v3925_v24  ;;  %v3927_v16 = vpop.f32.mrf.mxu1  ;;  %v12246_v24 = vld [vmem:[#allocation6 + $0xc08] sm:$0xf] }
 0x398   :  { %v3928_v45 = vadd.f32 %v3927_v16, %v3598_v20 }
 0x399   :  { %v15229_v29 = vadd.f32 %v4582_v11, %v4254_v14  ;;  %3637 = vmatmul.bf16.gmra.mxu0 %v12219_v12  ;;  %v12247_v12 = vor.u32 %v14444_v51, %v12246_v24  ;;  %v14451_v51 = vld [vmem:[#allocation6 + $0xc58] sm:$0xf0] }
 0x39a   :  { %3966 = vmatmul.bf16.gmra.mxu1 %v12223_v13  ;;  %v12251_v13 = vor.u32 %v14441_v59, %v12248_v60  ;;  %v14448_v59 = vld [vmem:[#allocation6 + $0xc44] sm:$0xf]  ;;  %v12276_v60 = vld [vmem:[#allocation6 + $0xc5c] sm:$0xf0] }
 0x39b   :  { %17317 = vst [vmem:[#allocation69_spill] sm:$0xff] %v15229_v29  ;;  %4295 = vmatmul.bf16.gmra.mxu2 %v12227_v18  ;;  %v12255_v18 = vor.u32 %v14445_v0, %v12254_v63  ;;  %v12282_v63 = vld [vmem:[#allocation6 + $0xc48] sm:$0xf]  ;;  %v14452_v0 = vld [vmem:[#allocation6 + $0xc60] sm:$0xf0] }
 0x39c   :  { %4624 = vmatmul.bf16.gmra.mxu3 %v12231_v27  ;;  %v12259_v27 = vor.u32 %v14442_v2, %v12256_v6  ;;  %v14449_v2 = vld [vmem:[#allocation6 + $0xc4c] sm:$0xf]  ;;  %v12284_v6 = vld [vmem:[#allocation6 + $0xc64] sm:$0xf0] }
 0x39e   :  { %v4256_v36 = vpop.f32.mrf.mxu2  ;;  %v3600_v49 = vpop.f32.mrf.mxu0 }
 0x39f   :  { %v4585_v39 = vpop.f32.mrf.mxu3  ;;  %v4257_v40 = vadd.f32 %v4256_v36, %v3928_v45  ;;  %v3929_v50 = vpop.f32.mrf.mxu1 }
 0x3a0   :  { %v3930_v35 = vadd.f32 %v3929_v50, %v3600_v49 }
 0x3a1   :  { %v15231_v44 = vadd.f32 %v4585_v39, %v4257_v40 }
 0x3a3   :  { %17318 = vst [vmem:[#allocation70_spill] sm:$0xff] %v15231_v44 }
 0x3a6   :  { %v4258_v9 = vpop.f32.mrf.mxu2  ;;  %v3603_v20 = vpop.f32.mrf.mxu0 }
 0x3a7   :  { %v4587_v11 = vpop.f32.mrf.mxu3  ;;  %v4259_v14 = vadd.f32 %v4258_v9, %v3930_v35  ;;  %v3932_v16 = vpop.f32.mrf.mxu1  ;;  %v12274_v35 = vld [vmem:[#allocation6 + $0xc40] sm:$0xf] }
 0x3a8   :  { %v3933_v50 = vadd.f32 %v3932_v16, %v3603_v20 }
 0x3a9   :  { %v15233_v45 = vadd.f32 %v4587_v11, %v4259_v14  ;;  %3642 = vmatmul.bf16.gmra.mxu0 %v12247_v12  ;;  %v12275_v12 = vor.u32 %v14451_v51, %v12274_v35  ;;  %v14458_v51 = vld [vmem:[#allocation6 + $0xc90] sm:$0xf0] }
 0x3aa   :  { %3971 = vmatmul.bf16.gmra.mxu1 %v12251_v13  ;;  %v12279_v13 = vor.u32 %v14448_v59, %v12276_v60  ;;  %v14455_v59 = vld [vmem:[#allocation6 + $0xc7c] sm:$0xf]  ;;  %v12304_v60 = vld [vmem:[#allocation6 + $0xc94] sm:$0xf0] }
 0x3ab   :  { %17319 = vst [vmem:[#allocation71_spill] sm:$0xff] %v15233_v45  ;;  %4300 = vmatmul.bf16.gmra.mxu2 %v12255_v18  ;;  %v12283_v18 = vor.u32 %v14452_v0, %v12282_v63  ;;  %v12310_v63 = vld [vmem:[#allocation6 + $0xc80] sm:$0xf]  ;;  %v14459_v0 = vld [vmem:[#allocation6 + $0xc98] sm:$0xf0] }
 0x3ac   :  { %4629 = vmatmul.bf16.gmra.mxu3 %v12259_v27  ;;  %v12287_v27 = vor.u32 %v14449_v2, %v12284_v6  ;;  %v14456_v2 = vld [vmem:[#allocation6 + $0xc84] sm:$0xf]  ;;  %v12312_v6 = vld [vmem:[#allocation6 + $0xc9c] sm:$0xf0] }
 0x3ae   :  { %v4261_v36 = vpop.f32.mrf.mxu2  ;;  %v3605_v49 = vpop.f32.mrf.mxu0 }
 0x3af   :  { %v4590_v39 = vpop.f32.mrf.mxu3  ;;  %v4262_v40 = vadd.f32 %v4261_v36, %v3933_v50  ;;  %v3934_v44 = vpop.f32.mrf.mxu1 }
 0x3b0   :  { %v3935_v29 = vadd.f32 %v3934_v44, %v3605_v49 }
 0x3b1   :  { %v15235_v24 = vadd.f32 %v4590_v39, %v4262_v40 }
 0x3b3   :  { %17320 = vst [vmem:[#allocation72_spill] sm:$0xff] %v15235_v24 }
 0x3b6   :  { %v4263_v9 = vpop.f32.mrf.mxu2  ;;  %v3608_v20 = vpop.f32.mrf.mxu0 }
 0x3b7   :  { %v4592_v11 = vpop.f32.mrf.mxu3  ;;  %v4264_v14 = vadd.f32 %v4263_v9, %v3935_v29  ;;  %v3937_v16 = vpop.f32.mrf.mxu1  ;;  %v12302_v29 = vld [vmem:[#allocation6 + $0xc78] sm:$0xf] }
 0x3b8   :  { %v3938_v44 = vadd.f32 %v3937_v16, %v3608_v20 }
 0x3b9   :  { %v15237_v50 = vadd.f32 %v4592_v11, %v4264_v14  ;;  %3647 = vmatmul.bf16.gmra.mxu0 %v12275_v12  ;;  %v12303_v12 = vor.u32 %v14458_v51, %v12302_v29  ;;  %v14465_v51 = vld [vmem:[#allocation6 + $0xcc8] sm:$0xf0] }
 0x3ba   :  { %3976 = vmatmul.bf16.gmra.mxu1 %v12279_v13  ;;  %v12307_v13 = vor.u32 %v14455_v59, %v12304_v60  ;;  %v14462_v59 = vld [vmem:[#allocation6 + $0xcb4] sm:$0xf]  ;;  %v12332_v60 = vld [vmem:[#allocation6 + $0xccc] sm:$0xf0] }
 0x3bb   :  { %17321 = vst [vmem:[#allocation73_spill] sm:$0xff] %v15237_v50  ;;  %4305 = vmatmul.bf16.gmra.mxu2 %v12283_v18  ;;  %v12311_v18 = vor.u32 %v14459_v0, %v12310_v63  ;;  %v12338_v63 = vld [vmem:[#allocation6 + $0xcb8] sm:$0xf]  ;;  %v14466_v0 = vld [vmem:[#allocation6 + $0xcd0] sm:$0xf0] }
 0x3bc   :  { %4634 = vmatmul.bf16.gmra.mxu3 %v12287_v27  ;;  %v12315_v27 = vor.u32 %v14456_v2, %v12312_v6  ;;  %v14463_v2 = vld [vmem:[#allocation6 + $0xcbc] sm:$0xf]  ;;  %v12340_v6 = vld [vmem:[#allocation6 + $0xcd4] sm:$0xf0] }
 0x3be   :  { %v4266_v36 = vpop.f32.mrf.mxu2  ;;  %v3610_v49 = vpop.f32.mrf.mxu0 }
 0x3bf   :  { %v4595_v39 = vpop.f32.mrf.mxu3  ;;  %v4267_v40 = vadd.f32 %v4266_v36, %v3938_v44  ;;  %v3939_v24 = vpop.f32.mrf.mxu1 }
 0x3c0   :  { %v3940_v45 = vadd.f32 %v3939_v24, %v3610_v49 }
 0x3c1   :  { %v15239_v35 = vadd.f32 %v4595_v39, %v4267_v40 }
 0x3c3   :  { %17322 = vst [vmem:[#allocation74_spill] sm:$0xff] %v15239_v35 }
 0x3c6   :  { %v4268_v9 = vpop.f32.mrf.mxu2  ;;  %v3613_v20 = vpop.f32.mrf.mxu0 }
 0x3c7   :  { %v4597_v11 = vpop.f32.mrf.mxu3  ;;  %v4269_v14 = vadd.f32 %v4268_v9, %v3940_v45  ;;  %v3942_v16 = vpop.f32.mrf.mxu1  ;;  %v12330_v45 = vld [vmem:[#allocation6 + $0xcb0] sm:$0xf] }
 0x3c8   :  { %v3943_v24 = vadd.f32 %v3942_v16, %v3613_v20 }
 0x3c9   :  { %v15241_v44 = vadd.f32 %v4597_v11, %v4269_v14  ;;  %3652 = vmatmul.bf16.gmra.mxu0 %v12303_v12  ;;  %v12331_v12 = vor.u32 %v14465_v51, %v12330_v45  ;;  %v14472_v51 = vld [vmem:[#allocation6 + $0xd00] sm:$0xf0] }
 0x3ca   :  { %3981 = vmatmul.bf16.gmra.mxu1 %v12307_v13  ;;  %v12335_v13 = vor.u32 %v14462_v59, %v12332_v60  ;;  %v14469_v59 = vld [vmem:[#allocation6 + $0xcec] sm:$0xf]  ;;  %v12360_v60 = vld [vmem:[#allocation6 + $0xd04] sm:$0xf0] }
 0x3cb   :  { %17323 = vst [vmem:[#allocation75_spill] sm:$0xff] %v15241_v44  ;;  %4310 = vmatmul.bf16.gmra.mxu2 %v12311_v18  ;;  %v12339_v18 = vor.u32 %v14466_v0, %v12338_v63  ;;  %v12366_v63 = vld [vmem:[#allocation6 + $0xcf0] sm:$0xf]  ;;  %v14473_v0 = vld [vmem:[#allocation6 + $0xd08] sm:$0xf0] }
 0x3cc   :  { %4639 = vmatmul.bf16.gmra.mxu3 %v12315_v27  ;;  %v12343_v27 = vor.u32 %v14463_v2, %v12340_v6  ;;  %v14470_v2 = vld [vmem:[#allocation6 + $0xcf4] sm:$0xf]  ;;  %v12368_v6 = vld [vmem:[#allocation6 + $0xd0c] sm:$0xf0] }
 0x3ce   :  { %v4271_v36 = vpop.f32.mrf.mxu2  ;;  %v3615_v49 = vpop.f32.mrf.mxu0 }
 0x3cf   :  { %v4600_v39 = vpop.f32.mrf.mxu3  ;;  %v4272_v40 = vadd.f32 %v4271_v36, %v3943_v24  ;;  %v3944_v35 = vpop.f32.mrf.mxu1 }
 0x3d0   :  { %v3945_v50 = vadd.f32 %v3944_v35, %v3615_v49 }
 0x3d1   :  { %v15243_v29 = vadd.f32 %v4600_v39, %v4272_v40 }
 0x3d3   :  { %17324 = vst [vmem:[#allocation76_spill] sm:$0xff] %v15243_v29 }
 0x3d6   :  { %v4273_v9 = vpop.f32.mrf.mxu2  ;;  %v3618_v20 = vpop.f32.mrf.mxu0 }
 0x3d7   :  { %v4602_v11 = vpop.f32.mrf.mxu3  ;;  %v4274_v14 = vadd.f32 %v4273_v9, %v3945_v50  ;;  %v3947_v16 = vpop.f32.mrf.mxu1  ;;  %v12358_v50 = vld [vmem:[#allocation6 + $0xce8] sm:$0xf] }
 0x3d8   :  { %v3948_v35 = vadd.f32 %v3947_v16, %v3618_v20 }
 0x3d9   :  { %v15245_v24 = vadd.f32 %v4602_v11, %v4274_v14  ;;  %3657 = vmatmul.bf16.gmra.mxu0 %v12331_v12  ;;  %v12359_v12 = vor.u32 %v14472_v51, %v12358_v50  ;;  %v14479_v51 = vld [vmem:[#allocation6 + $0xd38] sm:$0xf0] }
 0x3da   :  { %3986 = vmatmul.bf16.gmra.mxu1 %v12335_v13  ;;  %v12363_v13 = vor.u32 %v14469_v59, %v12360_v60  ;;  %v14476_v59 = vld [vmem:[#allocation6 + $0xd24] sm:$0xf]  ;;  %v12388_v60 = vld [vmem:[#allocation6 + $0xd3c] sm:$0xf0] }
 0x3db   :  { %17325 = vst [vmem:[#allocation77_spill] sm:$0xff] %v15245_v24  ;;  %4315 = vmatmul.bf16.gmra.mxu2 %v12339_v18  ;;  %v12367_v18 = vor.u32 %v14473_v0, %v12366_v63  ;;  %v12394_v63 = vld [vmem:[#allocation6 + $0xd28] sm:$0xf]  ;;  %v14480_v0 = vld [vmem:[#allocation6 + $0xd40] sm:$0xf0] }
 0x3dc   :  { %4644 = vmatmul.bf16.gmra.mxu3 %v12343_v27  ;;  %v12371_v27 = vor.u32 %v14470_v2, %v12368_v6  ;;  %v14477_v2 = vld [vmem:[#allocation6 + $0xd2c] sm:$0xf]  ;;  %v12396_v6 = vld [vmem:[#allocation6 + $0xd44] sm:$0xf0] }
 0x3de   :  { %v4276_v36 = vpop.f32.mrf.mxu2  ;;  %v3620_v49 = vpop.f32.mrf.mxu0 }
 0x3df   :  { %v4605_v39 = vpop.f32.mrf.mxu3  ;;  %v4277_v40 = vadd.f32 %v4276_v36, %v3948_v35  ;;  %v3949_v29 = vpop.f32.mrf.mxu1 }
 0x3e0   :  { %v3950_v44 = vadd.f32 %v3949_v29, %v3620_v49 }
 0x3e1   :  { %v15247_v45 = vadd.f32 %v4605_v39, %v4277_v40 }
 0x3e3   :  { %17326 = vst [vmem:[#allocation78_spill] sm:$0xff] %v15247_v45 }
 0x3e6   :  { %v4278_v9 = vpop.f32.mrf.mxu2  ;;  %v3623_v20 = vpop.f32.mrf.mxu0 }
 0x3e7   :  { %v4607_v11 = vpop.f32.mrf.mxu3  ;;  %v4279_v14 = vadd.f32 %v4278_v9, %v3950_v44  ;;  %v3952_v16 = vpop.f32.mrf.mxu1  ;;  %v12386_v44 = vld [vmem:[#allocation6 + $0xd20] sm:$0xf] }
 0x3e8   :  { %v3953_v29 = vadd.f32 %v3952_v16, %v3623_v20 }
 0x3e9   :  { %v15249_v35 = vadd.f32 %v4607_v11, %v4279_v14  ;;  %3662 = vmatmul.bf16.gmra.mxu0 %v12359_v12  ;;  %v12387_v12 = vor.u32 %v14479_v51, %v12386_v44  ;;  %v14054_v44 = vld [vmem:[#allocation3 + $0x1b0] sm:$0xff] }
 0x3ea   :  { %3991 = vmatmul.bf16.gmra.mxu1 %v12363_v13  ;;  %v12391_v13 = vor.u32 %v14476_v59, %v12388_v60 }
 0x3eb   :  { %4320 = vmatmul.bf16.gmra.mxu2 %v12367_v18  ;;  %v12395_v18 = vor.u32 %v14480_v0, %v12394_v63  ;;  %v14037_v0 = vld [vmem:[#allocation3 + $0x128] sm:$0xff] }
 0x3ec   :  { %4649 = vmatmul.bf16.gmra.mxu3 %v12371_v27  ;;  %v12399_v27 = vor.u32 %v14477_v2, %v12396_v6  ;;  %v14045_v2 = vld [vmem:[#allocation3 + $0x168] sm:$0xff] }
 0x3ed   :  { %v14053_v6 = vld [vmem:[#allocation3 + $0x1a8] sm:$0xff] }
 0x3ee   :  { %v4281_v36 = vpop.f32.mrf.mxu2  ;;  %v3625_v49 = vpop.f32.mrf.mxu0 }
 0x3ef   :  { %v4610_v39 = vpop.f32.mrf.mxu3  ;;  %v4282_v40 = vadd.f32 %v4281_v36, %v3953_v29  ;;  %v3954_v45 = vpop.f32.mrf.mxu1  ;;  %v14055_v36 = vld [vmem:[#allocation3 + $0x1b8] sm:$0xff] }
 0x3f0   :  { %v3955_v24 = vadd.f32 %v3954_v45, %v3625_v49  ;;  %5333 = vmatpush.bf16.msrb.mxu2 %v14055_v36  ;;  %v14038_v49 = vld [vmem:[#allocation3 + $0x130] sm:$0xff] }
 0x3f1   :  { %v15251_v50 = vadd.f32 %v4610_v39, %v4282_v40  ;;  %4676 = vmatpush.bf16.msrb.mxu0 %v14038_v49  ;;  %v14052_v49 = vld [vmem:[#allocation3 + $0x1a0] sm:$0xff] }
 0x3f3   :  { %17327 = vst [vmem:[#allocation79_spill] sm:$0xff] %v15251_v50  ;;  %v14046_v50 = vld [vmem:[#allocation3 + $0x170] sm:$0xff] }
 0x3f4   :  { %5005 = vmatpush.bf16.msrb.mxu1 %v14046_v50  ;;  %5334 = vmatpush.bf16.msrb.mxu2 %v14054_v44 }
 0x3f5   :  { %4677 = vmatpush.bf16.msrb.mxu0 %v14037_v0  ;;  %v14035_v0 = vld [vmem:[#allocation3 + $0x118] sm:$0xff] }
 0x3f6   :  { %v4283_v9 = vpop.f32.mrf.mxu2  ;;  %v3628_v20 = vpop.f32.mrf.mxu0 }
 0x3f7   :  { %v4612_v11 = vpop.f32.mrf.mxu3  ;;  %v4284_v14 = vadd.f32 %v4283_v9, %v3955_v24  ;;  %v3957_v16 = vpop.f32.mrf.mxu1  ;;  %v12414_v9 = vld [vmem:[#allocation6 + $0xd58] sm:$0xf] }
 0x3f8   :  { %v3958_v45 = vadd.f32 %v3957_v16, %v3628_v20  ;;  %v14487_v20 = vld [vmem:[#allocation6 + $0xd78] sm:$0xf0]  ;;  %v14484_v16 = vld [vmem:[#allocation6 + $0xd64] sm:$0xf]  ;;  %5006 = vmatpush.bf16.msrb.mxu1 %v14045_v2  ;;  %5335 = vmatpush.bf16.msrb.mxu2 %v14053_v6 }
 0x3f9   :  { %v15253_v29 = vadd.f32 %v4612_v11, %v4284_v14  ;;  %3667 = vmatmul.bf16.gmra.mxu0 %v12387_v12  ;;  %v14486_v11 = vld [vmem:[#allocation6 + $0xd70] sm:$0xf0]  ;;  %v14483_v12 = vld [vmem:[#allocation6 + $0xd5c] sm:$0xf]  ;;  %v12422_v14 = vld [vmem:[#allocation6 + $0xd60] sm:$0xf] }
 0x3fa   :  { %3996 = vmatmul.bf16.gmra.mxu1 %v12391_v13  ;;  %v12416_v13 = vld [vmem:[#allocation6 + $0xd74] sm:$0xf0]  ;;  %v12415_v50 = vor.u32 %v14486_v11, %v12414_v9  ;;  %v14034_v11 = vld [vmem:[#allocation3 + $0x110] sm:$0xff] }
 0x3fb   :  { %17328 = vst [vmem:[#allocation80_spill] sm:$0xff] %v15253_v29  ;;  %4325 = vmatmul.bf16.gmra.mxu2 %v12395_v18  ;;  %v12424_v18 = vld [vmem:[#allocation6 + $0xd7c] sm:$0xf0]  ;;  %v12419_v36 = vor.u32 %v14483_v12, %v12416_v13  ;;  %v14043_v2 = vld [vmem:[#allocation3 + $0x158] sm:$0xff]  ;;  %v14042_v12 = vld [vmem:[#allocation3 + $0x150] sm:$0xff] }
 0x3fc   :  { %4654 = vmatmul.bf16.gmra.mxu3 %v12399_v27  ;;  %5336 = vmatpush.bf16.msrb.mxu2 %v14052_v49  ;;  %v14051_v6 = vld [vmem:[#allocation3 + $0x198] sm:$0xff]  ;;  %v14050_v13 = vld [vmem:[#allocation3 + $0x190] sm:$0xff] }
 0x3fd   :  { %v14490_v49 = vld [vmem:[#allocation6 + $0xd94] sm:$0xf] }
 0x3fe   :  { %v4286_v39 = vpop.f32.mrf.mxu2  ;;  %v3630_v24 = vpop.f32.mrf.mxu0 }
 0x3ff   :  { %v4615_v40 = vpop.f32.mrf.mxu3  ;;  %v4287_v51 = vadd.f32 %v4286_v39, %v3958_v45  ;;  %v3959_v59 = vpop.f32.mrf.mxu1  ;;  %v14036_v39 = vld [vmem:[#allocation3 + $0x120] sm:$0xff] }
 0x400   :  { %v3960_v60 = vadd.f32 %v3959_v59, %v3630_v24  ;;  %v12423_v59 = vor.u32 %v14487_v20, %v12422_v14  ;;  %4678 = vmatpush.bf16.msrb.mxu0 %v14036_v39  ;;  %5337 = vmatpush.bf16.msrb.mxu2 %v14051_v6  ;;  %v12442_v39 = vld [vmem:[#allocation6 + $0xd90] sm:$0xf] }
 0x401   :  { %v15255_v63 = vadd.f32 %v4615_v40, %v4287_v51  ;;  %v14044_v40 = vld [vmem:[#allocation3 + $0x160] sm:$0xff] }
 0x402   :  { %5007 = vmatpush.bf16.msrb.mxu1 %v14044_v40  ;;  %v14493_v40 = vld [vmem:[#allocation6 + $0xda8] sm:$0xf0] }
 0x403   :  { %17329 = vst [vmem:[#allocation81_spill] sm:$0xff] %v15255_v63  ;;  %v12427_v63 = vor.u32 %v14484_v16, %v12424_v18 }
 0x404   :  { %4679 = vmatpush.bf16.msrb.mxu0 %v14035_v0  ;;  %5338 = vmatpush.bf16.msrb.mxu2 %v14050_v13  ;;  %v14491_v0 = vld [vmem:[#allocation6 + $0xd9c] sm:$0xf]  ;;  %v14048_v13 = vld [vmem:[#allocation3 + $0x180] sm:$0xff] }
 0x406   :  { %v4288_v27 = vpop.f32.mrf.mxu2  ;;  %v3633_v51 = vpop.f32.mrf.mxu0  ;;  %5008 = vmatpush.bf16.msrb.mxu1 %v14043_v2  ;;  %v12452_v2 = vld [vmem:[#allocation6 + $0xdb4] sm:$0xf0] }
 0x407   :  { %v15257_v45 = vpop.f32.mrf.mxu3  ;;  %v15259_v44 = vadd.f32 %v4288_v27, %v3960_v60  ;;  %v3962_v24 = vpop.f32.mrf.mxu1 }
 0x408   :  { %17330 = vst [vmem:[#allocation82_spill] sm:$0xff] %v15257_v45  ;;  %v3963_v29 = vadd.f32 %v3962_v24, %v3633_v51  ;;  %4680 = vmatpush.bf16.msrb.mxu0 %v14034_v11  ;;  %v12444_v51 = vld [vmem:[#allocation6 + $0xdac] sm:$0xf0]  ;;  %v12450_v24 = vld [vmem:[#allocation6 + $0xd98] sm:$0xf]  ;;  %v14032_v11 = vld [vmem:[#allocation3 + $0x100] sm:$0xff]  ;;  %v12455_v45 = vor.u32 %v14491_v0, %v12452_v2 }
 0x409   :  { %17331 = vst [vmem:[#allocation83_spill] sm:$0xff] %v15259_v44  ;;  %3672 = vmatmul.bf16.gmra.mxu0 %v12415_v50  ;;  %v14033_v50 = vld [vmem:[#allocation3 + $0x108] sm:$0xff]  ;;  %v12478_v0 = vld [vmem:[#allocation6 + $0xdd0] sm:$0xf] }
 0x40a   :  { %4001 = vmatmul.bf16.gmra.mxu1 %v12419_v36  ;;  %v14041_v36 = vld [vmem:[#allocation3 + $0x148] sm:$0xff] }
 0x40b   :  { %4330 = vmatmul.bf16.gmra.mxu2 %v12423_v59  ;;  %5009 = vmatpush.bf16.msrb.mxu1 %v14042_v12  ;;  %v14494_v59 = vld [vmem:[#allocation6 + $0xdb0] sm:$0xf0]  ;;  %v14040_v12 = vld [vmem:[#allocation3 + $0x140] sm:$0xff]  ;;  %v14501_v2 = vld [vmem:[#allocation6 + $0xde8] sm:$0xf0] }
 0x40c   :  { %4659 = vmatmul.bf16.gmra.mxu3 %v12427_v63  ;;  %v14049_v63 = vld [vmem:[#allocation3 + $0x188] sm:$0xff]  ;;  %4681 = vmatpush.bf16.msrb.mxu0 %v14033_v50 }
 0x40d   :  { %5339 = vmatpush.bf16.msrb.mxu2 %v14049_v63 }
 0x40e   :  { %v4291_v60 = vpop.f32.mrf.mxu2  ;;  %v3635_v20 = vpop.f32.mrf.mxu0 }
 0x40f   :  { %v4620_v9 = vpop.f32.mrf.mxu3  ;;  %v4292_v14 = vadd.f32 %v4291_v60, %v3963_v29  ;;  %v3964_v16 = vpop.f32.mrf.mxu1  ;;  %5010 = vmatpush.bf16.msrb.mxu1 %v14041_v36  ;;  %v12443_v60 = vor.u32 %v14493_v40, %v12442_v39 }
 0x410   :  { %v3965_v18 = vadd.f32 %v3964_v16, %v3635_v20  ;;  %4682 = vmatpush.bf16.msrb.mxu0 %v14032_v11  ;;  %v14498_v11 = vld [vmem:[#allocation6 + $0xdd4] sm:$0xf] }
 0x411   :  { %v15261_v27 = vadd.f32 %v4620_v9, %v4292_v14  ;;  %v12447_v9 = vor.u32 %v14490_v49, %v12444_v51  ;;  %5340 = vmatpush.bf16.msrb.mxu2 %v14048_v13  ;;  %v12470_v51 = vld [vmem:[#allocation6 + $0xdc8] sm:$0xf] }
 0x413   :  { %17332 = vst [vmem:[#allocation84_spill] sm:$0xff] %v15261_v27  ;;  %v12451_v27 = vor.u32 %v14494_v59, %v12450_v24  ;;  %5011 = vmatpush.bf16.msrb.mxu1 %v14040_v12  ;;  %v14497_v24 = vld [vmem:[#allocation6 + $0xdcc] sm:$0xf]  ;;  %v12472_v59 = vld [vmem:[#allocation6 + $0xde4] sm:$0xf0] }
 0x414   :  { %v12480_v12 = vld [vmem:[#allocation6 + $0xdec] sm:$0xf0] }
 0x416   :  { %v4293_v29 = vpop.f32.mrf.mxu2  ;;  %v3638_v20 = vpop.f32.mrf.mxu0 }
 0x417   :  { %v15263_v6 = vpop.f32.mrf.mxu3  ;;  %v15265_v14 = vadd.f32 %v4293_v29, %v3965_v18  ;;  %v3967_v16 = vpop.f32.mrf.mxu1  ;;  %v14500_v29 = vld [vmem:[#allocation6 + $0xde0] sm:$0xf0] }
 0x418   :  { %17333 = vst [vmem:[#allocation85_spill] sm:$0xff] %v15263_v6  ;;  %v3968_v44 = vadd.f32 %v3967_v16, %v3638_v20  ;;  %v12479_v16 = vor.u32 %v14501_v2, %v12478_v0  ;;  %v14062_v0 = vld [vmem:[#allocation6 + $0x30] sm:$0xf0] }
 0x419   :  { %17334 = vst [vmem:[#allocation86_spill] sm:$0xff] %v15265_v14  ;;  %3677 = vmatmul.bf16.gmra.mxu0 %v12443_v60 }
 0x41a   :  { %4006 = vmatmul.bf16.gmra.mxu1 %v12447_v9 }
 0x41b   :  { %4335 = vmatmul.bf16.gmra.mxu2 %v12451_v27  ;;  %v12475_v27 = vor.u32 %v14497_v24, %v12472_v59  ;;  %v10724_v24 = vld [vmem:[#allocation6 + $0x2c] sm:$0xf0]  ;;  %v10730_v59 = vld [vmem:[#allocation6 + $0x18] sm:$0xf] }
 0x41c   :  { %4664 = vmatmul.bf16.gmra.mxu3 %v12455_v45  ;;  %v12471_v45 = vor.u32 %v14500_v29, %v12470_v51  ;;  %v10722_v51 = vld [vmem:[#allocation6 + $0x10] sm:$0xf]  ;;  %v14058_v29 = vld [vmem:[#allocation6 + $0x14] sm:$0xf] }
 0x41e   :  { %v4296_v50 = vpop.f32.mrf.mxu2  ;;  %v3640_v39 = vpop.f32.mrf.mxu0 }
 0x41f   :  { %v4625_v36 = vpop.f32.mrf.mxu3  ;;  %v4297_v63 = vadd.f32 %v4296_v50, %v3968_v44  ;;  %v3969_v40 = vpop.f32.mrf.mxu1  ;;  %v12483_v50 = vor.u32 %v14498_v11, %v12480_v12 }
 0x420   :  { %v3970_v49 = vadd.f32 %v3969_v40, %v3640_v39 }
 0x421   :  { %v15267_v18 = vadd.f32 %v4625_v36, %v4297_v63 }
 0x423   :  { %17335 = vst [vmem:[#allocation87_spill] sm:$0xff] %v15267_v18 }
 0x426   :  { %v4298_v60 = vpop.f32.mrf.mxu2  ;;  %v3643_v44 = vpop.f32.mrf.mxu0 }
 0x427   :  { %v15269_v9 = vpop.f32.mrf.mxu3  ;;  %v15271_v13 = vadd.f32 %v4298_v60, %v3970_v49  ;;  %v3972_v20 = vpop.f32.mrf.mxu1  ;;  %v14061_v49 = vld [vmem:[#allocation6 + $0x28] sm:$0xf0]  ;;  %v10727_v60 = vor.u32 %v14058_v29, %v10724_v24  ;;  %v10758_v29 = vld [vmem:[#allocation6 + $0x50] sm:$0xf] }
 0x428   :  { %17336 = vst [vmem:[#allocation88_spill] sm:$0xff] %v15269_v9  ;;  %v3973_v36 = vadd.f32 %v3972_v20, %v3643_v44  ;;  %v10723_v12 = vor.u32 %v14061_v49, %v10722_v51  ;;  %v10731_v20 = vor.u32 %v14062_v0, %v10730_v59  ;;  %v14068_v51 = vld [vmem:[#allocation6 + $0x60] sm:$0xf0]  ;;  %v14065_v49 = vld [vmem:[#allocation6 + $0x4c] sm:$0xf] }
 0x429   :  { %3682 = vmatmul.bf16.gmra.mxu0 %v12471_v45  ;;  %v14069_v24 = vld [vmem:[#allocation6 + $0x68] sm:$0xf0] }
 0x42a   :  { %4011 = vmatmul.bf16.gmra.mxu1 %v12475_v27 }
 0x42b   :  { %4340 = vmatmul.bf16.gmra.mxu2 %v12479_v16 }
 0x42c   :  { %4669 = vmatmul.bf16.gmra.mxu3 %v12483_v50 }
 0x42e   :  { %v4301_v63 = vpop.f32.mrf.mxu2  ;;  %v3645_v18 = vpop.f32.mrf.mxu0 }
 0x42f   :  { %v4630_v39 = vpop.f32.mrf.mxu3  ;;  %v4302_v40 = vadd.f32 %v4301_v63, %v3973_v36  ;;  %v3974_v6 = vpop.f32.mrf.mxu1 }
 0x430   :  { %v3975_v14 = vadd.f32 %v3974_v6, %v3645_v18 }
 0x431   :  { %v15273_v9 = vadd.f32 %v4630_v39, %v4302_v40 }
 0x436   :  { %v4303_v2 = vpop.f32.mrf.mxu2  ;;  %v3648_v27 = vpop.f32.mrf.mxu0 }
 0x437   :  { %v15275_v11 = vpop.f32.mrf.mxu3  ;;  %v15277_v45 = vadd.f32 %v4303_v2, %v3975_v14  ;;  %v3977_v44 = vpop.f32.mrf.mxu1  ;;  %v10752_v14 = vld [vmem:[#allocation6 + $0x64] sm:$0xf0] }
 0x438   :  { %17337 = vst [vmem:[#allocation89_spill] sm:$0xff] %v15275_v11  ;;  %v3978_v16 = vadd.f32 %v3977_v44, %v3648_v27  ;;  %v10750_v11 = vld [vmem:[#allocation6 + $0x48] sm:$0xf] }
 0x439   :  { %17338 = vst [vmem:[#allocation90_spill] sm:$0xff] %v15277_v45  ;;  %4683 = vmatmul.bf16.vlgmr.msrb.gmra.mxu0 %v10723_v12  ;;  %v10751_v0 = vor.u32 %v14068_v51, %v10750_v11  ;;  %v10755_v12 = vor.u32 %v14065_v49, %v10752_v14  ;;  %v14075_v11 = vld [vmem:[#allocation6 + $0x98] sm:$0xf0]  ;;  %v14072_v51 = vld [vmem:[#allocation6 + $0x84] sm:$0xf] }
 0x43a   :  { %5012 = vmatmul.bf16.vlgmr.msrb.gmra.mxu1 %v10727_v60  ;;  %v10786_v49 = vld [vmem:[#allocation6 + $0x88] sm:$0xf]  ;;  %v14076_v14 = vld [vmem:[#allocation6 + $0xa0] sm:$0xf0] }
 0x43b   :  { %5341 = vmatmul.bf16.vlgmr.msrb.gmra.mxu2 %v10731_v20  ;;  %v10759_v20 = vor.u32 %v14069_v24, %v10758_v29 }
 0x43e   :  { %v4306_v6 = vpop.f32.mrf.mxu2  ;;  %v3650_v36 = vpop.f32.mrf.mxu0 }
 0x43f   :  { %v4635_v18 = vpop.f32.mrf.mxu3  ;;  %v4307_v50 = vadd.f32 %v4306_v6, %v3978_v16  ;;  %v3979_v63 = vpop.f32.mrf.mxu1 }
 0x440   :  { %v3980_v39 = vadd.f32 %v3979_v63, %v3650_v36 }
 0x441   :  { %v15279_v40 = vadd.f32 %v4635_v18, %v4307_v50 }
 0x443   :  { %17339 = vst [vmem:[#allocation91_spill] sm:$0xff] %v15279_v40 }
 0x446   :  { %v4308_v2 = vpop.f32.mrf.mxu2  ;;  %v3653_v27 = vpop.f32.mrf.mxu0 }
 0x447   :  { %v15281_v59 = vpop.f32.mrf.mxu3  ;;  %v15283_v60 = vadd.f32 %v4308_v2, %v3980_v39  ;;  %v3982_v44 = vpop.f32.mrf.mxu1  ;;  %v10780_v39 = vld [vmem:[#allocation6 + $0x9c] sm:$0xf0] }
 0x448   :  { %17340 = vst [vmem:[#allocation92_spill] sm:$0xff] %v15281_v59  ;;  %v3983_v16 = vadd.f32 %v3982_v44, %v3653_v27  ;;  %v10778_v59 = vld [vmem:[#allocation6 + $0x80] sm:$0xf] }
 0x449   :  { %17341 = vst [vmem:[#allocation93_spill] sm:$0xff] %v15283_v60  ;;  %4688 = vmatmul.bf16.gmra.mxu0 %v10751_v0  ;;  %v10779_v24 = vor.u32 %v14075_v11, %v10778_v59  ;;  %v10783_v0 = vor.u32 %v14072_v51, %v10780_v39  ;;  %v14082_v59 = vld [vmem:[#allocation6 + $0xd0] sm:$0xf0]  ;;  %v14079_v11 = vld [vmem:[#allocation6 + $0xbc] sm:$0xf] }
 0x44a   :  { %5017 = vmatmul.bf16.gmra.mxu1 %v10755_v12  ;;  %v10814_v51 = vld [vmem:[#allocation6 + $0xc0] sm:$0xf]  ;;  %v14083_v39 = vld [vmem:[#allocation6 + $0xd8] sm:$0xf0] }
 0x44b   :  { %5346 = vmatmul.bf16.gmra.mxu2 %v10759_v20  ;;  %v10787_v20 = vor.u32 %v14076_v14, %v10786_v49 }
 0x44e   :  { %v4311_v6 = vpop.f32.mrf.mxu2  ;;  %v3655_v36 = vpop.f32.mrf.mxu0 }
 0x44f   :  { %v4640_v18 = vpop.f32.mrf.mxu3  ;;  %v4312_v50 = vadd.f32 %v4311_v6, %v3983_v16  ;;  %v3984_v63 = vpop.f32.mrf.mxu1 }
 0x450   :  { %v3985_v40 = vadd.f32 %v3984_v63, %v3655_v36 }
 0x451   :  { %v15285_v45 = vadd.f32 %v4640_v18, %v4312_v50 }
 0x453   :  { %17342 = vst [vmem:[#allocation94_spill] sm:$0xff] %v15285_v45 }
 0x456   :  { %v4313_v2 = vpop.f32.mrf.mxu2  ;;  %v3658_v27 = vpop.f32.mrf.mxu0 }
 0x457   :  { %v15287_v29 = vpop.f32.mrf.mxu3  ;;  %v15289_v12 = vadd.f32 %v4313_v2, %v3985_v40  ;;  %v3987_v44 = vpop.f32.mrf.mxu1  ;;  %v10808_v40 = vld [vmem:[#allocation6 + $0xd4] sm:$0xf0] }
 0x458   :  { %17343 = vst [vmem:[#allocation95_spill] sm:$0xff] %v15287_v29  ;;  %v3988_v16 = vadd.f32 %v3987_v44, %v3658_v27  ;;  %v10806_v29 = vld [vmem:[#allocation6 + $0xb8] sm:$0xf] }
 0x459   :  { %17344 = vst [vmem:[#allocation96_spill] sm:$0xff] %v15289_v12  ;;  %4693 = vmatmul.bf16.gmra.mxu0 %v10779_v24  ;;  %v10807_v14 = vor.u32 %v14082_v59, %v10806_v29  ;;  %v10811_v24 = vor.u32 %v14079_v11, %v10808_v40  ;;  %v14089_v29 = vld [vmem:[#allocation6 + $0x108] sm:$0xf0]  ;;  %v14086_v59 = vld [vmem:[#allocation6 + $0xf4] sm:$0xf] }
 0x45a   :  { %5022 = vmatmul.bf16.gmra.mxu1 %v10783_v0  ;;  %v10842_v11 = vld [vmem:[#allocation6 + $0xf8] sm:$0xf]  ;;  %v14090_v40 = vld [vmem:[#allocation6 + $0x110] sm:$0xf0] }
 0x45b   :  { %5351 = vmatmul.bf16.gmra.mxu2 %v10787_v20  ;;  %v10815_v20 = vor.u32 %v14083_v39, %v10814_v51 }
 0x45e   :  { %v4316_v6 = vpop.f32.mrf.mxu2  ;;  %v3660_v36 = vpop.f32.mrf.mxu0 }
 0x45f   :  { %v4645_v18 = vpop.f32.mrf.mxu3  ;;  %v4317_v50 = vadd.f32 %v4316_v6, %v3988_v16  ;;  %v3989_v63 = vpop.f32.mrf.mxu1 }
 0x460   :  { %v3990_v45 = vadd.f32 %v3989_v63, %v3660_v36 }
 0x461   :  { %v15291_v60 = vadd.f32 %v4645_v18, %v4317_v50 }
 0x463   :  { %17345 = vst [vmem:[#allocation97_spill] sm:$0xff] %v15291_v60 }
 0x466   :  { %v4318_v2 = vpop.f32.mrf.mxu2  ;;  %v3663_v27 = vpop.f32.mrf.mxu0 }
 0x467   :  { %v15293_v49 = vpop.f32.mrf.mxu3  ;;  %v15295_v0 = vadd.f32 %v4318_v2, %v3990_v45  ;;  %v3992_v44 = vpop.f32.mrf.mxu1  ;;  %v10836_v45 = vld [vmem:[#allocation6 + $0x10c] sm:$0xf0] }
 0x468   :  { %17346 = vst [vmem:[#allocation98_spill] sm:$0xff] %v15293_v49  ;;  %v3993_v16 = vadd.f32 %v3992_v44, %v3663_v27  ;;  %v10834_v49 = vld [vmem:[#allocation6 + $0xf0] sm:$0xf] }
 0x469   :  { %17347 = vst [vmem:[#allocation99_spill] sm:$0xff] %v15295_v0  ;;  %4698 = vmatmul.bf16.gmra.mxu0 %v10807_v14  ;;  %v10835_v39 = vor.u32 %v14089_v29, %v10834_v49  ;;  %v10839_v14 = vor.u32 %v14086_v59, %v10836_v45  ;;  %v14096_v49 = vld [vmem:[#allocation6 + $0x140] sm:$0xf0]  ;;  %v14093_v29 = vld [vmem:[#allocation6 + $0x12c] sm:$0xf] }
 0x46a   :  { %5027 = vmatmul.bf16.gmra.mxu1 %v10811_v24  ;;  %v10870_v59 = vld [vmem:[#allocation6 + $0x130] sm:$0xf]  ;;  %v14097_v45 = vld [vmem:[#allocation6 + $0x148] sm:$0xf0] }
 0x46b   :  { %5356 = vmatmul.bf16.gmra.mxu2 %v10815_v20  ;;  %v10843_v20 = vor.u32 %v14090_v40, %v10842_v11 }
 0x46e   :  { %v4321_v6 = vpop.f32.mrf.mxu2  ;;  %v3665_v36 = vpop.f32.mrf.mxu0 }
 0x46f   :  { %v4650_v18 = vpop.f32.mrf.mxu3  ;;  %v4322_v50 = vadd.f32 %v4321_v6, %v3993_v16  ;;  %v3994_v63 = vpop.f32.mrf.mxu1 }
 0x470   :  { %v3995_v60 = vadd.f32 %v3994_v63, %v3665_v36 }
 0x471   :  { %v15297_v12 = vadd.f32 %v4650_v18, %v4322_v50 }
 0x473   :  { %17348 = vst [vmem:[#allocation100_spill] sm:$0xff] %v15297_v12 }
 0x476   :  { %v4323_v2 = vpop.f32.mrf.mxu2  ;;  %v3668_v27 = vpop.f32.mrf.mxu0 }
 0x477   :  { %v15299_v51 = vpop.f32.mrf.mxu3  ;;  %v15301_v24 = vadd.f32 %v4323_v2, %v3995_v60  ;;  %v3997_v44 = vpop.f32.mrf.mxu1  ;;  %v10864_v60 = vld [vmem:[#allocation6 + $0x144] sm:$0xf0] }
 0x478   :  { %17349 = vst [vmem:[#allocation101_spill] sm:$0xff] %v15299_v51  ;;  %v3998_v16 = vadd.f32 %v3997_v44, %v3668_v27  ;;  %v10862_v51 = vld [vmem:[#allocation6 + $0x128] sm:$0xf] }
 0x479   :  { %17350 = vst [vmem:[#allocation102_spill] sm:$0xff] %v15301_v24  ;;  %4703 = vmatmul.bf16.gmra.mxu0 %v10835_v39  ;;  %v10863_v40 = vor.u32 %v14096_v49, %v10862_v51  ;;  %v10867_v39 = vor.u32 %v14093_v29, %v10864_v60  ;;  %v14103_v51 = vld [vmem:[#allocation6 + $0x178] sm:$0xf0]  ;;  %v14100_v49 = vld [vmem:[#allocation6 + $0x164] sm:$0xf] }
 0x47a   :  { %5032 = vmatmul.bf16.gmra.mxu1 %v10839_v14  ;;  %v10898_v29 = vld [vmem:[#allocation6 + $0x168] sm:$0xf]  ;;  %v14104_v60 = vld [vmem:[#allocation6 + $0x180] sm:$0xf0] }
 0x47b   :  { %5361 = vmatmul.bf16.gmra.mxu2 %v10843_v20  ;;  %v10871_v20 = vor.u32 %v14097_v45, %v10870_v59 }
 0x47e   :  { %v4326_v6 = vpop.f32.mrf.mxu2  ;;  %v3670_v36 = vpop.f32.mrf.mxu0 }
 0x47f   :  { %v4655_v18 = vpop.f32.mrf.mxu3  ;;  %v4327_v50 = vadd.f32 %v4326_v6, %v3998_v16  ;;  %v3999_v63 = vpop.f32.mrf.mxu1 }
 0x480   :  { %v4000_v12 = vadd.f32 %v3999_v63, %v3670_v36 }
 0x481   :  { %v15303_v0 = vadd.f32 %v4655_v18, %v4327_v50 }
 0x483   :  { %17351 = vst [vmem:[#allocation103_spill] sm:$0xff] %v15303_v0 }
 0x486   :  { %v4328_v2 = vpop.f32.mrf.mxu2  ;;  %v3673_v27 = vpop.f32.mrf.mxu0 }
 0x487   :  { %v15305_v11 = vpop.f32.mrf.mxu3  ;;  %v15307_v14 = vadd.f32 %v4328_v2, %v4000_v12  ;;  %v4002_v44 = vpop.f32.mrf.mxu1  ;;  %v10892_v12 = vld [vmem:[#allocation6 + $0x17c] sm:$0xf0] }
 0x488   :  { %17352 = vst [vmem:[#allocation104_spill] sm:$0xff] %v15305_v11  ;;  %v4003_v16 = vadd.f32 %v4002_v44, %v3673_v27  ;;  %v10890_v11 = vld [vmem:[#allocation6 + $0x160] sm:$0xf] }
 0x489   :  { %17353 = vst [vmem:[#allocation105_spill] sm:$0xff] %v15307_v14  ;;  %4708 = vmatmul.bf16.gmra.mxu0 %v10863_v40  ;;  %v10891_v45 = vor.u32 %v14103_v51, %v10890_v11  ;;  %v10895_v40 = vor.u32 %v14100_v49, %v10892_v12  ;;  %v14110_v11 = vld [vmem:[#allocation6 + $0x1b0] sm:$0xf0]  ;;  %v14107_v51 = vld [vmem:[#allocation6 + $0x19c] sm:$0xf] }
 0x48a   :  { %5037 = vmatmul.bf16.gmra.mxu1 %v10867_v39  ;;  %v10926_v49 = vld [vmem:[#allocation6 + $0x1a0] sm:$0xf]  ;;  %v14111_v12 = vld [vmem:[#allocation6 + $0x1b8] sm:$0xf0] }
 0x48b   :  { %5366 = vmatmul.bf16.gmra.mxu2 %v10871_v20  ;;  %v10899_v20 = vor.u32 %v14104_v60, %v10898_v29 }
 0x48e   :  { %v4331_v6 = vpop.f32.mrf.mxu2  ;;  %v3675_v36 = vpop.f32.mrf.mxu0 }
 0x48f   :  { %v4660_v18 = vpop.f32.mrf.mxu3  ;;  %v4332_v50 = vadd.f32 %v4331_v6, %v4003_v16  ;;  %v4004_v63 = vpop.f32.mrf.mxu1 }
 0x490   :  { %v4005_v0 = vadd.f32 %v4004_v63, %v3675_v36 }
 0x491   :  { %v15309_v24 = vadd.f32 %v4660_v18, %v4332_v50 }
 0x493   :  { %17354 = vst [vmem:[#allocation106_spill] sm:$0xff] %v15309_v24 }
 0x496   :  { %v4333_v2 = vpop.f32.mrf.mxu2  ;;  %v3678_v27 = vpop.f32.mrf.mxu0 }
 0x497   :  { %v15311_v59 = vpop.f32.mrf.mxu3  ;;  %v15313_v39 = vadd.f32 %v4333_v2, %v4005_v0  ;;  %v4007_v44 = vpop.f32.mrf.mxu1  ;;  %v10920_v0 = vld [vmem:[#allocation6 + $0x1b4] sm:$0xf0] }
 0x498   :  { %17355 = vst [vmem:[#allocation107_spill] sm:$0xff] %v15311_v59  ;;  %v4008_v16 = vadd.f32 %v4007_v44, %v3678_v27  ;;  %v10918_v59 = vld [vmem:[#allocation6 + $0x198] sm:$0xf] }
 0x499   :  { %17356 = vst [vmem:[#allocation108_spill] sm:$0xff] %v15313_v39  ;;  %4713 = vmatmul.bf16.gmra.mxu0 %v10891_v45  ;;  %v10919_v60 = vor.u32 %v14110_v11, %v10918_v59  ;;  %v10923_v45 = vor.u32 %v14107_v51, %v10920_v0  ;;  %v14117_v59 = vld [vmem:[#allocation6 + $0x1e8] sm:$0xf0]  ;;  %v14114_v11 = vld [vmem:[#allocation6 + $0x1d4] sm:$0xf] }
 0x49a   :  { %5042 = vmatmul.bf16.gmra.mxu1 %v10895_v40  ;;  %v10954_v51 = vld [vmem:[#allocation6 + $0x1d8] sm:$0xf]  ;;  %v14118_v0 = vld [vmem:[#allocation6 + $0x1f0] sm:$0xf0] }
 0x49b   :  { %5371 = vmatmul.bf16.gmra.mxu2 %v10899_v20  ;;  %v10927_v20 = vor.u32 %v14111_v12, %v10926_v49 }
 0x49e   :  { %v4336_v6 = vpop.f32.mrf.mxu2  ;;  %v3680_v36 = vpop.f32.mrf.mxu0 }
 0x49f   :  { %v4665_v18 = vpop.f32.mrf.mxu3  ;;  %v4337_v50 = vadd.f32 %v4336_v6, %v4008_v16  ;;  %v4009_v63 = vpop.f32.mrf.mxu1 }
 0x4a0   :  { %v4010_v24 = vadd.f32 %v4009_v63, %v3680_v36 }
 0x4a1   :  { %v15315_v14 = vadd.f32 %v4665_v18, %v4337_v50 }
 0x4a3   :  { %17357 = vst [vmem:[#allocation109_spill] sm:$0xff] %v15315_v14 }
 0x4a6   :  { %v4338_v2 = vpop.f32.mrf.mxu2  ;;  %v3683_v27 = vpop.f32.mrf.mxu0 }
 0x4a7   :  { %v15317_v29 = vpop.f32.mrf.mxu3  ;;  %v15319_v40 = vadd.f32 %v4338_v2, %v4010_v24  ;;  %v4012_v44 = vpop.f32.mrf.mxu1  ;;  %v10948_v24 = vld [vmem:[#allocation6 + $0x1ec] sm:$0xf0] }
 0x4a8   :  { %17358 = vst [vmem:[#allocation110_spill] sm:$0xff] %v15317_v29  ;;  %v4013_v16 = vadd.f32 %v4012_v44, %v3683_v27  ;;  %v10946_v29 = vld [vmem:[#allocation6 + $0x1d0] sm:$0xf]  ;;  %v10951_v12 = vor.u32 %v14114_v11, %v10948_v24  ;;  %v10955_v44 = vor.u32 %v14118_v0, %v10954_v51  ;;  %v10976_v11 = vld [vmem:[#allocation6 + $0x224] sm:$0xf0] }
 0x4a9   :  { %4718 = vmatmul.bf16.gmra.mxu0 %v10919_v60  ;;  %v10947_v49 = vor.u32 %v14117_v59, %v10946_v29  ;;  %v10974_v29 = vld [vmem:[#allocation6 + $0x208] sm:$0xf]  ;;  %v14124_v59 = vld [vmem:[#allocation6 + $0x220] sm:$0xf0]  ;;  %v10982_v24 = vld [vmem:[#allocation6 + $0x210] sm:$0xf] }
 0x4aa   :  { %5047 = vmatmul.bf16.gmra.mxu1 %v10923_v45  ;;  %v10975_v0 = vor.u32 %v14124_v59, %v10974_v29 }
 0x4ab   :  { %5376 = vmatmul.bf16.gmra.mxu2 %v10927_v20 }
 0x4ae   :  { %v4341_v6 = vpop.f32.mrf.mxu2  ;;  %v3685_v36 = vpop.f32.mrf.mxu0 }
 0x4af   :  { %v4670_v18 = vpop.f32.mrf.mxu3  ;;  %v4342_v50 = vadd.f32 %v4341_v6, %v4013_v16  ;;  %v4014_v63 = vpop.f32.mrf.mxu1 }
 0x4b0   :  { %v4015_v14 = vadd.f32 %v4014_v63, %v3685_v36 }
 0x4b1   :  { %v15321_v39 = vadd.f32 %v4670_v18, %v4342_v50 }
 0x4b3   :  { %17359 = vst [vmem:[#allocation111_spill] sm:$0xff] %v15321_v39 }
 0x4b6   :  { %v4343_v2 = vpop.f32.mrf.mxu2  ;;  %v4684_v45 = vpop.f32.mrf.mxu0 }
 0x4b7   :  { %v15323_v60 = vadd.f32 %v4343_v2, %v4015_v14  ;;  %v5013_v27 = vpop.f32.mrf.mxu1  ;;  %v4685_v20 = vadd.f32 %v4684_v45, %v15047_v22  ;;  %v14121_v14 = vld [vmem:[#allocation6 + $0x20c] sm:$0xf] }
 0x4b8   :  { %v14125_v2 = vld [vmem:[#allocation6 + $0x228] sm:$0xf0]  ;;  %v10979_v22 = vor.u32 %v14121_v14, %v10976_v11  ;;  %v11002_v11 = vld [vmem:[#allocation6 + $0x240] sm:$0xf] }
 0x4b9   :  { %17360 = vst [vmem:[#allocation112_spill] sm:$0xff] %v15323_v60  ;;  %v5014_v16 = vadd.f32 %v5013_v27, %v4685_v20  ;;  %4723 = vmatmul.bf16.gmra.mxu0 %v10947_v49 }
 0x4ba   :  { %5052 = vmatmul.bf16.gmra.mxu1 %v10951_v12 }
 0x4bb   :  { %5381 = vmatmul.bf16.gmra.mxu2 %v10955_v44  ;;  %v10983_v44 = vor.u32 %v14125_v2, %v10982_v24  ;;  %v14131_v24 = vld [vmem:[#allocation6 + $0x258] sm:$0xf0]  ;;  %v14128_v2 = vld [vmem:[#allocation6 + $0x244] sm:$0xf] }
 0x4be   :  { %v5342_v6 = vpop.f32.mrf.mxu2  ;;  %v4686_v50 = vpop.f32.mrf.mxu0 }
 0x4bf   :  { %v5343_v18 = vadd.f32 %v5342_v6, %v5014_v16  ;;  %v5015_v36 = vpop.f32.mrf.mxu1  ;;  %v4687_v63 = vadd.f32 %v4686_v50, %v15049_v41 }
 0x4c1   :  { %v5016_v39 = vadd.f32 %v5015_v36, %v4687_v63  ;;  %v5662_v45 = vmul.f32 0.2, %v5343_v18 }
 0x4c3   :  { %v5790_v41 = vmax.f32 %v5343_v18, %v5662_v45 }
 0x4c6   :  { %v5344_v51 = vpop.f32.mrf.mxu2  ;;  %v4689_v12 = vpop.f32.mrf.mxu0 }
 0x4c7   :  { %v5345_v49 = vadd.f32 %v5344_v51, %v5016_v39  ;;  %v5018_v27 = vpop.f32.mrf.mxu1  ;;  %v4690_v20 = vadd.f32 %v4689_v12, %v15051_v48  ;;  %v11004_v48 = vld [vmem:[#allocation6 + $0x25c] sm:$0xf0]  ;;  %v11010_v51 = vld [vmem:[#allocation6 + $0x248] sm:$0xf]  ;;  %v14132_v12 = vld [vmem:[#allocation6 + $0x260] sm:$0xf0] }
 0x4c8   :  { %v11007_v18 = vor.u32 %v14128_v2, %v11004_v48  ;;  %v11030_v2 = vld [vmem:[#allocation6 + $0x278] sm:$0xf]  ;;  %v14138_v48 = vld [vmem:[#allocation6 + $0x290] sm:$0xf0] }
 0x4c9   :  { %v5663_v16 = vmul.f32 0.2, %v5345_v49  ;;  %v5019_v6 = vadd.f32 %v5018_v27, %v4690_v20  ;;  %4728 = vmatmul.bf16.gmra.mxu0 %v10975_v0  ;;  %v11011_v20 = vor.u32 %v14132_v12, %v11010_v51  ;;  %v14135_v51 = vld [vmem:[#allocation6 + $0x27c] sm:$0xf]  ;;  %v11038_v12 = vld [vmem:[#allocation6 + $0x280] sm:$0xf] }
 0x4ca   :  { %5057 = vmatmul.bf16.gmra.mxu1 %v10979_v22  ;;  %v11003_v22 = vor.u32 %v14131_v24, %v11002_v11 }
 0x4cb   :  { %5386 = vmatmul.bf16.gmra.mxu2 %v10983_v44  ;;  %v5791_v50 = vmax.f32 %v5345_v49, %v5663_v16 }
 0x4cd   :  { %v15328_v36 = vpack.c.bf16 %v5791_v50, %v5790_v41 }
 0x4ce   :  { %v5347_v63 = vpop.f32.mrf.mxu2  ;;  %v4691_v29 = vpop.f32.mrf.mxu0 }
 0x4cf   :  { %v5348_v60 = vadd.f32 %v5347_v63, %v5019_v6  ;;  %v5020_v59 = vpop.f32.mrf.mxu1  ;;  %v4692_v39 = vadd.f32 %v4691_v29, %v15053_v3 }
 0x4d1   :  { %v5021_v14 = vadd.f32 %v5020_v59, %v4692_v39  ;;  %v5664_v45 = vmul.f32 0.2, %v5348_v60 }
 0x4d3   :  { %v5792_v3 = vmax.f32 %v5348_v60, %v5664_v45 }
 0x4d6   :  { %v5349_v0 = vpop.f32.mrf.mxu2  ;;  %v4694_v27 = vpop.f32.mrf.mxu0 }
 0x4d7   :  { %v5350_v49 = vadd.f32 %v5349_v0, %v5021_v14  ;;  %v5023_v44 = vpop.f32.mrf.mxu1  ;;  %v4695_v16 = vadd.f32 %v4694_v27, %v15055_v10  ;;  %v11032_v10 = vld [vmem:[#allocation6 + $0x294] sm:$0xf0]  ;;  %v14139_v0 = vld [vmem:[#allocation6 + $0x298] sm:$0xf0] }
 0x4d8   :  { %v11035_v60 = vor.u32 %v14135_v51, %v11032_v10  ;;  %v14145_v51 = vld [vmem:[#allocation6 + $0x2c8] sm:$0xf0]  ;;  %v14142_v10 = vld [vmem:[#allocation6 + $0x2b4] sm:$0xf] }
 0x4d9   :  { %v5665_v6 = vmul.f32 0.2, %v5350_v49  ;;  %v5024_v41 = vadd.f32 %v5023_v44, %v4695_v16  ;;  %4733 = vmatmul.bf16.gmra.mxu0 %v11003_v22 }
 0x4da   :  { %5062 = vmatmul.bf16.gmra.mxu1 %v11007_v18  ;;  %v11031_v18 = vor.u32 %v14138_v48, %v11030_v2  ;;  %v11058_v48 = vld [vmem:[#allocation6 + $0x2b0] sm:$0xf] }
 0x4db   :  { %5391 = vmatmul.bf16.gmra.mxu2 %v11011_v20  ;;  %v5793_v50 = vmax.f32 %v5350_v49, %v5665_v6  ;;  %v11039_v20 = vor.u32 %v14139_v0, %v11038_v12  ;;  %v11066_v12 = vld [vmem:[#allocation6 + $0x2b8] sm:$0xf]  ;;  %v14146_v0 = vld [vmem:[#allocation6 + $0x2d0] sm:$0xf0] }
 0x4dd   :  { %v15332_v63 = vpack.c.bf16 %v5793_v50, %v5792_v3 }
 0x4de   :  { %v5352_v29 = vpop.f32.mrf.mxu2  ;;  %v4696_v39 = vpop.f32.mrf.mxu0 }
 0x4df   :  { %v5353_v59 = vadd.f32 %v5352_v29, %v5024_v41  ;;  %v5025_v11 = vpop.f32.mrf.mxu1  ;;  %v4697_v14 = vadd.f32 %v4696_v39, %v15057_v30 }
 0x4e1   :  { %v5026_v24 = vadd.f32 %v5025_v11, %v4697_v14  ;;  %v5666_v45 = vmul.f32 0.2, %v5353_v59 }
 0x4e3   :  { %v5794_v30 = vmax.f32 %v5353_v59, %v5666_v45 }
 0x4e6   :  { %v5354_v22 = vpop.f32.mrf.mxu2  ;;  %v4699_v27 = vpop.f32.mrf.mxu0 }
 0x4e7   :  { %v5355_v49 = vadd.f32 %v5354_v22, %v5026_v24  ;;  %v5028_v44 = vpop.f32.mrf.mxu1  ;;  %v4700_v16 = vadd.f32 %v4699_v27, %v15059_v37  ;;  %v11060_v37 = vld [vmem:[#allocation6 + $0x2cc] sm:$0xf0] }
 0x4e8   :  { %v11063_v59 = vor.u32 %v14142_v10, %v11060_v37  ;;  %v11088_v10 = vld [vmem:[#allocation6 + $0x304] sm:$0xf0]  ;;  %v14153_v37 = vld [vmem:[#allocation6 + $0x308] sm:$0xf0] }
 0x4e9   :  { %v5667_v6 = vmul.f32 0.2, %v5355_v49  ;;  %v5029_v41 = vadd.f32 %v5028_v44, %v4700_v16  ;;  %4738 = vmatmul.bf16.gmra.mxu0 %v11031_v18  ;;  %v11059_v18 = vor.u32 %v14145_v51, %v11058_v48  ;;  %v11067_v44 = vor.u32 %v14146_v0, %v11066_v12  ;;  %v14152_v48 = vld [vmem:[#allocation6 + $0x300] sm:$0xf0]  ;;  %v14149_v51 = vld [vmem:[#allocation6 + $0x2ec] sm:$0xf] }
 0x4ea   :  { %5067 = vmatmul.bf16.gmra.mxu1 %v11035_v60 }
 0x4eb   :  { %5396 = vmatmul.bf16.gmra.mxu2 %v11039_v20  ;;  %v5795_v3 = vmax.f32 %v5355_v49, %v5667_v6 }
 0x4ed   :  { %v15336_v50 = vpack.c.bf16 %v5795_v3, %v5794_v30 }
 0x4ee   :  { %v5357_v29 = vpop.f32.mrf.mxu2  ;;  %v4701_v11 = vpop.f32.mrf.mxu0 }
 0x4ef   :  { %v5358_v39 = vadd.f32 %v5357_v29, %v5029_v41  ;;  %v5030_v14 = vpop.f32.mrf.mxu1  ;;  %v4702_v24 = vadd.f32 %v4701_v11, %v15061_v58 }
 0x4f1   :  { %v5031_v2 = vadd.f32 %v5030_v14, %v4702_v24  ;;  %v5668_v60 = vmul.f32 0.2, %v5358_v39 }
 0x4f3   :  { %v5796_v58 = vmax.f32 %v5358_v39, %v5668_v60  ;;  %v11091_v39 = vor.u32 %v14149_v51, %v11088_v10  ;;  %v11116_v51 = vld [vmem:[#allocation6 + $0x33c] sm:$0xf0]  ;;  %v11122_v10 = vld [vmem:[#allocation6 + $0x328] sm:$0xf] }
 0x4f6   :  { %v5359_v22 = vpop.f32.mrf.mxu2  ;;  %v4704_v49 = vpop.f32.mrf.mxu0 }
 0x4f7   :  { %v5360_v45 = vadd.f32 %v5359_v22, %v5031_v2  ;;  %v5033_v27 = vpop.f32.mrf.mxu1  ;;  %v4705_v20 = vadd.f32 %v4704_v49, %v15063_v1  ;;  %v11086_v2 = vld [vmem:[#allocation6 + $0x2e8] sm:$0xf]  ;;  %v11094_v1 = vld [vmem:[#allocation6 + $0x2f0] sm:$0xf] }
 0x4f8   :  { %v11087_v22 = vor.u32 %v14152_v48, %v11086_v2  ;;  %v11095_v49 = vor.u32 %v14153_v37, %v11094_v1  ;;  %v14159_v2 = vld [vmem:[#allocation6 + $0x338] sm:$0xf0]  ;;  %v14156_v48 = vld [vmem:[#allocation6 + $0x324] sm:$0xf] }
 0x4f9   :  { %v5669_v16 = vmul.f32 0.2, %v5360_v45  ;;  %v5034_v6 = vadd.f32 %v5033_v27, %v4705_v20  ;;  %4743 = vmatmul.bf16.gmra.mxu0 %v11059_v18  ;;  %v14160_v1 = vld [vmem:[#allocation6 + $0x340] sm:$0xf0] }
 0x4fa   :  { %5072 = vmatmul.bf16.gmra.mxu1 %v11063_v59 }
 0x4fb   :  { %5401 = vmatmul.bf16.gmra.mxu2 %v11067_v44  ;;  %v5797_v41 = vmax.f32 %v5360_v45, %v5669_v16 }
 0x4fd   :  { %v15340_v30 = vpack.c.bf16 %v5797_v41, %v5796_v58 }
 0x4fe   :  { %v5362_v3 = vpop.f32.mrf.mxu2  ;;  %v4706_v11 = vpop.f32.mrf.mxu0 }
 0x4ff   :  { %v5363_v29 = vadd.f32 %v5362_v3, %v5034_v6  ;;  %v5035_v14 = vpop.f32.mrf.mxu1  ;;  %v4707_v24 = vadd.f32 %v4706_v11, %v15065_v23 }
 0x501   :  { %v5036_v12 = vadd.f32 %v5035_v14, %v4707_v24  ;;  %v5670_v18 = vmul.f32 0.2, %v5363_v29  ;;  %v11114_v14 = vld [vmem:[#allocation6 + $0x320] sm:$0xf] }
 0x503   :  { %v5798_v44 = vmax.f32 %v5363_v29, %v5670_v18 }
 0x506   :  { %v5364_v0 = vpop.f32.mrf.mxu2  ;;  %v4709_v60 = vpop.f32.mrf.mxu0 }
 0x507   :  { %v5365_v59 = vadd.f32 %v5364_v0, %v5036_v12  ;;  %v5038_v45 = vpop.f32.mrf.mxu1  ;;  %v4710_v20 = vadd.f32 %v4709_v60, %v15067_v31  ;;  %v11115_v12 = vor.u32 %v14159_v2, %v11114_v14  ;;  %v11119_v0 = vor.u32 %v14156_v48, %v11116_v51  ;;  %v14163_v14 = vld [vmem:[#allocation6 + $0x35c] sm:$0xf]  ;;  %v11144_v2 = vld [vmem:[#allocation6 + $0x374] sm:$0xf0]  ;;  %v11150_v48 = vld [vmem:[#allocation6 + $0x360] sm:$0xf] }
 0x508   :  { %v14167_v51 = vld [vmem:[#allocation6 + $0x378] sm:$0xf0] }
 0x509   :  { %v5671_v27 = vmul.f32 0.2, %v5365_v59  ;;  %4748 = vmatmul.bf16.gmra.mxu0 %v11087_v22  ;;  %v5039_v3 = vadd.f32 %v5038_v45, %v4710_v20 }
 0x50a   :  { %5077 = vmatmul.bf16.gmra.mxu1 %v11091_v39 }
 0x50b   :  { %5406 = vmatmul.bf16.gmra.mxu2 %v11095_v49  ;;  %v5799_v23 = vmax.f32 %v5365_v59, %v5671_v27  ;;  %v11123_v59 = vor.u32 %v14160_v1, %v11122_v10 }
 0x50d   :  { %v15344_v16 = vpack.c.bf16 %v5799_v23, %v5798_v44 }
 0x50e   :  { %v5367_v6 = vpop.f32.mrf.mxu2  ;;  %v4711_v58 = vpop.f32.mrf.mxu0 }
 0x50f   :  { %v5040_v41 = vpop.f32.mrf.mxu1  ;;  %v4712_v11 = vadd.f32 %v4711_v58, %v15069_v53  ;;  %v5368_v24 = vadd.f32 %v5367_v6, %v5039_v3 }
 0x511   :  { %v5041_v29 = vadd.f32 %v5040_v41, %v4712_v11  ;;  %v5672_v31 = vmul.f32 0.2, %v5368_v24  ;;  %v11142_v41 = vld [vmem:[#allocation6 + $0x358] sm:$0xf]  ;;  %v14166_v11 = vld [vmem:[#allocation6 + $0x370] sm:$0xf0] }
 0x512   :  { %v11143_v1 = vor.u32 %v14166_v11, %v11142_v41  ;;  %v11172_v41 = vld [vmem:[#allocation6 + $0x3ac] sm:$0xf0]  ;;  %v11178_v11 = vld [vmem:[#allocation6 + $0x398] sm:$0xf] }
 0x513   :  { %v5800_v53 = vmax.f32 %v5368_v24, %v5672_v31  ;;  %v11151_v31 = vor.u32 %v14167_v51, %v11150_v48 }
 0x516   :  { %v5369_v37 = vpop.f32.mrf.mxu2  ;;  %v4714_v39 = vpop.f32.mrf.mxu0 }
 0x517   :  { %v5370_v22 = vadd.f32 %v5369_v37, %v5041_v29  ;;  %v5043_v18 = vpop.f32.mrf.mxu1  ;;  %v4715_v49 = vadd.f32 %v4714_v39, %v15071_v61  ;;  %v11147_v29 = vor.u32 %v14163_v14, %v11144_v2  ;;  %v14174_v14 = vld [vmem:[#allocation6 + $0x3b0] sm:$0xf0] }
 0x519   :  { %v5673_v60 = vmul.f32 0.2, %v5370_v22  ;;  %4753 = vmatmul.bf16.gmra.mxu0 %v11115_v12  ;;  %v5044_v6 = vadd.f32 %v5043_v18, %v4715_v49 }
 0x51a   :  { %5082 = vmatmul.bf16.gmra.mxu1 %v11119_v0 }
 0x51b   :  { %5411 = vmatmul.bf16.gmra.mxu2 %v11123_v59  ;;  %v5801_v45 = vmax.f32 %v5370_v22, %v5673_v60 }
 0x51d   :  { %v15348_v27 = vpack.c.bf16 %v5801_v45, %v5800_v53 }
 0x51e   :  { %v5372_v44 = vpop.f32.mrf.mxu2  ;;  %v4716_v23 = vpop.f32.mrf.mxu0 }
 0x51f   :  { %v5045_v20 = vpop.f32.mrf.mxu1  ;;  %v4717_v58 = vadd.f32 %v4716_v23, %v15073_v19  ;;  %v5373_v3 = vadd.f32 %v5372_v44, %v5044_v6  ;;  %v11170_v23 = vld [vmem:[#allocation6 + $0x390] sm:$0xf]  ;;  %v14173_v6 = vld [vmem:[#allocation6 + $0x3a8] sm:$0xf0] }
 0x520   :  { %v11171_v48 = vor.u32 %v14173_v6, %v11170_v23  ;;  %v11206_v23 = vld [vmem:[#allocation6 + $0x3d0] sm:$0xf]  ;;  %v14181_v6 = vld [vmem:[#allocation6 + $0x3e8] sm:$0xf0] }
 0x521   :  { %v5046_v24 = vadd.f32 %v5045_v20, %v4717_v58  ;;  %v5674_v61 = vmul.f32 0.2, %v5373_v3  ;;  %v14170_v58 = vld [vmem:[#allocation6 + $0x394] sm:$0xf] }
 0x522   :  { %v11175_v51 = vor.u32 %v14170_v58, %v11172_v41 }
 0x523   :  { %v5802_v19 = vmax.f32 %v5373_v3, %v5674_v61 }
 0x526   :  { %v5374_v10 = vpop.f32.mrf.mxu2  ;;  %v4719_v12 = vpop.f32.mrf.mxu0 }
 0x527   :  { %v5375_v37 = vadd.f32 %v5374_v10, %v5046_v24  ;;  %v5048_v0 = vpop.f32.mrf.mxu1  ;;  %v4720_v18 = vadd.f32 %v4719_v12, %v15075_v28 }
 0x529   :  { %v5675_v22 = vmul.f32 0.2, %v5375_v37  ;;  %4758 = vmatmul.bf16.gmra.mxu0 %v11143_v1  ;;  %v5049_v49 = vadd.f32 %v5048_v0, %v4720_v18 }
 0x52a   :  { %5087 = vmatmul.bf16.gmra.mxu1 %v11147_v29  ;;  %v11179_v29 = vor.u32 %v14174_v14, %v11178_v11 }
 0x52b   :  { %5416 = vmatmul.bf16.gmra.mxu2 %v11151_v31  ;;  %v5803_v39 = vmax.f32 %v5375_v37, %v5675_v22 }
 0x52d   :  { %v6180_v59 = vpack.c.bf16 %v5803_v39, %v5802_v19 }
 0x52e   :  { %v5377_v60 = vpop.f32.mrf.mxu2  ;;  %v4721_v53 = vpop.f32.mrf.mxu0 }
 0x52f   :  { %v5050_v45 = vpop.f32.mrf.mxu1  ;;  %v4722_v44 = vadd.f32 %v4721_v53, %v15077_v52  ;;  %v5378_v20 = vadd.f32 %v5377_v60, %v5049_v49  ;;  %v14180_v49 = vld [vmem:[#allocation6 + $0x3e0] sm:$0xf0] }
 0x531   :  { %v5051_v2 = vadd.f32 %v5050_v45, %v4722_v44  ;;  %v5676_v24 = vmul.f32 0.2, %v5378_v20  ;;  %v11198_v45 = vld [vmem:[#allocation6 + $0x3c8] sm:$0xf] }
 0x532   :  { %v11200_v44 = vld [vmem:[#allocation6 + $0x3e4] sm:$0xf0] }
 0x533   :  { %v5804_v12 = vmax.f32 %v5378_v20, %v5676_v24  ;;  %v11199_v20 = vor.u32 %v14180_v49, %v11198_v45 }
 0x536   :  { %v5379_v3 = vpop.f32.mrf.mxu2  ;;  %v4724_v10 = vpop.f32.mrf.mxu0 }
 0x537   :  { %v5380_v28 = vadd.f32 %v5379_v3, %v5051_v2  ;;  %v5053_v1 = vpop.f32.mrf.mxu1  ;;  %v4725_v61 = vadd.f32 %v4724_v10, %v15079_v62  ;;  %v14177_v62 = vld [vmem:[#allocation6 + $0x3cc] sm:$0xf] }
 0x538   :  { %v11203_v41 = vor.u32 %v14177_v62, %v11200_v44  ;;  %v14508_v62 = vld [vmem:[#allocation8 + $0x1c] sm:$0xf0] }
 0x539   :  { %v5677_v37 = vmul.f32 0.2, %v5380_v28  ;;  %v5054_v52 = vadd.f32 %v5053_v1, %v4725_v61  ;;  %4763 = vmatmul.bf16.gmra.mxu0 %v11171_v48  ;;  %v11207_v48 = vor.u32 %v14181_v6, %v11206_v23 }
 0x53a   :  { %5092 = vmatmul.bf16.gmra.mxu1 %v11175_v51 }
 0x53b   :  { %5421 = vmatmul.bf16.gmra.mxu2 %v11179_v29  ;;  %v5805_v0 = vmax.f32 %v5380_v28, %v5677_v37 }
 0x53d   :  { %v6181_v31 = vpack.c.bf16 %v5805_v0, %v5804_v12  ;;  %v14187_v12 = vld [vmem:[#allocation6 + $0x418] sm:$0xf0]  ;;  %v14184_v0 = vld [vmem:[#allocation6 + $0x404] sm:$0xf] }
 0x53e   :  { %v5382_v22 = vpop.f32.mrf.mxu2  ;;  %v4726_v39 = vpop.f32.mrf.mxu0 }
 0x53f   :  { %v5383_v19 = vadd.f32 %v5382_v22, %v5054_v52  ;;  %7902 = vmatpush.bf16.msrb.mxu3 %v6181_v31  ;;  %v5055_v18 = vpop.f32.mrf.mxu1  ;;  %v4727_v60 = vadd.f32 %v4726_v39, %v15081_v21  ;;  %v11226_v52 = vld [vmem:[#allocation6 + $0x400] sm:$0xf]  ;;  %v11234_v22 = vld [vmem:[#allocation6 + $0x408] sm:$0xf] }
 0x540   :  { %v11228_v31 = vld [vmem:[#allocation6 + $0x41c] sm:$0xf0]  ;;  %v11227_v39 = vor.u32 %v14187_v12, %v11226_v52 }
 0x541   :  { %v5056_v53 = vadd.f32 %v5055_v18, %v4727_v60  ;;  %v5678_v11 = vmul.f32 0.2, %v5383_v19  ;;  %v11231_v18 = vor.u32 %v14184_v0, %v11228_v31  ;;  %v12754_v12 = vld [vmem:[#allocation8 + $0x40] sm:$0xf] }
 0x542   :  { %v14516_v0 = vld [vmem:[#allocation8 + $0x5c] sm:$0xf0] }
 0x543   :  { %7903 = vmatpush.bf16.msrb.mxu3 %v6180_v59  ;;  %v5806_v59 = vmax.f32 %v5383_v19, %v5678_v11  ;;  %v14188_v19 = vld [vmem:[#allocation6 + $0x420] sm:$0xf0] }
 0x544   :  { %v11235_v49 = vor.u32 %v14188_v19, %v11234_v22  ;;  %v12755_v19 = vor.u32 %v14516_v0, %v12754_v12  ;;  %v14208_v12 = vld [vmem:[#allocation6 + $0x4c0] sm:$0xf0]  ;;  %v11312_v0 = vld [vmem:[#allocation6 + $0x4c4] sm:$0xf0] }
 0x546   :  { %v5384_v58 = vpop.f32.mrf.mxu2  ;;  %v4729_v2 = vpop.f32.mrf.mxu0 }
 0x547   :  { %v5385_v14 = vadd.f32 %v5384_v58, %v5056_v53  ;;  %7904 = vmatpush.bf16.msrb.mxu3 %v15348_v27  ;;  %v5058_v3 = vpop.f32.mrf.mxu1  ;;  %v4730_v21 = vadd.f32 %v4729_v2, %v15083_v33 }
 0x549   :  { %v5679_v51 = vmul.f32 0.2, %v5385_v14  ;;  %v5059_v24 = vadd.f32 %v5058_v3, %v4730_v21  ;;  %4768 = vmatmul.bf16.gmra.mxu0 %v11199_v20  ;;  %v14194_v21 = vld [vmem:[#allocation6 + $0x450] sm:$0xf0] }
 0x54a   :  { %5097 = vmatmul.bf16.gmra.mxu1 %v11203_v41 }
 0x54b   :  { %v5807_v28 = vmax.f32 %v5385_v14, %v5679_v51  ;;  %5426 = vmatmul.bf16.gmra.mxu2 %v11207_v48  ;;  %7905 = vmatpush.bf16.msrb.mxu3 %v15344_v16  ;;  %v11254_v48 = vld [vmem:[#allocation6 + $0x438] sm:$0xf]  ;;  %v14191_v51 = vld [vmem:[#allocation6 + $0x43c] sm:$0xf] }
 0x54d   :  { %v15358_v10 = vpack.c.bf16 %v5807_v28, %v5806_v59  ;;  %v11262_v59 = vld [vmem:[#allocation6 + $0x440] sm:$0xf]  ;;  %v14195_v28 = vld [vmem:[#allocation6 + $0x458] sm:$0xf0] }
 0x54e   :  { %v5387_v1 = vpop.f32.mrf.mxu2  ;;  %v4731_v27 = vpop.f32.mrf.mxu0  ;;  %v11263_v52 = vor.u32 %v14195_v28, %v11262_v59 }
 0x54f   :  { %v5388_v29 = vadd.f32 %v5387_v1, %v5059_v24  ;;  %7906 = vmatpush.bf16.msrb.mxu3 %v15340_v30  ;;  %v5060_v61 = vpop.f32.mrf.mxu1  ;;  %v4732_v37 = vadd.f32 %v4731_v27, %v15085_v57  ;;  %v12722_v57 = vld [vmem:[#allocation8] sm:$0xf]  ;;  %v11256_v24 = vld [vmem:[#allocation6 + $0x454] sm:$0xf0] }
 0x550   :  { %v12723_v6 = vor.u32 %v14508_v62, %v12722_v57  ;;  %v11259_v27 = vor.u32 %v14191_v51, %v11256_v24  ;;  %v11282_v62 = vld [vmem:[#allocation6 + $0x470] sm:$0xf] }
 0x551   :  { %v5061_v33 = vadd.f32 %v5060_v61, %v4732_v37  ;;  %v5680_v60 = vmul.f32 0.2, %v5388_v29 }
 0x553   :  { %7907 = vmatpush.bf16.msrb.mxu3 %v15336_v50  ;;  %v5808_v58 = vmax.f32 %v5388_v29, %v5680_v60  ;;  %v11255_v29 = vor.u32 %v14194_v21, %v11254_v48  ;;  %v12786_v48 = vld [vmem:[#allocation8 + $0x80] sm:$0xf] }
 0x554   :  { %v14524_v21 = vld [vmem:[#allocation8 + $0x9c] sm:$0xf0] }
 0x555   :  { %v12787_v59 = vor.u32 %v14524_v21, %v12786_v48  ;;  %v11338_v48 = vld [vmem:[#allocation6 + $0x4e0] sm:$0xf]  ;;  %v14215_v21 = vld [vmem:[#allocation6 + $0x4f8] sm:$0xf0] }
 0x556   :  { %v5389_v16 = vpop.f32.mrf.mxu2  ;;  %v4734_v30 = vpop.f32.mrf.mxu0 }
 0x557   :  { %v5390_v53 = vadd.f32 %v5389_v16, %v5061_v33  ;;  %7908 = vmatpush.bf16.msrb.mxu3 %v15332_v63  ;;  %v5063_v45 = vpop.f32.mrf.mxu1  ;;  %v4735_v44 = vadd.f32 %v4734_v30, %v15087_v5 }
 0x559   :  { %v5681_v50 = vmul.f32 0.2, %v5390_v53  ;;  %v5064_v23 = vadd.f32 %v5063_v45, %v4735_v44  ;;  %4773 = vmatmul.bf16.gmra.mxu0 %v11227_v39  ;;  %v14198_v44 = vld [vmem:[#allocation6 + $0x474] sm:$0xf] }
 0x55a   :  { %5102 = vmatmul.bf16.gmra.mxu1 %v11231_v18 }
 0x55b   :  { %v5809_v20 = vmax.f32 %v5390_v53, %v5681_v50  ;;  %5431 = vmatmul.bf16.gmra.mxu2 %v11235_v49  ;;  %7909 = vmatpush.bf16.msrb.mxu3 %v15328_v36  ;;  %v11284_v50 = vld [vmem:[#allocation6 + $0x48c] sm:$0xf0] }
 0x55d   :  { %v15366_v41 = vpack.c.bf16 %v5809_v20, %v5808_v58 }
 0x55e   :  { %v5392_v63 = vpop.f32.mrf.mxu2  ;;  %7910 = vmatmul.bf16.vlgmr.msrb.gmra.mxu3 %v12723_v6  ;;  %v4736_v14 = vpop.f32.mrf.mxu0  ;;  %v14202_v6 = vld [vmem:[#allocation6 + $0x490] sm:$0xf0] }
 0x55f   :  { %v5393_v11 = vadd.f32 %v5392_v63, %v5064_v23  ;;  %v5065_v2 = vpop.f32.mrf.mxu1  ;;  %v4737_v3 = vadd.f32 %v4736_v14, %v15089_v32  ;;  %v11290_v23 = vld [vmem:[#allocation6 + $0x478] sm:$0xf]  ;;  %v11287_v63 = vor.u32 %v14198_v44, %v11284_v50 }
 0x561   :  { %v5066_v5 = vadd.f32 %v5065_v2, %v4737_v3  ;;  %v5682_v36 = vmul.f32 0.2, %v5393_v11 }
 0x563   :  { %v5810_v16 = vmax.f32 %v5393_v11, %v5682_v36 }
 0x566   :  { %v5394_v1 = vpop.f32.mrf.mxu2  ;;  %v4739_v37 = vpop.f32.mrf.mxu0 }
 0x567   :  { %v5395_v61 = vadd.f32 %v5394_v1, %v5066_v5  ;;  %v5068_v33 = vpop.f32.mrf.mxu1  ;;  %v4740_v31 = vadd.f32 %v4739_v37, %v15091_v42  ;;  %v14201_v42 = vld [vmem:[#allocation6 + $0x488] sm:$0xf0]  ;;  %v11291_v5 = vor.u32 %v14202_v6, %v11290_v23 }
 0x568   :  { %v11283_v20 = vor.u32 %v14201_v42, %v11282_v62  ;;  %v12818_v62 = vld [vmem:[#allocation8 + $0xc0] sm:$0xf] }
 0x569   :  { %v5683_v32 = vmul.f32 0.2, %v5395_v61  ;;  %v5069_v22 = vadd.f32 %v5068_v33, %v4740_v31  ;;  %4778 = vmatmul.bf16.gmra.mxu0 %v11255_v29  ;;  %v14985_v31 = vmov 0   ;;  %v14532_v42 = vld [vmem:[#allocation8 + $0xdc] sm:$0xf0] }
 0x56a   :  { %5107 = vmatmul.bf16.gmra.mxu1 %v11259_v27  ;;  %14839 = vset.pattern.permute.xlu1 %v14985_v31  ;;  %v12819_v50 = vor.u32 %v14532_v42, %v12818_v62  ;;  %v11366_v42 = vld [vmem:[#allocation6 + $0x518] sm:$0xf] }
 0x56b   :  { %v5811_v39 = vmax.f32 %v5395_v61, %v5683_v32  ;;  %5436 = vmatmul.bf16.gmra.mxu2 %v11263_v52  ;;  %v11310_v52 = vld [vmem:[#allocation6 + $0x4a8] sm:$0xf]  ;;  %v6268_v32 = vld [vmem:[%s17258_s3 + $0xf0] sm:$0xff]  ;;  %14840 = vset.pattern.permute.xlu2 %v14985_v31 }
 0x56c   :  { %6454 = vperm.xlu1 %14839, %v6268_v32   ;;  %14838 = vset.pattern.permute.xlu0 %v14985_v31 }
 0x56d   :  { %v15370_v18 = vpack.c.bf16 %v5811_v39, %v5810_v16 }
 0x56e   :  { %v5397_v60 = vpop.f32.mrf.mxu2  ;;  %7915 = vmatmul.bf16.gmra.mxu3 %v12755_v19  ;;  %v4741_v30 = vpop.f32.mrf.mxu0  ;;  %v14209_v19 = vld [vmem:[#allocation6 + $0x4c8] sm:$0xf0] }
 0x56f   :  { %v5398_v53 = vadd.f32 %v5397_v60, %v5069_v22  ;;  %v5070_v45 = vpop.f32.mrf.mxu1  ;;  %v4742_v49 = vadd.f32 %v4741_v30, %v15093_v7  ;;  %v11318_v22 = vld [vmem:[#allocation6 + $0x4b0] sm:$0xf]  ;;  %v11311_v60 = vor.u32 %v14208_v12, %v11310_v52 }
 0x571   :  { %v5071_v57 = vadd.f32 %v5070_v45, %v4742_v49  ;;  %v5684_v11 = vmul.f32 0.2, %v5398_v53 }
 0x573   :  { %v5812_v28 = vmax.f32 %v5398_v53, %v5684_v11 }
 0x576   :  { %v5399_v58 = vpop.f32.mrf.mxu2  ;;  %v4744_v2 = vpop.f32.mrf.mxu0 }
 0x577   :  { %v5400_v14 = vadd.f32 %v5399_v58, %v5071_v57  ;;  %v5073_v3 = vpop.f32.mrf.mxu1  ;;  %v4745_v51 = vadd.f32 %v4744_v2, %v15095_v15  ;;  %v14205_v15 = vld [vmem:[#allocation6 + $0x4ac] sm:$0xf]  ;;  %v11319_v57 = vor.u32 %v14209_v19, %v11318_v22  ;;  %v6269_v58 = vld [vmem:[%s17258_s3 + $0xf8] sm:$0xff] }
 0x578   :  { %v11315_v53 = vor.u32 %v14205_v15, %v11312_v0  ;;  %6459 = vperm.xlu1 %14839, %v6269_v58   ;;  %v12850_v15 = vld [vmem:[#allocation8 + $0x100] sm:$0xf]  ;;  %v6251_v58 = vld [vmem:[%s17258_s3 + $0x68] sm:$0xff] }
 0x579   :  { %v5685_v7 = vmul.f32 0.2, %v5400_v14  ;;  %v5074_v24 = vadd.f32 %v5073_v3, %v4745_v51  ;;  %4783 = vmatmul.bf16.gmra.mxu0 %v11283_v20  ;;  %v14540_v0 = vld [vmem:[#allocation8 + $0x11c] sm:$0xf0] }
 0x57a   :  { %5112 = vmatmul.bf16.gmra.mxu1 %v11287_v63  ;;  %v12851_v32 = vor.u32 %v14540_v0, %v12850_v15 }
 0x57b   :  { %v5813_v1 = vmax.f32 %v5400_v14, %v5685_v7  ;;  %5441 = vmatmul.bf16.gmra.mxu2 %v11291_v5  ;;  %v14212_v7 = vld [vmem:[#allocation6 + $0x4e4] sm:$0xf] }
 0x57d   :  { %v15374_v29 = vpack.c.bf16 %v5813_v1, %v5812_v28  ;;  %v11346_v28 = vld [vmem:[#allocation6 + $0x4e8] sm:$0xf] }
 0x57e   :  { %v5402_v27 = vpop.f32.mrf.mxu2  ;;  %7920 = vmatmul.bf16.gmra.mxu3 %v12787_v59  ;;  %v4746_v61 = vpop.f32.mrf.mxu0  ;;  %v6267_v59 = vld [vmem:[%s17258_s3 + $0xe8] sm:$0xff] }
 0x57f   :  { %v5403_v36 = vadd.f32 %v5402_v27, %v5074_v24  ;;  %v5075_v37 = vpop.f32.mrf.mxu1  ;;  %v4747_v33 = vadd.f32 %v4746_v61, %v15097_v46  ;;  %v11340_v24 = vld [vmem:[#allocation6 + $0x4fc] sm:$0xf0] }
 0x580   :  { %6449 = vperm.xlu1 %14839, %v6267_v59   ;;  %v11343_v61 = vor.u32 %v14212_v7, %v11340_v24  ;;  %v12882_v59 = vld [vmem:[#allocation8 + $0x140] sm:$0xf] }
 0x581   :  { %v5076_v16 = vadd.f32 %v5075_v37, %v4747_v33  ;;  %v5686_v46 = vmul.f32 0.2, %v5403_v36 }
 0x583   :  { %v5814_v23 = vmax.f32 %v5403_v36, %v5686_v46  ;;  %v11339_v36 = vor.u32 %v14215_v21, %v11338_v48 }
 0x586   :  { %v5404_v39 = vpop.f32.mrf.mxu2  ;;  %v4749_v45 = vpop.f32.mrf.mxu0 }
 0x587   :  { %v5405_v30 = vadd.f32 %v5404_v39, %v5076_v16  ;;  %v5078_v49 = vpop.f32.mrf.mxu1  ;;  %v4750_v20 = vadd.f32 %v4749_v45, %v15099_v56  ;;  %v14216_v56 = vld [vmem:[#allocation6 + $0x500] sm:$0xf0]  ;;  %v6264_v16 = vld [vmem:[%s17258_s3 + $0xd0] sm:$0xff] }
 0x588   :  { %v11347_v12 = vor.u32 %v14216_v56, %v11346_v28  ;;  %6434 = vperm.xlu1 %14839, %v6264_v16   ;;  %v6252_v39 = vld [vmem:[%s17258_s3 + $0x70] sm:$0xff]  ;;  %v14548_v28 = vld [vmem:[#allocation8 + $0x15c] sm:$0xf0] }
 0x589   :  { %v5687_v44 = vmul.f32 0.2, %v5405_v30  ;;  %4788 = vmatmul.bf16.gmra.mxu0 %v11311_v60  ;;  %v5079_v3 = vadd.f32 %v5078_v49, %v4750_v20  ;;  %v6250_v60 = vld [vmem:[%s17258_s3 + $0x60] sm:$0xff]  ;;  %6374 = vperm.xlu0 %14838, %v6252_v39   ;;  %v6247_v20 = vld [vmem:[%s17258_s3 + $0x48] sm:$0xff]  ;;  %v14226_v16 = vld [vmem:[#allocation6 + $0x554] sm:$0xf] }
 0x58a   :  { %5117 = vmatmul.bf16.gmra.mxu1 %v11315_v53  ;;  %6364 = vperm.xlu2 %14840, %v6250_v60   ;;  %v11396_v39 = vld [vmem:[#allocation6 + $0x56c] sm:$0xf0] }
 0x58b   :  { %v5815_v6 = vmax.f32 %v5405_v30, %v5687_v44  ;;  %5446 = vmatmul.bf16.gmra.mxu2 %v11319_v57  ;;  %v14222_v44 = vld [vmem:[#allocation6 + $0x530] sm:$0xf0] }
 0x58d   :  { %v15384_v63 = vpack.c.bf16 %v5815_v6, %v5814_v23  ;;  %v11368_v23 = vld [vmem:[#allocation6 + $0x534] sm:$0xf0] }
 0x58e   :  { %v5407_v11 = vpop.f32.mrf.mxu2  ;;  %7925 = vmatmul.bf16.gmra.mxu3 %v12819_v50  ;;  %v4751_v14 = vpop.f32.mrf.mxu0  ;;  %v14219_v50 = vld [vmem:[#allocation6 + $0x51c] sm:$0xf] }
 0x58f   :  { %v5080_v2 = vpop.f32.mrf.mxu1  ;;  %v4752_v5 = vadd.f32 %v4751_v14, %v15101_v25  ;;  %v5408_v51 = vadd.f32 %v5407_v11, %v5079_v3  ;;  %v11374_v11 = vld [vmem:[#allocation6 + $0x520] sm:$0xf]  ;;  %v14223_v14 = vld [vmem:[#allocation6 + $0x538] sm:$0xf0]  ;;  %v11367_v3 = vor.u32 %v14222_v44, %v11366_v42  ;;  %v11399_v42 = vor.u32 %v14226_v16, %v11396_v39 }
 0x590   :  { %6349 = vperm.xlu1 %14839, %v6247_v20   ;;  %v11375_v24 = vor.u32 %v14223_v14, %v11374_v11  ;;  %v14556_v20 = vld [vmem:[#allocation8 + $0x19c] sm:$0xf0] }
 0x591   :  { %v5081_v1 = vadd.f32 %v5080_v2, %v4752_v5  ;;  %v5688_v37 = vmul.f32 0.2, %v5408_v51  ;;  %v11371_v5 = vor.u32 %v14219_v50, %v11368_v23 }
 0x592   :  { %6369 = vperm.xlu2 %14840, %v6251_v58   ;;  %v12914_v58 = vld [vmem:[#allocation8 + $0x180] sm:$0xf] }
 0x593   :  { %v5816_v22 = vmax.f32 %v5408_v51, %v5688_v37  ;;  %v6248_v37 = vld [vmem:[%s17258_s3 + $0x50] sm:$0xff] }
 0x596   :  { %v5409_v27 = vpop.f32.mrf.mxu2  ;;  %v4754_v52 = vpop.f32.mrf.mxu0 }
 0x597   :  { %v5410_v33 = vadd.f32 %v5409_v27, %v5081_v1  ;;  %v5083_v25 = vpop.f32.mrf.mxu1  ;;  %v4755_v53 = vadd.f32 %v4754_v52, %v15103_v38  ;;  %v6253_v38 = vld [vmem:[%s17258_s3 + $0x78] sm:$0xff]  ;;  %v12883_v1 = vor.u32 %v14548_v28, %v12882_v59 }
 0x598   :  { %6379 = vperm.xlu0 %14838, %v6253_v38  }
 0x599   :  { %v5689_v31 = vmul.f32 0.2, %v5410_v33  ;;  %4793 = vmatmul.bf16.gmra.mxu0 %v11339_v36  ;;  %v5084_v57 = vadd.f32 %v5083_v25, %v4755_v53  ;;  %v6265_v53 = vld [vmem:[%s17258_s3 + $0xd8] sm:$0xff] }
 0x59a   :  { %5122 = vmatmul.bf16.gmra.mxu1 %v11343_v61  ;;  %v6266_v61 = vld [vmem:[%s17258_s3 + $0xe0] sm:$0xff]  ;;  %6354 = vperm.xlu2 %14840, %v6248_v37   ;;  %v11424_v37 = vld [vmem:[#allocation6 + $0x5a4] sm:$0xf0] }
 0x59b   :  { %v5817_v19 = vmax.f32 %v5410_v33, %v5689_v31  ;;  %5451 = vmatmul.bf16.gmra.mxu2 %v11347_v12  ;;  %v6244_v33 = vld [vmem:[%s17258_s3 + $0x30] sm:$0xff] }
 0x59c   :  { %6334 = vperm.xlu1 %14839, %v6244_v33   ;;  %v6263_v33 = vld [vmem:[%s17258_s3 + $0xc8] sm:$0xff] }
 0x59d   :  { %v15400_v46 = vpack.c.bf16 %v5817_v19, %v5816_v22  ;;  %v11394_v22 = vld [vmem:[#allocation6 + $0x550] sm:$0xf]  ;;  %v14229_v19 = vld [vmem:[#allocation6 + $0x568] sm:$0xf0] }
 0x59e   :  { %v5412_v30 = vpop.f32.mrf.mxu2  ;;  %7930 = vmatmul.bf16.gmra.mxu3 %v12851_v32  ;;  %v4756_v45 = vpop.f32.mrf.mxu0 }
 0x59f   :  { %v5085_v49 = vpop.f32.mrf.mxu1  ;;  %v4757_v62 = vadd.f32 %v4756_v45, %v15105_v8  ;;  %v5413_v6 = vadd.f32 %v5412_v30, %v5084_v57  ;;  %v6261_v30 = vld [vmem:[%s17258_s3 + $0xb8] sm:$0xff] }
 0x5a0   :  { %6444 = vperm.xlu0 %14838, %v6266_v61   ;;  %v11402_v45 = vld [vmem:[#allocation6 + $0x558] sm:$0xf]  ;;  %v14233_v61 = vld [vmem:[#allocation6 + $0x58c] sm:$0xf] }
 0x5a1   :  { %v5086_v8 = vadd.f32 %v5085_v49, %v4757_v62  ;;  %v5690_v48 = vmul.f32 0.2, %v5413_v6  ;;  %v14230_v49 = vld [vmem:[#allocation6 + $0x570] sm:$0xf0]  ;;  %v11395_v62 = vor.u32 %v14229_v19, %v11394_v22 }
 0x5a2   :  { %6439 = vperm.xlu2 %14840, %v6265_v53   ;;  %v11403_v38 = vor.u32 %v14230_v49, %v11402_v45 }
 0x5a3   :  { %v5818_v27 = vmax.f32 %v5413_v6, %v5690_v48  ;;  %v6262_v48 = vld [vmem:[%s17258_s3 + $0xc0] sm:$0xff] }
 0x5a4   :  { %6419 = vperm.xlu1 %14839, %v6261_v30  }
 0x5a6   :  { %v5414_v2 = vpop.f32.mrf.mxu2  ;;  %v4759_v51 = vpop.f32.mrf.mxu0 }
 0x5a7   :  { %v5415_v21 = vadd.f32 %v5414_v2, %v5086_v8  ;;  %v5088_v7 = vpop.f32.mrf.mxu1  ;;  %v4760_v52 = vadd.f32 %v4759_v51, %v15107_v17  ;;  %v6249_v17 = vld [vmem:[%s17258_s3 + $0x58] sm:$0xff]  ;;  %v12915_v2 = vor.u32 %v14556_v20, %v12914_v58  ;;  %v11450_v58 = vld [vmem:[#allocation6 + $0x5c0] sm:$0xf] }
 0x5a8   :  { %6359 = vperm.xlu0 %14838, %v6249_v17   ;;  %v14564_v17 = vld [vmem:[#allocation8 + $0x1dc] sm:$0xf0]  ;;  %v14243_v20 = vld [vmem:[#allocation6 + $0x5d8] sm:$0xf0] }
 0x5a9   :  { %v5691_v56 = vmul.f32 0.2, %v5415_v21  ;;  %4798 = vmatmul.bf16.gmra.mxu0 %v11367_v3  ;;  %v5089_v31 = vadd.f32 %v5088_v7, %v4760_v52  ;;  %v6245_v52 = vld [vmem:[%s17258_s3 + $0x38] sm:$0xff] }
 0x5aa   :  { %5127 = vmatmul.bf16.gmra.mxu1 %v11371_v5  ;;  %6424 = vperm.xlu2 %14840, %v6262_v48  }
 0x5ab   :  { %v5819_v36 = vmax.f32 %v5415_v21, %v5691_v56  ;;  %5456 = vmatmul.bf16.gmra.mxu2 %v11375_v24  ;;  %v6246_v21 = vld [vmem:[%s17258_s3 + $0x40] sm:$0xff] }
 0x5ad   :  { %v6188_v25 = vpack.c.bf16 %v5819_v36, %v5818_v27  ;;  %v14236_v36 = vld [vmem:[#allocation6 + $0x5a0] sm:$0xf0] }
 0x5ae   :  { %v5417_v12 = vpop.f32.mrf.mxu2  ;;  %7935 = vmatmul.bf16.gmra.mxu3 %v12883_v1  ;;  %v4761_v15 = vpop.f32.mrf.mxu0  ;;  %v11422_v1 = vld [vmem:[#allocation6 + $0x588] sm:$0xf] }
 0x5af   :  { %v5090_v0 = vpop.f32.mrf.mxu1  ;;  %v4762_v32 = vadd.f32 %v4761_v15, %v15109_v54  ;;  %v5418_v60 = vadd.f32 %v5417_v12, %v5089_v31  ;;  %v6241_v12 = vld [vmem:[%s17258_s3 + $0x18] sm:$0xff]  ;;  %v11430_v15 = vld [vmem:[#allocation6 + $0x590] sm:$0xf]  ;;  %v11423_v31 = vor.u32 %v14236_v36, %v11422_v1 }
 0x5b0   :  { %6344 = vperm.xlu0 %14838, %v6246_v21  }
 0x5b1   :  { %v5091_v54 = vadd.f32 %v5090_v0, %v4762_v32  ;;  %v5692_v44 = vmul.f32 0.2, %v5418_v60  ;;  %v11427_v32 = vor.u32 %v14233_v61, %v11424_v37 }
 0x5b2   :  { %6339 = vperm.xlu2 %14840, %v6245_v52  }
 0x5b3   :  { %v5820_v3 = vmax.f32 %v5418_v60, %v5692_v44  ;;  %v12946_v60 = vld [vmem:[#allocation8 + $0x1c0] sm:$0xf] }
 0x5b4   :  { %v12947_v49 = vor.u32 %v14564_v17, %v12946_v60  ;;  %v14251_v60 = vld [vmem:[#allocation6 + $0x618] sm:$0xf0] }
 0x5b6   :  { %v5419_v57 = vpop.f32.mrf.mxu2  ;;  %v4764_v23 = vpop.f32.mrf.mxu0 }
 0x5b7   :  { %v5420_v50 = vadd.f32 %v5419_v57, %v5091_v54  ;;  %v5093_v6 = vpop.f32.mrf.mxu1  ;;  %v4765_v11 = vadd.f32 %v4764_v23, %v15111_v4  ;;  %v6258_v4 = vld [vmem:[%s17258_s3 + $0xa0] sm:$0xff] }
 0x5b8   :  { %6404 = vperm.xlu1 %14839, %v6258_v4   ;;  %6429 = vperm.xlu0 %14838, %v6263_v33  }
 0x5b9   :  { %v5693_v14 = vmul.f32 0.2, %v5420_v50  ;;  %v5094_v8 = vadd.f32 %v5093_v6, %v4765_v11  ;;  %4803 = vmatmul.bf16.gmra.mxu0 %v11395_v62  ;;  %v6242_v62 = vld [vmem:[%s17258_s3 + $0x20] sm:$0xff] }
 0x5ba   :  { %5132 = vmatmul.bf16.gmra.mxu1 %v11399_v42  ;;  %6324 = vperm.xlu2 %14840, %v6242_v62   ;;  %v14240_v11 = vld [vmem:[#allocation6 + $0x5c4] sm:$0xf]  ;;  %v14580_v62 = vld [vmem:[#allocation8 + $0x25c] sm:$0xf0] }
 0x5bb   :  { %v5821_v5 = vmax.f32 %v5420_v50, %v5693_v14  ;;  %5461 = vmatmul.bf16.gmra.mxu2 %v11403_v38  ;;  %v11452_v14 = vld [vmem:[#allocation6 + $0x5dc] sm:$0xf0] }
 0x5bc   :  { %v11455_v48 = vor.u32 %v14240_v11, %v11452_v14 }
 0x5bd   :  { %v6189_v51 = vpack.c.bf16 %v5821_v5, %v5820_v3  ;;  %v14244_v3 = vld [vmem:[#allocation6 + $0x5e0] sm:$0xf0]  ;;  %v11451_v5 = vor.u32 %v14243_v20, %v11450_v58 }
 0x5be   :  { %v5422_v7 = vpop.f32.mrf.mxu2  ;;  %7940 = vmatmul.bf16.gmra.mxu3 %v12915_v2  ;;  %v4766_v59 = vpop.f32.mrf.mxu0  ;;  %v6259_v2 = vld [vmem:[%s17258_s3 + $0xa8] sm:$0xff] }
 0x5bf   :  { %v5423_v24 = vadd.f32 %v5422_v7, %v5094_v8  ;;  %8071 = vmatpush.bf16.msra.mxu3 %v6189_v51  ;;  %v5095_v28 = vpop.f32.mrf.mxu1  ;;  %v4767_v56 = vadd.f32 %v4766_v59, %v15113_v43  ;;  %v14237_v43 = vld [vmem:[#allocation6 + $0x5a8] sm:$0xf0]  ;;  %v14572_v59 = vld [vmem:[#allocation8 + $0x21c] sm:$0xf0] }
 0x5c0   :  { %6319 = vperm.xlu1 %14839, %v6241_v12   ;;  %v11431_v39 = vor.u32 %v14237_v43, %v11430_v15  ;;  %v6243_v8 = vld [vmem:[%s17258_s3 + $0x28] sm:$0xff] }
 0x5c1   :  { %v5096_v27 = vadd.f32 %v5095_v28, %v4767_v56  ;;  %v15477_v56 = vpop.f32.mrf.mxu3 }
 0x5c2   :  { %6409 = vperm.xlu2 %14840, %v6259_v2  }
 0x5c3   :  { %8072 = vmatpush.bf16.msra.mxu3 %v6188_v25  ;;  %v5694_v25 = vmul.f32 0.2, %v5423_v24 }
 0x5c5   :  { %v5822_v54 = vmax.f32 %v5423_v24, %v5694_v25  ;;  %v12978_v24 = vld [vmem:[#allocation8 + $0x200] sm:$0xf]  ;;  %v14250_v25 = vld [vmem:[#allocation6 + $0x610] sm:$0xf0] }
 0x5c6   :  { %v5424_v0 = vpop.f32.mrf.mxu2  ;;  %v4769_v19 = vpop.f32.mrf.mxu0  ;;  %v12979_v36 = vor.u32 %v14572_v59, %v12978_v24 }
 0x5c7   :  { %v5425_v22 = vadd.f32 %v5424_v0, %v5096_v27  ;;  %8073 = vmatpush.bf16.msra.mxu3 %v15400_v46  ;;  %v5098_v16 = vpop.f32.mrf.mxu1  ;;  %v4770_v53 = vadd.f32 %v4769_v19, %v15115_v55  ;;  %v6260_v46 = vld [vmem:[%s17258_s3 + $0xb0] sm:$0xff]  ;;  %v6238_v55 = vld [vmem:[%s17258_s3] sm:$0xff]  ;;  %v11480_v19 = vld [vmem:[#allocation6 + $0x614] sm:$0xf0] }
 0x5c8   :  { %6414 = vperm.xlu0 %14838, %v6260_v46   ;;  %6304 = vperm.xlu1 %14839, %v6238_v55   ;;  %v13010_v46 = vld [vmem:[#allocation8 + $0x240] sm:$0xf] }
 0x5c9   :  { %v5695_v30 = vmul.f32 0.2, %v5425_v22  ;;  %v5099_v45 = vadd.f32 %v5098_v16, %v4770_v53  ;;  %4808 = vmatmul.bf16.gmra.mxu0 %v11423_v31  ;;  %v6239_v16 = vld [vmem:[%s17258_s3 + $0x8] sm:$0xff] }
 0x5ca   :  { %5137 = vmatmul.bf16.gmra.mxu1 %v11427_v32  ;;  %v11478_v32 = vld [vmem:[#allocation6 + $0x5f8] sm:$0xf]  ;;  %v17361_v55 = vld [vmem:[#allocation16_spill] sm:$0xff] }
 0x5cb   :  { %v5823_v57 = vmax.f32 %v5425_v22, %v5695_v30  ;;  %5466 = vmatmul.bf16.gmra.mxu2 %v11431_v39  ;;  %8074 = vmatpush.bf16.msra.mxu3 %v15384_v63  ;;  %v14247_v22 = vld [vmem:[#allocation6 + $0x5fc] sm:$0xf]  ;;  %v11486_v39 = vld [vmem:[#allocation6 + $0x600] sm:$0xf]  ;;  %v11479_v53 = vor.u32 %v14250_v25, %v11478_v32 }
 0x5cc   :  { %v11483_v30 = vor.u32 %v14247_v22, %v11480_v19 }
 0x5cd   :  { %v15464_v42 = vpack.c.bf16 %v5823_v57, %v5822_v54  ;;  %v11487_v57 = vor.u32 %v14251_v60, %v11486_v39 }
 0x5ce   :  { %v5427_v44 = vpop.f32.mrf.mxu2  ;;  %7945 = vmatmul.bf16.gmra.mxu3 %v12947_v49  ;;  %v4771_v50 = vpop.f32.mrf.mxu0 }
 0x5cf   :  { %v5428_v63 = vadd.f32 %v5427_v44, %v5099_v45  ;;  %8075 = vmatpush.bf16.msra.mxu3 %v15374_v29  ;;  %v5100_v23 = vpop.f32.mrf.mxu1  ;;  %v4772_v6 = vadd.f32 %v4771_v50, %v15117_v34  ;;  %v11458_v29 = vld [vmem:[#allocation6 + $0x5c8] sm:$0xf] }
 0x5d0   :  { %6329 = vperm.xlu0 %14838, %v6243_v8   ;;  %v11459_v7 = vor.u32 %v14244_v3, %v11458_v29  ;;  %v17362_v29 = vld [vmem:[#allocation17_spill] sm:$0xff] }
 0x5d1   :  { %v5101_v38 = vadd.f32 %v5100_v23, %v4772_v6  ;;  %v5696_v21 = vmul.f32 0.2, %v5428_v63  ;;  %v13011_v6 = vor.u32 %v14580_v62, %v13010_v46  ;;  %v14265_v46 = vld [vmem:[#allocation6 + $0x688] sm:$0xf0] }
 0x5d3   :  { %8076 = vmatpush.bf16.msra.mxu3 %v15370_v18  ;;  %v5824_v61 = vmax.f32 %v5428_v63, %v5696_v21  ;;  %v14257_v21 = vld [vmem:[#allocation6 + $0x648] sm:$0xf0] }
 0x5d6   :  { %v5429_v34 = vpop.f32.mrf.mxu2  ;;  %v4774_v18 = vpop.f32.mrf.mxu0 }
 0x5d7   :  { %v5430_v4 = vadd.f32 %v5429_v34, %v5101_v38  ;;  %8077 = vmatpush.bf16.msra.mxu3 %v15366_v41  ;;  %v5103_v51 = vpop.f32.mrf.mxu1  ;;  %v4775_v28 = vadd.f32 %v4774_v18, %v15119_v47  ;;  %v6256_v41 = vld [vmem:[%s17258_s3 + $0x90] sm:$0xff] }
 0x5d8   :  { %v6240_v47 = vld [vmem:[%s17258_s3 + $0x10] sm:$0xff]  ;;  %6394 = vperm.xlu2 %14840, %v6256_v41   ;;  %v13042_v41 = vld [vmem:[#allocation8 + $0x280] sm:$0xf] }
 0x5d9   :  { %v5697_v1 = vmul.f32 0.2, %v5430_v4  ;;  %v5104_v27 = vadd.f32 %v5103_v51, %v4775_v28  ;;  %4813 = vmatmul.bf16.gmra.mxu0 %v11451_v5  ;;  %6314 = vperm.xlu0 %14838, %v6240_v47   ;;  %v11508_v18 = vld [vmem:[#allocation6 + $0x64c] sm:$0xf0]  ;;  %v11514_v51 = vld [vmem:[#allocation6 + $0x638] sm:$0xf] }
 0x5da   :  { %5142 = vmatmul.bf16.gmra.mxu1 %v11455_v48  ;;  %v11506_v48 = vld [vmem:[#allocation6 + $0x630] sm:$0xf]  ;;  %v14588_v47 = vld [vmem:[#allocation8 + $0x29c] sm:$0xf0] }
 0x5db   :  { %v5825_v37 = vmax.f32 %v5430_v4, %v5697_v1  ;;  %5471 = vmatmul.bf16.gmra.mxu2 %v11459_v7  ;;  %8078 = vmatpush.bf16.msra.mxu3 %v15358_v10  ;;  %v14254_v4 = vld [vmem:[#allocation6 + $0x634] sm:$0xf]  ;;  %v11507_v59 = vor.u32 %v14257_v21, %v11506_v48  ;;  %v17365_v21 = vld [vmem:[#allocation20_spill] sm:$0xff] }
 0x5dc   :  { %v14258_v7 = vld [vmem:[#allocation6 + $0x650] sm:$0xf0]  ;;  %v11511_v28 = vor.u32 %v14254_v4, %v11508_v18 }
 0x5dd   :  { %v15486_v33 = vpack.c.bf16 %v5825_v37, %v5824_v61  ;;  %v11515_v37 = vor.u32 %v14258_v7, %v11514_v51 }
 0x5de   :  { %v5432_v52 = vpop.f32.mrf.mxu2  ;;  %7950 = vmatmul.bf16.gmra.mxu3 %v12979_v36  ;;  %v4776_v15 = vpop.f32.mrf.mxu0 }
 0x5df   :  { %v5433_v12 = vadd.f32 %v5432_v52, %v5104_v27  ;;  %v5105_v43 = vpop.f32.mrf.mxu1  ;;  %v4777_v0 = vadd.f32 %v4776_v15, %v15121_v26  ;;  %v17363_v52 = vld [vmem:[#allocation18_spill] sm:$0xff] }
 0x5e0   :  { %6309 = vperm.xlu2 %14840, %v6239_v16  }
 0x5e1   :  { %v15489_v10 = vpop.f32.mrf.mxu3  ;;  %v5106_v31 = vadd.f32 %v5105_v43, %v4777_v0  ;;  %v5698_v45 = vmul.f32 0.2, %v5433_v12 }
 0x5e3   :  { %v5826_v38 = vmax.f32 %v5433_v12, %v5698_v45  ;;  %v11534_v45 = vld [vmem:[#allocation6 + $0x668] sm:$0xf] }
 0x5e6   :  { %v5434_v17 = vpop.f32.mrf.mxu2  ;;  %v4779_v26 = vpop.f32.mrf.mxu0 }
 0x5e7   :  { %v5435_v49 = vadd.f32 %v5434_v17, %v5106_v31  ;;  %v5108_v54 = vpop.f32.mrf.mxu1  ;;  %v4780_v44 = vadd.f32 %v4779_v26, %v17361_v55  ;;  %v13043_v31 = vor.u32 %v14588_v47, %v13042_v41  ;;  %v17364_v17 = vld [vmem:[#allocation19_spill] sm:$0xff]  ;;  %v14261_v26 = vld [vmem:[#allocation6 + $0x66c] sm:$0xf]  ;;  %v14268_v41 = vld [vmem:[#allocation6 + $0x6a4] sm:$0xf] }
 0x5e8   :  { %v11564_v47 = vld [vmem:[#allocation6 + $0x6bc] sm:$0xf0] }
 0x5e9   :  { %v5699_v63 = vmul.f32 0.2, %v5435_v49  ;;  %v15495_v50 = vpop.f32.mrf.mxu3  ;;  %v5109_v23 = vadd.f32 %v5108_v54, %v4780_v44  ;;  %4818 = vmatmul.bf16.gmra.mxu0 %v11479_v53  ;;  %v11536_v54 = vld [vmem:[#allocation6 + $0x684] sm:$0xf0] }
 0x5ea   :  { %5147 = vmatmul.bf16.gmra.mxu1 %v11483_v30 }
 0x5eb   :  { %v5827_v58 = vmax.f32 %v5435_v49, %v5699_v63  ;;  %5476 = vmatmul.bf16.gmra.mxu2 %v11487_v57  ;;  %v14264_v49 = vld [vmem:[#allocation6 + $0x680] sm:$0xf0]  ;;  %v11542_v57 = vld [vmem:[#allocation6 + $0x670] sm:$0xf]  ;;  %v11539_v63 = vor.u32 %v14261_v26, %v11536_v54 }
 0x5ec   :  { %v11535_v44 = vor.u32 %v14264_v49, %v11534_v45 }
 0x5ed   :  { %v15497_v20 = vpack.c.bf16 %v5827_v58, %v5826_v38 }
 0x5ee   :  { %v5437_v11 = vpop.f32.mrf.mxu2  ;;  %7955 = vmatmul.bf16.gmra.mxu3 %v13011_v6  ;;  %v4781_v8 = vpop.f32.mrf.mxu0 }
 0x5ef   :  { %v5438_v14 = vadd.f32 %v5437_v11, %v5109_v23  ;;  %v5110_v2 = vpop.f32.mrf.mxu1  ;;  %v4782_v3 = vadd.f32 %v4781_v8, %v17362_v29  ;;  %v11543_v11 = vor.u32 %v14265_v46, %v11542_v57  ;;  %v14596_v8 = vld [vmem:[#allocation8 + $0x2dc] sm:$0xf0]  ;;  %v17367_v46 = vld [vmem:[#allocation22_spill] sm:$0xff] }
 0x5f1   :  { %v15500_v34 = vpop.f32.mrf.mxu3  ;;  %v5111_v5 = vadd.f32 %v5110_v2, %v4782_v3  ;;  %v5700_v1 = vmul.f32 0.2, %v5438_v14 }
 0x5f3   :  { %v5828_v32 = vmax.f32 %v5438_v14, %v5700_v1  ;;  %v13074_v14 = vld [vmem:[#allocation8 + $0x2c0] sm:$0xf] }
 0x5f4   :  { %v13075_v3 = vor.u32 %v14596_v8, %v13074_v14  ;;  %v11590_v14 = vld [vmem:[#allocation6 + $0x6d8] sm:$0xf] }
 0x5f6   :  { %v5439_v24 = vpop.f32.mrf.mxu2  ;;  %v4784_v36 = vpop.f32.mrf.mxu0 }
 0x5f7   :  { %v5440_v27 = vadd.f32 %v5439_v24, %v5111_v5  ;;  %v5113_v61 = vpop.f32.mrf.mxu1  ;;  %v4785_v12 = vadd.f32 %v4784_v36, %v17363_v52  ;;  %v11562_v36 = vld [vmem:[#allocation6 + $0x6a0] sm:$0xf]  ;;  %v11570_v52 = vld [vmem:[#allocation6 + $0x6a8] sm:$0xf] }
 0x5f9   :  { %v5701_v15 = vmul.f32 0.2, %v5440_v27  ;;  %v15503_v43 = vpop.f32.mrf.mxu3  ;;  %v5114_v0 = vadd.f32 %v5113_v61, %v4785_v12  ;;  %4823 = vmatmul.bf16.gmra.mxu0 %v11507_v59  ;;  %v14272_v12 = vld [vmem:[#allocation6 + $0x6c0] sm:$0xf0] }
 0x5fa   :  { %5152 = vmatmul.bf16.gmra.mxu1 %v11511_v28  ;;  %v17366_v28 = vld [vmem:[#allocation21_spill] sm:$0xff] }
 0x5fb   :  { %v5829_v25 = vmax.f32 %v5440_v27, %v5701_v15  ;;  %5481 = vmatmul.bf16.gmra.mxu2 %v11515_v37  ;;  %v14271_v37 = vld [vmem:[#allocation6 + $0x6b8] sm:$0xf0] }
 0x5fd   :  { %v15505_v22 = vpack.c.bf16 %v5829_v25, %v5828_v32  ;;  %v11567_v32 = vor.u32 %v14268_v41, %v11564_v47  ;;  %v14612_v41 = vld [vmem:[#allocation8 + $0x35c] sm:$0xf0] }
 0x5fe   :  { %v5442_v19 = vpop.f32.mrf.mxu2  ;;  %7960 = vmatmul.bf16.gmra.mxu3 %v13043_v31  ;;  %v4786_v39 = vpop.f32.mrf.mxu0  ;;  %v11563_v31 = vor.u32 %v14271_v37, %v11562_v36  ;;  %v13138_v37 = vld [vmem:[#allocation8 + $0x340] sm:$0xf] }
 0x5ff   :  { %v5443_v16 = vadd.f32 %v5442_v19, %v5114_v0  ;;  %v5115_v60 = vpop.f32.mrf.mxu1  ;;  %v4787_v53 = vadd.f32 %v4786_v39, %v17364_v17  ;;  %v13106_v17 = vld [vmem:[#allocation8 + $0x300] sm:$0xf] }
 0x601   :  { %v15508_v30 = vpop.f32.mrf.mxu3  ;;  %v5116_v62 = vadd.f32 %v5115_v60, %v4787_v53  ;;  %v5702_v23 = vmul.f32 0.2, %v5443_v16  ;;  %v11571_v60 = vor.u32 %v14272_v12, %v11570_v52  ;;  %v14604_v53 = vld [vmem:[#allocation8 + $0x31c] sm:$0xf0]  ;;  %v13139_v12 = vor.u32 %v14612_v41, %v13138_v37 }
 0x602   :  { %v13107_v26 = vor.u32 %v14604_v53, %v13106_v17  ;;  %v17370_v17 = vld [vmem:[#allocation25_spill] sm:$0xff] }
 0x603   :  { %v5830_v5 = vmax.f32 %v5443_v16, %v5702_v23 }
 0x606   :  { %v5444_v55 = vpop.f32.mrf.mxu2  ;;  %v4789_v38 = vpop.f32.mrf.mxu0 }
 0x607   :  { %v5445_v6 = vadd.f32 %v5444_v55, %v5116_v62  ;;  %v5118_v58 = vpop.f32.mrf.mxu1  ;;  %v4790_v4 = vadd.f32 %v4789_v38, %v17365_v21  ;;  %v17368_v38 = vld [vmem:[#allocation23_spill] sm:$0xff] }
 0x608   :  { %v14279_v21 = vld [vmem:[#allocation6 + $0x6f8] sm:$0xf0] }
 0x609   :  { %v5703_v2 = vmul.f32 0.2, %v5445_v6  ;;  %v15510_v29 = vpop.f32.mrf.mxu3  ;;  %4828 = vmatmul.bf16.gmra.mxu0 %v11535_v44  ;;  %v5119_v59 = vadd.f32 %v5118_v58, %v4790_v4 }
 0x60a   :  { %5157 = vmatmul.bf16.gmra.mxu1 %v11539_v63 }
 0x60b   :  { %v5831_v48 = vmax.f32 %v5445_v6, %v5703_v2  ;;  %5486 = vmatmul.bf16.gmra.mxu2 %v11543_v11  ;;  %v14278_v2 = vld [vmem:[#allocation6 + $0x6f0] sm:$0xf0] }
 0x60d   :  { %v15513_v18 = vpack.c.bf16 %v5831_v48, %v5830_v5  ;;  %v11592_v5 = vld [vmem:[#allocation6 + $0x6f4] sm:$0xf0]  ;;  %v11598_v48 = vld [vmem:[#allocation6 + $0x6e0] sm:$0xf] }
 0x60e   :  { %v5447_v51 = vpop.f32.mrf.mxu2  ;;  %7965 = vmatmul.bf16.gmra.mxu3 %v13075_v3  ;;  %v4791_v7 = vpop.f32.mrf.mxu0  ;;  %v14275_v3 = vld [vmem:[#allocation6 + $0x6dc] sm:$0xf] }
 0x60f   :  { %v5120_v24 = vpop.f32.mrf.mxu1  ;;  %v4792_v1 = vadd.f32 %v4791_v7, %v17366_v28  ;;  %v5448_v61 = vadd.f32 %v5447_v51, %v5119_v59  ;;  %v11591_v7 = vor.u32 %v14278_v2, %v11590_v14 }
 0x611   :  { %v15516_v27 = vpop.f32.mrf.mxu3  ;;  %v5121_v15 = vadd.f32 %v5120_v24, %v4792_v1  ;;  %v5704_v25 = vmul.f32 0.2, %v5448_v61  ;;  %v11595_v24 = vor.u32 %v14275_v3, %v11592_v5 }
 0x613   :  { %v5832_v54 = vmax.f32 %v5448_v61, %v5704_v25  ;;  %v11599_v61 = vor.u32 %v14279_v21, %v11598_v48  ;;  %v13170_v48 = vld [vmem:[#allocation8 + $0x380] sm:$0xf] }
 0x614   :  { %v14620_v21 = vld [vmem:[#allocation8 + $0x39c] sm:$0xf0] }
 0x616   :  { %v5449_v0 = vpop.f32.mrf.mxu2  ;;  %v4794_v16 = vpop.f32.mrf.mxu0 }
 0x617   :  { %v5450_v19 = vadd.f32 %v5449_v0, %v5121_v15  ;;  %v5123_v39 = vpop.f32.mrf.mxu1  ;;  %v4795_v62 = vadd.f32 %v4794_v16, %v17367_v46  ;;  %v14282_v46 = vld [vmem:[#allocation6 + $0x714] sm:$0xf] }
 0x619   :  { %v5705_v45 = vmul.f32 0.2, %v5450_v19  ;;  %v15518_v49 = vpop.f32.mrf.mxu3  ;;  %4833 = vmatmul.bf16.gmra.mxu0 %v11563_v31  ;;  %v5124_v6 = vadd.f32 %v5123_v39, %v4795_v62  ;;  %v17369_v31 = vld [vmem:[#allocation24_spill] sm:$0xff]  ;;  %v11620_v62 = vld [vmem:[#allocation6 + $0x72c] sm:$0xf0] }
 0x61a   :  { %5162 = vmatmul.bf16.gmra.mxu1 %v11567_v32 }
 0x61b   :  { %v5833_v57 = vmax.f32 %v5450_v19, %v5705_v45  ;;  %5491 = vmatmul.bf16.gmra.mxu2 %v11571_v60 }
 0x61d   :  { %v15521_v55 = vpack.c.bf16 %v5833_v57, %v5832_v54  ;;  %v14285_v57 = vld [vmem:[#allocation6 + $0x728] sm:$0xf0] }
 0x61e   :  { %v5452_v44 = vpop.f32.mrf.mxu2  ;;  %7970 = vmatmul.bf16.gmra.mxu3 %v13107_v26  ;;  %v4796_v63 = vpop.f32.mrf.mxu0  ;;  %v11618_v26 = vld [vmem:[#allocation6 + $0x710] sm:$0xf] }
 0x61f   :  { %v5125_v23 = vpop.f32.mrf.mxu1  ;;  %v4797_v58 = vadd.f32 %v4796_v63, %v17368_v38  ;;  %v5453_v8 = vadd.f32 %v5452_v44, %v5124_v6  ;;  %v11626_v44 = vld [vmem:[#allocation6 + $0x718] sm:$0xf]  ;;  %v14286_v63 = vld [vmem:[#allocation6 + $0x730] sm:$0xf0]  ;;  %v11619_v38 = vor.u32 %v14285_v57, %v11618_v26  ;;  %v14293_v26 = vld [vmem:[#allocation6 + $0x768] sm:$0xf0] }
 0x620   :  { %v11627_v5 = vor.u32 %v14286_v63, %v11626_v44 }
 0x621   :  { %v15524_v11 = vpop.f32.mrf.mxu3  ;;  %v5126_v4 = vadd.f32 %v5125_v23, %v4797_v58  ;;  %v5706_v59 = vmul.f32 0.2, %v5453_v8  ;;  %v11623_v58 = vor.u32 %v14282_v46, %v11620_v62 }
 0x623   :  { %v5834_v15 = vmax.f32 %v5453_v8, %v5706_v59 }
 0x626   :  { %v5454_v51 = vpop.f32.mrf.mxu2  ;;  %v4799_v1 = vpop.f32.mrf.mxu0 }
 0x627   :  { %v5455_v28 = vadd.f32 %v5454_v51, %v5126_v4  ;;  %v5128_v36 = vpop.f32.mrf.mxu1  ;;  %v4800_v32 = vadd.f32 %v4799_v1, %v17369_v31  ;;  %v17371_v4 = vld [vmem:[#allocation26_spill] sm:$0xff] }
 0x629   :  { %v5707_v47 = vmul.f32 0.2, %v5455_v28  ;;  %v15526_v52 = vpop.f32.mrf.mxu3  ;;  %4838 = vmatmul.bf16.gmra.mxu0 %v11591_v7  ;;  %v5129_v60 = vadd.f32 %v5128_v36, %v4800_v32 }
 0x62a   :  { %5167 = vmatmul.bf16.gmra.mxu1 %v11595_v24 }
 0x62b   :  { %v5835_v0 = vmax.f32 %v5455_v28, %v5707_v47  ;;  %5496 = vmatmul.bf16.gmra.mxu2 %v11599_v61  ;;  %v13171_v28 = vor.u32 %v14620_v21, %v13170_v48 }
 0x62d   :  { %v6196_v25 = vpack.c.bf16 %v5835_v0, %v5834_v15  ;;  %v17373_v15 = vld [vmem:[#allocation27_spill] sm:$0xff] }
 0x62e   :  { %v5457_v19 = vpop.f32.mrf.mxu2  ;;  %7975 = vmatmul.bf16.gmra.mxu3 %v13139_v12  ;;  %v4801_v16 = vpop.f32.mrf.mxu0 }
 0x62f   :  { %v5130_v39 = vpop.f32.mrf.mxu1  ;;  %v4802_v53 = vadd.f32 %v4801_v16, %v17370_v17  ;;  %v5458_v54 = vadd.f32 %v5457_v19, %v5129_v60  ;;  %v11646_v19 = vld [vmem:[#allocation6 + $0x748] sm:$0xf]  ;;  %v14292_v16 = vld [vmem:[#allocation6 + $0x760] sm:$0xf0]  ;;  %v6257_v17 = vld [vmem:[%s17258_s3 + $0x98] sm:$0xff] }
 0x630   :  { %v11648_v60 = vld [vmem:[#allocation6 + $0x764] sm:$0xf0]  ;;  %6399 = vperm.xlu0 %14838, %v6257_v17   ;;  %v11647_v57 = vor.u32 %v14292_v16, %v11646_v19 }
 0x631   :  { %v15530_v45 = vpop.f32.mrf.mxu3  ;;  %v5131_v23 = vadd.f32 %v5130_v39, %v4802_v53  ;;  %v5708_v14 = vmul.f32 0.2, %v5458_v54  ;;  %v14289_v39 = vld [vmem:[#allocation6 + $0x74c] sm:$0xf]  ;;  %v11654_v53 = vld [vmem:[#allocation6 + $0x750] sm:$0xf] }
 0x632   :  { %v11651_v46 = vor.u32 %v14289_v39, %v11648_v60 }
 0x633   :  { %v5836_v1 = vmax.f32 %v5458_v54, %v5708_v14 }
 0x636   :  { %v5459_v6 = vpop.f32.mrf.mxu2  ;;  %v4804_v2 = vpop.f32.mrf.mxu0 }
 0x637   :  { %v5460_v8 = vadd.f32 %v5459_v6, %v5131_v23  ;;  %v5133_v3 = vpop.f32.mrf.mxu1  ;;  %v4805_v51 = vadd.f32 %v4804_v2, %v17371_v4  ;;  %v11655_v6 = vor.u32 %v14293_v26, %v11654_v53  ;;  %v6255_v4 = vld [vmem:[%s17258_s3 + $0x88] sm:$0xff] }
 0x638   :  { %6389 = vperm.xlu1 %14839, %v6255_v4   ;;  %v14306_v4 = vld [vmem:[#allocation6 + $0x7d0] sm:$0xf0] }
 0x639   :  { %v5709_v7 = vmul.f32 0.2, %v5460_v8  ;;  %v15533_v24 = vpop.f32.mrf.mxu3  ;;  %v5134_v59 = vadd.f32 %v5133_v3, %v4805_v51  ;;  %4843 = vmatmul.bf16.gmra.mxu0 %v11619_v38  ;;  %v14628_v38 = vld [vmem:[#allocation8 + $0x3dc] sm:$0xf0] }
 0x63a   :  { %17372 = vst [vmem:[#allocation16_spill] sm:$0xff] %v15533_v24  ;;  %5172 = vmatmul.bf16.gmra.mxu1 %v11623_v58  ;;  %v17375_v58 = vld [vmem:[#allocation28_spill] sm:$0xff] }
 0x63b   :  { %v5837_v36 = vmax.f32 %v5460_v8, %v5709_v7  ;;  %5501 = vmatmul.bf16.gmra.mxu2 %v11627_v5 }
 0x63d   :  { %v6197_v61 = vpack.c.bf16 %v5837_v36, %v5836_v1 }
 0x63e   :  { %v5462_v37 = vpop.f32.mrf.mxu2  ;;  %7980 = vmatmul.bf16.gmra.mxu3 %v13171_v28  ;;  %v4806_v47 = vpop.f32.mrf.mxu0 }
 0x63f   :  { %v5463_v41 = vadd.f32 %v5462_v37, %v5134_v59  ;;  %8240 = vmatpush.bf16.msra.mxu0 %v6197_v61  ;;  %v5135_v12 = vpop.f32.mrf.mxu1  ;;  %v4807_v0 = vadd.f32 %v4806_v47, %v17373_v15  ;;  %v14299_v47 = vld [vmem:[#allocation6 + $0x798] sm:$0xf0]  ;;  %v11676_v15 = vld [vmem:[#allocation6 + $0x79c] sm:$0xf0] }
 0x641   :  { %v15536_v31 = vpop.f32.mrf.mxu3  ;;  %v5136_v32 = vadd.f32 %v5135_v12, %v4807_v0  ;;  %v5710_v62 = vmul.f32 0.2, %v5463_v41  ;;  %v14296_v12 = vld [vmem:[#allocation6 + $0x784] sm:$0xf]  ;;  %v11682_v0 = vld [vmem:[#allocation6 + $0x788] sm:$0xf] }
 0x642   :  { %17374 = vst [vmem:[#allocation17_spill] sm:$0xff] %v15536_v31  ;;  %v11679_v39 = vor.u32 %v14296_v12, %v11676_v15 }
 0x643   :  { %8241 = vmatpush.bf16.msra.mxu0 %v6196_v25  ;;  %v13202_v25 = vld [vmem:[#allocation8 + $0x3c0] sm:$0xf]  ;;  %v5838_v48 = vmax.f32 %v5463_v41, %v5710_v62 }
 0x644   :  { %v13203_v5 = vor.u32 %v14628_v38, %v13202_v25  ;;  %v11674_v41 = vld [vmem:[#allocation6 + $0x780] sm:$0xf] }
 0x645   :  { %v11675_v16 = vor.u32 %v14299_v47, %v11674_v41 }
 0x646   :  { %v5464_v54 = vpop.f32.mrf.mxu2  ;;  %v4809_v63 = vpop.f32.mrf.mxu0 }
 0x647   :  { %v5465_v44 = vadd.f32 %v5464_v54, %v5136_v32  ;;  %8242 = vmatpush.bf16.msra.mxu0 %v15521_v55  ;;  %v5138_v23 = vpop.f32.mrf.mxu1  ;;  %v4810_v14 = vadd.f32 %v4809_v63, %v17375_v58  ;;  %v6254_v55 = vld [vmem:[%s17258_s3 + $0x80] sm:$0xff] }
 0x648   :  { %6384 = vperm.xlu0 %14838, %v6254_v55   ;;  %v14300_v32 = vld [vmem:[#allocation6 + $0x7a0] sm:$0xf0]  ;;  %v13234_v54 = vld [vmem:[#allocation8 + $0x400] sm:$0xf]  ;;  %v11702_v55 = vld [vmem:[#allocation6 + $0x7b8] sm:$0xf] }
 0x649   :  { %v5711_v8 = vmul.f32 0.2, %v5465_v44  ;;  %v15543_v2 = vpop.f32.mrf.mxu3  ;;  %v5139_v3 = vadd.f32 %v5138_v23, %v4810_v14  ;;  %4848 = vmatmul.bf16.gmra.mxu0 %v11647_v57  ;;  %v11683_v26 = vor.u32 %v14300_v32, %v11682_v0  ;;  %v14636_v57 = vld [vmem:[#allocation8 + $0x41c] sm:$0xf0] }
 0x64a   :  { %17376 = vst [vmem:[#allocation18_spill] sm:$0xff] %v15543_v2  ;;  %5177 = vmatmul.bf16.gmra.mxu1 %v11651_v46  ;;  %v17379_v46 = vld [vmem:[#allocation30_spill] sm:$0xff]  ;;  %v13235_v23 = vor.u32 %v14636_v57, %v13234_v54  ;;  %v13266_v0 = vld [vmem:[#allocation8 + $0x440] sm:$0xf] }
 0x64b   :  { %v5839_v21 = vmax.f32 %v5465_v44, %v5711_v8  ;;  %5506 = vmatmul.bf16.gmra.mxu2 %v11655_v6  ;;  %8243 = vmatpush.bf16.msra.mxu0 %v15513_v18  ;;  %v17377_v18 = vld [vmem:[#allocation29_spill] sm:$0xff]  ;;  %v14644_v32 = vld [vmem:[#allocation8 + $0x45c] sm:$0xf0] }
 0x64d   :  { %v15552_v51 = vpack.c.bf16 %v5839_v21, %v5838_v48 }
 0x64e   :  { %v5467_v7 = vpop.f32.mrf.mxu2  ;;  %7985 = vmatmul.bf16.gmra.mxu3 %v13203_v5  ;;  %v4811_v28 = vpop.f32.mrf.mxu0 }
 0x64f   :  { %v5468_v59 = vadd.f32 %v5467_v7, %v5139_v3  ;;  %8244 = vmatpush.bf16.msra.mxu0 %v15505_v22  ;;  %v5140_v1 = vpop.f32.mrf.mxu1  ;;  %v4812_v36 = vadd.f32 %v4811_v28, %v17377_v18  ;;  %v17381_v3 = vld [vmem:[#allocation31_spill] sm:$0xff] }
 0x650   :  { %v14303_v7 = vld [vmem:[#allocation6 + $0x7bc] sm:$0xf]  ;;  %v11710_v28 = vld [vmem:[#allocation6 + $0x7c0] sm:$0xf] }
 0x651   :  { %v15556_v61 = vpop.f32.mrf.mxu3  ;;  %v5141_v37 = vadd.f32 %v5140_v1, %v4812_v36  ;;  %v5712_v60 = vmul.f32 0.2, %v5468_v59  ;;  %v14307_v1 = vld [vmem:[#allocation6 + $0x7d8] sm:$0xf0] }
 0x652   :  { %17378 = vst [vmem:[#allocation19_spill] sm:$0xff] %v15556_v61  ;;  %v11711_v15 = vor.u32 %v14307_v1, %v11710_v28 }
 0x653   :  { %8245 = vmatpush.bf16.msra.mxu0 %v15497_v20  ;;  %v5840_v6 = vmax.f32 %v5468_v59, %v5712_v60  ;;  %v11704_v59 = vld [vmem:[#allocation6 + $0x7d4] sm:$0xf0] }
 0x654   :  { %v11707_v36 = vor.u32 %v14303_v7, %v11704_v59 }
 0x656   :  { %v5469_v19 = vpop.f32.mrf.mxu2  ;;  %v4814_v17 = vpop.f32.mrf.mxu0 }
 0x657   :  { %v5470_v22 = vadd.f32 %v5469_v19, %v5141_v37  ;;  %8246 = vmatpush.bf16.msra.mxu0 %v15486_v33  ;;  %v5143_v53 = vpop.f32.mrf.mxu1  ;;  %v4815_v62 = vadd.f32 %v4814_v17, %v17379_v46  ;;  %v17383_v19 = vld [vmem:[#allocation32_spill] sm:$0xff]  ;;  %v13267_v17 = vor.u32 %v14644_v32, %v13266_v0 }
 0x659   :  { %v5713_v20 = vmul.f32 0.2, %v5470_v22  ;;  %v15561_v44 = vpop.f32.mrf.mxu3  ;;  %v5144_v63 = vadd.f32 %v5143_v53, %v4815_v62  ;;  %4853 = vmatmul.bf16.gmra.mxu0 %v11675_v16 }
 0x65a   :  { %17380 = vst [vmem:[#allocation20_spill] sm:$0xff] %v15561_v44  ;;  %5182 = vmatmul.bf16.gmra.mxu1 %v11679_v39 }
 0x65b   :  { %v5841_v25 = vmax.f32 %v5470_v22, %v5713_v20  ;;  %5511 = vmatmul.bf16.gmra.mxu2 %v11683_v26  ;;  %8247 = vmatpush.bf16.msra.mxu0 %v15464_v42  ;;  %v11703_v42 = vor.u32 %v14306_v4, %v11702_v55 }
 0x65d   :  { %v15564_v33 = vpack.c.bf16 %v5841_v25, %v5840_v6 }
 0x65e   :  { %v5472_v38 = vpop.f32.mrf.mxu2  ;;  %7990 = vmatmul.bf16.gmra.mxu3 %v13235_v23  ;;  %v4816_v14 = vpop.f32.mrf.mxu0 }
 0x65f   :  { %v5473_v58 = vadd.f32 %v5472_v38, %v5144_v63  ;;  %v5145_v8 = vpop.f32.mrf.mxu1  ;;  %v4817_v5 = vadd.f32 %v4816_v14, %v17381_v3  ;;  %v17385_v63 = vld [vmem:[#allocation33_spill] sm:$0xff] }
 0x660   :  { %v11730_v38 = vld [vmem:[#allocation6 + $0x7f0] sm:$0xf]  ;;  %v14313_v14 = vld [vmem:[#allocation6 + $0x808] sm:$0xf0] }
 0x661   :  { %v15567_v48 = vpop.f32.mrf.mxu3  ;;  %v5146_v21 = vadd.f32 %v5145_v8, %v4817_v5  ;;  %v5714_v37 = vmul.f32 0.2, %v5473_v58  ;;  %v14310_v8 = vld [vmem:[#allocation6 + $0x7f4] sm:$0xf]  ;;  %v11732_v3 = vld [vmem:[#allocation6 + $0x80c] sm:$0xf0]  ;;  %v11731_v55 = vor.u32 %v14313_v14, %v11730_v38 }
 0x662   :  { %17382 = vst [vmem:[#allocation21_spill] sm:$0xff] %v15567_v48  ;;  %v11738_v5 = vld [vmem:[#allocation6 + $0x7f8] sm:$0xf]  ;;  %v11735_v4 = vor.u32 %v14310_v8, %v11732_v3  ;;  %v11766_v38 = vld [vmem:[#allocation6 + $0x830] sm:$0xf] }
 0x663   :  { %v5842_v53 = vmax.f32 %v5473_v58, %v5714_v37  ;;  %v14314_v58 = vld [vmem:[#allocation6 + $0x810] sm:$0xf0]  ;;  %v14321_v14 = vld [vmem:[#allocation6 + $0x848] sm:$0xf0] }
 0x664   :  { %v17387_v37 = vld [vmem:[#allocation34_spill] sm:$0xff] }
 0x666   :  { %v5474_v18 = vpop.f32.mrf.mxu2  ;;  %v4819_v47 = vpop.f32.mrf.mxu0 }
 0x667   :  { %v5475_v41 = vadd.f32 %v5474_v18, %v5146_v21  ;;  %v5148_v12 = vpop.f32.mrf.mxu1  ;;  %v4820_v16 = vadd.f32 %v4819_v47, %v17383_v19  ;;  %v11739_v18 = vor.u32 %v14314_v58, %v11738_v5 }
 0x669   :  { %v5715_v39 = vmul.f32 0.2, %v5475_v41  ;;  %v15570_v60 = vpop.f32.mrf.mxu3  ;;  %v5149_v22 = vadd.f32 %v5148_v12, %v4820_v16  ;;  %4858 = vmatmul.bf16.gmra.mxu0 %v11703_v42  ;;  %v13298_v42 = vld [vmem:[#allocation8 + $0x480] sm:$0xf] }
 0x66a   :  { %17384 = vst [vmem:[#allocation22_spill] sm:$0xff] %v15570_v60  ;;  %5187 = vmatmul.bf16.gmra.mxu1 %v11707_v36  ;;  %v14652_v36 = vld [vmem:[#allocation8 + $0x49c] sm:$0xf0] }
 0x66b   :  { %v5843_v26 = vmax.f32 %v5475_v41, %v5715_v39  ;;  %5516 = vmatmul.bf16.gmra.mxu2 %v11711_v15  ;;  %v13299_v0 = vor.u32 %v14652_v36, %v13298_v42 }
 0x66d   :  { %v15572_v54 = vpack.c.bf16 %v5843_v26, %v5842_v53  ;;  %v17389_v26 = vld [vmem:[#allocation35_spill] sm:$0xff] }
 0x66e   :  { %v5477_v57 = vpop.f32.mrf.mxu2  ;;  %7995 = vmatmul.bf16.gmra.mxu3 %v13267_v17  ;;  %v4821_v62 = vpop.f32.mrf.mxu0 }
 0x66f   :  { %v5478_v46 = vadd.f32 %v5477_v57, %v5149_v22  ;;  %v5150_v20 = vpop.f32.mrf.mxu1  ;;  %v4822_v23 = vadd.f32 %v4821_v62, %v17385_v63  ;;  %v14320_v63 = vld [vmem:[#allocation6 + $0x840] sm:$0xf0] }
 0x671   :  { %v15575_v6 = vpop.f32.mrf.mxu3  ;;  %v5151_v25 = vadd.f32 %v5150_v20, %v4822_v23  ;;  %v5716_v7 = vmul.f32 0.2, %v5478_v46  ;;  %v11758_v20 = vld [vmem:[#allocation6 + $0x828] sm:$0xf]  ;;  %v14317_v23 = vld [vmem:[#allocation6 + $0x82c] sm:$0xf] }
 0x672   :  { %17386 = vst [vmem:[#allocation23_spill] sm:$0xff] %v15575_v6  ;;  %v11759_v3 = vor.u32 %v14320_v63, %v11758_v20  ;;  %v14327_v63 = vld [vmem:[#allocation6 + $0x878] sm:$0xf0] }
 0x673   :  { %v5844_v32 = vmax.f32 %v5478_v46, %v5716_v7  ;;  %v11767_v7 = vor.u32 %v14321_v14, %v11766_v38  ;;  %v14328_v38 = vld [vmem:[#allocation6 + $0x880] sm:$0xf0] }
 0x676   :  { %v5479_v21 = vpop.f32.mrf.mxu2  ;;  %v4824_v28 = vpop.f32.mrf.mxu0 }
 0x677   :  { %v5480_v59 = vadd.f32 %v5479_v21, %v5151_v25  ;;  %v5153_v1 = vpop.f32.mrf.mxu1  ;;  %v4825_v41 = vadd.f32 %v4824_v28, %v17387_v37  ;;  %v11760_v25 = vld [vmem:[#allocation6 + $0x844] sm:$0xf0]  ;;  %v14660_v28 = vld [vmem:[#allocation8 + $0x4dc] sm:$0xf0] }
 0x678   :  { %v11763_v5 = vor.u32 %v14317_v23, %v11760_v25  ;;  %v14324_v23 = vld [vmem:[#allocation6 + $0x864] sm:$0xf]  ;;  %v11794_v25 = vld [vmem:[#allocation6 + $0x868] sm:$0xf] }
 0x679   :  { %v5717_v47 = vmul.f32 0.2, %v5480_v59  ;;  %v15578_v12 = vpop.f32.mrf.mxu3  ;;  %v5154_v15 = vadd.f32 %v5153_v1, %v4825_v41  ;;  %4863 = vmatmul.bf16.gmra.mxu0 %v11731_v55  ;;  %v17392_v41 = vld [vmem:[#allocation36_spill] sm:$0xff] }
 0x67a   :  { %17388 = vst [vmem:[#allocation24_spill] sm:$0xff] %v15578_v12  ;;  %5192 = vmatmul.bf16.gmra.mxu1 %v11735_v4 }
 0x67b   :  { %v5845_v19 = vmax.f32 %v5480_v59, %v5717_v47  ;;  %5521 = vmatmul.bf16.gmra.mxu2 %v11739_v18  ;;  %v13330_v59 = vld [vmem:[#allocation8 + $0x4c0] sm:$0xf] }
 0x67c   :  { %v13331_v42 = vor.u32 %v14660_v28, %v13330_v59  ;;  %v14668_v59 = vld [vmem:[#allocation8 + $0x51c] sm:$0xf0] }
 0x67d   :  { %v15580_v16 = vpack.c.bf16 %v5845_v19, %v5844_v32 }
 0x67e   :  { %v5482_v39 = vpop.f32.mrf.mxu2  ;;  %8000 = vmatmul.bf16.gmra.mxu3 %v13299_v0  ;;  %v4826_v17 = vpop.f32.mrf.mxu0 }
 0x67f   :  { %v5483_v22 = vadd.f32 %v5482_v39, %v5154_v15  ;;  %v5155_v53 = vpop.f32.mrf.mxu1  ;;  %v4827_v57 = vadd.f32 %v4826_v17, %v17389_v26  ;;  %v17393_v17 = vld [vmem:[#allocation37_spill] sm:$0xff] }
 0x681   :  { %v15583_v62 = vpop.f32.mrf.mxu3  ;;  %v5156_v46 = vadd.f32 %v5155_v53, %v4827_v57  ;;  %v5718_v58 = vmul.f32 0.2, %v5483_v22  ;;  %v11786_v57 = vld [vmem:[#allocation6 + $0x860] sm:$0xf] }
 0x682   :  { %17390 = vst [vmem:[#allocation25_spill] sm:$0xff] %v15583_v62 }
 0x683   :  { %v5846_v36 = vmax.f32 %v5483_v22, %v5718_v58  ;;  %v11788_v22 = vld [vmem:[#allocation6 + $0x87c] sm:$0xf0] }
 0x686   :  { %v5484_v8 = vpop.f32.mrf.mxu2  ;;  %v4829_v55 = vpop.f32.mrf.mxu0 }
 0x687   :  { %v5485_v21 = vadd.f32 %v5484_v8, %v5156_v46  ;;  %v5158_v4 = vpop.f32.mrf.mxu1  ;;  %v4830_v47 = vadd.f32 %v4829_v55, %v17392_v41  ;;  %v11787_v8 = vor.u32 %v14327_v63, %v11786_v57  ;;  %v17396_v41 = vld [vmem:[#allocation38_spill] sm:$0xff] }
 0x689   :  { %v5719_v1 = vmul.f32 0.2, %v5485_v21  ;;  %v15585_v18 = vpop.f32.mrf.mxu3  ;;  %4868 = vmatmul.bf16.gmra.mxu0 %v11759_v3  ;;  %v5159_v39 = vadd.f32 %v5158_v4, %v4830_v47  ;;  %v11791_v3 = vor.u32 %v14324_v23, %v11788_v22  ;;  %v11795_v4 = vor.u32 %v14328_v38, %v11794_v25  ;;  %v11814_v23 = vld [vmem:[#allocation6 + $0x898] sm:$0xf]  ;;  %v14334_v25 = vld [vmem:[#allocation6 + $0x8b0] sm:$0xf0] }
 0x68a   :  { %17391 = vst [vmem:[#allocation26_spill] sm:$0xff] %v15585_v18  ;;  %5197 = vmatmul.bf16.gmra.mxu1 %v11763_v5  ;;  %v14331_v38 = vld [vmem:[#allocation6 + $0x89c] sm:$0xf] }
 0x68b   :  { %v5847_v37 = vmax.f32 %v5485_v21, %v5719_v1  ;;  %5526 = vmatmul.bf16.gmra.mxu2 %v11767_v7  ;;  %v13362_v7 = vld [vmem:[#allocation8 + $0x500] sm:$0xf] }
 0x68d   :  { %v15588_v15 = vpack.c.bf16 %v5847_v37, %v5846_v36 }
 0x68e   :  { %v5487_v0 = vpop.f32.mrf.mxu2  ;;  %8005 = vmatmul.bf16.gmra.mxu3 %v13331_v42  ;;  %v4831_v32 = vpop.f32.mrf.mxu0  ;;  %v13363_v42 = vor.u32 %v14668_v59, %v13362_v7 }
 0x68f   :  { %v5160_v19 = vpop.f32.mrf.mxu1  ;;  %v4832_v53 = vadd.f32 %v4831_v32, %v17393_v17  ;;  %v5488_v20 = vadd.f32 %v5487_v0, %v5159_v39 }
 0x691   :  { %v15591_v26 = vpop.f32.mrf.mxu3  ;;  %v5161_v14 = vadd.f32 %v5160_v19, %v4832_v53  ;;  %v5720_v5 = vmul.f32 0.2, %v5488_v20  ;;  %v17397_v53 = vld [vmem:[#allocation39_spill] sm:$0xff] }
 0x692   :  { %17394 = vst [vmem:[#allocation27_spill] sm:$0xff] %v15591_v26 }
 0x693   :  { %v5848_v36 = vmax.f32 %v5488_v20, %v5720_v5  ;;  %v11816_v20 = vld [vmem:[#allocation6 + $0x8b4] sm:$0xf0]  ;;  %v11815_v5 = vor.u32 %v14334_v25, %v11814_v23 }
 0x696   :  { %v5489_v46 = vpop.f32.mrf.mxu2  ;;  %v4834_v21 = vpop.f32.mrf.mxu0 }
 0x697   :  { %v5490_v58 = vadd.f32 %v5489_v46, %v5161_v14  ;;  %v5163_v55 = vpop.f32.mrf.mxu1  ;;  %v4835_v47 = vadd.f32 %v4834_v21, %v17396_v41  ;;  %v11822_v14 = vld [vmem:[#allocation6 + $0x8a0] sm:$0xf]  ;;  %v14335_v46 = vld [vmem:[#allocation6 + $0x8b8] sm:$0xf0] }
 0x699   :  { %v5721_v28 = vmul.f32 0.2, %v5490_v58  ;;  %v15593_v1 = vpop.f32.mrf.mxu3  ;;  %4873 = vmatmul.bf16.gmra.mxu0 %v11787_v8  ;;  %v5164_v17 = vadd.f32 %v5163_v55, %v4835_v47  ;;  %v11823_v55 = vor.u32 %v14335_v46, %v11822_v14  ;;  %v11842_v46 = vld [vmem:[#allocation6 + $0x8d0] sm:$0xf] }
 0x69a   :  { %17395 = vst [vmem:[#allocation28_spill] sm:$0xff] %v15593_v1  ;;  %5202 = vmatmul.bf16.gmra.mxu1 %v11791_v3 }
 0x69b   :  { %v5849_v37 = vmax.f32 %v5490_v58, %v5721_v28  ;;  %5531 = vmatmul.bf16.gmra.mxu2 %v11795_v4  ;;  %v11819_v58 = vor.u32 %v14331_v38, %v11816_v20  ;;  %v13394_v28 = vld [vmem:[#allocation8 + $0x540] sm:$0xf]  ;;  %v17401_v38 = vld [vmem:[#allocation41_spill] sm:$0xff] }
 0x69d   :  { %v15596_v0 = vpack.c.bf16 %v5849_v37, %v5848_v36 }
 0x69e   :  { %v5492_v32 = vpop.f32.mrf.mxu2  ;;  %8010 = vmatmul.bf16.gmra.mxu3 %v13363_v42  ;;  %v4836_v19 = vpop.f32.mrf.mxu0  ;;  %v14676_v42 = vld [vmem:[#allocation8 + $0x55c] sm:$0xf0] }
 0x69f   :  { %v5165_v39 = vpop.f32.mrf.mxu1  ;;  %v4837_v57 = vadd.f32 %v4836_v19, %v17397_v53  ;;  %v5493_v22 = vadd.f32 %v5492_v32, %v5164_v17  ;;  %v13395_v41 = vor.u32 %v14676_v42, %v13394_v28  ;;  %v17400_v19 = vld [vmem:[#allocation40_spill] sm:$0xff] }
 0x6a1   :  { %v15599_v63 = vpop.f32.mrf.mxu3  ;;  %v5166_v8 = vadd.f32 %v5165_v39, %v4837_v57  ;;  %v5722_v21 = vmul.f32 0.2, %v5493_v22 }
 0x6a2   :  { %17398 = vst [vmem:[#allocation29_spill] sm:$0xff] %v15599_v63 }
 0x6a3   :  { %v5850_v47 = vmax.f32 %v5493_v22, %v5722_v21  ;;  %v11850_v22 = vld [vmem:[#allocation6 + $0x8d8] sm:$0xf]  ;;  %v14342_v21 = vld [vmem:[#allocation6 + $0x8f0] sm:$0xf0] }
 0x6a6   :  { %v5494_v3 = vpop.f32.mrf.mxu2  ;;  %v4839_v7 = vpop.f32.mrf.mxu0 }
 0x6a7   :  { %v5495_v4 = vadd.f32 %v5494_v3, %v5166_v8  ;;  %v5168_v59 = vpop.f32.mrf.mxu1  ;;  %v4840_v39 = vadd.f32 %v4839_v7, %v17400_v19  ;;  %v14341_v3 = vld [vmem:[#allocation6 + $0x8e8] sm:$0xf0]  ;;  %v14684_v19 = vld [vmem:[#allocation8 + $0x59c] sm:$0xf0] }
 0x6a8   :  { %v11843_v7 = vor.u32 %v14341_v3, %v11842_v46 }
 0x6a9   :  { %v5723_v36 = vmul.f32 0.2, %v5495_v4  ;;  %v15601_v37 = vpop.f32.mrf.mxu3  ;;  %4878 = vmatmul.bf16.gmra.mxu0 %v11815_v5  ;;  %v5169_v25 = vadd.f32 %v5168_v59, %v4840_v39  ;;  %v14338_v5 = vld [vmem:[#allocation6 + $0x8d4] sm:$0xf]  ;;  %v11851_v59 = vor.u32 %v14342_v21, %v11850_v22  ;;  %v17405_v21 = vld [vmem:[#allocation43_spill] sm:$0xff] }
 0x6aa   :  { %17399 = vst [vmem:[#allocation30_spill] sm:$0xff] %v15601_v37  ;;  %5207 = vmatmul.bf16.gmra.mxu1 %v11819_v58  ;;  %v11844_v58 = vld [vmem:[#allocation6 + $0x8ec] sm:$0xf0] }
 0x6ab   :  { %v5851_v32 = vmax.f32 %v5495_v4, %v5723_v36  ;;  %5536 = vmatmul.bf16.gmra.mxu2 %v11823_v55  ;;  %v11847_v28 = vor.u32 %v14338_v5, %v11844_v58  ;;  %v17403_v39 = vld [vmem:[#allocation42_spill] sm:$0xff] }
 0x6ad   :  { %v6204_v17 = vpack.c.bf16 %v5851_v32, %v5850_v47  ;;  %v13426_v32 = vld [vmem:[#allocation8 + $0x580] sm:$0xf] }
 0x6ae   :  { %v5497_v53 = vpop.f32.mrf.mxu2  ;;  %8015 = vmatmul.bf16.gmra.mxu3 %v13395_v41  ;;  %v4841_v57 = vpop.f32.mrf.mxu0 }
 0x6af   :  { %v5170_v23 = vpop.f32.mrf.mxu1  ;;  %v4842_v20 = vadd.f32 %v4841_v57, %v17401_v38  ;;  %v5498_v8 = vadd.f32 %v5497_v53, %v5169_v25 }
 0x6b1   :  { %v15605_v14 = vpop.f32.mrf.mxu3  ;;  %v5171_v4 = vadd.f32 %v5170_v23, %v4842_v20  ;;  %v5724_v42 = vmul.f32 0.2, %v5498_v8 }
 0x6b2   :  { %17402 = vst [vmem:[#allocation31_spill] sm:$0xff] %v15605_v14  ;;  %v13427_v14 = vor.u32 %v14684_v19, %v13426_v32 }
 0x6b3   :  { %v5852_v23 = vmax.f32 %v5498_v8, %v5724_v42  ;;  %v11878_v8 = vld [vmem:[#allocation6 + $0x910] sm:$0xf]  ;;  %v14349_v42 = vld [vmem:[#allocation6 + $0x928] sm:$0xf0] }
 0x6b6   :  { %v5499_v55 = vpop.f32.mrf.mxu2  ;;  %v4844_v41 = vpop.f32.mrf.mxu0 }
 0x6b7   :  { %v5500_v36 = vadd.f32 %v5499_v55, %v5171_v4  ;;  %v5173_v47 = vpop.f32.mrf.mxu1  ;;  %v4845_v57 = vadd.f32 %v4844_v41, %v17403_v39  ;;  %v11870_v39 = vld [vmem:[#allocation6 + $0x908] sm:$0xf] }
 0x6b9   :  { %v5725_v38 = vmul.f32 0.2, %v5500_v36  ;;  %v15608_v53 = vpop.f32.mrf.mxu3  ;;  %v5174_v25 = vadd.f32 %v5173_v47, %v4845_v57  ;;  %4883 = vmatmul.bf16.gmra.mxu0 %v11843_v7  ;;  %v14348_v7 = vld [vmem:[#allocation6 + $0x920] sm:$0xf0]  ;;  %v11872_v47 = vld [vmem:[#allocation6 + $0x924] sm:$0xf0] }
 0x6ba   :  { %17404 = vst [vmem:[#allocation32_spill] sm:$0xff] %v15608_v53  ;;  %5212 = vmatmul.bf16.gmra.mxu1 %v11847_v28  ;;  %v14345_v28 = vld [vmem:[#allocation6 + $0x90c] sm:$0xf] }
 0x6bb   :  { %v5853_v20 = vmax.f32 %v5500_v36, %v5725_v38  ;;  %5541 = vmatmul.bf16.gmra.mxu2 %v11851_v59  ;;  %v11871_v59 = vor.u32 %v14348_v7, %v11870_v39  ;;  %v11875_v32 = vor.u32 %v14345_v28, %v11872_v47 }
 0x6bd   :  { %v6205_v46 = vpack.c.bf16 %v5853_v20, %v5852_v23  ;;  %v13458_v23 = vld [vmem:[#allocation8 + $0x5c0] sm:$0xf] }
 0x6be   :  { %v5502_v3 = vpop.f32.mrf.mxu2  ;;  %8020 = vmatmul.bf16.gmra.mxu3 %v13427_v14  ;;  %v4846_v58 = vpop.f32.mrf.mxu0  ;;  %v14692_v20 = vld [vmem:[#allocation8 + $0x5dc] sm:$0xf0] }
 0x6bf   :  { %v5503_v5 = vadd.f32 %v5502_v3, %v5174_v25  ;;  %8409 = vmatpush.bf16.msra.mxu1 %v6205_v46  ;;  %v5175_v22 = vpop.f32.mrf.mxu1  ;;  %v4847_v4 = vadd.f32 %v4846_v58, %v17405_v21  ;;  %v11879_v25 = vor.u32 %v14349_v42, %v11878_v8  ;;  %v17407_v46 = vld [vmem:[#allocation44_spill] sm:$0xff]  ;;  %v13459_v21 = vor.u32 %v14692_v20, %v13458_v23  ;;  %v17409_v42 = vld [vmem:[#allocation45_spill] sm:$0xff] }
 0x6c1   :  { %v15611_v55 = vpop.f32.mrf.mxu3  ;;  %v5176_v41 = vadd.f32 %v5175_v22, %v4847_v4  ;;  %v5726_v14 = vmul.f32 0.2, %v5503_v5 }
 0x6c2   :  { %17406 = vst [vmem:[#allocation33_spill] sm:$0xff] %v15611_v55 }
 0x6c3   :  { %8410 = vmatpush.bf16.msra.mxu1 %v6204_v17  ;;  %v5854_v4 = vmax.f32 %v5503_v5, %v5726_v14  ;;  %v14352_v14 = vld [vmem:[#allocation6 + $0x944] sm:$0xf] }
 0x6c6   :  { %v5504_v36 = vpop.f32.mrf.mxu2  ;;  %v4849_v57 = vpop.f32.mrf.mxu0 }
 0x6c7   :  { %v5505_v19 = vadd.f32 %v5504_v36, %v5176_v41  ;;  %8411 = vmatpush.bf16.msra.mxu1 %v15596_v0  ;;  %v5178_v38 = vpop.f32.mrf.mxu1  ;;  %v4850_v3 = vadd.f32 %v4849_v57, %v17407_v46  ;;  %v6271_v0 = vld [vmem:[%s17258_s3 + $0x108] sm:$0xff] }
 0x6c8   :  { %6469 = vperm.xlu0 %14838, %v6271_v0   ;;  %v11906_v57 = vld [vmem:[#allocation6 + $0x948] sm:$0xf] }
 0x6c9   :  { %v5727_v17 = vmul.f32 0.2, %v5505_v19  ;;  %v15615_v58 = vpop.f32.mrf.mxu3  ;;  %v5179_v22 = vadd.f32 %v5178_v38, %v4850_v3  ;;  %4888 = vmatmul.bf16.gmra.mxu0 %v11871_v59  ;;  %v14356_v38 = vld [vmem:[#allocation6 + $0x960] sm:$0xf0] }
 0x6ca   :  { %17408 = vst [vmem:[#allocation34_spill] sm:$0xff] %v15615_v58  ;;  %5217 = vmatmul.bf16.gmra.mxu1 %v11875_v32  ;;  %v14355_v32 = vld [vmem:[#allocation6 + $0x958] sm:$0xf0] }
 0x6cb   :  { %v5855_v39 = vmax.f32 %v5505_v19, %v5727_v17  ;;  %5546 = vmatmul.bf16.gmra.mxu2 %v11879_v25  ;;  %8412 = vmatpush.bf16.msra.mxu1 %v15588_v15  ;;  %v11898_v15 = vld [vmem:[#allocation6 + $0x940] sm:$0xf] }
 0x6cc   :  { %v11900_v19 = vld [vmem:[#allocation6 + $0x95c] sm:$0xf0]  ;;  %v11899_v23 = vor.u32 %v14355_v32, %v11898_v15 }
 0x6cd   :  { %v15621_v41 = vpack.c.bf16 %v5855_v39, %v5854_v4  ;;  %v11903_v20 = vor.u32 %v14352_v14, %v11900_v19  ;;  %v14700_v4 = vld [vmem:[#allocation8 + $0x61c] sm:$0xf0]  ;;  %v17411_v39 = vld [vmem:[#allocation46_spill] sm:$0xff] }
 0x6ce   :  { %v5507_v7 = vpop.f32.mrf.mxu2  ;;  %8025 = vmatmul.bf16.gmra.mxu3 %v13459_v21  ;;  %v4851_v47 = vpop.f32.mrf.mxu0  ;;  %v13490_v21 = vld [vmem:[#allocation8 + $0x600] sm:$0xf] }
 0x6cf   :  { %v5508_v28 = vadd.f32 %v5507_v7, %v5179_v22  ;;  %8413 = vmatpush.bf16.msra.mxu1 %v15580_v16  ;;  %v5180_v8 = vpop.f32.mrf.mxu1  ;;  %v4852_v5 = vadd.f32 %v4851_v47, %v17409_v42  ;;  %v11907_v22 = vor.u32 %v14356_v38, %v11906_v57  ;;  %v17413_v57 = vld [vmem:[#allocation47_spill] sm:$0xff] }
 0x6d1   :  { %v15625_v36 = vpop.f32.mrf.mxu3  ;;  %v5181_v59 = vadd.f32 %v5180_v8, %v4852_v5  ;;  %v5728_v46 = vmul.f32 0.2, %v5508_v28  ;;  %v13491_v8 = vor.u32 %v14700_v4, %v13490_v21 }
 0x6d2   :  { %17410 = vst [vmem:[#allocation35_spill] sm:$0xff] %v15625_v36 }
 0x6d3   :  { %8414 = vmatpush.bf16.msra.mxu1 %v15572_v54  ;;  %v5856_v42 = vmax.f32 %v5508_v28, %v5728_v46  ;;  %v11928_v46 = vld [vmem:[#allocation6 + $0x994] sm:$0xf0] }
 0x6d6   :  { %v5509_v25 = vpop.f32.mrf.mxu2  ;;  %v4854_v3 = vpop.f32.mrf.mxu0 }
 0x6d7   :  { %v5510_v16 = vadd.f32 %v5509_v25, %v5181_v59  ;;  %8415 = vmatpush.bf16.msra.mxu1 %v15564_v33  ;;  %v5183_v17 = vpop.f32.mrf.mxu1  ;;  %v4855_v0 = vadd.f32 %v4854_v3, %v17411_v39  ;;  %v6272_v33 = vld [vmem:[%s17258_s3 + $0x110] sm:$0xff]  ;;  %v11934_v3 = vld [vmem:[#allocation6 + $0x980] sm:$0xf] }
 0x6d8   :  { %6474 = vperm.xlu1 %14839, %v6272_v33   ;;  %v17414_v33 = vld [vmem:[#allocation48_spill] sm:$0xff] }
 0x6d9   :  { %v5729_v54 = vmul.f32 0.2, %v5510_v16  ;;  %v15630_v7 = vpop.f32.mrf.mxu3  ;;  %v5184_v47 = vadd.f32 %v5183_v17, %v4855_v0  ;;  %4893 = vmatmul.bf16.gmra.mxu0 %v11899_v23  ;;  %v11926_v23 = vld [vmem:[#allocation6 + $0x978] sm:$0xf]  ;;  %v14363_v17 = vld [vmem:[#allocation6 + $0x998] sm:$0xf0] }
 0x6da   :  { %17412 = vst [vmem:[#allocation36_spill] sm:$0xff] %v15630_v7  ;;  %5222 = vmatmul.bf16.gmra.mxu1 %v11903_v20  ;;  %v14362_v20 = vld [vmem:[#allocation6 + $0x990] sm:$0xf0] }
 0x6db   :  { %v5857_v5 = vmax.f32 %v5510_v16, %v5729_v54  ;;  %5551 = vmatmul.bf16.gmra.mxu2 %v11907_v22  ;;  %8416 = vmatpush.bf16.msra.mxu1 %v15552_v51  ;;  %v14359_v51 = vld [vmem:[#allocation6 + $0x97c] sm:$0xf]  ;;  %v11927_v21 = vor.u32 %v14362_v20, %v11926_v23  ;;  %v6275_v23 = vld [vmem:[%s17258_s3 + $0x128] sm:$0xff] }
 0x6dc   :  { %v6270_v16 = vld [vmem:[%s17258_s3 + $0x100] sm:$0xff]  ;;  %v11931_v4 = vor.u32 %v14359_v51, %v11928_v46 }
 0x6dd   :  { %v15636_v59 = vpack.c.bf16 %v5857_v5, %v5856_v42  ;;  %6464 = vperm.xlu2 %14840, %v6270_v16   ;;  %v13522_v42 = vld [vmem:[#allocation8 + $0x640] sm:$0xf] }
 0x6de   :  { %v5512_v15 = vpop.f32.mrf.mxu2  ;;  %8030 = vmatmul.bf16.gmra.mxu3 %v13491_v8  ;;  %v4856_v14 = vpop.f32.mrf.mxu0  ;;  %v11935_v8 = vor.u32 %v14363_v17, %v11934_v3  ;;  %v14708_v5 = vld [vmem:[#allocation8 + $0x65c] sm:$0xf0] }
 0x6df   :  { %v5513_v32 = vadd.f32 %v5512_v15, %v5184_v47  ;;  %v5185_v19 = vpop.f32.mrf.mxu1  ;;  %v4857_v38 = vadd.f32 %v4856_v14, %v17413_v57 }
 0x6e0   :  { %6489 = vperm.xlu1 %14839, %v6275_v23   ;;  %v13554_v23 = vld [vmem:[#allocation8 + $0x680] sm:$0xf] }
 0x6e1   :  { %v15639_v25 = vpop.f32.mrf.mxu3  ;;  %v5186_v28 = vadd.f32 %v5185_v19, %v4857_v38  ;;  %v5730_v39 = vmul.f32 0.2, %v5513_v32  ;;  %v13523_v38 = vor.u32 %v14708_v5, %v13522_v42  ;;  %v14370_v42 = vld [vmem:[#allocation6 + $0x9d0] sm:$0xf0] }
 0x6e3   :  { %v5858_v16 = vmax.f32 %v5513_v32, %v5730_v39  ;;  %v17415_v32 = vld [vmem:[#allocation49_spill] sm:$0xff] }
 0x6e4   :  { %v11954_v39 = vld [vmem:[#allocation6 + $0x9b0] sm:$0xf] }
 0x6e6   :  { %v5514_v22 = vpop.f32.mrf.mxu2  ;;  %v4859_v54 = vpop.f32.mrf.mxu0 }
 0x6e7   :  { %v5515_v0 = vadd.f32 %v5514_v22, %v5186_v28  ;;  %v5188_v47 = vpop.f32.mrf.mxu1  ;;  %v4860_v15 = vadd.f32 %v4859_v54, %v17414_v33  ;;  %v6274_v28 = vld [vmem:[%s17258_s3 + $0x120] sm:$0xff]  ;;  %v14366_v54 = vld [vmem:[#allocation6 + $0x9b4] sm:$0xf] }
 0x6e8   :  { %6484 = vperm.xlu0 %14838, %v6274_v28  }
 0x6e9   :  { %v5731_v14 = vmul.f32 0.2, %v5515_v0  ;;  %v15645_v19 = vpop.f32.mrf.mxu3  ;;  %v5189_v57 = vadd.f32 %v5188_v47, %v4860_v15  ;;  %4898 = vmatmul.bf16.gmra.mxu0 %v11927_v21  ;;  %v11956_v47 = vld [vmem:[#allocation6 + $0x9cc] sm:$0xf0] }
 0x6ea   :  { %5227 = vmatmul.bf16.gmra.mxu1 %v11931_v4  ;;  %v11959_v15 = vor.u32 %v14366_v54, %v11956_v47 }
 0x6eb   :  { %v5859_v7 = vmax.f32 %v5515_v0, %v5731_v14  ;;  %5556 = vmatmul.bf16.gmra.mxu2 %v11935_v8  ;;  %v14369_v0 = vld [vmem:[#allocation6 + $0x9c8] sm:$0xf0]  ;;  %v11962_v8 = vld [vmem:[#allocation6 + $0x9b8] sm:$0xf] }
 0x6ec   :  { %v11955_v33 = vor.u32 %v14369_v0, %v11954_v39  ;;  %v11963_v28 = vor.u32 %v14370_v42, %v11962_v8  ;;  %v17419_v42 = vld [vmem:[#allocation51_spill] sm:$0xff] }
 0x6ed   :  { %v15653_v20 = vpack.c.bf16 %v5859_v7, %v5858_v16  ;;  %v6273_v7 = vld [vmem:[%s17258_s3 + $0x118] sm:$0xff] }
 0x6ee   :  { %v5517_v51 = vpop.f32.mrf.mxu2  ;;  %8035 = vmatmul.bf16.gmra.mxu3 %v13523_v38  ;;  %v4861_v3 = vpop.f32.mrf.mxu0  ;;  %6479 = vperm.xlu2 %14840, %v6273_v7  }
 0x6ef   :  { %v5518_v46 = vadd.f32 %v5517_v51, %v5189_v57  ;;  %v5190_v17 = vpop.f32.mrf.mxu1  ;;  %v4862_v22 = vadd.f32 %v4861_v3, %v17415_v32  ;;  %v14716_v51 = vld [vmem:[#allocation8 + $0x69c] sm:$0xf0]  ;;  %v17417_v3 = vld [vmem:[#allocation50_spill] sm:$0xff] }
 0x6f0   :  { %v13555_v36 = vor.u32 %v14716_v51, %v13554_v23 }
 0x6f1   :  { %v15656_v21 = vpop.f32.mrf.mxu3  ;;  %v5191_v4 = vadd.f32 %v5190_v17, %v4862_v22  ;;  %v5732_v14 = vmul.f32 0.2, %v5518_v46 }
 0x6f2   :  { %17416 = vst [vmem:[#allocation37_spill] sm:$0xff] %v15656_v21 }
 0x6f3   :  { %v5860_v7 = vmax.f32 %v5518_v46, %v5732_v14  ;;  %v11982_v46 = vld [vmem:[#allocation6 + $0x9e8] sm:$0xf]  ;;  %v14376_v14 = vld [vmem:[#allocation6 + $0xa00] sm:$0xf0] }
 0x6f6   :  { %v5519_v5 = vpop.f32.mrf.mxu2  ;;  %v4864_v38 = vpop.f32.mrf.mxu0 }
 0x6f7   :  { %v5520_v57 = vadd.f32 %v5519_v5, %v5191_v4  ;;  %v5193_v16 = vpop.f32.mrf.mxu1  ;;  %v4865_v17 = vadd.f32 %v4864_v38, %v17417_v3  ;;  %v6277_v4 = vld [vmem:[%s17258_s3 + $0x138] sm:$0xff]  ;;  %v11984_v38 = vld [vmem:[#allocation6 + $0xa04] sm:$0xf0] }
 0x6f8   :  { %6499 = vperm.xlu0 %14838, %v6277_v4   ;;  %v13586_v4 = vld [vmem:[#allocation8 + $0x6c0] sm:$0xf] }
 0x6f9   :  { %v5733_v32 = vmul.f32 0.2, %v5520_v57  ;;  %v15662_v22 = vpop.f32.mrf.mxu3  ;;  %v5194_v21 = vadd.f32 %v5193_v16, %v4865_v17  ;;  %4903 = vmatmul.bf16.gmra.mxu0 %v11955_v33  ;;  %v6280_v16 = vld [vmem:[%s17258_s3 + $0x150] sm:$0xff] }
 0x6fa   :  { %17418 = vst [vmem:[#allocation38_spill] sm:$0xff] %v15662_v22  ;;  %5232 = vmatmul.bf16.gmra.mxu1 %v11959_v15 }
 0x6fb   :  { %v5861_v58 = vmax.f32 %v5520_v57, %v5733_v32  ;;  %5561 = vmatmul.bf16.gmra.mxu2 %v11963_v28  ;;  %v14373_v57 = vld [vmem:[#allocation6 + $0x9ec] sm:$0xf] }
 0x6fc   :  { %v14377_v28 = vld [vmem:[#allocation6 + $0xa08] sm:$0xf0]  ;;  %v11987_v23 = vor.u32 %v14373_v57, %v11984_v38 }
 0x6fd   :  { %v15667_v39 = vpack.c.bf16 %v5861_v58, %v5860_v7  ;;  %v11990_v58 = vld [vmem:[#allocation6 + $0x9f0] sm:$0xf] }
 0x6fe   :  { %v5522_v0 = vpop.f32.mrf.mxu2  ;;  %8040 = vmatmul.bf16.gmra.mxu3 %v13555_v36  ;;  %v4866_v47 = vpop.f32.mrf.mxu0  ;;  %v11991_v7 = vor.u32 %v14377_v28, %v11990_v58 }
 0x6ff   :  { %v5523_v54 = vadd.f32 %v5522_v0, %v5194_v21  ;;  %v5195_v8 = vpop.f32.mrf.mxu1  ;;  %v4867_v5 = vadd.f32 %v4866_v47, %v17419_v42  ;;  %v11983_v21 = vor.u32 %v14376_v14, %v11982_v46  ;;  %v14724_v0 = vld [vmem:[#allocation8 + $0x6dc] sm:$0xf0]  ;;  %v6300_v46 = vld [vmem:[%s17258_s3 + $0x1f0] sm:$0xff] }
 0x700   :  { %6514 = vperm.xlu0 %14838, %v6280_v16   ;;  %v13587_v42 = vor.u32 %v14724_v0, %v13586_v4  ;;  %v17422_v14 = vld [vmem:[#allocation52_spill] sm:$0xff] }
 0x701   :  { %v15670_v33 = vpop.f32.mrf.mxu3  ;;  %v5196_v15 = vadd.f32 %v5195_v8, %v4867_v5  ;;  %v5734_v51 = vmul.f32 0.2, %v5523_v54  ;;  %v12012_v0 = vld [vmem:[#allocation6 + $0xa3c] sm:$0xf0] }
 0x702   :  { %17420 = vst [vmem:[#allocation39_spill] sm:$0xff] %v15670_v33 }
 0x703   :  { %v5862_v5 = vmax.f32 %v5523_v54, %v5734_v51  ;;  %v12010_v51 = vld [vmem:[#allocation6 + $0xa20] sm:$0xf] }
 0x706   :  { %v5524_v36 = vpop.f32.mrf.mxu2  ;;  %v4869_v17 = vpop.f32.mrf.mxu0 }
 0x707   :  { %v5525_v3 = vadd.f32 %v5524_v36, %v5196_v15  ;;  %v5198_v32 = vpop.f32.mrf.mxu1  ;;  %v6278_v15 = vld [vmem:[%s17258_s3 + $0x140] sm:$0xff]  ;;  %v4870_v57 = vadd.f32 %v4869_v17, %v17422_v14  ;;  %v17423_v36 = vld [vmem:[#allocation53_spill] sm:$0xff] }
 0x708   :  { %6614 = vperm.xlu0 %14838, %v6300_v46   ;;  %6504 = vperm.xlu1 %14839, %v6278_v15   ;;  %v6276_v17 = vld [vmem:[%s17258_s3 + $0x130] sm:$0xff] }
 0x709   :  { %v5735_v47 = vmul.f32 0.2, %v5525_v3  ;;  %v15675_v8 = vpop.f32.mrf.mxu3  ;;  %4908 = vmatmul.bf16.gmra.mxu0 %v11983_v21  ;;  %v5199_v28 = vadd.f32 %v5198_v32, %v4870_v57  ;;  %6494 = vperm.xlu2 %14840, %v6276_v17  }
 0x70a   :  { %17421 = vst [vmem:[#allocation40_spill] sm:$0xff] %v15675_v8  ;;  %5237 = vmatmul.bf16.gmra.mxu1 %v11987_v23 }
 0x70b   :  { %v5863_v33 = vmax.f32 %v5525_v3, %v5735_v47  ;;  %5566 = vmatmul.bf16.gmra.mxu2 %v11991_v7  ;;  %v14383_v3 = vld [vmem:[#allocation6 + $0xa38] sm:$0xf0]  ;;  %v14380_v7 = vld [vmem:[#allocation6 + $0xa24] sm:$0xf]  ;;  %v12018_v47 = vld [vmem:[#allocation6 + $0xa28] sm:$0xf] }
 0x70c   :  { %v12011_v46 = vor.u32 %v14383_v3, %v12010_v51  ;;  %v12015_v15 = vor.u32 %v14380_v7, %v12012_v0 }
 0x70d   :  { %v15684_v38 = vpack.c.bf16 %v5863_v33, %v5862_v5  ;;  %v6283_v33 = vld [vmem:[%s17258_s3 + $0x168] sm:$0xff] }
 0x70e   :  { %v5527_v16 = vpop.f32.mrf.mxu2  ;;  %8045 = vmatmul.bf16.gmra.mxu3 %v13587_v42  ;;  %v4871_v58 = vpop.f32.mrf.mxu0  ;;  %v14384_v42 = vld [vmem:[#allocation6 + $0xa40] sm:$0xf0] }
 0x70f   :  { %v5200_v54 = vpop.f32.mrf.mxu1  ;;  %v4872_v21 = vadd.f32 %v4871_v58, %v17423_v36  ;;  %v5528_v4 = vadd.f32 %v5527_v16, %v5199_v28  ;;  %v12019_v28 = vor.u32 %v14384_v42, %v12018_v47  ;;  %v13618_v36 = vld [vmem:[#allocation8 + $0x700] sm:$0xf] }
 0x710   :  { %6529 = vperm.xlu0 %14838, %v6283_v33   ;;  %v17427_v42 = vld [vmem:[#allocation55_spill] sm:$0xff] }
 0x711   :  { %v15687_v23 = vpop.f32.mrf.mxu3  ;;  %v5201_v32 = vadd.f32 %v5200_v54, %v4872_v21  ;;  %v5736_v14 = vmul.f32 0.2, %v5528_v4  ;;  %v6281_v54 = vld [vmem:[%s17258_s3 + $0x158] sm:$0xff] }
 0x712   :  { %17424 = vst [vmem:[#allocation41_spill] sm:$0xff] %v15687_v23  ;;  %v14732_v23 = vld [vmem:[#allocation8 + $0x71c] sm:$0xf0]  ;;  %v17426_v21 = vld [vmem:[#allocation54_spill] sm:$0xff] }
 0x713   :  { %v13619_v55 = vor.u32 %v14732_v23, %v13618_v36  ;;  %v5864_v53 = vmax.f32 %v5528_v4, %v5736_v14  ;;  %v14390_v4 = vld [vmem:[#allocation6 + $0xa70] sm:$0xf0]  ;;  %v6279_v14 = vld [vmem:[%s17258_s3 + $0x148] sm:$0xff] }
 0x714   :  { %6509 = vperm.xlu2 %14840, %v6279_v14  }
 0x716   :  { %v5529_v5 = vpop.f32.mrf.mxu2  ;;  %v4874_v16 = vpop.f32.mrf.mxu0 }
 0x717   :  { %v5530_v57 = vadd.f32 %v5529_v5, %v5201_v32  ;;  %v5203_v58 = vpop.f32.mrf.mxu1  ;;  %v4875_v51 = vadd.f32 %v4874_v16, %v17426_v21 }
 0x718   :  { %6519 = vperm.xlu0 %14838, %v6281_v54  }
 0x719   :  { %v5737_v8 = vmul.f32 0.2, %v5530_v57  ;;  %v15695_v22 = vpop.f32.mrf.mxu3  ;;  %4913 = vmatmul.bf16.gmra.mxu0 %v12011_v46  ;;  %v5204_v47 = vadd.f32 %v5203_v58, %v4875_v51  ;;  %v14387_v46 = vld [vmem:[#allocation6 + $0xa5c] sm:$0xf] }
 0x71a   :  { %17425 = vst [vmem:[#allocation42_spill] sm:$0xff] %v15695_v22  ;;  %5242 = vmatmul.bf16.gmra.mxu1 %v12015_v15  ;;  %v12040_v15 = vld [vmem:[#allocation6 + $0xa74] sm:$0xf0] }
 0x71b   :  { %v5865_v33 = vmax.f32 %v5530_v57, %v5737_v8  ;;  %5571 = vmatmul.bf16.gmra.mxu2 %v12019_v28  ;;  %v12038_v8 = vld [vmem:[#allocation6 + $0xa58] sm:$0xf]  ;;  %v14391_v57 = vld [vmem:[#allocation6 + $0xa78] sm:$0xf0]  ;;  %v12043_v58 = vor.u32 %v14387_v46, %v12040_v15 }
 0x71c   :  { %v12039_v28 = vor.u32 %v14390_v4, %v12038_v8 }
 0x71d   :  { %v15701_v3 = vpack.c.bf16 %v5865_v33, %v5864_v53  ;;  %v12046_v53 = vld [vmem:[#allocation6 + $0xa60] sm:$0xf] }
 0x71e   :  { %v5532_v7 = vpop.f32.mrf.mxu2  ;;  %8050 = vmatmul.bf16.gmra.mxu3 %v13619_v55  ;;  %v4876_v0 = vpop.f32.mrf.mxu0  ;;  %v12047_v51 = vor.u32 %v14391_v57, %v12046_v53  ;;  %v17431_v57 = vld [vmem:[#allocation57_spill] sm:$0xff] }
 0x71f   :  { %v5205_v17 = vpop.f32.mrf.mxu1  ;;  %v4877_v32 = vadd.f32 %v4876_v0, %v17427_v42  ;;  %v5533_v5 = vadd.f32 %v5532_v7, %v5204_v47  ;;  %v13650_v0 = vld [vmem:[#allocation8 + $0x740] sm:$0xf] }
 0x720   :  { %v14740_v7 = vld [vmem:[#allocation8 + $0x75c] sm:$0xf0] }
 0x721   :  { %v15704_v23 = vpop.f32.mrf.mxu3  ;;  %v5206_v55 = vadd.f32 %v5205_v17, %v4877_v32  ;;  %v5738_v36 = vmul.f32 0.2, %v5533_v5  ;;  %v6284_v17 = vld [vmem:[%s17258_s3 + $0x170] sm:$0xff]  ;;  %v17430_v32 = vld [vmem:[#allocation56_spill] sm:$0xff] }
 0x722   :  { %17428 = vst [vmem:[#allocation43_spill] sm:$0xff] %v15704_v23  ;;  %v13651_v23 = vor.u32 %v14740_v7, %v13650_v0  ;;  %6534 = vperm.xlu1 %14839, %v6284_v17  }
 0x723   :  { %v5866_v22 = vmax.f32 %v5533_v5, %v5738_v36  ;;  %v12066_v5 = vld [vmem:[#allocation6 + $0xa90] sm:$0xf] }
 0x724   :  { %v12068_v36 = vld [vmem:[#allocation6 + $0xaac] sm:$0xf0] }
 0x726   :  { %v5534_v16 = vpop.f32.mrf.mxu2  ;;  %v4879_v54 = vpop.f32.mrf.mxu0 }
 0x727   :  { %v5535_v33 = vadd.f32 %v5534_v16, %v5206_v55  ;;  %v5208_v21 = vpop.f32.mrf.mxu1  ;;  %v4880_v8 = vadd.f32 %v4879_v54, %v17430_v32  ;;  %v14398_v54 = vld [vmem:[#allocation6 + $0xab0] sm:$0xf0] }
 0x729   :  { %v5739_v47 = vmul.f32 0.2, %v5535_v33  ;;  %v15709_v42 = vpop.f32.mrf.mxu3  ;;  %4918 = vmatmul.bf16.gmra.mxu0 %v12039_v28  ;;  %v5209_v53 = vadd.f32 %v5208_v21, %v4880_v8  ;;  %v14397_v28 = vld [vmem:[#allocation6 + $0xaa8] sm:$0xf0] }
 0x72a   :  { %17429 = vst [vmem:[#allocation44_spill] sm:$0xff] %v15709_v42  ;;  %5247 = vmatmul.bf16.gmra.mxu1 %v12043_v58  ;;  %v14394_v58 = vld [vmem:[#allocation6 + $0xa94] sm:$0xf]  ;;  %v12067_v7 = vor.u32 %v14397_v28, %v12066_v5  ;;  %v6282_v28 = vld [vmem:[%s17258_s3 + $0x160] sm:$0xff] }
 0x72b   :  { %v5867_v37 = vmax.f32 %v5535_v33, %v5739_v47  ;;  %5576 = vmatmul.bf16.gmra.mxu2 %v12047_v51  ;;  %v6294_v51 = vld [vmem:[%s17258_s3 + $0x1c0] sm:$0xff]  ;;  %v12071_v47 = vor.u32 %v14394_v58, %v12068_v36  ;;  %v6293_v5 = vld [vmem:[%s17258_s3 + $0x1b8] sm:$0xff] }
 0x72c   :  { %6584 = vperm.xlu0 %14838, %v6294_v51  }
 0x72d   :  { %v6212_v4 = vpack.c.bf16 %v5867_v37, %v5866_v22  ;;  %v6285_v37 = vld [vmem:[%s17258_s3 + $0x178] sm:$0xff] }
 0x72e   :  { %v5537_v46 = vpop.f32.mrf.mxu2  ;;  %8055 = vmatmul.bf16.gmra.mxu3 %v13651_v23  ;;  %v4881_v15 = vpop.f32.mrf.mxu0  ;;  %v6301_v22 = vld [vmem:[%s17258_s3 + $0x1f8] sm:$0xff]  ;;  %6539 = vperm.xlu2 %14840, %v6285_v37  }
 0x72f   :  { %v5210_v14 = vpop.f32.mrf.mxu1  ;;  %v4882_v55 = vadd.f32 %v4881_v15, %v17431_v57  ;;  %v5538_v33 = vadd.f32 %v5537_v46, %v5209_v53  ;;  %v12074_v23 = vld [vmem:[#allocation6 + $0xa98] sm:$0xf]  ;;  %6619 = vperm.xlu1 %14839, %v6301_v22   ;;  %v13682_v53 = vld [vmem:[#allocation8 + $0x780] sm:$0xf] }
 0x730   :  { %v12075_v15 = vor.u32 %v14398_v54, %v12074_v23  ;;  %v14748_v57 = vld [vmem:[#allocation8 + $0x79c] sm:$0xf0]  ;;  %v12094_v54 = vld [vmem:[#allocation6 + $0xac8] sm:$0xf] }
 0x731   :  { %v15716_v16 = vpop.f32.mrf.mxu3  ;;  %v5211_v21 = vadd.f32 %v5210_v14, %v4882_v55  ;;  %v5740_v17 = vmul.f32 0.2, %v5538_v33  ;;  %v13683_v14 = vor.u32 %v14748_v57, %v13682_v53  ;;  %v17435_v37 = vld [vmem:[#allocation59_spill] sm:$0xff] }
 0x732   :  { %17432 = vst [vmem:[#allocation45_spill] sm:$0xff] %v15716_v16  ;;  %v17433_v16 = vld [vmem:[#allocation58_spill] sm:$0xff] }
 0x733   :  { %v5868_v55 = vmax.f32 %v5538_v33, %v5740_v17  ;;  %v6288_v17 = vld [vmem:[%s17258_s3 + $0x190] sm:$0xff] }
 0x734   :  { %6579 = vperm.xlu0 %14838, %v6293_v5  }
 0x736   :  { %v5539_v0 = vpop.f32.mrf.mxu2  ;;  %v4884_v8 = vpop.f32.mrf.mxu0  ;;  %6524 = vperm.xlu2 %14840, %v6282_v28   ;;  %v13714_v28 = vld [vmem:[#allocation8 + $0x7c0] sm:$0xf] }
 0x737   :  { %v5540_v32 = vadd.f32 %v5539_v0, %v5211_v21  ;;  %v5213_v46 = vpop.f32.mrf.mxu1  ;;  %v4885_v42 = vadd.f32 %v4884_v8, %v17433_v16  ;;  %v14404_v0 = vld [vmem:[#allocation6 + $0xae0] sm:$0xf0]  ;;  %v12102_v8 = vld [vmem:[#allocation6 + $0xad0] sm:$0xf] }
 0x738   :  { %v12095_v53 = vor.u32 %v14404_v0, %v12094_v54 }
 0x739   :  { %v5741_v63 = vmul.f32 0.2, %v5540_v32  ;;  %v15728_v1 = vpop.f32.mrf.mxu3  ;;  %v5214_v26 = vadd.f32 %v5213_v46, %v4885_v42  ;;  %4923 = vmatmul.bf16.gmra.mxu0 %v12067_v7  ;;  %v6298_v42 = vld [vmem:[%s17258_s3 + $0x1e0] sm:$0xff]  ;;  %v14401_v7 = vld [vmem:[#allocation6 + $0xacc] sm:$0xf] }
 0x73a   :  { %17434 = vst [vmem:[#allocation46_spill] sm:$0xff] %v15728_v1  ;;  %5252 = vmatmul.bf16.gmra.mxu1 %v12071_v47  ;;  %6604 = vperm.xlu1 %14839, %v6298_v42   ;;  %v12096_v47 = vld [vmem:[#allocation6 + $0xae4] sm:$0xf0]  ;;  %v14405_v46 = vld [vmem:[#allocation6 + $0xae8] sm:$0xf0] }
 0x73b   :  { %v5869_v51 = vmax.f32 %v5540_v32, %v5741_v63  ;;  %5581 = vmatmul.bf16.gmra.mxu2 %v12075_v15  ;;  %v6296_v32 = vld [vmem:[%s17258_s3 + $0x1d0] sm:$0xff]  ;;  %v12103_v5 = vor.u32 %v14405_v46, %v12102_v8  ;;  %v14756_v42 = vld [vmem:[#allocation8 + $0x7dc] sm:$0xf0] }
 0x73c   :  { %6554 = vperm.xlu0 %14838, %v6288_v17   ;;  %v17439_v8 = vld [vmem:[#allocation61_spill] sm:$0xff] }
 0x73d   :  { %v6213_v16 = vpack.c.bf16 %v5869_v51, %v5868_v55 }
 0x73e   :  { %v5542_v58 = vpop.f32.mrf.mxu2  ;;  %8060 = vmatmul.bf16.gmra.mxu3 %v13683_v14  ;;  %v4886_v36 = vpop.f32.mrf.mxu0 }
 0x73f   :  { %v5543_v63 = vadd.f32 %v5542_v58, %v5214_v26  ;;  %8578 = vmatpush.bf16.msra.mxu2 %v6213_v16  ;;  %v5215_v33 = vpop.f32.mrf.mxu1  ;;  %v4887_v22 = vadd.f32 %v4886_v36, %v17435_v37  ;;  %v6299_v26 = vld [vmem:[%s17258_s3 + $0x1e8] sm:$0xff] }
 0x740   :  { %6609 = vperm.xlu2 %14840, %v6299_v26   ;;  %v17437_v16 = vld [vmem:[#allocation60_spill] sm:$0xff] }
 0x741   :  { %v15740_v23 = vpop.f32.mrf.mxu3  ;;  %v5216_v21 = vadd.f32 %v5215_v33, %v4887_v22  ;;  %v5742_v57 = vmul.f32 0.2, %v5543_v63  ;;  %v13715_v22 = vor.u32 %v14756_v42, %v13714_v28 }
 0x742   :  { %17436 = vst [vmem:[#allocation47_spill] sm:$0xff] %v15740_v23  ;;  %6594 = vperm.xlu1 %14839, %v6296_v32  }
 0x743   :  { %8579 = vmatpush.bf16.msra.mxu2 %v6212_v4  ;;  %v12099_v4 = vor.u32 %v14401_v7, %v12096_v47  ;;  %v5870_v54 = vmax.f32 %v5543_v63, %v5742_v57  ;;  %v6295_v7 = vld [vmem:[%s17258_s3 + $0x1c8] sm:$0xff] }
 0x744   :  { %v14408_v57 = vld [vmem:[#allocation6 + $0xb04] sm:$0xf] }
 0x746   :  { %v5544_v15 = vpop.f32.mrf.mxu2  ;;  %v4889_v55 = vpop.f32.mrf.mxu0 }
 0x747   :  { %v5545_v14 = vadd.f32 %v5544_v15, %v5216_v21  ;;  %8580 = vmatpush.bf16.msra.mxu2 %v15701_v3  ;;  %v5218_v51 = vpop.f32.mrf.mxu1  ;;  %v4890_v58 = vadd.f32 %v4889_v55, %v17437_v16  ;;  %v6287_v3 = vld [vmem:[%s17258_s3 + $0x188] sm:$0xff]  ;;  %v6297_v21 = vld [vmem:[%s17258_s3 + $0x1d8] sm:$0xff]  ;;  %v6292_v55 = vld [vmem:[%s17258_s3 + $0x1b0] sm:$0xff] }
 0x748   :  { %6549 = vperm.xlu0 %14838, %v6287_v3   ;;  %6599 = vperm.xlu2 %14840, %v6297_v21   ;;  %v12724_v3 = vld [vmem:[#allocation8 + $0x20] sm:$0xf0]  ;;  %v17441_v21 = vld [vmem:[#allocation62_spill] sm:$0xff] }
 0x749   :  { %v5743_v36 = vmul.f32 0.2, %v5545_v14  ;;  %v15753_v33 = vpop.f32.mrf.mxu3  ;;  %v5219_v37 = vadd.f32 %v5218_v51, %v4890_v58  ;;  %4928 = vmatmul.bf16.gmra.mxu0 %v12095_v53  ;;  %v12122_v53 = vld [vmem:[#allocation6 + $0xb00] sm:$0xf] }
 0x74a   :  { %17438 = vst [vmem:[#allocation48_spill] sm:$0xff] %v15753_v33  ;;  %5257 = vmatmul.bf16.gmra.mxu1 %v12099_v4  ;;  %6589 = vperm.xlu1 %14839, %v6295_v7   ;;  %v14411_v4 = vld [vmem:[#allocation6 + $0xb18] sm:$0xf0] }
 0x74b   :  { %v5871_v0 = vmax.f32 %v5545_v14, %v5743_v36  ;;  %5586 = vmatmul.bf16.gmra.mxu2 %v12103_v5  ;;  %v12124_v14 = vld [vmem:[#allocation6 + $0xb1c] sm:$0xf0]  ;;  %v14412_v5 = vld [vmem:[#allocation6 + $0xb20] sm:$0xf0]  ;;  %v12123_v42 = vor.u32 %v14411_v4, %v12122_v53 }
 0x74c   :  { %8581 = vmatpush.bf16.msra.mxu2 %v15684_v38  ;;  %v6290_v51 = vld [vmem:[%s17258_s3 + $0x1a0] sm:$0xff]  ;;  %v12127_v16 = vor.u32 %v14408_v57, %v12124_v14 }
 0x74d   :  { %v15765_v47 = vpack.c.bf16 %v5871_v0, %v5870_v54  ;;  %v14504_v0 = vld [vmem:[#allocation8 + $0x4] sm:$0xf] }
 0x74e   :  { %v5547_v63 = vpop.f32.mrf.mxu2  ;;  %8065 = vmatmul.bf16.gmra.mxu3 %v13715_v22  ;;  %v4891_v26 = vpop.f32.mrf.mxu0 }
 0x74f   :  { %v5548_v17 = vadd.f32 %v5547_v63, %v5219_v37  ;;  %v5220_v32 = vpop.f32.mrf.mxu1  ;;  %v4892_v46 = vadd.f32 %v4891_v26, %v17439_v8 }
 0x750   :  { %8582 = vmatpush.bf16.msra.mxu2 %v15667_v39  ;;  %v12130_v39 = vld [vmem:[#allocation6 + $0xb08] sm:$0xf]  ;;  %6574 = vperm.xlu2 %14840, %v6292_v55   ;;  %v17443_v55 = vld [vmem:[#allocation63_spill] sm:$0xff] }
 0x751   :  { %v15769_v15 = vpop.f32.mrf.mxu3  ;;  %v5221_v38 = vadd.f32 %v5220_v32, %v4892_v46  ;;  %v5744_v58 = vmul.f32 0.2, %v5548_v17  ;;  %v12131_v54 = vor.u32 %v14412_v5, %v12130_v39  ;;  %v12727_v32 = vor.u32 %v14504_v0, %v12724_v3 }
 0x752   :  { %17440 = vst [vmem:[#allocation49_spill] sm:$0xff] %v15769_v15  ;;  %6564 = vperm.xlu1 %14839, %v6290_v51   ;;  %v12290_v15 = vld [vmem:[#allocation6 + $0xc50] sm:$0xf] }
 0x753   :  { %v5872_v8 = vmax.f32 %v5548_v17, %v5744_v58  ;;  %v12152_v58 = vld [vmem:[#allocation6 + $0xb54] sm:$0xf0] }
 0x754   :  { %8583 = vmatpush.bf16.msra.mxu2 %v15653_v20 }
 0x756   :  { %v5549_v28 = vpop.f32.mrf.mxu2  ;;  %v4894_v37 = vpop.f32.mrf.mxu0 }
 0x757   :  { %v5550_v36 = vadd.f32 %v5549_v28, %v5221_v38  ;;  %v5223_v22 = vpop.f32.mrf.mxu1  ;;  %v4895_v7 = vadd.f32 %v4894_v37, %v17441_v21  ;;  %v6291_v38 = vld [vmem:[%s17258_s3 + $0x1a8] sm:$0xff]  ;;  %v12150_v28 = vld [vmem:[#allocation6 + $0xb38] sm:$0xf]  ;;  %v14419_v37 = vld [vmem:[#allocation6 + $0xb58] sm:$0xf0] }
 0x758   :  { %8584 = vmatpush.bf16.msra.mxu2 %v15636_v59  ;;  %v6289_v59 = vld [vmem:[%s17258_s3 + $0x198] sm:$0xff]  ;;  %6569 = vperm.xlu2 %14840, %v6291_v38  }
 0x759   :  { %v5745_v63 = vmul.f32 0.2, %v5550_v36  ;;  %v15780_v20 = vpop.f32.mrf.mxu3  ;;  %v5224_v26 = vadd.f32 %v5223_v22, %v4895_v7  ;;  %4933 = vmatmul.bf16.gmra.mxu0 %v12123_v42  ;;  %v14418_v42 = vld [vmem:[#allocation6 + $0xb50] sm:$0xf0] }
 0x75a   :  { %17442 = vst [vmem:[#allocation50_spill] sm:$0xff] %v15780_v20  ;;  %5262 = vmatmul.bf16.gmra.mxu1 %v12127_v16  ;;  %6559 = vperm.xlu1 %14839, %v6289_v59   ;;  %v14415_v16 = vld [vmem:[#allocation6 + $0xb3c] sm:$0xf] }
 0x75b   :  { %v5873_v46 = vmax.f32 %v5550_v36, %v5745_v63  ;;  %5591 = vmatmul.bf16.gmra.mxu2 %v12131_v54  ;;  %v12158_v36 = vld [vmem:[#allocation6 + $0xb40] sm:$0xf]  ;;  %v12151_v54 = vor.u32 %v14418_v42, %v12150_v28  ;;  %v12155_v0 = vor.u32 %v14415_v16, %v12152_v58 }
 0x75c   :  { %8585 = vmatpush.bf16.msra.mxu2 %v15621_v41  ;;  %v6286_v41 = vld [vmem:[%s17258_s3 + $0x180] sm:$0xff] }
 0x75d   :  { %v15789_v53 = vpack.c.bf16 %v5873_v46, %v5872_v8  ;;  %v12756_v8 = vld [vmem:[#allocation8 + $0x60] sm:$0xf0] }
 0x75e   :  { %v5552_v4 = vpop.f32.mrf.mxu2  ;;  %8079 = vmatmul.bf16.vlgmr.msra.gmra.mxu3 %v12727_v32  ;;  %v4896_v17 = vpop.f32.mrf.mxu0  ;;  %v14512_v32 = vld [vmem:[#allocation8 + $0x44] sm:$0xf] }
 0x75f   :  { %v5553_v57 = vadd.f32 %v5552_v4, %v5224_v26  ;;  %v5225_v14 = vpop.f32.mrf.mxu1  ;;  %v4897_v51 = vadd.f32 %v4896_v17, %v17443_v55  ;;  %v12159_v26 = vor.u32 %v14419_v37, %v12158_v36  ;;  %v17445_v46 = vld [vmem:[#allocation64_spill] sm:$0xff] }
 0x760   :  { %6544 = vperm.xlu2 %14840, %v6286_v41   ;;  %v17447_v41 = vld [vmem:[#allocation65_spill] sm:$0xff] }
 0x761   :  { %v15792_v39 = vpop.f32.mrf.mxu3  ;;  %v5226_v5 = vadd.f32 %v5225_v14, %v4897_v51  ;;  %v5746_v3 = vmul.f32 0.2, %v5553_v57  ;;  %v12759_v14 = vor.u32 %v14512_v32, %v12756_v8  ;;  %v12186_v32 = vld [vmem:[#allocation6 + $0xb78] sm:$0xf] }
 0x762   :  { %17444 = vst [vmem:[#allocation51_spill] sm:$0xff] %v15792_v39 }
 0x763   :  { %v5874_v55 = vmax.f32 %v5553_v57, %v5746_v3  ;;  %v14426_v57 = vld [vmem:[#allocation6 + $0xb90] sm:$0xf0] }
 0x766   :  { %v5554_v22 = vpop.f32.mrf.mxu2  ;;  %v4899_v7 = vpop.f32.mrf.mxu0 }
 0x767   :  { %v5555_v21 = vadd.f32 %v5554_v22, %v5226_v5  ;;  %v5228_v63 = vpop.f32.mrf.mxu1  ;;  %v4900_v38 = vadd.f32 %v4899_v7, %v17445_v46  ;;  %v12178_v7 = vld [vmem:[#allocation6 + $0xb70] sm:$0xf] }
 0x769   :  { %v5747_v59 = vmul.f32 0.2, %v5555_v21  ;;  %v15798_v4 = vpop.f32.mrf.mxu3  ;;  %v5229_v17 = vadd.f32 %v5228_v63, %v4900_v38  ;;  %4938 = vmatmul.bf16.gmra.mxu0 %v12151_v54  ;;  %v14425_v63 = vld [vmem:[#allocation6 + $0xb88] sm:$0xf0]  ;;  %v14422_v54 = vld [vmem:[#allocation6 + $0xb74] sm:$0xf] }
 0x76a   :  { %17446 = vst [vmem:[#allocation52_spill] sm:$0xff] %v15798_v4  ;;  %5267 = vmatmul.bf16.gmra.mxu1 %v12155_v0  ;;  %v12180_v0 = vld [vmem:[#allocation6 + $0xb8c] sm:$0xf0] }
 0x76b   :  { %v5875_v51 = vmax.f32 %v5555_v21, %v5747_v59  ;;  %5596 = vmatmul.bf16.gmra.mxu2 %v12159_v26  ;;  %v12179_v21 = vor.u32 %v14425_v63, %v12178_v7  ;;  %v12183_v26 = vor.u32 %v14422_v54, %v12180_v0 }
 0x76d   :  { %v15800_v28 = vpack.c.bf16 %v5875_v51, %v5874_v55  ;;  %v12788_v55 = vld [vmem:[#allocation8 + $0xa0] sm:$0xf0]  ;;  %v17449_v51 = vld [vmem:[#allocation66_spill] sm:$0xff] }
 0x76e   :  { %v5557_v5 = vpop.f32.mrf.mxu2  ;;  %8084 = vmatmul.bf16.gmra.mxu3 %v12759_v14  ;;  %v4901_v16 = vpop.f32.mrf.mxu0  ;;  %v14520_v14 = vld [vmem:[#allocation8 + $0x84] sm:$0xf] }
 0x76f   :  { %v5558_v42 = vadd.f32 %v5557_v5, %v5229_v17  ;;  %v5230_v58 = vpop.f32.mrf.mxu1  ;;  %v4902_v36 = vadd.f32 %v4901_v16, %v17447_v41  ;;  %v12187_v17 = vor.u32 %v14426_v57, %v12186_v32  ;;  %v17451_v32 = vld [vmem:[#allocation67_spill] sm:$0xff] }
 0x771   :  { %v15803_v37 = vpop.f32.mrf.mxu3  ;;  %v5231_v22 = vadd.f32 %v5230_v58, %v4902_v36  ;;  %v5748_v8 = vmul.f32 0.2, %v5558_v42  ;;  %v12791_v36 = vor.u32 %v14520_v14, %v12788_v55  ;;  %v14433_v14 = vld [vmem:[#allocation6 + $0xbc8] sm:$0xf0] }
 0x772   :  { %17448 = vst [vmem:[#allocation53_spill] sm:$0xff] %v15803_v37 }
 0x773   :  { %v5876_v37 = vmax.f32 %v5558_v42, %v5748_v8 }
 0x776   :  { %v5559_v3 = vpop.f32.mrf.mxu2  ;;  %v4904_v38 = vpop.f32.mrf.mxu0 }
 0x777   :  { %v5560_v46 = vadd.f32 %v5559_v3, %v5231_v22  ;;  %v5233_v59 = vpop.f32.mrf.mxu1  ;;  %v4905_v5 = vadd.f32 %v4904_v38, %v17449_v51  ;;  %v12206_v38 = vld [vmem:[#allocation6 + $0xba8] sm:$0xf]  ;;  %v14432_v51 = vld [vmem:[#allocation6 + $0xbc0] sm:$0xf0] }
 0x779   :  { %v5749_v16 = vmul.f32 0.2, %v5560_v46  ;;  %v15806_v58 = vpop.f32.mrf.mxu3  ;;  %v5234_v41 = vadd.f32 %v5233_v59, %v4905_v5  ;;  %4943 = vmatmul.bf16.gmra.mxu0 %v12179_v21  ;;  %v14429_v59 = vld [vmem:[#allocation6 + $0xbac] sm:$0xf]  ;;  %v12208_v21 = vld [vmem:[#allocation6 + $0xbc4] sm:$0xf0] }
 0x77a   :  { %17450 = vst [vmem:[#allocation54_spill] sm:$0xff] %v15806_v58  ;;  %5272 = vmatmul.bf16.gmra.mxu1 %v12183_v26  ;;  %v12214_v26 = vld [vmem:[#allocation6 + $0xbb0] sm:$0xf] }
 0x77b   :  { %v5877_v4 = vmax.f32 %v5560_v46, %v5749_v16  ;;  %5601 = vmatmul.bf16.gmra.mxu2 %v12187_v17  ;;  %v12207_v46 = vor.u32 %v14432_v51, %v12206_v38  ;;  %v12215_v16 = vor.u32 %v14433_v14, %v12214_v26  ;;  %v17455_v14 = vld [vmem:[#allocation69_spill] sm:$0xff] }
 0x77d   :  { %v15808_v7 = vpack.c.bf16 %v5877_v4, %v5876_v37  ;;  %v12211_v4 = vor.u32 %v14429_v59, %v12208_v21 }
 0x77e   :  { %v5562_v22 = vpop.f32.mrf.mxu2  ;;  %8089 = vmatmul.bf16.gmra.mxu3 %v12791_v36  ;;  %v4906_v54 = vpop.f32.mrf.mxu0  ;;  %v12820_v36 = vld [vmem:[#allocation8 + $0xe0] sm:$0xf0] }
 0x77f   :  { %v5563_v63 = vadd.f32 %v5562_v22, %v5234_v41  ;;  %v5235_v0 = vpop.f32.mrf.mxu1  ;;  %v4907_v57 = vadd.f32 %v4906_v54, %v17451_v32  ;;  %v14528_v41 = vld [vmem:[#allocation8 + $0xc4] sm:$0xf] }
 0x780   :  { %v12823_v32 = vor.u32 %v14528_v41, %v12820_v36  ;;  %v14436_v41 = vld [vmem:[#allocation6 + $0xbe4] sm:$0xf] }
 0x781   :  { %v15811_v3 = vpop.f32.mrf.mxu3  ;;  %v5236_v42 = vadd.f32 %v5235_v0, %v4907_v57  ;;  %v5750_v37 = vmul.f32 0.2, %v5563_v63  ;;  %v17454_v0 = vld [vmem:[#allocation68_spill] sm:$0xff] }
 0x782   :  { %17452 = vst [vmem:[#allocation55_spill] sm:$0xff] %v15811_v3 }
 0x783   :  { %v5878_v3 = vmax.f32 %v5563_v63, %v5750_v37  ;;  %v12236_v63 = vld [vmem:[#allocation6 + $0xbfc] sm:$0xf0]  ;;  %v12242_v37 = vld [vmem:[#allocation6 + $0xbe8] sm:$0xf] }
 0x786   :  { %v5564_v8 = vpop.f32.mrf.mxu2  ;;  %v4909_v55 = vpop.f32.mrf.mxu0 }
 0x787   :  { %v5565_v17 = vadd.f32 %v5564_v8, %v5236_v42  ;;  %v5238_v5 = vpop.f32.mrf.mxu1  ;;  %v4910_v57 = vadd.f32 %v4909_v55, %v17454_v0 }
 0x789   :  { %v5751_v22 = vmul.f32 0.2, %v5565_v17  ;;  %v15813_v54 = vpop.f32.mrf.mxu3  ;;  %4948 = vmatmul.bf16.gmra.mxu0 %v12207_v46  ;;  %v5239_v26 = vadd.f32 %v5238_v5, %v4910_v57  ;;  %v14536_v57 = vld [vmem:[#allocation8 + $0x104] sm:$0xf] }
 0x78a   :  { %17453 = vst [vmem:[#allocation56_spill] sm:$0xff] %v15813_v54  ;;  %5277 = vmatmul.bf16.gmra.mxu1 %v12211_v4  ;;  %v12234_v54 = vld [vmem:[#allocation6 + $0xbe0] sm:$0xf]  ;;  %v14439_v4 = vld [vmem:[#allocation6 + $0xbf8] sm:$0xf0] }
 0x78b   :  { %v5879_v58 = vmax.f32 %v5565_v17, %v5751_v22  ;;  %5606 = vmatmul.bf16.gmra.mxu2 %v12215_v16  ;;  %v14440_v17 = vld [vmem:[#allocation6 + $0xc00] sm:$0xf0] }
 0x78c   :  { %v12243_v5 = vor.u32 %v14440_v17, %v12242_v37  ;;  %v17459_v17 = vld [vmem:[#allocation71_spill] sm:$0xff] }
 0x78d   :  { %v15816_v38 = vpack.c.bf16 %v5879_v58, %v5878_v3  ;;  %v12235_v58 = vor.u32 %v14439_v4, %v12234_v54  ;;  %v12239_v3 = vor.u32 %v14436_v41, %v12236_v63 }
 0x78e   :  { %v5567_v51 = vpop.f32.mrf.mxu2  ;;  %8094 = vmatmul.bf16.gmra.mxu3 %v12823_v32  ;;  %v4911_v59 = vpop.f32.mrf.mxu0 }
 0x78f   :  { %v5240_v21 = vpop.f32.mrf.mxu1  ;;  %v4912_v42 = vadd.f32 %v4911_v59, %v17455_v14  ;;  %v5568_v46 = vadd.f32 %v5567_v51, %v5239_v26  ;;  %v12852_v59 = vld [vmem:[#allocation8 + $0x120] sm:$0xf0] }
 0x790   :  { %v12855_v51 = vor.u32 %v14536_v57, %v12852_v59  ;;  %v14443_v57 = vld [vmem:[#allocation6 + $0xc1c] sm:$0xf] }
 0x791   :  { %v15819_v8 = vpop.f32.mrf.mxu3  ;;  %v5241_v16 = vadd.f32 %v5240_v21, %v4912_v42  ;;  %v5752_v36 = vmul.f32 0.2, %v5568_v46  ;;  %v17458_v21 = vld [vmem:[#allocation70_spill] sm:$0xff] }
 0x792   :  { %17456 = vst [vmem:[#allocation57_spill] sm:$0xff] %v15819_v8 }
 0x793   :  { %v5880_v26 = vmax.f32 %v5568_v46, %v5752_v36  ;;  %v12264_v46 = vld [vmem:[#allocation6 + $0xc34] sm:$0xf0]  ;;  %v12270_v36 = vld [vmem:[#allocation6 + $0xc20] sm:$0xf] }
 0x794   :  { %v12267_v59 = vor.u32 %v14443_v57, %v12264_v46 }
 0x796   :  { %v5569_v55 = vpop.f32.mrf.mxu2  ;;  %v4914_v32 = vpop.f32.mrf.mxu0 }
 0x797   :  { %v5570_v22 = vadd.f32 %v5569_v55, %v5241_v16  ;;  %v5243_v0 = vpop.f32.mrf.mxu1  ;;  %v4915_v42 = vadd.f32 %v4914_v32, %v17458_v21 }
 0x799   :  { %v5753_v14 = vmul.f32 0.2, %v5570_v22  ;;  %v15821_v8 = vpop.f32.mrf.mxu3  ;;  %4953 = vmatmul.bf16.gmra.mxu0 %v12235_v58  ;;  %v5244_v37 = vadd.f32 %v5243_v0, %v4915_v42  ;;  %v14544_v42 = vld [vmem:[#allocation8 + $0x144] sm:$0xf] }
 0x79a   :  { %17457 = vst [vmem:[#allocation58_spill] sm:$0xff] %v15821_v8  ;;  %5282 = vmatmul.bf16.gmra.mxu1 %v12239_v3  ;;  %v12262_v8 = vld [vmem:[#allocation6 + $0xc18] sm:$0xf]  ;;  %v14446_v3 = vld [vmem:[#allocation6 + $0xc30] sm:$0xf0] }
 0x79b   :  { %v5881_v39 = vmax.f32 %v5570_v22, %v5753_v14  ;;  %5611 = vmatmul.bf16.gmra.mxu2 %v12243_v5  ;;  %v14447_v22 = vld [vmem:[#allocation6 + $0xc38] sm:$0xf0] }
 0x79c   :  { %v12271_v0 = vor.u32 %v14447_v22, %v12270_v36  ;;  %v17463_v36 = vld [vmem:[#allocation73_spill] sm:$0xff] }
 0x79d   :  { %v15824_v54 = vpack.c.bf16 %v5881_v39, %v5880_v26  ;;  %v12263_v39 = vor.u32 %v14446_v3, %v12262_v8 }
 0x79e   :  { %v5572_v4 = vpop.f32.mrf.mxu2  ;;  %8099 = vmatmul.bf16.gmra.mxu3 %v12855_v51  ;;  %v4916_v41 = vpop.f32.mrf.mxu0 }
 0x79f   :  { %v5245_v63 = vpop.f32.mrf.mxu1  ;;  %v4917_v16 = vadd.f32 %v4916_v41, %v17459_v17  ;;  %v5573_v58 = vadd.f32 %v5572_v4, %v5244_v37  ;;  %v12884_v41 = vld [vmem:[#allocation8 + $0x160] sm:$0xf0] }
 0x7a0   :  { %v12887_v4 = vor.u32 %v14544_v42, %v12884_v41  ;;  %v12292_v42 = vld [vmem:[#allocation6 + $0xc6c] sm:$0xf0] }
 0x7a1   :  { %v15827_v55 = vpop.f32.mrf.mxu3  ;;  %v5246_v5 = vadd.f32 %v5245_v63, %v4917_v16  ;;  %v5754_v14 = vmul.f32 0.2, %v5573_v58  ;;  %v17462_v63 = vld [vmem:[#allocation72_spill] sm:$0xff] }
 0x7a2   :  { %17460 = vst [vmem:[#allocation59_spill] sm:$0xff] %v15827_v55 }
 0x7a3   :  { %v5882_v37 = vmax.f32 %v5573_v58, %v5754_v14  ;;  %v12298_v58 = vld [vmem:[#allocation6 + $0xc58] sm:$0xf]  ;;  %v14454_v14 = vld [vmem:[#allocation6 + $0xc70] sm:$0xf0] }
 0x7a6   :  { %v5574_v32 = vpop.f32.mrf.mxu2  ;;  %v4919_v26 = vpop.f32.mrf.mxu0 }
 0x7a7   :  { %v5575_v51 = vadd.f32 %v5574_v32, %v5246_v5  ;;  %v5248_v21 = vpop.f32.mrf.mxu1  ;;  %v4920_v16 = vadd.f32 %v4919_v26, %v17462_v63  ;;  %v14552_v63 = vld [vmem:[#allocation8 + $0x184] sm:$0xf] }
 0x7a9   :  { %v5755_v17 = vmul.f32 0.2, %v5575_v51  ;;  %v15829_v55 = vpop.f32.mrf.mxu3  ;;  %4958 = vmatmul.bf16.gmra.mxu0 %v12263_v39  ;;  %v5249_v5 = vadd.f32 %v5248_v21, %v4920_v16  ;;  %v14453_v39 = vld [vmem:[#allocation6 + $0xc68] sm:$0xf0]  ;;  %v12299_v21 = vor.u32 %v14454_v14, %v12298_v58  ;;  %v12916_v16 = vld [vmem:[#allocation8 + $0x1a0] sm:$0xf0] }
 0x7aa   :  { %17461 = vst [vmem:[#allocation60_spill] sm:$0xff] %v15829_v55  ;;  %5287 = vmatmul.bf16.gmra.mxu1 %v12267_v59  ;;  %v14450_v59 = vld [vmem:[#allocation6 + $0xc54] sm:$0xf]  ;;  %v12291_v26 = vor.u32 %v14453_v39, %v12290_v15  ;;  %v12919_v33 = vor.u32 %v14552_v63, %v12916_v16  ;;  %v17467_v14 = vld [vmem:[#allocation75_spill] sm:$0xff] }
 0x7ab   :  { %v5883_v20 = vmax.f32 %v5575_v51, %v5755_v17  ;;  %5616 = vmatmul.bf16.gmra.mxu2 %v12271_v0 }
 0x7ad   :  { %v6220_v8 = vpack.c.bf16 %v5883_v20, %v5882_v37  ;;  %v12295_v20 = vor.u32 %v14450_v59, %v12292_v42 }
 0x7ae   :  { %v5577_v3 = vpop.f32.mrf.mxu2  ;;  %8104 = vmatmul.bf16.gmra.mxu3 %v12887_v4  ;;  %v4921_v57 = vpop.f32.mrf.mxu0 }
 0x7af   :  { %v5250_v46 = vpop.f32.mrf.mxu1  ;;  %v4922_v22 = vadd.f32 %v4921_v57, %v17463_v36  ;;  %v5578_v55 = vadd.f32 %v5577_v3, %v5249_v5  ;;  %v17465_v57 = vld [vmem:[#allocation74_spill] sm:$0xff] }
 0x7b1   :  { %v15833_v32 = vpop.f32.mrf.mxu3  ;;  %v5251_v51 = vadd.f32 %v5250_v46, %v4922_v22  ;;  %v5756_v41 = vmul.f32 0.2, %v5578_v55 }
 0x7b2   :  { %17464 = vst [vmem:[#allocation61_spill] sm:$0xff] %v15833_v32 }
 0x7b3   :  { %v5884_v46 = vmax.f32 %v5578_v55, %v5756_v41  ;;  %v12326_v55 = vld [vmem:[#allocation6 + $0xc90] sm:$0xf] }
 0x7b6   :  { %v5579_v0 = vpop.f32.mrf.mxu2  ;;  %v4924_v4 = vpop.f32.mrf.mxu0 }
 0x7b7   :  { %v5580_v17 = vadd.f32 %v5579_v0, %v5251_v51  ;;  %v5253_v37 = vpop.f32.mrf.mxu1  ;;  %v4925_v36 = vadd.f32 %v4924_v4, %v17465_v57  ;;  %v12318_v57 = vld [vmem:[#allocation6 + $0xc88] sm:$0xf] }
 0x7b9   :  { %v5757_v32 = vmul.f32 0.2, %v5580_v17  ;;  %v15836_v3 = vpop.f32.mrf.mxu3  ;;  %v5254_v5 = vadd.f32 %v5253_v37, %v4925_v36  ;;  %4963 = vmatmul.bf16.gmra.mxu0 %v12291_v26  ;;  %v14460_v26 = vld [vmem:[#allocation6 + $0xca0] sm:$0xf0]  ;;  %v12320_v37 = vld [vmem:[#allocation6 + $0xca4] sm:$0xf0] }
 0x7ba   :  { %17466 = vst [vmem:[#allocation62_spill] sm:$0xff] %v15836_v3  ;;  %5292 = vmatmul.bf16.gmra.mxu1 %v12295_v20  ;;  %v14457_v20 = vld [vmem:[#allocation6 + $0xc8c] sm:$0xf] }
 0x7bb   :  { %v5885_v22 = vmax.f32 %v5580_v17, %v5757_v32  ;;  %5621 = vmatmul.bf16.gmra.mxu2 %v12299_v21  ;;  %v14461_v32 = vld [vmem:[#allocation6 + $0xca8] sm:$0xf0]  ;;  %v12319_v17 = vor.u32 %v14460_v26, %v12318_v57  ;;  %v12323_v21 = vor.u32 %v14457_v20, %v12320_v37 }
 0x7bd   :  { %v6221_v15 = vpack.c.bf16 %v5885_v22, %v5884_v46  ;;  %v14560_v46 = vld [vmem:[#allocation8 + $0x1c4] sm:$0xf] }
 0x7be   :  { %v5582_v39 = vpop.f32.mrf.mxu2  ;;  %8109 = vmatmul.bf16.gmra.mxu3 %v12919_v33  ;;  %v4926_v42 = vpop.f32.mrf.mxu0  ;;  %v12948_v22 = vld [vmem:[#allocation8 + $0x1e0] sm:$0xf0] }
 0x7bf   :  { %v5583_v59 = vadd.f32 %v5582_v39, %v5254_v5  ;;  %8747 = vmatpush.bf16.msrb.mxu3 %v6221_v15  ;;  %v5255_v58 = vpop.f32.mrf.mxu1  ;;  %v4927_v51 = vadd.f32 %v4926_v42, %v17467_v14  ;;  %v12327_v5 = vor.u32 %v14461_v32, %v12326_v55  ;;  %v17469_v15 = vld [vmem:[#allocation76_spill] sm:$0xff]  ;;  %v12951_v14 = vor.u32 %v14560_v46, %v12948_v22  ;;  %v17471_v55 = vld [vmem:[#allocation77_spill] sm:$0xff] }
 0x7c1   :  { %v15839_v0 = vpop.f32.mrf.mxu3  ;;  %v5256_v4 = vadd.f32 %v5255_v58, %v4927_v51  ;;  %v5758_v33 = vmul.f32 0.2, %v5583_v59 }
 0x7c2   :  { %17468 = vst [vmem:[#allocation63_spill] sm:$0xff] %v15839_v0 }
 0x7c3   :  { %8748 = vmatpush.bf16.msrb.mxu3 %v6220_v8  ;;  %v5886_v51 = vmax.f32 %v5583_v59, %v5758_v33  ;;  %v14467_v59 = vld [vmem:[#allocation6 + $0xcd8] sm:$0xf0]  ;;  %v14464_v33 = vld [vmem:[#allocation6 + $0xcc4] sm:$0xf] }
 0x7c6   :  { %v5584_v41 = vpop.f32.mrf.mxu2  ;;  %v4929_v16 = vpop.f32.mrf.mxu0 }
 0x7c7   :  { %v5585_v63 = vadd.f32 %v5584_v41, %v5256_v4  ;;  %8749 = vmatpush.bf16.msrb.mxu3 %v15824_v54  ;;  %v5258_v36 = vpop.f32.mrf.mxu1  ;;  %v4930_v39 = vadd.f32 %v4929_v16, %v17469_v15  ;;  %v14468_v16 = vld [vmem:[#allocation6 + $0xce0] sm:$0xf0] }
 0x7c9   :  { %v5759_v8 = vmul.f32 0.2, %v5585_v63  ;;  %v15843_v42 = vpop.f32.mrf.mxu3  ;;  %v5259_v58 = vadd.f32 %v5258_v36, %v4930_v39  ;;  %4968 = vmatmul.bf16.gmra.mxu0 %v12319_v17 }
 0x7ca   :  { %17470 = vst [vmem:[#allocation64_spill] sm:$0xff] %v15843_v42  ;;  %5297 = vmatmul.bf16.gmra.mxu1 %v12323_v21  ;;  %v12346_v21 = vld [vmem:[#allocation6 + $0xcc0] sm:$0xf] }
 0x7cb   :  { %v5887_v57 = vmax.f32 %v5585_v63, %v5759_v8  ;;  %5626 = vmatmul.bf16.gmra.mxu2 %v12327_v5  ;;  %8750 = vmatpush.bf16.msrb.mxu3 %v15816_v38  ;;  %v12348_v38 = vld [vmem:[#allocation6 + $0xcdc] sm:$0xf0]  ;;  %v12354_v63 = vld [vmem:[#allocation6 + $0xcc8] sm:$0xf]  ;;  %v12347_v5 = vor.u32 %v14467_v59, %v12346_v21 }
 0x7cc   :  { %v12351_v46 = vor.u32 %v14464_v33, %v12348_v38  ;;  %v12355_v8 = vor.u32 %v14468_v16, %v12354_v63 }
 0x7cd   :  { %v15846_v54 = vpack.c.bf16 %v5887_v57, %v5886_v51  ;;  %v17473_v51 = vld [vmem:[#allocation78_spill] sm:$0xff] }
 0x7ce   :  { %v5587_v4 = vpop.f32.mrf.mxu2  ;;  %8114 = vmatmul.bf16.gmra.mxu3 %v12951_v14  ;;  %v4931_v20 = vpop.f32.mrf.mxu0  ;;  %v12980_v14 = vld [vmem:[#allocation8 + $0x220] sm:$0xf0] }
 0x7cf   :  { %v5588_v26 = vadd.f32 %v5587_v4, %v5259_v58  ;;  %8751 = vmatpush.bf16.msrb.mxu3 %v15808_v7  ;;  %v5260_v37 = vpop.f32.mrf.mxu1  ;;  %v4932_v32 = vadd.f32 %v4931_v20, %v17471_v55  ;;  %v14568_v58 = vld [vmem:[#allocation8 + $0x204] sm:$0xf] }
 0x7d1   :  { %v15850_v41 = vpop.f32.mrf.mxu3  ;;  %v5261_v17 = vadd.f32 %v5260_v37, %v4932_v32  ;;  %v5760_v22 = vmul.f32 0.2, %v5588_v26  ;;  %v12983_v37 = vor.u32 %v14568_v58, %v12980_v14 }
 0x7d2   :  { %17472 = vst [vmem:[#allocation65_spill] sm:$0xff] %v15850_v41 }
 0x7d3   :  { %8752 = vmatpush.bf16.msrb.mxu3 %v15800_v28  ;;  %v5888_v55 = vmax.f32 %v5588_v26, %v5760_v22  ;;  %v12376_v26 = vld [vmem:[#allocation6 + $0xd14] sm:$0xf0]  ;;  %v12382_v22 = vld [vmem:[#allocation6 + $0xd00] sm:$0xf] }
 0x7d6   :  { %v5589_v36 = vpop.f32.mrf.mxu2  ;;  %v4934_v15 = vpop.f32.mrf.mxu0 }
 0x7d7   :  { %v5590_v7 = vadd.f32 %v5589_v36, %v5261_v17  ;;  %8753 = vmatpush.bf16.msrb.mxu3 %v15789_v53  ;;  %v5263_v39 = vpop.f32.mrf.mxu1  ;;  %v4935_v57 = vadd.f32 %v4934_v15, %v17473_v51  ;;  %v12374_v36 = vld [vmem:[#allocation6 + $0xcf8] sm:$0xf] }
 0x7d9   :  { %v5761_v28 = vmul.f32 0.2, %v5590_v7  ;;  %v15855_v4 = vpop.f32.mrf.mxu3  ;;  %v5264_v20 = vadd.f32 %v5263_v39, %v4935_v57  ;;  %4973 = vmatmul.bf16.gmra.mxu0 %v12347_v5  ;;  %v14474_v5 = vld [vmem:[#allocation6 + $0xd10] sm:$0xf0] }
 0x7da   :  { %17474 = vst [vmem:[#allocation66_spill] sm:$0xff] %v15855_v4  ;;  %5302 = vmatmul.bf16.gmra.mxu1 %v12351_v46  ;;  %v14471_v46 = vld [vmem:[#allocation6 + $0xcfc] sm:$0xf] }
 0x7db   :  { %v5889_v32 = vmax.f32 %v5590_v7, %v5761_v28  ;;  %5631 = vmatmul.bf16.gmra.mxu2 %v12355_v8  ;;  %8754 = vmatpush.bf16.msrb.mxu3 %v15765_v47  ;;  %v14475_v7 = vld [vmem:[#allocation6 + $0xd18] sm:$0xf0]  ;;  %v12375_v47 = vor.u32 %v14474_v5, %v12374_v36  ;;  %v12379_v39 = vor.u32 %v14471_v46, %v12376_v26  ;;  %v14576_v28 = vld [vmem:[#allocation8 + $0x244] sm:$0xf] }
 0x7dc   :  { %v12383_v57 = vor.u32 %v14475_v7, %v12382_v22  ;;  %v17476_v22 = vld [vmem:[#allocation80_spill] sm:$0xff] }
 0x7dd   :  { %v15858_v53 = vpack.c.bf16 %v5889_v32, %v5888_v55 }
 0x7de   :  { %v5592_v17 = vpop.f32.mrf.mxu2  ;;  %8119 = vmatmul.bf16.gmra.mxu3 %v12983_v37  ;;  %v4936_v59 = vpop.f32.mrf.mxu0 }
 0x7df   :  { %v5593_v21 = vadd.f32 %v5592_v17, %v5264_v20  ;;  %v5265_v33 = vpop.f32.mrf.mxu1  ;;  %v4937_v38 = vadd.f32 %v4936_v59, %v15249_v35  ;;  %v13012_v20 = vld [vmem:[#allocation8 + $0x260] sm:$0xf0]  ;;  %v17475_v35 = vld [vmem:[#allocation79_spill] sm:$0xff] }
 0x7e0   :  { %v13015_v59 = vor.u32 %v14576_v28, %v13012_v20  ;;  %v12410_v28 = vld [vmem:[#allocation6 + $0xd38] sm:$0xf] }
 0x7e1   :  { %v15861_v63 = vpop.f32.mrf.mxu3  ;;  %v5266_v16 = vadd.f32 %v5265_v33, %v4937_v38  ;;  %v5762_v8 = vmul.f32 0.2, %v5593_v21 }
 0x7e3   :  { %v5890_v33 = vmax.f32 %v5593_v21, %v5762_v8  ;;  %v14482_v21 = vld [vmem:[#allocation6 + $0xd50] sm:$0xf0] }
 0x7e6   :  { %v5594_v15 = vpop.f32.mrf.mxu2  ;;  %v4939_v14 = vpop.f32.mrf.mxu0 }
 0x7e7   :  { %v5595_v58 = vadd.f32 %v5594_v15, %v5266_v16  ;;  %v5268_v51 = vpop.f32.mrf.mxu1  ;;  %v4940_v37 = vadd.f32 %v4939_v14, %v17475_v35  ;;  %v12402_v35 = vld [vmem:[#allocation6 + $0xd30] sm:$0xf] }
 0x7e9   :  { %v5763_v55 = vmul.f32 0.2, %v5595_v58  ;;  %v15864_v32 = vpop.f32.mrf.mxu3  ;;  %v5269_v17 = vadd.f32 %v5268_v51, %v4940_v37  ;;  %4978 = vmatmul.bf16.gmra.mxu0 %v12375_v47  ;;  %v14481_v51 = vld [vmem:[#allocation6 + $0xd48] sm:$0xf0]  ;;  %v14478_v47 = vld [vmem:[#allocation6 + $0xd34] sm:$0xf] }
 0x7ea   :  { %5307 = vmatmul.bf16.gmra.mxu1 %v12379_v39  ;;  %v12404_v39 = vld [vmem:[#allocation6 + $0xd4c] sm:$0xf0] }
 0x7eb   :  { %v5891_v38 = vmax.f32 %v5595_v58, %v5763_v55  ;;  %5636 = vmatmul.bf16.gmra.mxu2 %v12383_v57  ;;  %v12403_v58 = vor.u32 %v14481_v51, %v12402_v35  ;;  %v12407_v57 = vor.u32 %v14478_v47, %v12404_v39  ;;  %v17478_v51 = vld [vmem:[#allocation83_spill] sm:$0xff]  ;;  %v17479_v47 = vld [vmem:[#allocation82_spill] sm:$0xff] }
 0x7ec   :  { %v4618_v39 = vadd.f32 %v17479_v47, %v17478_v51  ;;  %v13076_v51 = vld [vmem:[#allocation8 + $0x2e0] sm:$0xf0] }
 0x7ed   :  { %v15866_v36 = vpack.c.bf16 %v5891_v38, %v5890_v33  ;;  %v14584_v33 = vld [vmem:[#allocation8 + $0x284] sm:$0xf] }
 0x7ee   :  { %v5597_v16 = vpop.f32.mrf.mxu2  ;;  %8124 = vmatmul.bf16.gmra.mxu3 %v13015_v59  ;;  %v4941_v46 = vpop.f32.mrf.mxu0  ;;  %v12411_v59 = vor.u32 %v14482_v21, %v12410_v28  ;;  %v13044_v38 = vld [vmem:[#allocation8 + $0x2a0] sm:$0xf0] }
 0x7ef   :  { %v5598_v5 = vadd.f32 %v5597_v16, %v5269_v17  ;;  %v5270_v26 = vpop.f32.mrf.mxu1  ;;  %v4942_v7 = vadd.f32 %v4941_v46, %v17476_v22  ;;  %v17477_v16 = vld [vmem:[#allocation81_spill] sm:$0xff]  ;;  %v13047_v4 = vor.u32 %v14584_v33, %v13044_v38 }
 0x7f0   :  { %v12432_v33 = vld [vmem:[#allocation6 + $0xd84] sm:$0xf0] }
 0x7f1   :  { %v15869_v15 = vpop.f32.mrf.mxu3  ;;  %v5271_v14 = vadd.f32 %v5270_v26, %v4942_v7  ;;  %v5764_v20 = vmul.f32 0.2, %v5598_v5 }
 0x7f3   :  { %v5892_v41 = vmax.f32 %v5598_v5, %v5764_v20  ;;  %v12438_v5 = vld [vmem:[#allocation6 + $0xd70] sm:$0xf]  ;;  %v14489_v20 = vld [vmem:[#allocation6 + $0xd88] sm:$0xf0] }
 0x7f6   :  { %v5599_v8 = vpop.f32.mrf.mxu2  ;;  %v4944_v55 = vpop.f32.mrf.mxu0 }
 0x7f7   :  { %v5600_v37 = vadd.f32 %v5599_v8, %v5271_v14  ;;  %v5273_v17 = vpop.f32.mrf.mxu1  ;;  %v4945_v46 = vadd.f32 %v4944_v55, %v17477_v16 }
 0x7f9   :  { %v5765_v22 = vmul.f32 0.2, %v5600_v37  ;;  %v15872_v26 = vpop.f32.mrf.mxu3  ;;  %v5274_v7 = vadd.f32 %v5273_v17, %v4945_v46  ;;  %4983 = vmatmul.bf16.gmra.mxu0 %v12403_v58  ;;  %v12430_v17 = vld [vmem:[#allocation6 + $0xd68] sm:$0xf]  ;;  %v14488_v58 = vld [vmem:[#allocation6 + $0xd80] sm:$0xf0] }
 0x7fa   :  { %5312 = vmatmul.bf16.gmra.mxu1 %v12407_v57  ;;  %v14485_v57 = vld [vmem:[#allocation6 + $0xd6c] sm:$0xf] }
 0x7fb   :  { %v5893_v42 = vmax.f32 %v5600_v37, %v5765_v22  ;;  %5641 = vmatmul.bf16.gmra.mxu2 %v12411_v59  ;;  %v12435_v59 = vor.u32 %v14485_v57, %v12432_v33  ;;  %v17481_v57 = vld [vmem:[#allocation86_spill] sm:$0xff]  ;;  %v17482_v33 = vld [vmem:[#allocation85_spill] sm:$0xff] }
 0x7fd   :  { %v15874_v35 = vpack.c.bf16 %v5893_v42, %v5892_v41  ;;  %v12431_v41 = vor.u32 %v14488_v58, %v12430_v17 }
 0x7fe   :  { %v5602_v14 = vpop.f32.mrf.mxu2  ;;  %8129 = vmatmul.bf16.gmra.mxu3 %v13047_v4  ;;  %v4946_v21 = vpop.f32.mrf.mxu0 }
 0x7ff   :  { %v5603_v28 = vadd.f32 %v5602_v14, %v5274_v7  ;;  %v5275_v8 = vpop.f32.mrf.mxu1  ;;  %v4947_v55 = vadd.f32 %v4946_v21, %v4618_v39  ;;  %v12439_v7 = vor.u32 %v14489_v20, %v12438_v5  ;;  %v14592_v14 = vld [vmem:[#allocation8 + $0x2c4] sm:$0xf]  ;;  %v4623_v5 = vadd.f32 %v17482_v33, %v17481_v57 }
 0x800   :  { %v13079_v21 = vor.u32 %v14592_v14, %v13076_v51 }
 0x801   :  { %v15878_v16 = vpop.f32.mrf.mxu3  ;;  %v5276_v37 = vadd.f32 %v5275_v8, %v4947_v55  ;;  %v5766_v4 = vmul.f32 0.2, %v5603_v28  ;;  %v17480_v8 = vld [vmem:[#allocation84_spill] sm:$0xff] }
 0x803   :  { %v5894_v0 = vmax.f32 %v5603_v28, %v5766_v4  ;;  %v14495_v28 = vld [vmem:[#allocation6 + $0xdb8] sm:$0xf0]  ;;  %v14492_v4 = vld [vmem:[#allocation6 + $0xda4] sm:$0xf] }
 0x806   :  { %v5604_v42 = vpop.f32.mrf.mxu2  ;;  %v4949_v46 = vpop.f32.mrf.mxu0 }
 0x807   :  { %v5605_v38 = vadd.f32 %v5604_v42, %v5276_v37  ;;  %v5278_v22 = vpop.f32.mrf.mxu1  ;;  %v4950_v55 = vadd.f32 %v4949_v46, %v17480_v8  ;;  %v14496_v46 = vld [vmem:[#allocation6 + $0xdc0] sm:$0xf0] }
 0x809   :  { %v5767_v47 = vmul.f32 0.2, %v5605_v38  ;;  %v15880_v39 = vpop.f32.mrf.mxu3  ;;  %4988 = vmatmul.bf16.gmra.mxu0 %v12431_v41  ;;  %v5279_v42 = vadd.f32 %v5278_v22, %v4950_v55  ;;  %v12458_v41 = vld [vmem:[#allocation6 + $0xda0] sm:$0xf]  ;;  %v14600_v22 = vld [vmem:[#allocation8 + $0x304] sm:$0xf] }
 0x80a   :  { %5317 = vmatmul.bf16.gmra.mxu1 %v12435_v59  ;;  %v12459_v14 = vor.u32 %v14495_v28, %v12458_v41  ;;  %v13108_v55 = vld [vmem:[#allocation8 + $0x320] sm:$0xf0] }
 0x80b   :  { %v5895_v3 = vmax.f32 %v5605_v38, %v5767_v47  ;;  %5646 = vmatmul.bf16.gmra.mxu2 %v12439_v7  ;;  %v12460_v38 = vld [vmem:[#allocation6 + $0xdbc] sm:$0xf0]  ;;  %v12466_v7 = vld [vmem:[#allocation6 + $0xda8] sm:$0xf] }
 0x80c   :  { %v12463_v51 = vor.u32 %v14492_v4, %v12460_v38  ;;  %v12467_v33 = vor.u32 %v14496_v46, %v12466_v7  ;;  %v17484_v4 = vld [vmem:[#allocation88_spill] sm:$0xff] }
 0x80d   :  { %v15883_v17 = vpack.c.bf16 %v5895_v3, %v5894_v0  ;;  %v4628_v38 = vadd.f32 %v17484_v4, %v15271_v13 }
 0x80e   :  { %v5607_v58 = vpop.f32.mrf.mxu2  ;;  %8134 = vmatmul.bf16.gmra.mxu3 %v13079_v21  ;;  %v4951_v20 = vpop.f32.mrf.mxu0 }
 0x80f   :  { %v5280_v37 = vpop.f32.mrf.mxu1  ;;  %v4952_v23 = vadd.f32 %v4951_v20, %v4623_v5  ;;  %v5608_v59 = vadd.f32 %v5607_v58, %v5279_v42  ;;  %v13111_v58 = vor.u32 %v14600_v22, %v13108_v55 }
 0x811   :  { %v15887_v1 = vpop.f32.mrf.mxu3  ;;  %v5281_v3 = vadd.f32 %v5280_v37, %v4952_v23  ;;  %v5768_v47 = vmul.f32 0.2, %v5608_v59  ;;  %v17483_v23 = vld [vmem:[#allocation87_spill] sm:$0xff] }
 0x813   :  { %v5896_v42 = vmax.f32 %v5608_v59, %v5768_v47  ;;  %v14502_v59 = vld [vmem:[#allocation6 + $0xdf0] sm:$0xf0]  ;;  %v14499_v47 = vld [vmem:[#allocation6 + $0xddc] sm:$0xf] }
 0x816   :  { %v5609_v0 = vpop.f32.mrf.mxu2  ;;  %v4954_v8 = vpop.f32.mrf.mxu0 }
 0x817   :  { %v5610_v21 = vadd.f32 %v5609_v0, %v5281_v3  ;;  %v5283_v57 = vpop.f32.mrf.mxu1  ;;  %v4955_v37 = vadd.f32 %v4954_v8, %v17483_v23  ;;  %v14503_v8 = vld [vmem:[#allocation6 + $0xdf8] sm:$0xf0] }
 0x819   :  { %v5769_v5 = vmul.f32 0.2, %v5610_v21  ;;  %v15889_v20 = vpop.f32.mrf.mxu3  ;;  %4993 = vmatmul.bf16.gmra.mxu0 %v12459_v14  ;;  %v5284_v3 = vadd.f32 %v5283_v57, %v4955_v37  ;;  %v12486_v14 = vld [vmem:[#allocation6 + $0xdd8] sm:$0xf]  ;;  %v14608_v57 = vld [vmem:[#allocation8 + $0x344] sm:$0xf] }
 0x81a   :  { %5322 = vmatmul.bf16.gmra.mxu1 %v12463_v51  ;;  %v12487_v55 = vor.u32 %v14502_v59, %v12486_v14  ;;  %v13140_v37 = vld [vmem:[#allocation8 + $0x360] sm:$0xf0]  ;;  %v17485_v59 = vld [vmem:[#allocation90_spill] sm:$0xff] }
 0x81b   :  { %v5897_v18 = vmax.f32 %v5610_v21, %v5769_v5  ;;  %5651 = vmatmul.bf16.gmra.mxu2 %v12467_v33  ;;  %v12488_v21 = vld [vmem:[#allocation6 + $0xdf4] sm:$0xf0]  ;;  %v12494_v33 = vld [vmem:[#allocation6 + $0xde0] sm:$0xf] }
 0x81c   :  { %v12491_v5 = vor.u32 %v14499_v47, %v12488_v21  ;;  %v12495_v4 = vor.u32 %v14503_v8, %v12494_v33  ;;  %v17486_v47 = vld [vmem:[#allocation89_spill] sm:$0xff] }
 0x81d   :  { %v15892_v41 = vpack.c.bf16 %v5897_v18, %v5896_v42  ;;  %v4633_v21 = vadd.f32 %v17486_v47, %v17485_v59 }
 0x81e   :  { %v5612_v28 = vpop.f32.mrf.mxu2  ;;  %8139 = vmatmul.bf16.gmra.mxu3 %v13111_v58  ;;  %v4956_v7 = vpop.f32.mrf.mxu0 }
 0x81f   :  { %v5285_v46 = vpop.f32.mrf.mxu1  ;;  %v4957_v0 = vadd.f32 %v4956_v7, %v4628_v38  ;;  %v5613_v51 = vadd.f32 %v5612_v28, %v5284_v3  ;;  %v13143_v28 = vor.u32 %v14608_v57, %v13140_v37  ;;  %v14509_v57 = vld [vmem:[#allocation8 + $0x24] sm:$0xf0] }
 0x821   :  { %v15896_v62 = vpop.f32.mrf.mxu3  ;;  %v5286_v18 = vadd.f32 %v5285_v46, %v4957_v0  ;;  %v5770_v58 = vmul.f32 0.2, %v5613_v51 }
 0x823   :  { %v5898_v3 = vmax.f32 %v5613_v51, %v5770_v58  ;;  %v14505_v51 = vld [vmem:[#allocation8 + $0xc] sm:$0xf] }
 0x824   :  { %v12732_v58 = vld [vmem:[#allocation8 + $0x28] sm:$0xf0] }
 0x825   :  { %v12735_v37 = vor.u32 %v14505_v51, %v12732_v58  ;;  %v17491_v51 = vld [vmem:[#allocation92_spill] sm:$0xff] }
 0x826   :  { %v5614_v22 = vpop.f32.mrf.mxu2  ;;  %v4959_v13 = vpop.f32.mrf.mxu0 }
 0x827   :  { %v5615_v42 = vadd.f32 %v5614_v22, %v5286_v18  ;;  %v5288_v23 = vpop.f32.mrf.mxu1  ;;  %v4960_v46 = vadd.f32 %v4959_v13, %v15273_v9 }
 0x829   :  { %v5771_v38 = vmul.f32 0.2, %v5615_v42  ;;  %v15898_v7 = vpop.f32.mrf.mxu3  ;;  %4998 = vmatmul.bf16.gmra.mxu0 %v12487_v55  ;;  %v5289_v18 = vadd.f32 %v5288_v23, %v4960_v46  ;;  %v12730_v55 = vld [vmem:[#allocation8 + $0x8] sm:$0xf]  ;;  %v14616_v23 = vld [vmem:[#allocation8 + $0x384] sm:$0xf] }
 0x82a   :  { %5327 = vmatmul.bf16.gmra.mxu1 %v12491_v5  ;;  %v12731_v13 = vor.u32 %v14509_v57, %v12730_v55  ;;  %v13172_v46 = vld [vmem:[#allocation8 + $0x3a0] sm:$0xf0]  ;;  %v17490_v57 = vld [vmem:[#allocation93_spill] sm:$0xff] }
 0x82b   :  { %v5899_v12 = vmax.f32 %v5615_v42, %v5771_v38  ;;  %5656 = vmatmul.bf16.gmra.mxu2 %v12495_v4  ;;  %v12738_v42 = vld [vmem:[#allocation8 + $0x10] sm:$0xf]  ;;  %v13175_v48 = vor.u32 %v14616_v23, %v13172_v46  ;;  %v4638_v58 = vadd.f32 %v17491_v51, %v17490_v57  ;;  %v13204_v57 = vld [vmem:[#allocation8 + $0x3e0] sm:$0xf0] }
 0x82c   :  { %v14510_v4 = vld [vmem:[#allocation8 + $0x2c] sm:$0xf0] }
 0x82d   :  { %v6228_v0 = vpack.c.bf16 %v5899_v12, %v5898_v3  ;;  %v12739_v47 = vor.u32 %v14510_v4, %v12738_v42  ;;  %v17493_v51 = vld [vmem:[#allocation94_spill] sm:$0xff] }
 0x82e   :  { %v5617_v14 = vpop.f32.mrf.mxu2  ;;  %8144 = vmatmul.bf16.gmra.mxu3 %v13143_v28  ;;  %v4961_v33 = vpop.f32.mrf.mxu0 }
 0x82f   :  { %v5290_v8 = vpop.f32.mrf.mxu1  ;;  %v4962_v22 = vadd.f32 %v4961_v33, %v4633_v21  ;;  %v5618_v5 = vadd.f32 %v5617_v14, %v5289_v18  ;;  %v17488_v21 = vld [vmem:[#allocation91_spill] sm:$0xff] }
 0x831   :  { %v15903_v6 = vpop.f32.mrf.mxu3  ;;  %v5291_v9 = vadd.f32 %v5290_v8, %v4962_v22  ;;  %v5772_v38 = vmul.f32 0.2, %v5618_v5 }
 0x832   :  { %17487 = vst [vmem:[#allocation67_spill] sm:$0xff] %v15903_v6 }
 0x833   :  { %v5900_v8 = vmax.f32 %v5618_v5, %v5772_v38  ;;  %v14513_v5 = vld [vmem:[#allocation8 + $0x4c] sm:$0xf]  ;;  %v12770_v38 = vld [vmem:[#allocation8 + $0x50] sm:$0xf] }
 0x836   :  { %v5619_v12 = vpop.f32.mrf.mxu2  ;;  %v4964_v3 = vpop.f32.mrf.mxu0 }
 0x837   :  { %v5620_v28 = vadd.f32 %v5619_v12, %v5291_v9  ;;  %v5293_v59 = vpop.f32.mrf.mxu1  ;;  %v4965_v33 = vadd.f32 %v4964_v3, %v17488_v21 }
 0x839   :  { %v5773_v60 = vmul.f32 0.2, %v5620_v28  ;;  %v15906_v14 = vpop.f32.mrf.mxu3  ;;  %v5294_v18 = vadd.f32 %v5293_v59, %v4965_v33  ;;  %8248 = vmatmul.bf16.vlgmr.msra.gmra.mxu0 %v12731_v13  ;;  %v12762_v13 = vld [vmem:[#allocation8 + $0x48] sm:$0xf] }
 0x83a   :  { %17489 = vst [vmem:[#allocation68_spill] sm:$0xff] %v15906_v14  ;;  %8417 = vmatmul.bf16.vlgmr.msra.gmra.mxu1 %v12735_v37  ;;  %v14517_v37 = vld [vmem:[#allocation8 + $0x64] sm:$0xf0] }
 0x83b   :  { %v5901_v22 = vmax.f32 %v5620_v28, %v5773_v60  ;;  %8586 = vmatmul.bf16.vlgmr.msra.gmra.mxu2 %v12739_v47  ;;  %v12764_v60 = vld [vmem:[#allocation8 + $0x68] sm:$0xf0]  ;;  %v14518_v28 = vld [vmem:[#allocation8 + $0x6c] sm:$0xf0]  ;;  %v12763_v23 = vor.u32 %v14517_v37, %v12762_v13  ;;  %v17496_v37 = vld [vmem:[#allocation95_spill] sm:$0xff] }
 0x83c   :  { %v12767_v46 = vor.u32 %v14513_v5, %v12764_v60 }
 0x83d   :  { %v6229_v55 = vpack.c.bf16 %v5901_v22, %v5900_v8  ;;  %v12771_v22 = vor.u32 %v14518_v28, %v12770_v38 }
 0x83e   :  { %v5622_v9 = vpop.f32.mrf.mxu2  ;;  %8149 = vmatmul.bf16.gmra.mxu3 %v13175_v48  ;;  %v4966_v4 = vpop.f32.mrf.mxu0 }
 0x83f   :  { %v5623_v42 = vadd.f32 %v5622_v9, %v5294_v18  ;;  %8916 = vmatpush.bf16.msrb.mxu0 %v6229_v55  ;;  %v5295_v12 = vpop.f32.mrf.mxu1  ;;  %v4967_v3 = vadd.f32 %v4966_v4, %v4638_v58  ;;  %v14624_v55 = vld [vmem:[#allocation8 + $0x3c4] sm:$0xf] }
 0x841   :  { %v15910_v21 = vpop.f32.mrf.mxu3  ;;  %v5296_v59 = vadd.f32 %v5295_v12, %v4967_v3  ;;  %v5774_v33 = vmul.f32 0.2, %v5623_v42  ;;  %v13207_v12 = vor.u32 %v14624_v55, %v13204_v57  ;;  %v15925_v55 = vpop.permute.xlu1 %6454 }
 0x842   :  { %17492 = vst [vmem:[#allocation69_spill] sm:$0xff] %v15910_v21 }
 0x843   :  { %8917 = vmatpush.bf16.msrb.mxu0 %v6228_v0  ;;  %v5902_v3 = vmax.f32 %v5623_v42, %v5774_v33  ;;  %v12794_v33 = vld [vmem:[#allocation8 + $0x88] sm:$0xf]  ;;  %17498 = vst [vmem:[#allocation72_spill] sm:$0xff] %v15925_v55 }
 0x846   :  { %v5624_v47 = vpop.f32.mrf.mxu2  ;;  %v4969_v18 = vpop.f32.mrf.mxu0 }
 0x847   :  { %v5625_v48 = vadd.f32 %v5624_v47, %v5296_v59  ;;  %8918 = vmatpush.bf16.msrb.mxu0 %v15892_v41  ;;  %v5298_v8 = vpop.f32.mrf.mxu1  ;;  %v4970_v58 = vadd.f32 %v4969_v18, %v17493_v51  ;;  %v17495_v59 = vld [vmem:[#allocation96_spill] sm:$0xff]  ;;  %v12796_v18 = vld [vmem:[#allocation8 + $0xa8] sm:$0xf0] }
 0x848   :  { %v4643_v5 = vadd.f32 %v17496_v37, %v17495_v59  ;;  %v13236_v59 = vld [vmem:[#allocation8 + $0x420] sm:$0xf0] }
 0x849   :  { %v5775_v0 = vmul.f32 0.2, %v5625_v48  ;;  %v15914_v9 = vpop.f32.mrf.mxu3  ;;  %v5299_v4 = vadd.f32 %v5298_v8, %v4970_v58  ;;  %8253 = vmatmul.bf16.gmra.mxu0 %v12763_v23  ;;  %v12802_v8 = vld [vmem:[#allocation8 + $0x90] sm:$0xf] }
 0x84a   :  { %17494 = vst [vmem:[#allocation70_spill] sm:$0xff] %v15914_v9  ;;  %8422 = vmatmul.bf16.gmra.mxu1 %v12767_v46 }
 0x84b   :  { %v5903_v13 = vmax.f32 %v5625_v48, %v5775_v0  ;;  %8591 = vmatmul.bf16.gmra.mxu2 %v12771_v22  ;;  %8919 = vmatpush.bf16.msrb.mxu0 %v15883_v17  ;;  %v14525_v17 = vld [vmem:[#allocation8 + $0xa4] sm:$0xf0]  ;;  %v14521_v48 = vld [vmem:[#allocation8 + $0x8c] sm:$0xf]  ;;  %v14526_v22 = vld [vmem:[#allocation8 + $0xac] sm:$0xf0] }
 0x84c   :  { %v12795_v51 = vor.u32 %v14525_v17, %v12794_v33  ;;  %v12799_v58 = vor.u32 %v14521_v48, %v12796_v18  ;;  %v17502_v17 = vld [vmem:[#allocation98_spill] sm:$0xff]  ;;  %v15936_v18 = vpop.permute.xlu2 %6364 }
 0x84d   :  { %v15917_v41 = vpack.c.bf16 %v5903_v13, %v5902_v3  ;;  %v12803_v3 = vor.u32 %v14526_v22, %v12802_v8  ;;  %v14632_v13 = vld [vmem:[#allocation8 + $0x404] sm:$0xf]  ;;  %17503 = vst [vmem:[#allocation74_spill] sm:$0xff] %v15936_v18 }
 0x84e   :  { %v5627_v60 = vpop.f32.mrf.mxu2  ;;  %8154 = vmatmul.bf16.gmra.mxu3 %v13207_v12  ;;  %v4971_v28 = vpop.f32.mrf.mxu0 }
 0x84f   :  { %v5628_v38 = vadd.f32 %v5627_v60, %v5299_v4  ;;  %8920 = vmatpush.bf16.msrb.mxu0 %v15874_v35  ;;  %v5300_v47 = vpop.f32.mrf.mxu1  ;;  %v4972_v23 = vadd.f32 %v4971_v28, %v4643_v5 }
 0x851   :  { %v15922_v46 = vpop.f32.mrf.mxu3  ;;  %v5301_v42 = vadd.f32 %v5300_v47, %v4972_v23  ;;  %v5776_v35 = vmul.f32 0.2, %v5628_v38  ;;  %v13239_v47 = vor.u32 %v14632_v13, %v13236_v59  ;;  %v12834_v13 = vld [vmem:[#allocation8 + $0xd0] sm:$0xf] }
 0x852   :  { %17497 = vst [vmem:[#allocation71_spill] sm:$0xff] %v15922_v46  ;;  %v14534_v59 = vld [vmem:[#allocation8 + $0xec] sm:$0xf0] }
 0x853   :  { %8921 = vmatpush.bf16.msrb.mxu0 %v15866_v36  ;;  %v17499_v36 = vld [vmem:[#allocation97_spill] sm:$0xff]  ;;  %v5904_v23 = vmax.f32 %v5628_v38, %v5776_v35 }
 0x856   :  { %v5629_v57 = vpop.f32.mrf.mxu2  ;;  %v4974_v4 = vpop.f32.mrf.mxu0 }
 0x857   :  { %v5630_v0 = vadd.f32 %v5629_v57, %v5301_v42  ;;  %8922 = vmatpush.bf16.msrb.mxu0 %v15858_v53  ;;  %v5303_v12 = vpop.f32.mrf.mxu1  ;;  %v4975_v37 = vadd.f32 %v4974_v4, %v17499_v36  ;;  %v17501_v42 = vld [vmem:[#allocation99_spill] sm:$0xff] }
 0x858   :  { %v4648_v48 = vadd.f32 %v17502_v17, %v17501_v42  ;;  %v12835_v42 = vor.u32 %v14534_v59, %v12834_v13  ;;  %v14640_v17 = vld [vmem:[#allocation8 + $0x444] sm:$0xf]  ;;  %v17511_v13 = vld [vmem:[#allocation101_spill] sm:$0xff] }
 0x859   :  { %v5777_v5 = vmul.f32 0.2, %v5630_v0  ;;  %v15929_v60 = vpop.f32.mrf.mxu3  ;;  %v5304_v28 = vadd.f32 %v5303_v12, %v4975_v37  ;;  %8258 = vmatmul.bf16.gmra.mxu0 %v12795_v51  ;;  %v15938_v51 = vpop.permute.xlu1 %6459  ;;  %v14529_v12 = vld [vmem:[#allocation8 + $0xcc] sm:$0xf] }
 0x85a   :  { %17500 = vst [vmem:[#allocation73_spill] sm:$0xff] %v15929_v60  ;;  %8427 = vmatmul.bf16.gmra.mxu1 %v12799_v58 }
 0x85b   :  { %v5905_v33 = vmax.f32 %v5630_v0, %v5777_v5  ;;  %8596 = vmatmul.bf16.gmra.mxu2 %v12803_v3  ;;  %8923 = vmatpush.bf16.msrb.mxu0 %v15846_v54  ;;  %17504 = vst [vmem:[#allocation75_spill] sm:$0xff] %v15938_v51  ;;  %v12826_v0 = vld [vmem:[#allocation8 + $0xc8] sm:$0xf]  ;;  %v12828_v3 = vld [vmem:[#allocation8 + $0xe8] sm:$0xf0] }
 0x85c   :  { %v14533_v54 = vld [vmem:[#allocation8 + $0xe4] sm:$0xf0]  ;;  %v12831_v5 = vor.u32 %v14529_v12, %v12828_v3  ;;  %v17510_v3 = vld [vmem:[#allocation102_spill] sm:$0xff] }
 0x85d   :  { %v15932_v53 = vpack.c.bf16 %v5905_v33, %v5904_v23  ;;  %v12827_v37 = vor.u32 %v14533_v54, %v12826_v0  ;;  %v4653_v59 = vadd.f32 %v17511_v13, %v17510_v3 }
 0x85e   :  { %v5632_v8 = vpop.f32.mrf.mxu2  ;;  %8159 = vmatmul.bf16.gmra.mxu3 %v13239_v47  ;;  %v4976_v57 = vpop.f32.mrf.mxu0 }
 0x85f   :  { %v5633_v22 = vadd.f32 %v5632_v8, %v5304_v28  ;;  %v5305_v4 = vpop.f32.mrf.mxu1  ;;  %v4977_v58 = vadd.f32 %v4976_v57, %v4648_v48  ;;  %v13268_v8 = vld [vmem:[#allocation8 + $0x460] sm:$0xf0]  ;;  %v15942_v48 = vpop.permute.xlu2 %6369 }
 0x860   :  { %17506 = vst [vmem:[#allocation77_spill] sm:$0xff] %v15942_v48  ;;  %v17507_v57 = vld [vmem:[#allocation100_spill] sm:$0xff]  ;;  %v13271_v0 = vor.u32 %v14640_v17, %v13268_v8  ;;  %v12866_v8 = vld [vmem:[#allocation8 + $0x110] sm:$0xf] }
 0x861   :  { %v15940_v38 = vpop.f32.mrf.mxu3  ;;  %v5306_v35 = vadd.f32 %v5305_v4, %v4977_v58  ;;  %v5778_v23 = vmul.f32 0.2, %v5633_v22  ;;  %v15947_v55 = vpop.permute.xlu1 %6449 }
 0x862   :  { %17505 = vst [vmem:[#allocation76_spill] sm:$0xff] %v15940_v38 }
 0x863   :  { %17509 = vst [vmem:[#allocation79_spill] sm:$0xff] %v15947_v55  ;;  %v5906_v54 = vmax.f32 %v5633_v22, %v5778_v23  ;;  %v14541_v23 = vld [vmem:[#allocation8 + $0x124] sm:$0xf0] }
 0x866   :  { %v5634_v36 = vpop.f32.mrf.mxu2  ;;  %v4979_v28 = vpop.f32.mrf.mxu0 }
 0x867   :  { %v5635_v47 = vadd.f32 %v5634_v36, %v5306_v35  ;;  %v5308_v33 = vpop.f32.mrf.mxu1  ;;  %v4980_v4 = vadd.f32 %v4979_v28, %v17507_v57 }
 0x869   :  { %v5779_v58 = vmul.f32 0.2, %v5635_v47  ;;  %v15945_v51 = vpop.f32.mrf.mxu3  ;;  %v5309_v38 = vadd.f32 %v5308_v33, %v4980_v4  ;;  %8263 = vmatmul.bf16.gmra.mxu0 %v12827_v37  ;;  %v15957_v37 = vpop.permute.xlu2 %6354  ;;  %v14542_v4 = vld [vmem:[#allocation8 + $0x12c] sm:$0xf0] }
 0x86a   :  { %17508 = vst [vmem:[#allocation78_spill] sm:$0xff] %v15945_v51  ;;  %8432 = vmatmul.bf16.gmra.mxu1 %v12831_v5  ;;  %v15953_v51 = vpop.permute.xlu0 %6374  ;;  %v12858_v5 = vld [vmem:[#allocation8 + $0x108] sm:$0xf]  ;;  %v15959_v17 = vpop.permute.xlu1 %6434 }
 0x86b   :  { %v5907_v35 = vmax.f32 %v5635_v47, %v5779_v58  ;;  %8601 = vmatmul.bf16.gmra.mxu2 %v12835_v42  ;;  %17512 = vst [vmem:[#allocation80_spill] sm:$0xff] %v15953_v51  ;;  %v14537_v47 = vld [vmem:[#allocation8 + $0x10c] sm:$0xf] }
 0x86c   :  { %v12860_v42 = vld [vmem:[#allocation8 + $0x128] sm:$0xf0]  ;;  %17514 = vst [vmem:[#allocation83_spill] sm:$0xff] %v15959_v17 }
 0x86d   :  { %v15949_v12 = vpack.c.bf16 %v5907_v35, %v5906_v54 }
 0x86e   :  { %v5637_v36 = vpop.f32.mrf.mxu2  ;;  %8164 = vmatmul.bf16.gmra.mxu3 %v13271_v0  ;;  %v4981_v57 = vpop.f32.mrf.mxu0  ;;  %v12863_v0 = vor.u32 %v14537_v47, %v12860_v42 }
 0x86f   :  { %v5638_v28 = vadd.f32 %v5637_v36, %v5309_v38  ;;  %v5310_v60 = vpop.f32.mrf.mxu1  ;;  %v4982_v55 = vadd.f32 %v4981_v57, %v4653_v59  ;;  %v12859_v38 = vor.u32 %v14541_v23, %v12858_v5  ;;  %v12867_v59 = vor.u32 %v14542_v4, %v12866_v8  ;;  %v14648_v36 = vld [vmem:[#allocation8 + $0x484] sm:$0xf] }
 0x870   :  { %v13300_v57 = vld [vmem:[#allocation8 + $0x4a0] sm:$0xf0] }
 0x871   :  { %v15955_v33 = vpop.f32.mrf.mxu3  ;;  %v5311_v22 = vadd.f32 %v5310_v60, %v4982_v55  ;;  %v5780_v54 = vmul.f32 0.2, %v5638_v28  ;;  %v13303_v61 = vor.u32 %v14648_v36, %v13300_v57  ;;  %v17520_v4 = vld [vmem:[#allocation104_spill] sm:$0xff]  ;;  %v12898_v57 = vld [vmem:[#allocation8 + $0x150] sm:$0xf] }
 0x872   :  { %17513 = vst [vmem:[#allocation81_spill] sm:$0xff] %v15955_v33  ;;  %v17515_v33 = vld [vmem:[#allocation103_spill] sm:$0xff]  ;;  %v15964_v46 = vpop.permute.xlu0 %6379  ;;  %v15970_v42 = vpop.permute.xlu1 %6349 }
 0x873   :  { %17517 = vst [vmem:[#allocation84_spill] sm:$0xff] %v15964_v46  ;;  %v5908_v5 = vmax.f32 %v5638_v28, %v5780_v54  ;;  %v12890_v28 = vld [vmem:[#allocation8 + $0x148] sm:$0xf] }
 0x874   :  { %v14549_v54 = vld [vmem:[#allocation8 + $0x164] sm:$0xf0] }
 0x876   :  { %v5639_v58 = vpop.f32.mrf.mxu2  ;;  %v4984_v3 = vpop.f32.mrf.mxu0 }
 0x877   :  { %v5640_v35 = vadd.f32 %v5639_v58, %v5311_v22  ;;  %v5313_v13 = vpop.f32.mrf.mxu1  ;;  %v4985_v55 = vadd.f32 %v4984_v3, %v17515_v33  ;;  %v15966_v22 = vpop.permute.xlu2 %6439  ;;  %v17519_v33 = vld [vmem:[#allocation105_spill] sm:$0xff] }
 0x878   :  { %17518 = vst [vmem:[#allocation86_spill] sm:$0xff] %v15966_v22  ;;  %v4658_v58 = vadd.f32 %v17520_v4, %v17519_v33  ;;  %v14656_v22 = vld [vmem:[#allocation8 + $0x4c4] sm:$0xf] }
 0x879   :  { %v5781_v60 = vmul.f32 0.2, %v5640_v35  ;;  %v15962_v44 = vpop.f32.mrf.mxu3  ;;  %v5314_v17 = vadd.f32 %v5313_v13, %v4985_v55  ;;  %8268 = vmatmul.bf16.gmra.mxu0 %v12859_v38  ;;  %v14550_v55 = vld [vmem:[#allocation8 + $0x16c] sm:$0xf0] }
 0x87a   :  { %17516 = vst [vmem:[#allocation82_spill] sm:$0xff] %v15962_v44  ;;  %8437 = vmatmul.bf16.gmra.mxu1 %v12863_v0  ;;  %v15976_v36 = vpop.permute.xlu0 %6444  ;;  %v15980_v46 = vpop.permute.xlu1 %6334 }
 0x87b   :  { %v5909_v23 = vmax.f32 %v5640_v35, %v5781_v60  ;;  %8606 = vmatmul.bf16.gmra.mxu2 %v12867_v59  ;;  %v14545_v35 = vld [vmem:[#allocation8 + $0x14c] sm:$0xf]  ;;  %17522 = vst [vmem:[#allocation87_spill] sm:$0xff] %v15976_v36 }
 0x87c   :  { %v12892_v59 = vld [vmem:[#allocation8 + $0x168] sm:$0xf0] }
 0x87d   :  { %v15968_v47 = vpack.c.bf16 %v5909_v23, %v5908_v5  ;;  %v12891_v23 = vor.u32 %v14549_v54, %v12890_v28  ;;  %v12895_v33 = vor.u32 %v14545_v35, %v12892_v59  ;;  %v17525_v28 = vld [vmem:[#allocation106_spill] sm:$0xff] }
 0x87e   :  { %v5642_v8 = vpop.f32.mrf.mxu2  ;;  %8169 = vmatmul.bf16.gmra.mxu3 %v13303_v61  ;;  %v4986_v44 = vpop.f32.mrf.mxu0 }
 0x87f   :  { %v5643_v3 = vadd.f32 %v5642_v8, %v5314_v17  ;;  %v5315_v13 = vpop.f32.mrf.mxu1  ;;  %v4987_v38 = vadd.f32 %v4986_v44, %v4658_v58  ;;  %v15978_v5 = vpop.permute.xlu2 %6424  ;;  %v12899_v58 = vor.u32 %v14550_v55, %v12898_v57  ;;  %v17527_v55 = vld [vmem:[#allocation108_spill] sm:$0xff] }
 0x880   :  { %17523 = vst [vmem:[#allocation88_spill] sm:$0xff] %v15978_v5 }
 0x881   :  { %v15974_v0 = vpop.f32.mrf.mxu3  ;;  %v5316_v60 = vadd.f32 %v5315_v13, %v4987_v38  ;;  %v5782_v17 = vmul.f32 0.2, %v5643_v3 }
 0x882   :  { %17521 = vst [vmem:[#allocation85_spill] sm:$0xff] %v15974_v0  ;;  %v13332_v0 = vld [vmem:[#allocation8 + $0x4e0] sm:$0xf0]  ;;  %v15987_v59 = vpop.permute.xlu0 %6359 }
 0x883   :  { %v13335_v13 = vor.u32 %v14656_v22, %v13332_v0  ;;  %v5910_v38 = vmax.f32 %v5643_v3, %v5782_v17  ;;  %17526 = vst [vmem:[#allocation89_spill] sm:$0xff] %v15987_v59  ;;  %v12922_v0 = vld [vmem:[#allocation8 + $0x188] sm:$0xf]  ;;  %v14553_v17 = vld [vmem:[#allocation8 + $0x18c] sm:$0xf] }
 0x886   :  { %v5644_v61 = vpop.f32.mrf.mxu2  ;;  %v4989_v4 = vpop.f32.mrf.mxu0 }
 0x887   :  { %v5645_v8 = vadd.f32 %v5644_v61, %v5316_v60  ;;  %v5318_v44 = vpop.f32.mrf.mxu1  ;;  %v4990_v54 = vadd.f32 %v4989_v4, %v17525_v28  ;;  %v17528_v60 = vld [vmem:[#allocation107_spill] sm:$0xff]  ;;  %v12930_v4 = vld [vmem:[#allocation8 + $0x190] sm:$0xf] }
 0x888   :  { %v4663_v61 = vadd.f32 %v17528_v60, %v17527_v55 }
 0x889   :  { %v5783_v51 = vmul.f32 0.2, %v5645_v8  ;;  %v15982_v9 = vpop.f32.mrf.mxu3  ;;  %8273 = vmatmul.bf16.gmra.mxu0 %v12891_v23  ;;  %v5319_v23 = vadd.f32 %v5318_v44, %v4990_v54  ;;  %v14664_v54 = vld [vmem:[#allocation8 + $0x504] sm:$0xf] }
 0x88a   :  { %17524 = vst [vmem:[#allocation90_spill] sm:$0xff] %v15982_v9  ;;  %8442 = vmatmul.bf16.gmra.mxu1 %v12895_v33  ;;  %v15991_v9 = vpop.permute.xlu2 %6339  ;;  %v14557_v33 = vld [vmem:[#allocation8 + $0x1a4] sm:$0xf0] }
 0x88b   :  { %v5911_v36 = vmax.f32 %v5645_v8, %v5783_v51  ;;  %8611 = vmatmul.bf16.gmra.mxu2 %v12899_v58  ;;  %v15995_v51 = vpop.permute.xlu1 %6419  ;;  %v12924_v8 = vld [vmem:[#allocation8 + $0x1a8] sm:$0xf0]  ;;  %v14558_v58 = vld [vmem:[#allocation8 + $0x1ac] sm:$0xf0]  ;;  %v12923_v28 = vor.u32 %v14557_v33, %v12922_v0 }
 0x88c   :  { %17530 = vst [vmem:[#allocation93_spill] sm:$0xff] %v15995_v51  ;;  %v12927_v55 = vor.u32 %v14553_v17, %v12924_v8  ;;  %v17533_v17 = vld [vmem:[#allocation109_spill] sm:$0xff] }
 0x88d   :  { %v15985_v35 = vpack.c.bf16 %v5911_v36, %v5910_v38 }
 0x88e   :  { %v5647_v57 = vpop.f32.mrf.mxu2  ;;  %8174 = vmatmul.bf16.gmra.mxu3 %v13335_v13  ;;  %v4991_v5 = vpop.f32.mrf.mxu0 }
 0x88f   :  { %v5320_v2 = vpop.f32.mrf.mxu1  ;;  %v4992_v22 = vadd.f32 %v4991_v5, %v4663_v61  ;;  %v5648_v36 = vadd.f32 %v5647_v57, %v5319_v23  ;;  %v12931_v5 = vor.u32 %v14558_v58, %v12930_v4  ;;  %v13364_v61 = vld [vmem:[#allocation8 + $0x520] sm:$0xf0] }
 0x891   :  { %v15993_v3 = vpop.f32.mrf.mxu3  ;;  %v5321_v13 = vadd.f32 %v5320_v2, %v4992_v22  ;;  %v5784_v60 = vmul.f32 0.2, %v5648_v36  ;;  %v13367_v2 = vor.u32 %v14664_v54, %v13364_v61  ;;  %v12962_v61 = vld [vmem:[#allocation8 + $0x1d0] sm:$0xf] }
 0x892   :  { %17529 = vst [vmem:[#allocation91_spill] sm:$0xff] %v15993_v3  ;;  %v15997_v3 = vpop.permute.xlu0 %6344  ;;  %v16001_v23 = vpop.permute.xlu2 %6324 }
 0x893   :  { %v5912_v22 = vmax.f32 %v5648_v36, %v5784_v60  ;;  %v16003_v33 = vpop.permute.xlu1 %6404  ;;  %v14565_v60 = vld [vmem:[#allocation8 + $0x1e4] sm:$0xf0] }
 0x894   :  { %17532 = vst [vmem:[#allocation94_spill] sm:$0xff] %v16003_v33 }
 0x896   :  { %v5649_v38 = vpop.f32.mrf.mxu2  ;;  %v4994_v21 = vpop.f32.mrf.mxu0 }
 0x897   :  { %v5650_v48 = vadd.f32 %v5649_v38, %v5321_v13  ;;  %v5323_v44 = vpop.f32.mrf.mxu1  ;;  %v4995_v8 = vadd.f32 %v4994_v21, %v17533_v17  ;;  %v17534_v13 = vld [vmem:[#allocation110_spill] sm:$0xff]  ;;  %v12956_v21 = vld [vmem:[#allocation8 + $0x1e8] sm:$0xf0] }
 0x898   :  { %v4668_v38 = vadd.f32 %v17534_v13, %v15319_v40 }
 0x899   :  { %v5785_v51 = vmul.f32 0.2, %v5650_v48  ;;  %v15999_v57 = vpop.f32.mrf.mxu3  ;;  %8278 = vmatmul.bf16.gmra.mxu0 %v12923_v28  ;;  %v5324_v18 = vadd.f32 %v5323_v44, %v4995_v8 }
 0x89a   :  { %17531 = vst [vmem:[#allocation92_spill] sm:$0xff] %v15999_v57  ;;  %8447 = vmatmul.bf16.gmra.mxu1 %v12927_v55  ;;  %v16012_v36 = vpop.permute.xlu0 %6429  ;;  %v16014_v54 = vpop.permute.xlu2 %6409 }
 0x89b   :  { %v5913_v0 = vmax.f32 %v5650_v48, %v5785_v51  ;;  %8616 = vmatmul.bf16.gmra.mxu2 %v12931_v5  ;;  %17536 = vst [vmem:[#allocation95_spill] sm:$0xff] %v16012_v36  ;;  %v12954_v48 = vld [vmem:[#allocation8 + $0x1c8] sm:$0xf]  ;;  %v14561_v5 = vld [vmem:[#allocation8 + $0x1cc] sm:$0xf] }
 0x89c   :  { %17537 = vst [vmem:[#allocation97_spill] sm:$0xff] %v16014_v54  ;;  %v12955_v17 = vor.u32 %v14565_v60, %v12954_v48  ;;  %v12959_v44 = vor.u32 %v14561_v5, %v12956_v21  ;;  %v17540_v48 = vld [vmem:[#allocation111_spill] sm:$0xff] }
 0x89d   :  { %v16006_v4 = vpack.c.bf16 %v5913_v0, %v5912_v22  ;;  %v16016_v0 = vpop.permute.xlu1 %6319 }
 0x89e   :  { %v5652_v58 = vpop.f32.mrf.mxu2  ;;  %8179 = vmatmul.bf16.gmra.mxu3 %v13367_v2  ;;  %v4996_v57 = vpop.f32.mrf.mxu0  ;;  %v14566_v2 = vld [vmem:[#allocation8 + $0x1ec] sm:$0xf0] }
 0x89f   :  { %v5325_v31 = vpop.f32.mrf.mxu1  ;;  %v4997_v28 = vadd.f32 %v4996_v57, %v4668_v38  ;;  %v5653_v51 = vadd.f32 %v5652_v58, %v5324_v18  ;;  %v12963_v36 = vor.u32 %v14566_v2, %v12962_v61  ;;  %v13396_v18 = vld [vmem:[#allocation8 + $0x560] sm:$0xf0] }
 0x8a0   :  { %v17542_v61 = vld [vmem:[#allocation112_spill] sm:$0xff] }
 0x8a1   :  { %v16010_v55 = vpop.f32.mrf.mxu3  ;;  %v5326_v22 = vadd.f32 %v5325_v31, %v4997_v28  ;;  %v5786_v57 = vmul.f32 0.2, %v5653_v51  ;;  %v4673_v2 = vadd.f32 %v15477_v56, %v17542_v61 }
 0x8a2   :  { %17535 = vst [vmem:[#allocation96_spill] sm:$0xff] %v16010_v55  ;;  %v14672_v55 = vld [vmem:[#allocation8 + $0x544] sm:$0xf]  ;;  %v16020_v28 = vpop.permute.xlu0 %6414  ;;  %v16023_v21 = vpop.permute.xlu2 %6394 }
 0x8a3   :  { %v13399_v54 = vor.u32 %v14672_v55, %v13396_v18  ;;  %v5914_v14 = vmax.f32 %v5653_v51, %v5786_v57  ;;  %17539 = vst [vmem:[#allocation98_spill] sm:$0xff] %v16020_v28  ;;  %v14569_v18 = vld [vmem:[#allocation8 + $0x20c] sm:$0xf] }
 0x8a4   :  { %17541 = vst [vmem:[#allocation100_spill] sm:$0xff] %v16023_v21  ;;  %v13428_v21 = vld [vmem:[#allocation8 + $0x5a0] sm:$0xf0] }
 0x8a6   :  { %v5654_v40 = vpop.f32.mrf.mxu2  ;;  %v4999_v13 = vpop.f32.mrf.mxu0 }
 0x8a7   :  { %v5655_v8 = vadd.f32 %v5654_v40, %v5326_v22  ;;  %v5328_v38 = vpop.f32.mrf.mxu1  ;;  %v5000_v60 = vadd.f32 %v4999_v13, %v17540_v48  ;;  %v12988_v13 = vld [vmem:[#allocation8 + $0x228] sm:$0xf0] }
 0x8a9   :  { %v5787_v58 = vmul.f32 0.2, %v5655_v8  ;;  %v16018_v33 = vpop.f32.mrf.mxu3  ;;  %8283 = vmatmul.bf16.gmra.mxu0 %v12955_v17  ;;  %v6305_v17 = vpop.permute.xlu1 %6304 }
 0x8aa   :  { %17538 = vst [vmem:[#allocation99_spill] sm:$0xff] %v16018_v33  ;;  %8452 = vmatmul.bf16.gmra.mxu1 %v12959_v44  ;;  %v5329_v44 = vadd.f32 %v5328_v38, %v5000_v60  ;;  %v16030_v48 = vpop.permute.xlu0 %6329  ;;  %v12991_v38 = vor.u32 %v14569_v18, %v12988_v13  ;;  %v6310_v59 = vpop.permute.xlu2 %6309 }
 0x8ab   :  { %v5915_v31 = vmax.f32 %v5655_v8, %v5787_v58  ;;  %8621 = vmatmul.bf16.gmra.mxu2 %v12963_v36  ;;  %v12986_v36 = vld [vmem:[#allocation8 + $0x208] sm:$0xf]  ;;  %v12994_v58 = vld [vmem:[#allocation8 + $0x210] sm:$0xf] }
 0x8ac   :  { %v14573_v8 = vld [vmem:[#allocation8 + $0x224] sm:$0xf0] }
 0x8ad   :  { %v6236_v5 = vpack.c.bf16 %v5915_v31, %v5914_v14  ;;  %v7912_v14 = vadd.f32 %v15489_v10, %v6305_v17  ;;  %v14574_v31 = vld [vmem:[#allocation8 + $0x22c] sm:$0xf0]  ;;  %v12987_v28 = vor.u32 %v14573_v8, %v12986_v36  ;;  %v7914_v36 = vadd.f32 %v15495_v50, %v6310_v59  ;;  %v13020_v50 = vld [vmem:[#allocation8 + $0x268] sm:$0xf0] }
 0x8ae   :  { %v5657_v22 = vpop.f32.mrf.mxu2  ;;  %8184 = vmatmul.bf16.gmra.mxu3 %v13399_v54  ;;  %v5001_v40 = vpop.f32.mrf.mxu0  ;;  %v14582_v59 = vld [vmem:[#allocation8 + $0x26c] sm:$0xf0] }
 0x8af   :  { %v5330_v33 = vpop.f32.mrf.mxu1  ;;  %v5002_v55 = vadd.f32 %v5001_v40, %v4673_v2  ;;  %v5658_v57 = vadd.f32 %v5657_v22, %v5329_v44  ;;  %v8081_v61 = vadd.f32 %v15861_v63, %v7912_v14  ;;  %v12995_v22 = vor.u32 %v14574_v31, %v12994_v58  ;;  %v14680_v44 = vld [vmem:[#allocation8 + $0x584] sm:$0xf] }
 0x8b0   :  { %v8083_v18 = vadd.f32 %v15864_v32, %v7914_v36  ;;  %v13026_v32 = vld [vmem:[#allocation8 + $0x250] sm:$0xf] }
 0x8b1   :  { %v16027_v51 = vpop.f32.mrf.mxu3  ;;  %v5331_v54 = vadd.f32 %v5330_v33, %v5002_v55  ;;  %v5788_v60 = vmul.f32 0.2, %v5658_v57  ;;  %v13431_v55 = vor.u32 %v14680_v44, %v13428_v21 }
 0x8b2   :  { %17543 = vst [vmem:[#allocation102_spill] sm:$0xff] %v16027_v51 }
 0x8b3   :  { %v5916_v6 = vmax.f32 %v5658_v57, %v5788_v60  ;;  %v14581_v57 = vld [vmem:[#allocation8 + $0x264] sm:$0xf0] }
 0x8b6   :  { %v5659_v56 = vpop.f32.mrf.mxu2  ;;  %v8249_v40 = vpop.f32.mrf.mxu0 }
 0x8b7   :  { %v5660_v2 = vadd.f32 %v5659_v56, %v5331_v54  ;;  %v8418_v51 = vpop.f32.mrf.mxu1  ;;  %v8250_v24 = vadd.f32 %v8249_v40, %v8081_v61  ;;  %v14577_v56 = vld [vmem:[#allocation8 + $0x24c] sm:$0xf] }
 0x8b9   :  { %v5789_v10 = vmul.f32 0.2, %v5660_v2  ;;  %v16033_v17 = vpop.f32.mrf.mxu3  ;;  %v8419_v33 = vadd.f32 %v8418_v51, %v8250_v24  ;;  %8288 = vmatmul.bf16.gmra.mxu0 %v12987_v28  ;;  %v6315_v24 = vpop.permute.xlu0 %6314  ;;  %v13018_v51 = vld [vmem:[#allocation8 + $0x248] sm:$0xf] }
 0x8ba   :  { %8457 = vmatmul.bf16.gmra.mxu1 %v12991_v38  ;;  %v13019_v60 = vor.u32 %v14581_v57, %v13018_v51  ;;  %v13058_v57 = vld [vmem:[#allocation8 + $0x290] sm:$0xf] }
 0x8bb   :  { %v5917_v63 = vmax.f32 %v5660_v2, %v5789_v10  ;;  %8626 = vmatmul.bf16.gmra.mxu2 %v12995_v22  ;;  %v13023_v2 = vor.u32 %v14577_v56, %v13020_v50  ;;  %v13027_v10 = vor.u32 %v14582_v59, %v13026_v32  ;;  %v14590_v56 = vld [vmem:[#allocation8 + $0x2ac] sm:$0xf0] }
 0x8bd   :  { %v6237_v8 = vpack.c.bf16 %v5917_v63, %v5916_v6  ;;  %v7917_v6 = vadd.f32 %v15500_v34, %v6315_v24 }
 0x8be   :  { %8189 = vmatmul.bf16.gmra.mxu3 %v13431_v55  ;;  %v8587_v13 = vpop.f32.mrf.mxu2  ;;  %v8251_v58 = vpop.f32.mrf.mxu0 }
 0x8bf   :  { %v16037_v14 = vadd.f32 %v8587_v13, %v8419_v33  ;;  %9085 = vmatpush.bf16.msrb.mxu1 %v6237_v8  ;;  %v8420_v31 = vpop.f32.mrf.mxu1  ;;  %v8252_v54 = vadd.f32 %v8251_v58, %v8083_v18  ;;  %v8086_v38 = vadd.f32 %v15869_v15, %v7917_v6  ;;  %v13460_v33 = vld [vmem:[#allocation8 + $0x5e0] sm:$0xf0]  ;;  %v7919_v15 = vadd.f32 %v15503_v43, %v16016_v0  ;;  %v14589_v43 = vld [vmem:[#allocation8 + $0x2a4] sm:$0xf0] }
 0x8c0   :  { %v7922_v0 = vadd.f32 %v15508_v30, %v16001_v23 }
 0x8c1   :  { %v16039_v28 = vpop.f32.mrf.mxu3  ;;  %v8421_v21 = vadd.f32 %v8420_v31, %v8252_v54  ;;  %v16057_v51 = vpop.permute.xlu0 %6399 }
 0x8c2   :  { %v8091_v50 = vadd.f32 %v15878_v16, %v7922_v0  ;;  %v7924_v16 = vadd.f32 %v15510_v29, %v16030_v48  ;;  %v14597_v29 = vld [vmem:[#allocation8 + $0x2e4] sm:$0xf0]  ;;  %v14593_v48 = vld [vmem:[#allocation8 + $0x2cc] sm:$0xf] }
 0x8c3   :  { %9086 = vmatpush.bf16.msrb.mxu1 %v6236_v5  ;;  %v14688_v5 = vld [vmem:[#allocation8 + $0x5c4] sm:$0xf] }
 0x8c4   :  { %v13463_v36 = vor.u32 %v14688_v5, %v13460_v33  ;;  %v8093_v5 = vadd.f32 %v15880_v39, %v7924_v16  ;;  %v7927_v39 = vadd.f32 %v15516_v27, %v15980_v46 }
 0x8c6   :  { %v8589_v61 = vpop.f32.mrf.mxu2  ;;  %v8254_v22 = vpop.f32.mrf.mxu0 }
 0x8c7   :  { %v16043_v40 = vadd.f32 %v8589_v61, %v8421_v21  ;;  %9087 = vmatpush.bf16.msrb.mxu1 %v16006_v4  ;;  %v8423_v44 = vpop.f32.mrf.mxu1  ;;  %v8255_v55 = vadd.f32 %v8254_v22, %v8086_v38  ;;  %v8088_v4 = vadd.f32 %v15872_v26, %v7919_v15  ;;  %v13050_v21 = vld [vmem:[#allocation8 + $0x288] sm:$0xf]  ;;  %v13052_v26 = vld [vmem:[#allocation8 + $0x2a8] sm:$0xf0] }
 0x8c8   :  { %v13051_v6 = vor.u32 %v14589_v43, %v13050_v21  ;;  %v14598_v21 = vld [vmem:[#allocation8 + $0x2ec] sm:$0xf0] }
 0x8c9   :  { %v16046_v63 = vpop.f32.mrf.mxu3  ;;  %v8424_v34 = vadd.f32 %v8423_v44, %v8255_v55  ;;  %8293 = vmatmul.bf16.gmra.mxu0 %v13019_v60  ;;  %v14696_v60 = vld [vmem:[#allocation8 + $0x604] sm:$0xf] }
 0x8ca   :  { %8462 = vmatmul.bf16.gmra.mxu1 %v13023_v2  ;;  %v13492_v2 = vld [vmem:[#allocation8 + $0x620] sm:$0xf0] }
 0x8cb   :  { %8631 = vmatmul.bf16.gmra.mxu2 %v13027_v10  ;;  %9088 = vmatpush.bf16.msrb.mxu1 %v15985_v35  ;;  %v14585_v35 = vld [vmem:[#allocation8 + $0x28c] sm:$0xf]  ;;  %v13495_v23 = vor.u32 %v14696_v60, %v13492_v2  ;;  %v16071_v10 = vpop.permute.xlu0 %6384 }
 0x8cc   :  { %v13055_v32 = vor.u32 %v14585_v35, %v13052_v26  ;;  %v8096_v26 = vadd.f32 %v15887_v1, %v7927_v39  ;;  %v7929_v1 = vadd.f32 %v15518_v49, %v15991_v9  ;;  %v13122_v49 = vld [vmem:[#allocation8 + $0x310] sm:$0xf] }
 0x8cd   :  { %v14606_v9 = vld [vmem:[#allocation8 + $0x32c] sm:$0xf0] }
 0x8ce   :  { %8194 = vmatmul.bf16.gmra.mxu3 %v13463_v36  ;;  %v8592_v8 = vpop.f32.mrf.mxu2  ;;  %v8256_v13 = vpop.f32.mrf.mxu0  ;;  %v8098_v2 = vadd.f32 %v15889_v20, %v7929_v1  ;;  %v13123_v39 = vor.u32 %v14606_v9, %v13122_v49  ;;  %v17546_v9 = vld [vmem:[#allocation16_spill] sm:$0xff] }
 0x8cf   :  { %v16052_v18 = vadd.f32 %v8592_v8, %v8424_v34  ;;  %9089 = vmatpush.bf16.msrb.mxu1 %v15968_v47  ;;  %v8425_v58 = vpop.f32.mrf.mxu1  ;;  %v8257_v31 = vadd.f32 %v8256_v13, %v8088_v4 }
 0x8d1   :  { %v16055_v54 = vpop.f32.mrf.mxu3  ;;  %v8426_v24 = vadd.f32 %v8425_v58, %v8257_v31  ;;  %v13084_v31 = vld [vmem:[#allocation8 + $0x2e8] sm:$0xf0] }
 0x8d3   :  { %9090 = vmatpush.bf16.msrb.mxu1 %v15949_v12  ;;  %v13059_v12 = vor.u32 %v14590_v56, %v13058_v57  ;;  %v6470_v43 = vpop.permute.xlu0 %6469  ;;  %v13087_v57 = vor.u32 %v14593_v48, %v13084_v31 }
 0x8d6   :  { %v8594_v47 = vpop.f32.mrf.mxu2  ;;  %v8259_v61 = vpop.f32.mrf.mxu0 }
 0x8d7   :  { %v16063_v59 = vadd.f32 %v8594_v47, %v8426_v24  ;;  %9091 = vmatpush.bf16.msrb.mxu1 %v15932_v53  ;;  %v8428_v38 = vpop.f32.mrf.mxu1  ;;  %v8260_v22 = vadd.f32 %v8259_v61, %v8091_v50  ;;  %v6465_v53 = vpop.permute.xlu2 %6464  ;;  %v13090_v24 = vld [vmem:[#allocation8 + $0x2d0] sm:$0xf] }
 0x8d8   :  { %v7992_v4 = vadd.f32 %v15639_v25, %v6465_v53  ;;  %v13091_v50 = vor.u32 %v14598_v21, %v13090_v24  ;;  %v14712_v24 = vld [vmem:[#allocation8 + $0x684] sm:$0xf] }
 0x8d9   :  { %v16066_v44 = vpop.f32.mrf.mxu3  ;;  %v8429_v30 = vadd.f32 %v8428_v38, %v8260_v22  ;;  %8298 = vmatmul.bf16.gmra.mxu0 %v13051_v6  ;;  %v14704_v6 = vld [vmem:[#allocation8 + $0x644] sm:$0xf]  ;;  %v7994_v38 = vadd.f32 %v15645_v19, %v6470_v43 }
 0x8da   :  { %8467 = vmatmul.bf16.gmra.mxu1 %v13055_v32  ;;  %v13524_v32 = vld [vmem:[#allocation8 + $0x660] sm:$0xf0] }
 0x8db   :  { %8636 = vmatmul.bf16.gmra.mxu2 %v13059_v12  ;;  %9092 = vmatpush.bf16.msrb.mxu1 %v15917_v41  ;;  %v13082_v41 = vld [vmem:[#allocation8 + $0x2c8] sm:$0xf]  ;;  %v13527_v46 = vor.u32 %v14704_v6, %v13524_v32  ;;  %v13556_v21 = vld [vmem:[#allocation8 + $0x6a0] sm:$0xf0] }
 0x8dc   :  { %v13083_v0 = vor.u32 %v14597_v29, %v13082_v41 }
 0x8de   :  { %8199 = vmatmul.bf16.gmra.mxu3 %v13495_v23  ;;  %v8597_v33 = vpop.f32.mrf.mxu2  ;;  %v8261_v34 = vpop.f32.mrf.mxu0 }
 0x8df   :  { %v16074_v55 = vadd.f32 %v8597_v33, %v8429_v30  ;;  %v8430_v36 = vpop.f32.mrf.mxu1  ;;  %v8262_v15 = vadd.f32 %v8261_v34, %v8093_v5  ;;  %v13114_v33 = vld [vmem:[#allocation8 + $0x308] sm:$0xf] }
 0x8e0   :  { %v14605_v34 = vld [vmem:[#allocation8 + $0x324] sm:$0xf0] }
 0x8e1   :  { %v8160_v8 = vpop.f32.mrf.mxu3  ;;  %v8431_v13 = vadd.f32 %v8430_v36, %v8262_v15  ;;  %v14601_v36 = vld [vmem:[#allocation8 + $0x30c] sm:$0xf] }
 0x8e2   :  { %v16077_v58 = vadd.f32 %v8160_v8, %v7992_v4  ;;  %v13116_v15 = vld [vmem:[#allocation8 + $0x328] sm:$0xf0]  ;;  %v7932_v4 = vadd.f32 %v15524_v11, %v15997_v3  ;;  %v13559_v11 = vor.u32 %v14712_v24, %v13556_v21 }
 0x8e3   :  { %v13119_v41 = vor.u32 %v14601_v36, %v13116_v15  ;;  %v13588_v36 = vld [vmem:[#allocation8 + $0x6e0] sm:$0xf0] }
 0x8e4   :  { %v8101_v8 = vadd.f32 %v15896_v62, %v7932_v4  ;;  %v7934_v62 = vadd.f32 %v15526_v52, %v15970_v42  ;;  %v13154_v52 = vld [vmem:[#allocation8 + $0x350] sm:$0xf] }
 0x8e5   :  { %v14614_v42 = vld [vmem:[#allocation8 + $0x36c] sm:$0xf0] }
 0x8e6   :  { %v8599_v35 = vpop.f32.mrf.mxu2  ;;  %v8264_v56 = vpop.f32.mrf.mxu0  ;;  %v8103_v3 = vadd.f32 %v15898_v7, %v7934_v62  ;;  %v17544_v7 = vld [vmem:[#allocation67_spill] sm:$0xff]  ;;  %v14617_v62 = vld [vmem:[#allocation8 + $0x38c] sm:$0xf] }
 0x8e7   :  { %v16082_v25 = vadd.f32 %v8599_v35, %v8431_v13  ;;  %v8433_v47 = vpop.f32.mrf.mxu1  ;;  %v8265_v61 = vadd.f32 %v8264_v56, %v8096_v26  ;;  %v13115_v13 = vor.u32 %v14605_v34, %v13114_v33  ;;  %v13155_v33 = vor.u32 %v14614_v42, %v13154_v52  ;;  %v14720_v34 = vld [vmem:[#allocation8 + $0x6c4] sm:$0xf] }
 0x8e9   :  { %v8162_v12 = vpop.f32.mrf.mxu3  ;;  %v8434_v27 = vadd.f32 %v8433_v47, %v8265_v61  ;;  %8303 = vmatmul.bf16.gmra.mxu0 %v13083_v0  ;;  %v13146_v61 = vld [vmem:[#allocation8 + $0x348] sm:$0xf] }
 0x8ea   :  { %8472 = vmatmul.bf16.gmra.mxu1 %v13087_v57  ;;  %v16085_v60 = vadd.f32 %v8162_v12, %v7994_v38  ;;  %v14613_v38 = vld [vmem:[#allocation8 + $0x364] sm:$0xf0]  ;;  %v14609_v12 = vld [vmem:[#allocation8 + $0x34c] sm:$0xf] }
 0x8eb   :  { %8641 = vmatmul.bf16.gmra.mxu2 %v13091_v50 }
 0x8ee   :  { %8204 = vmatmul.bf16.gmra.mxu3 %v13527_v46  ;;  %v8602_v22 = vpop.f32.mrf.mxu2  ;;  %v8266_v23 = vpop.f32.mrf.mxu0  ;;  %v7937_v46 = vadd.f32 %v15530_v45, %v15957_v37  ;;  %v13591_v45 = vor.u32 %v14720_v34, %v13588_v36  ;;  %v17545_v37 = vld [vmem:[#allocation89_spill] sm:$0xff]  ;;  %v17552_v36 = vld [vmem:[#allocation18_spill] sm:$0xff] }
 0x8ef   :  { %v16090_v30 = vadd.f32 %v8602_v22, %v8434_v27  ;;  %v8435_v16 = vpop.f32.mrf.mxu1  ;;  %v8267_v19 = vadd.f32 %v8266_v23, %v8098_v2  ;;  %v13148_v27 = vld [vmem:[#allocation8 + $0x368] sm:$0xf0]  ;;  %v13147_v22 = vor.u32 %v14613_v38, %v13146_v61 }
 0x8f0   :  { %v8106_v1 = vadd.f32 %v17544_v7, %v7937_v46  ;;  %v13151_v23 = vor.u32 %v14609_v12, %v13148_v27  ;;  %v17550_v61 = vld [vmem:[#allocation69_spill] sm:$0xff] }
 0x8f1   :  { %v16092_v53 = vpop.f32.mrf.mxu3  ;;  %v8436_v5 = vadd.f32 %v8435_v16, %v8267_v19  ;;  %v17551_v34 = vld [vmem:[#allocation77_spill] sm:$0xff] }
 0x8f6   :  { %v8604_v20 = vpop.f32.mrf.mxu2  ;;  %v8269_v48 = vpop.f32.mrf.mxu0 }
 0x8f7   :  { %v16097_v29 = vadd.f32 %v8604_v20, %v8436_v5  ;;  %v8438_v31 = vpop.f32.mrf.mxu1  ;;  %v8270_v43 = vadd.f32 %v8269_v48, %v8101_v8  ;;  %v7939_v20 = vadd.f32 %v17546_v9, %v17545_v37  ;;  %v17547_v8 = vld [vmem:[#allocation68_spill] sm:$0xff] }
 0x8f9   :  { %v16099_v35 = vpop.f32.mrf.mxu3  ;;  %v8439_v26 = vadd.f32 %v8438_v31, %v8270_v43  ;;  %8308 = vmatmul.bf16.gmra.mxu0 %v13115_v13  ;;  %v8108_v13 = vadd.f32 %v17547_v8, %v7939_v20 }
 0x8fa   :  { %8477 = vmatmul.bf16.gmra.mxu1 %v13119_v41 }
 0x8fb   :  { %8646 = vmatmul.bf16.gmra.mxu2 %v13123_v39 }
 0x8fe   :  { %8209 = vmatmul.bf16.gmra.mxu3 %v13559_v11  ;;  %v8607_v0 = vpop.f32.mrf.mxu2  ;;  %v8271_v56 = vpop.f32.mrf.mxu0  ;;  %v14621_v11 = vld [vmem:[#allocation8 + $0x3a4] sm:$0xf0] }
 0x8ff   :  { %v16104_v57 = vadd.f32 %v8607_v0, %v8439_v26  ;;  %v8440_v47 = vpop.f32.mrf.mxu1  ;;  %v8272_v50 = vadd.f32 %v8271_v56, %v8103_v3  ;;  %v13178_v26 = vld [vmem:[#allocation8 + $0x388] sm:$0xf]  ;;  %v13180_v3 = vld [vmem:[#allocation8 + $0x3a8] sm:$0xf0]  ;;  %v17548_v0 = vld [vmem:[#allocation74_spill] sm:$0xff] }
 0x900   :  { %v17549_v56 = vld [vmem:[#allocation17_spill] sm:$0xff]  ;;  %v13179_v27 = vor.u32 %v14621_v11, %v13178_v26  ;;  %v13183_v46 = vor.u32 %v14617_v62, %v13180_v3  ;;  %v17554_v11 = vld [vmem:[#allocation80_spill] sm:$0xff]  ;;  %v17555_v62 = vld [vmem:[#allocation19_spill] sm:$0xff] }
 0x901   :  { %v16106_v6 = vpop.f32.mrf.mxu3  ;;  %v8441_v32 = vadd.f32 %v8440_v47, %v8272_v50  ;;  %v7942_v47 = vadd.f32 %v17549_v56, %v17548_v0  ;;  %v13186_v50 = vld [vmem:[#allocation8 + $0x390] sm:$0xf]  ;;  %v13212_v26 = vld [vmem:[#allocation8 + $0x3e8] sm:$0xf0]  ;;  %v7947_v3 = vadd.f32 %v17555_v62, %v17554_v11 }
 0x902   :  { %v13218_v0 = vld [vmem:[#allocation8 + $0x3d0] sm:$0xf]  ;;  %v13244_v11 = vld [vmem:[#allocation8 + $0x428] sm:$0xf0] }
 0x903   :  { %v8111_v38 = vadd.f32 %v17550_v61, %v7942_v47  ;;  %v14630_v56 = vld [vmem:[#allocation8 + $0x3ec] sm:$0xf0]  ;;  %v17556_v47 = vld [vmem:[#allocation71_spill] sm:$0xff] }
 0x904   :  { %v17560_v62 = vld [vmem:[#allocation21_spill] sm:$0xff] }
 0x906   :  { %v8609_v2 = vpop.f32.mrf.mxu2  ;;  %v8274_v19 = vpop.f32.mrf.mxu0 }
 0x907   :  { %v16111_v16 = vadd.f32 %v8609_v2, %v8441_v32  ;;  %v8443_v5 = vpop.f32.mrf.mxu1  ;;  %v8275_v15 = vadd.f32 %v8274_v19, %v8106_v1  ;;  %v14622_v32 = vld [vmem:[#allocation8 + $0x3ac] sm:$0xf0]  ;;  %v14728_v2 = vld [vmem:[#allocation8 + $0x704] sm:$0xf] }
 0x908   :  { %v13187_v1 = vor.u32 %v14622_v32, %v13186_v50  ;;  %v8116_v50 = vadd.f32 %v17556_v47, %v7947_v3  ;;  %v7952_v3 = vadd.f32 %v17560_v62, %v16071_v10  ;;  %v14645_v62 = vld [vmem:[#allocation8 + $0x464] sm:$0xf0] }
 0x909   :  { %v16113_v4 = vpop.f32.mrf.mxu3  ;;  %v8444_v49 = vadd.f32 %v8443_v5, %v8275_v15  ;;  %8313 = vmatmul.bf16.gmra.mxu0 %v13147_v22  ;;  %v13620_v22 = vld [vmem:[#allocation8 + $0x720] sm:$0xf0]  ;;  %v7944_v15 = vadd.f32 %v17552_v36, %v17551_v34 }
 0x90a   :  { %8482 = vmatmul.bf16.gmra.mxu1 %v13151_v23  ;;  %v17558_v34 = vld [vmem:[#allocation20_spill] sm:$0xff] }
 0x90b   :  { %8651 = vmatmul.bf16.gmra.mxu2 %v13155_v33  ;;  %v13623_v33 = vor.u32 %v14728_v2, %v13620_v22 }
 0x90e   :  { %8214 = vmatmul.bf16.gmra.mxu3 %v13591_v45  ;;  %v8612_v41 = vpop.f32.mrf.mxu2  ;;  %v8276_v31 = vpop.f32.mrf.mxu0 }
 0x90f   :  { %v16118_v48 = vadd.f32 %v8612_v41, %v8444_v49  ;;  %v8445_v39 = vpop.f32.mrf.mxu1  ;;  %v8277_v24 = vadd.f32 %v8276_v31, %v8108_v13  ;;  %v17553_v49 = vld [vmem:[#allocation70_spill] sm:$0xff] }
 0x910   :  { %v8113_v45 = vadd.f32 %v17553_v49, %v7944_v15  ;;  %v17559_v15 = vld [vmem:[#allocation73_spill] sm:$0xff] }
 0x911   :  { %v16120_v21 = vpop.f32.mrf.mxu3  ;;  %v8446_v43 = vadd.f32 %v8445_v39, %v8277_v24  ;;  %v13210_v39 = vld [vmem:[#allocation8 + $0x3c8] sm:$0xf] }
 0x912   :  { %v14629_v24 = vld [vmem:[#allocation8 + $0x3e4] sm:$0xf0] }
 0x913   :  { %v13211_v61 = vor.u32 %v14629_v24, %v13210_v39  ;;  %v13242_v24 = vld [vmem:[#allocation8 + $0x408] sm:$0xf] }
 0x916   :  { %v8614_v12 = vpop.f32.mrf.mxu2  ;;  %v8279_v42 = vpop.f32.mrf.mxu0 }
 0x917   :  { %v16125_v52 = vadd.f32 %v8614_v12, %v8446_v43  ;;  %v8448_v7 = vpop.f32.mrf.mxu1  ;;  %v8280_v23 = vadd.f32 %v8279_v42, %v8111_v38  ;;  %v14625_v43 = vld [vmem:[#allocation8 + $0x3cc] sm:$0xf]  ;;  %v13219_v42 = vor.u32 %v14630_v56, %v13218_v0  ;;  %v13250_v0 = vld [vmem:[#allocation8 + $0x410] sm:$0xf] }
 0x918   :  { %v13215_v38 = vor.u32 %v14625_v43, %v13212_v26  ;;  %v14637_v43 = vld [vmem:[#allocation8 + $0x424] sm:$0xf0]  ;;  %v14633_v26 = vld [vmem:[#allocation8 + $0x40c] sm:$0xf]  ;;  %v14638_v56 = vld [vmem:[#allocation8 + $0x42c] sm:$0xf0] }
 0x919   :  { %v16127_v19 = vpop.f32.mrf.mxu3  ;;  %v8449_v5 = vadd.f32 %v8448_v7, %v8280_v23  ;;  %8318 = vmatmul.bf16.gmra.mxu0 %v13179_v27  ;;  %v14736_v7 = vld [vmem:[#allocation8 + $0x744] sm:$0xf] }
 0x91a   :  { %8487 = vmatmul.bf16.gmra.mxu1 %v13183_v46 }
 0x91b   :  { %8656 = vmatmul.bf16.gmra.mxu2 %v13187_v1  ;;  %v13652_v1 = vld [vmem:[#allocation8 + $0x760] sm:$0xf0] }
 0x91e   :  { %8219 = vmatmul.bf16.gmra.mxu3 %v13623_v33  ;;  %v8617_v37 = vpop.f32.mrf.mxu2  ;;  %v8281_v20 = vpop.f32.mrf.mxu0  ;;  %v17557_v33 = vld [vmem:[#allocation84_spill] sm:$0xff] }
 0x91f   :  { %v16132_v9 = vadd.f32 %v8617_v37, %v8449_v5  ;;  %v8450_v8 = vpop.f32.mrf.mxu1  ;;  %v8282_v13 = vadd.f32 %v8281_v20, %v8113_v45  ;;  %v13655_v5 = vor.u32 %v14736_v7, %v13652_v1  ;;  %v7949_v36 = vadd.f32 %v17558_v34, %v17557_v33  ;;  %v14744_v1 = vld [vmem:[#allocation8 + $0x784] sm:$0xf] }
 0x920   :  { %v13251_v7 = vor.u32 %v14638_v56, %v13250_v0  ;;  %v13276_v0 = vld [vmem:[#allocation8 + $0x468] sm:$0xf0]  ;;  %v17566_v56 = vld [vmem:[#allocation100_spill] sm:$0xff] }
 0x921   :  { %v16134_v41 = vpop.f32.mrf.mxu3  ;;  %v8451_v31 = vadd.f32 %v8450_v8, %v8282_v13  ;;  %v8118_v49 = vadd.f32 %v17559_v15, %v7949_v36  ;;  %v17563_v36 = vld [vmem:[#allocation22_spill] sm:$0xff] }
 0x926   :  { %v8619_v32 = vpop.f32.mrf.mxu2  ;;  %v8284_v27 = vpop.f32.mrf.mxu0 }
 0x927   :  { %v16139_v12 = vadd.f32 %v8619_v32, %v8451_v31  ;;  %v8453_v46 = vpop.f32.mrf.mxu1  ;;  %v8285_v2 = vadd.f32 %v8284_v27, %v8116_v50  ;;  %v17561_v50 = vld [vmem:[#allocation76_spill] sm:$0xff] }
 0x928   :  { %v8121_v32 = vadd.f32 %v17561_v50, %v7952_v3  ;;  %v14641_v3 = vld [vmem:[#allocation8 + $0x44c] sm:$0xf] }
 0x929   :  { %v16141_v22 = vpop.f32.mrf.mxu3  ;;  %v8454_v23 = vadd.f32 %v8453_v46, %v8285_v2  ;;  %8323 = vmatmul.bf16.gmra.mxu0 %v13211_v61  ;;  %v13243_v61 = vor.u32 %v14637_v43, %v13242_v24  ;;  %v13684_v2 = vld [vmem:[#allocation8 + $0x7a0] sm:$0xf0] }
 0x92a   :  { %8492 = vmatmul.bf16.gmra.mxu1 %v13215_v38  ;;  %v13247_v38 = vor.u32 %v14633_v26, %v13244_v11  ;;  %v13687_v10 = vor.u32 %v14744_v1, %v13684_v2  ;;  %v13274_v11 = vld [vmem:[#allocation8 + $0x448] sm:$0xf]  ;;  %v13279_v1 = vor.u32 %v14641_v3, %v13276_v0 }
 0x92b   :  { %8661 = vmatmul.bf16.gmra.mxu2 %v13219_v42 }
 0x92e   :  { %8224 = vmatmul.bf16.gmra.mxu3 %v13655_v5  ;;  %v8622_v45 = vpop.f32.mrf.mxu2  ;;  %v8286_v20 = vpop.f32.mrf.mxu0 }
 0x92f   :  { %v16146_v37 = vadd.f32 %v8622_v45, %v8454_v23  ;;  %v8455_v8 = vpop.f32.mrf.mxu1  ;;  %v8287_v13 = vadd.f32 %v8286_v20, %v8118_v49  ;;  %v6390_v5 = vpop.permute.xlu1 %6389  ;;  %v17564_v49 = vld [vmem:[#allocation78_spill] sm:$0xff] }
 0x930   :  { %v7954_v15 = vadd.f32 %v17563_v36, %v6390_v5  ;;  %v13716_v36 = vld [vmem:[#allocation8 + $0x7e0] sm:$0xf0] }
 0x931   :  { %v16148_v31 = vpop.f32.mrf.mxu3  ;;  %v8456_v39 = vadd.f32 %v8455_v8, %v8287_v13 }
 0x932   :  { %v8123_v45 = vadd.f32 %v17564_v49, %v7954_v15 }
 0x936   :  { %v8624_v47 = vpop.f32.mrf.mxu2  ;;  %v8289_v46 = vpop.f32.mrf.mxu0 }
 0x937   :  { %v16153_v27 = vadd.f32 %v8624_v47, %v8456_v39  ;;  %v8458_v42 = vpop.f32.mrf.mxu1  ;;  %v8290_v23 = vadd.f32 %v8289_v46, %v8121_v32  ;;  %v17567_v47 = vld [vmem:[#allocation23_spill] sm:$0xff]  ;;  %v13282_v32 = vld [vmem:[#allocation8 + $0x450] sm:$0xf] }
 0x938   :  { %v7957_v50 = vadd.f32 %v17567_v47, %v17566_v56 }
 0x939   :  { %17562 = vst [vmem:[#allocation101_spill] sm:$0xff] %v16153_v27  ;;  %v16155_v33 = vpop.f32.mrf.mxu3  ;;  %v8459_v34 = vadd.f32 %v8458_v42, %v8290_v23  ;;  %8328 = vmatmul.bf16.gmra.mxu0 %v13243_v61  ;;  %v14646_v61 = vld [vmem:[#allocation8 + $0x46c] sm:$0xf0] }
 0x93a   :  { %8497 = vmatmul.bf16.gmra.mxu1 %v13247_v38  ;;  %v17568_v38 = vld [vmem:[#allocation81_spill] sm:$0xff] }
 0x93b   :  { %8666 = vmatmul.bf16.gmra.mxu2 %v13251_v7  ;;  %v8126_v46 = vadd.f32 %v17568_v38, %v7957_v50  ;;  %v13275_v7 = vor.u32 %v14645_v62, %v13274_v11  ;;  %v14649_v38 = vld [vmem:[#allocation8 + $0x48c] sm:$0xf] }
 0x93e   :  { %8229 = vmatmul.bf16.gmra.mxu3 %v13687_v10  ;;  %v8627_v20 = vpop.f32.mrf.mxu2  ;;  %v8291_v13 = vpop.f32.mrf.mxu0  ;;  %v14752_v10 = vld [vmem:[#allocation8 + $0x7c4] sm:$0xf] }
 0x93f   :  { %v16159_v8 = vadd.f32 %v8627_v20, %v8459_v34  ;;  %v8460_v39 = vpop.f32.mrf.mxu1  ;;  %v8292_v24 = vadd.f32 %v8291_v13, %v8123_v45  ;;  %v13283_v34 = vor.u32 %v14646_v61, %v13282_v32  ;;  %v13719_v20 = vor.u32 %v14752_v10, %v13716_v36  ;;  %v17570_v13 = vld [vmem:[#allocation24_spill] sm:$0xff] }
 0x940   :  { %v13306_v32 = vld [vmem:[#allocation8 + $0x488] sm:$0xf] }
 0x941   :  { %17565 = vst [vmem:[#allocation103_spill] sm:$0xff] %v16159_v8  ;;  %v16161_v43 = vpop.f32.mrf.mxu3  ;;  %v8461_v26 = vadd.f32 %v8460_v39, %v8292_v24  ;;  %v7959_v39 = vadd.f32 %v17570_v13, %v16057_v51  ;;  %v17571_v24 = vld [vmem:[#allocation82_spill] sm:$0xff]  ;;  %v14653_v61 = vld [vmem:[#allocation8 + $0x4a4] sm:$0xf0] }
 0x942   :  { %v13314_v51 = vld [vmem:[#allocation8 + $0x490] sm:$0xf]  ;;  %v13307_v36 = vor.u32 %v14653_v61, %v13306_v32 }
 0x943   :  { %v8128_v11 = vadd.f32 %v17571_v24, %v7959_v39  ;;  %v14506_v24 = vld [vmem:[#allocation8 + $0x14] sm:$0xf] }
 0x944   :  { %v17579_v32 = vld [vmem:[#allocation90_spill] sm:$0xff] }
 0x946   :  { %v8629_v42 = vpop.f32.mrf.mxu2  ;;  %v8294_v23 = vpop.f32.mrf.mxu0 }
 0x947   :  { %v16166_v2 = vadd.f32 %v8629_v42, %v8461_v26  ;;  %v8463_v5 = vpop.f32.mrf.mxu1  ;;  %v8295_v15 = vadd.f32 %v8294_v23, %v8126_v46  ;;  %v13308_v46 = vld [vmem:[#allocation8 + $0x4a8] sm:$0xf0]  ;;  %v17573_v42 = vld [vmem:[#allocation94_spill] sm:$0xff] }
 0x948   :  { %v14654_v23 = vld [vmem:[#allocation8 + $0x4ac] sm:$0xf0] }
 0x949   :  { %17569 = vst [vmem:[#allocation105_spill] sm:$0xff] %v16166_v2  ;;  %v16168_v49 = vpop.f32.mrf.mxu3  ;;  %v8464_v45 = vadd.f32 %v8463_v5, %v8295_v15  ;;  %8333 = vmatmul.bf16.gmra.mxu0 %v13275_v7  ;;  %v17574_v7 = vld [vmem:[#allocation25_spill] sm:$0xff]  ;;  %v13311_v15 = vor.u32 %v14649_v38, %v13308_v46  ;;  %v13315_v39 = vor.u32 %v14654_v23, %v13314_v51 }
 0x94a   :  { %8502 = vmatmul.bf16.gmra.mxu1 %v13279_v1  ;;  %v7962_v1 = vadd.f32 %v17574_v7, %v17573_v42  ;;  %v17575_v5 = vld [vmem:[#allocation85_spill] sm:$0xff]  ;;  %v17578_v7 = vld [vmem:[#allocation26_spill] sm:$0xff] }
 0x94b   :  { %8671 = vmatmul.bf16.gmra.mxu2 %v13283_v34  ;;  %v17577_v42 = vld [vmem:[#allocation97_spill] sm:$0xff] }
 0x94c   :  { %v8131_v34 = vadd.f32 %v17575_v5, %v7962_v1  ;;  %v7964_v1 = vadd.f32 %v17578_v7, %v17577_v42  ;;  %v17583_v42 = vld [vmem:[#allocation91_spill] sm:$0xff] }
 0x94e   :  { %8234 = vmatmul.bf16.gmra.mxu3 %v13719_v20  ;;  %v8632_v26 = vpop.f32.mrf.mxu2  ;;  %v8296_v3 = vpop.f32.mrf.mxu0  ;;  %v8133_v61 = vadd.f32 %v17579_v32, %v7964_v1 }
 0x94f   :  { %v16173_v62 = vadd.f32 %v8632_v26, %v8464_v45  ;;  %v8465_v0 = vpop.f32.mrf.mxu1  ;;  %v8297_v56 = vadd.f32 %v8296_v3, %v8128_v11  ;;  %v12740_v11 = vld [vmem:[#allocation8 + $0x30] sm:$0xf0] }
 0x951   :  { %17572 = vst [vmem:[#allocation104_spill] sm:$0xff] %v16173_v62  ;;  %v16175_v47 = vpop.f32.mrf.mxu3  ;;  %v8466_v50 = vadd.f32 %v8465_v0, %v8297_v56  ;;  %v12743_v56 = vor.u32 %v14506_v24, %v12740_v11  ;;  %v13346_v11 = vld [vmem:[#allocation8 + $0x4d0] sm:$0xf] }
 0x956   :  { %v8634_v10 = vpop.f32.mrf.mxu2  ;;  %v8299_v20 = vpop.f32.mrf.mxu0 }
 0x957   :  { %v16180_v45 = vadd.f32 %v8634_v10, %v8466_v50  ;;  %v8468_v13 = vpop.f32.mrf.mxu1  ;;  %v8300_v26 = vadd.f32 %v8299_v20, %v8131_v34  ;;  %v13338_v10 = vld [vmem:[#allocation8 + $0x4c8] sm:$0xf]  ;;  %v13340_v20 = vld [vmem:[#allocation8 + $0x4e8] sm:$0xf0] }
 0x959   :  { %17576 = vst [vmem:[#allocation106_spill] sm:$0xff] %v16180_v45  ;;  %v16182_v3 = vpop.f32.mrf.mxu3  ;;  %v8469_v0 = vadd.f32 %v8468_v13, %v8300_v26  ;;  %8338 = vmatmul.bf16.gmra.mxu0 %v13307_v36  ;;  %v14661_v36 = vld [vmem:[#allocation8 + $0x4e4] sm:$0xf0]  ;;  %v17581_v13 = vld [vmem:[#allocation98_spill] sm:$0xff] }
 0x95a   :  { %8507 = vmatmul.bf16.gmra.mxu1 %v13311_v15  ;;  %v14657_v15 = vld [vmem:[#allocation8 + $0x4cc] sm:$0xf]  ;;  %v14662_v26 = vld [vmem:[#allocation8 + $0x4ec] sm:$0xf0] }
 0x95b   :  { %8676 = vmatmul.bf16.gmra.mxu2 %v13315_v39  ;;  %v17582_v39 = vld [vmem:[#allocation27_spill] sm:$0xff]  ;;  %v13343_v1 = vor.u32 %v14657_v15, %v13340_v20 }
 0x95c   :  { %v7967_v24 = vadd.f32 %v17582_v39, %v17581_v13  ;;  %v17585_v39 = vld [vmem:[#allocation93_spill] sm:$0xff] }
 0x95e   :  { %v8637_v50 = vpop.f32.mrf.mxu2  ;;  %8755 = vmatmul.bf16.vlgmr.msrb.gmra.mxu3 %v12743_v56  ;;  %v8301_v46 = vpop.f32.mrf.mxu0  ;;  %v8136_v7 = vadd.f32 %v17583_v42, %v7967_v24  ;;  %v17586_v24 = vld [vmem:[#allocation28_spill] sm:$0xff] }
 0x95f   :  { %v16187_v38 = vadd.f32 %v8637_v50, %v8469_v0  ;;  %v8470_v51 = vpop.f32.mrf.mxu1  ;;  %v8302_v23 = vadd.f32 %v8301_v46, %v8133_v61  ;;  %v13339_v0 = vor.u32 %v14661_v36, %v13338_v10  ;;  %v13347_v46 = vor.u32 %v14662_v26, %v13346_v11  ;;  %v17587_v10 = vld [vmem:[#allocation92_spill] sm:$0xff] }
 0x960   :  { %v7969_v42 = vadd.f32 %v17586_v24, %v17585_v39  ;;  %v14670_v39 = vld [vmem:[#allocation8 + $0x52c] sm:$0xf0]  ;;  %v17591_v24 = vld [vmem:[#allocation96_spill] sm:$0xff] }
 0x961   :  { %17580 = vst [vmem:[#allocation108_spill] sm:$0xff] %v16187_v38  ;;  %v16189_v5 = vpop.f32.mrf.mxu3  ;;  %v8471_v34 = vadd.f32 %v8470_v51, %v8302_v23  ;;  %v14514_v51 = vld [vmem:[#allocation8 + $0x54] sm:$0xf] }
 0x962   :  { %v12772_v23 = vld [vmem:[#allocation8 + $0x70] sm:$0xf0]  ;;  %v8138_v36 = vadd.f32 %v17587_v10, %v7969_v42 }
 0x963   :  { %v12775_v13 = vor.u32 %v14514_v51, %v12772_v23  ;;  %v13378_v23 = vld [vmem:[#allocation8 + $0x510] sm:$0xf] }
 0x966   :  { %v8639_v56 = vpop.f32.mrf.mxu2  ;;  %v8304_v61 = vpop.f32.mrf.mxu0 }
 0x967   :  { %v16194_v32 = vadd.f32 %v8639_v56, %v8471_v34  ;;  %v8473_v50 = vpop.f32.mrf.mxu1  ;;  %v8305_v38 = vadd.f32 %v8304_v61, %v8136_v7  ;;  %v13372_v61 = vld [vmem:[#allocation8 + $0x528] sm:$0xf0] }
 0x969   :  { %17584 = vst [vmem:[#allocation107_spill] sm:$0xff] %v16194_v32  ;;  %v16196_v45 = vpop.f32.mrf.mxu3  ;;  %v8474_v62 = vadd.f32 %v8473_v50, %v8305_v38  ;;  %8343 = vmatmul.bf16.gmra.mxu0 %v13339_v0  ;;  %v13370_v38 = vld [vmem:[#allocation8 + $0x508] sm:$0xf] }
 0x96a   :  { %8512 = vmatmul.bf16.gmra.mxu1 %v13343_v1  ;;  %v14669_v0 = vld [vmem:[#allocation8 + $0x524] sm:$0xf0]  ;;  %v14665_v1 = vld [vmem:[#allocation8 + $0x50c] sm:$0xf] }
 0x96b   :  { %8681 = vmatmul.bf16.gmra.mxu2 %v13347_v46  ;;  %v17589_v50 = vld [vmem:[#allocation88_spill] sm:$0xff]  ;;  %v17590_v46 = vld [vmem:[#allocation29_spill] sm:$0xff]  ;;  %v13375_v10 = vor.u32 %v14665_v1, %v13372_v61 }
 0x96c   :  { %v7972_v51 = vadd.f32 %v17590_v46, %v17589_v50  ;;  %v17593_v46 = vld [vmem:[#allocation95_spill] sm:$0xff] }
 0x96e   :  { %v8642_v34 = vpop.f32.mrf.mxu2  ;;  %8760 = vmatmul.bf16.gmra.mxu3 %v12775_v13  ;;  %v8306_v20 = vpop.f32.mrf.mxu0  ;;  %v8141_v42 = vadd.f32 %v17591_v24, %v7972_v51  ;;  %v17594_v51 = vld [vmem:[#allocation30_spill] sm:$0xff] }
 0x96f   :  { %v16201_v15 = vadd.f32 %v8642_v34, %v8474_v62  ;;  %v8475_v11 = vpop.f32.mrf.mxu1  ;;  %v8307_v26 = vadd.f32 %v8306_v20, %v8138_v36  ;;  %v13371_v62 = vor.u32 %v14669_v0, %v13370_v38  ;;  %v7974_v24 = vadd.f32 %v17594_v51, %v17593_v46  ;;  %v17595_v38 = vld [vmem:[#allocation99_spill] sm:$0xff]  ;;  %v14678_v46 = vld [vmem:[#allocation8 + $0x56c] sm:$0xf0] }
 0x970   :  { %v17600_v51 = vld [vmem:[#allocation102_spill] sm:$0xff] }
 0x971   :  { %17588 = vst [vmem:[#allocation109_spill] sm:$0xff] %v16201_v15  ;;  %v16203_v7 = vpop.f32.mrf.mxu3  ;;  %v8476_v56 = vadd.f32 %v8475_v11, %v8307_v26  ;;  %v13379_v15 = vor.u32 %v14670_v39, %v13378_v23  ;;  %v14522_v11 = vld [vmem:[#allocation8 + $0x94] sm:$0xf]  ;;  %v8143_v0 = vadd.f32 %v17595_v38, %v7974_v24 }
 0x972   :  { %v12804_v26 = vld [vmem:[#allocation8 + $0xb0] sm:$0xf0] }
 0x973   :  { %v12807_v50 = vor.u32 %v14522_v11, %v12804_v26  ;;  %v13410_v26 = vld [vmem:[#allocation8 + $0x550] sm:$0xf] }
 0x976   :  { %v8644_v13 = vpop.f32.mrf.mxu2  ;;  %v8309_v36 = vpop.f32.mrf.mxu0 }
 0x977   :  { %v16208_v34 = vadd.f32 %v8644_v13, %v8476_v56  ;;  %v8478_v20 = vpop.f32.mrf.mxu1  ;;  %v8310_v32 = vadd.f32 %v8309_v36, %v8141_v42  ;;  %v13404_v36 = vld [vmem:[#allocation8 + $0x568] sm:$0xf0] }
 0x979   :  { %17592 = vst [vmem:[#allocation110_spill] sm:$0xff] %v16208_v34  ;;  %v16210_v2 = vpop.f32.mrf.mxu3  ;;  %v8479_v8 = vadd.f32 %v8478_v20, %v8310_v32  ;;  %8348 = vmatmul.bf16.gmra.mxu0 %v13371_v62  ;;  %v13402_v32 = vld [vmem:[#allocation8 + $0x548] sm:$0xf]  ;;  %v17599_v20 = vld [vmem:[#allocation31_spill] sm:$0xff] }
 0x97a   :  { %8517 = vmatmul.bf16.gmra.mxu1 %v13375_v10  ;;  %v14677_v62 = vld [vmem:[#allocation8 + $0x564] sm:$0xf0]  ;;  %v14673_v10 = vld [vmem:[#allocation8 + $0x54c] sm:$0xf] }
 0x97b   :  { %8686 = vmatmul.bf16.gmra.mxu2 %v13379_v15  ;;  %v17598_v15 = vld [vmem:[#allocation83_spill] sm:$0xff]  ;;  %v13407_v38 = vor.u32 %v14673_v10, %v13404_v36 }
 0x97c   :  { %v7977_v11 = vadd.f32 %v17599_v20, %v17598_v15  ;;  %v17602_v20 = vld [vmem:[#allocation86_spill] sm:$0xff] }
 0x97e   :  { %v8647_v56 = vpop.f32.mrf.mxu2  ;;  %8765 = vmatmul.bf16.gmra.mxu3 %v12807_v50  ;;  %v8311_v61 = vpop.f32.mrf.mxu0  ;;  %v8146_v24 = vadd.f32 %v17600_v51, %v7977_v11  ;;  %v17603_v11 = vld [vmem:[#allocation32_spill] sm:$0xff] }
 0x97f   :  { %v16215_v1 = vadd.f32 %v8647_v56, %v8479_v8  ;;  %v8480_v23 = vpop.f32.mrf.mxu1  ;;  %v8312_v39 = vadd.f32 %v8311_v61, %v8143_v0  ;;  %v13403_v8 = vor.u32 %v14677_v62, %v13402_v32  ;;  %v7979_v51 = vadd.f32 %v17603_v11, %v17602_v20 }
 0x981   :  { %17596 = vst [vmem:[#allocation111_spill] sm:$0xff] %v16215_v1  ;;  %v16217_v42 = vpop.f32.mrf.mxu3  ;;  %v8481_v13 = vadd.f32 %v8480_v23, %v8312_v39  ;;  %v13411_v1 = vor.u32 %v14678_v46, %v13410_v26  ;;  %v14530_v23 = vld [vmem:[#allocation8 + $0xd4] sm:$0xf]  ;;  %v8148_v32 = vadd.f32 %v16033_v17, %v7979_v51 }
 0x982   :  { %17597 = vst [vmem:[#allocation112_spill] sm:$0xff] %v16217_v42  ;;  %v12836_v39 = vld [vmem:[#allocation8 + $0xf0] sm:$0xf0] }
 0x983   :  { %v12839_v15 = vor.u32 %v14530_v23, %v12836_v39  ;;  %v13442_v23 = vld [vmem:[#allocation8 + $0x590] sm:$0xf] }
 0x984   :  { %v14686_v39 = vld [vmem:[#allocation8 + $0x5ac] sm:$0xf0] }
 0x986   :  { %v8649_v50 = vpop.f32.mrf.mxu2  ;;  %v8314_v0 = vpop.f32.mrf.mxu0 }
 0x987   :  { %v16222_v56 = vadd.f32 %v8649_v50, %v8481_v13  ;;  %v8483_v61 = vpop.f32.mrf.mxu1  ;;  %v8315_v34 = vadd.f32 %v8314_v0, %v8146_v24  ;;  %v14685_v50 = vld [vmem:[#allocation8 + $0x5a4] sm:$0xf0] }
 0x988   :  { %v17606_v0 = vld [vmem:[#allocation33_spill] sm:$0xff] }
 0x989   :  { %17601 = vst [vmem:[#allocation67_spill] sm:$0xff] %v16222_v56  ;;  %v16224_v27 = vpop.f32.mrf.mxu3  ;;  %v8484_v42 = vadd.f32 %v8483_v61, %v8315_v34  ;;  %8353 = vmatmul.bf16.gmra.mxu0 %v13403_v8  ;;  %v13434_v34 = vld [vmem:[#allocation8 + $0x588] sm:$0xf]  ;;  %v14681_v8 = vld [vmem:[#allocation8 + $0x58c] sm:$0xf] }
 0x98a   :  { %8522 = vmatmul.bf16.gmra.mxu1 %v13407_v38  ;;  %v13436_v38 = vld [vmem:[#allocation8 + $0x5a8] sm:$0xf0] }
 0x98b   :  { %8691 = vmatmul.bf16.gmra.mxu2 %v13411_v1  ;;  %v17605_v1 = vld [vmem:[#allocation87_spill] sm:$0xff]  ;;  %v13439_v20 = vor.u32 %v14681_v8, %v13436_v38 }
 0x98c   :  { %v7982_v61 = vadd.f32 %v17606_v0, %v17605_v1  ;;  %v17608_v0 = vld [vmem:[#allocation79_spill] sm:$0xff] }
 0x98e   :  { %v8652_v13 = vpop.f32.mrf.mxu2  ;;  %8770 = vmatmul.bf16.gmra.mxu3 %v12839_v15  ;;  %v8316_v10 = vpop.f32.mrf.mxu0  ;;  %v8151_v17 = vadd.f32 %v16039_v28, %v7982_v61  ;;  %v17609_v28 = vld [vmem:[#allocation34_spill] sm:$0xff] }
 0x98f   :  { %v16229_v62 = vadd.f32 %v8652_v13, %v8484_v42  ;;  %v8485_v36 = vpop.f32.mrf.mxu1  ;;  %v8317_v26 = vadd.f32 %v8316_v10, %v8148_v32  ;;  %v13435_v42 = vor.u32 %v14685_v50, %v13434_v34  ;;  %v13443_v13 = vor.u32 %v14686_v39, %v13442_v23  ;;  %v14538_v10 = vld [vmem:[#allocation8 + $0x114] sm:$0xf] }
 0x990   :  { %v7984_v61 = vadd.f32 %v17609_v28, %v17608_v0 }
 0x991   :  { %17604 = vst [vmem:[#allocation89_spill] sm:$0xff] %v16229_v62  ;;  %v16231_v46 = vpop.f32.mrf.mxu3  ;;  %v8486_v24 = vadd.f32 %v8485_v36, %v8317_v26  ;;  %v12868_v36 = vld [vmem:[#allocation8 + $0x130] sm:$0xf0] }
 0x992   :  { %v12871_v1 = vor.u32 %v14538_v10, %v12868_v36  ;;  %v8153_v34 = vadd.f32 %v16046_v63, %v7984_v61  ;;  %v13474_v36 = vld [vmem:[#allocation8 + $0x5d0] sm:$0xf] }
 0x996   :  { %v8654_v15 = vpop.f32.mrf.mxu2  ;;  %v8319_v51 = vpop.f32.mrf.mxu0 }
 0x997   :  { %v16236_v11 = vadd.f32 %v8654_v15, %v8486_v24  ;;  %v8488_v32 = vpop.f32.mrf.mxu1  ;;  %v8320_v26 = vadd.f32 %v8319_v51, %v8151_v17  ;;  %v13466_v15 = vld [vmem:[#allocation8 + $0x5c8] sm:$0xf]  ;;  %v13468_v51 = vld [vmem:[#allocation8 + $0x5e8] sm:$0xf0] }
 0x999   :  { %17607 = vst [vmem:[#allocation16_spill] sm:$0xff] %v16236_v11  ;;  %v16238_v62 = vpop.f32.mrf.mxu3  ;;  %v8489_v56 = vadd.f32 %v8488_v32, %v8320_v26  ;;  %8358 = vmatmul.bf16.gmra.mxu0 %v13435_v42  ;;  %v14693_v42 = vld [vmem:[#allocation8 + $0x5e4] sm:$0xf0]  ;;  %v14694_v26 = vld [vmem:[#allocation8 + $0x5ec] sm:$0xf0] }
 0x99a   :  { %8527 = vmatmul.bf16.gmra.mxu1 %v13439_v20  ;;  %v14689_v20 = vld [vmem:[#allocation8 + $0x5cc] sm:$0xf]  ;;  %v17611_v32 = vld [vmem:[#allocation72_spill] sm:$0xff] }
 0x99b   :  { %8696 = vmatmul.bf16.gmra.mxu2 %v13443_v13  ;;  %v17612_v13 = vld [vmem:[#allocation35_spill] sm:$0xff]  ;;  %v13471_v0 = vor.u32 %v14689_v20, %v13468_v51 }
 0x99c   :  { %v7987_v10 = vadd.f32 %v17612_v13, %v17611_v32  ;;  %v17614_v13 = vld [vmem:[#allocation75_spill] sm:$0xff] }
 0x99e   :  { %v8657_v24 = vpop.f32.mrf.mxu2  ;;  %8775 = vmatmul.bf16.gmra.mxu3 %v12871_v1  ;;  %v8321_v8 = vpop.f32.mrf.mxu0  ;;  %v8156_v63 = vadd.f32 %v16055_v54, %v7987_v10  ;;  %v17615_v54 = vld [vmem:[#allocation36_spill] sm:$0xff] }
 0x99f   :  { %v16243_v50 = vadd.f32 %v8657_v24, %v8489_v56  ;;  %v8490_v38 = vpop.f32.mrf.mxu1  ;;  %v8322_v23 = vadd.f32 %v8321_v8, %v8153_v34  ;;  %v13467_v56 = vor.u32 %v14693_v42, %v13466_v15  ;;  %v13475_v24 = vor.u32 %v14694_v26, %v13474_v36  ;;  %v14546_v8 = vld [vmem:[#allocation8 + $0x154] sm:$0xf] }
 0x9a0   :  { %v7989_v10 = vadd.f32 %v17615_v54, %v17614_v13  ;;  %v14554_v54 = vld [vmem:[#allocation8 + $0x194] sm:$0xf] }
 0x9a1   :  { %17610 = vst [vmem:[#allocation68_spill] sm:$0xff] %v16243_v50  ;;  %v16245_v39 = vpop.f32.mrf.mxu3  ;;  %v8491_v17 = vadd.f32 %v8490_v38, %v8322_v23  ;;  %v12900_v38 = vld [vmem:[#allocation8 + $0x170] sm:$0xf0] }
 0x9a2   :  { %v12903_v32 = vor.u32 %v14546_v8, %v12900_v38  ;;  %v8158_v15 = vadd.f32 %v16066_v44, %v7989_v10  ;;  %v12932_v10 = vld [vmem:[#allocation8 + $0x1b0] sm:$0xf0] }
 0x9a6   :  { %v8659_v1 = vpop.f32.mrf.mxu2  ;;  %v8324_v61 = vpop.f32.mrf.mxu0 }
 0x9a7   :  { %v16250_v28 = vadd.f32 %v8659_v1, %v8491_v17  ;;  %v8493_v34 = vpop.f32.mrf.mxu1  ;;  %v8325_v23 = vadd.f32 %v8324_v61, %v8156_v63  ;;  %v13498_v1 = vld [vmem:[#allocation8 + $0x608] sm:$0xf]  ;;  %v13500_v61 = vld [vmem:[#allocation8 + $0x628] sm:$0xf0] }
 0x9a9   :  { %17613 = vst [vmem:[#allocation74_spill] sm:$0xff] %v16250_v28  ;;  %v16252_v50 = vpop.f32.mrf.mxu3  ;;  %v8494_v11 = vadd.f32 %v8493_v34, %v8325_v23  ;;  %8363 = vmatmul.bf16.gmra.mxu0 %v13467_v56  ;;  %v14701_v56 = vld [vmem:[#allocation8 + $0x624] sm:$0xf0]  ;;  %v13506_v34 = vld [vmem:[#allocation8 + $0x610] sm:$0xf] }
 0x9aa   :  { %8532 = vmatmul.bf16.gmra.mxu1 %v13471_v0  ;;  %v14697_v0 = vld [vmem:[#allocation8 + $0x60c] sm:$0xf]  ;;  %v13499_v38 = vor.u32 %v14701_v56, %v13498_v1 }
 0x9ab   :  { %8701 = vmatmul.bf16.gmra.mxu2 %v13475_v24  ;;  %v14702_v24 = vld [vmem:[#allocation8 + $0x62c] sm:$0xf0]  ;;  %v13503_v23 = vor.u32 %v14697_v0, %v13500_v61  ;;  %v6475_v61 = vpop.permute.xlu1 %6474 }
 0x9ac   :  { %v13507_v13 = vor.u32 %v14702_v24, %v13506_v34 }
 0x9ae   :  { %v8662_v17 = vpop.f32.mrf.mxu2  ;;  %8780 = vmatmul.bf16.gmra.mxu3 %v12903_v32  ;;  %v8326_v20 = vpop.f32.mrf.mxu0 }
 0x9af   :  { %v16257_v42 = vadd.f32 %v8662_v17, %v8494_v11  ;;  %v8495_v51 = vpop.f32.mrf.mxu1  ;;  %v8327_v36 = vadd.f32 %v8326_v20, %v8158_v15 }
 0x9b1   :  { %17616 = vst [vmem:[#allocation17_spill] sm:$0xff] %v16257_v42  ;;  %v16259_v26 = vpop.f32.mrf.mxu3  ;;  %v8496_v63 = vadd.f32 %v8495_v51, %v8327_v36  ;;  %v12935_v51 = vor.u32 %v14554_v54, %v12932_v10  ;;  %v13538_v54 = vld [vmem:[#allocation8 + $0x650] sm:$0xf]  ;;  %v6480_v42 = vpop.permute.xlu2 %6479 }
 0x9b6   :  { %v8664_v8 = vpop.f32.mrf.mxu2  ;;  %v8329_v32 = vpop.f32.mrf.mxu0 }
 0x9b7   :  { %v16261_v44 = vadd.f32 %v8664_v8, %v8496_v63  ;;  %v8498_v11 = vpop.f32.mrf.mxu1  ;;  %v8330_v15 = vadd.f32 %v8329_v32, %v16077_v58  ;;  %v13530_v58 = vld [vmem:[#allocation8 + $0x648] sm:$0xf]  ;;  %v14705_v32 = vld [vmem:[#allocation8 + $0x64c] sm:$0xf] }
 0x9b8   :  { %v14709_v8 = vld [vmem:[#allocation8 + $0x664] sm:$0xf0] }
 0x9b9   :  { %17617 = vst [vmem:[#allocation69_spill] sm:$0xff] %v16261_v44  ;;  %v16264_v17 = vpop.f32.mrf.mxu3  ;;  %v8499_v20 = vadd.f32 %v8498_v11, %v8330_v15  ;;  %8368 = vmatmul.bf16.gmra.mxu0 %v13499_v38  ;;  %v13532_v11 = vld [vmem:[#allocation8 + $0x668] sm:$0xf0]  ;;  %v14562_v44 = vld [vmem:[#allocation8 + $0x1d4] sm:$0xf] }
 0x9ba   :  { %8537 = vmatmul.bf16.gmra.mxu1 %v13503_v23  ;;  %v17620_v38 = vld [vmem:[#allocation37_spill] sm:$0xff] }
 0x9bb   :  { %8706 = vmatmul.bf16.gmra.mxu2 %v13507_v13  ;;  %v7997_v23 = vadd.f32 %v17620_v38, %v6475_v61  ;;  %v14710_v13 = vld [vmem:[#allocation8 + $0x66c] sm:$0xf0] }
 0x9bc   :  { %v17622_v38 = vld [vmem:[#allocation38_spill] sm:$0xff] }
 0x9bd   :  { %v8166_v15 = vadd.f32 %v16092_v53, %v7997_v23  ;;  %v7999_v53 = vadd.f32 %v17622_v38, %v6480_v42  ;;  %v13570_v42 = vld [vmem:[#allocation8 + $0x690] sm:$0xf] }
 0x9be   :  { %v8667_v36 = vpop.f32.mrf.mxu2  ;;  %8785 = vmatmul.bf16.gmra.mxu3 %v12935_v51  ;;  %v8331_v63 = vpop.f32.mrf.mxu0  ;;  %v13535_v51 = vor.u32 %v14705_v32, %v13532_v11 }
 0x9bf   :  { %v16266_v1 = vadd.f32 %v8667_v36, %v8499_v20  ;;  %v8500_v56 = vpop.f32.mrf.mxu1  ;;  %v8332_v0 = vadd.f32 %v8331_v63, %v16085_v60  ;;  %v13531_v20 = vor.u32 %v14709_v8, %v13530_v58  ;;  %v8168_v58 = vadd.f32 %v16099_v35, %v7999_v53 }
 0x9c1   :  { %17618 = vst [vmem:[#allocation77_spill] sm:$0xff] %v16266_v1  ;;  %v16269_v34 = vpop.f32.mrf.mxu3  ;;  %v8501_v24 = vadd.f32 %v8500_v56, %v8332_v0  ;;  %v13539_v1 = vor.u32 %v14710_v13, %v13538_v54  ;;  %v12964_v56 = vld [vmem:[#allocation8 + $0x1f0] sm:$0xf0]  ;;  %v6485_v54 = vpop.permute.xlu0 %6484 }
 0x9c2   :  { %17619 = vst [vmem:[#allocation18_spill] sm:$0xff] %v16269_v34  ;;  %v12967_v61 = vor.u32 %v14562_v44, %v12964_v56  ;;  %v13564_v44 = vld [vmem:[#allocation8 + $0x6a8] sm:$0xf0] }
 0x9c6   :  { %v8669_v10 = vpop.f32.mrf.mxu2  ;;  %v8334_v60 = vpop.f32.mrf.mxu0 }
 0x9c7   :  { %v16273_v36 = vadd.f32 %v8669_v10, %v8501_v24  ;;  %v8503_v63 = vpop.f32.mrf.mxu1  ;;  %v8335_v0 = vadd.f32 %v8334_v60, %v8166_v15  ;;  %v13562_v15 = vld [vmem:[#allocation8 + $0x688] sm:$0xf] }
 0x9c9   :  { %17621 = vst [vmem:[#allocation70_spill] sm:$0xff] %v16273_v36  ;;  %v16275_v28 = vpop.f32.mrf.mxu3  ;;  %v8504_v34 = vadd.f32 %v8503_v63, %v8335_v0  ;;  %8373 = vmatmul.bf16.gmra.mxu0 %v13531_v20  ;;  %v14717_v20 = vld [vmem:[#allocation8 + $0x6a4] sm:$0xf0]  ;;  %v14718_v63 = vld [vmem:[#allocation8 + $0x6ac] sm:$0xf0] }
 0x9ca   :  { %8542 = vmatmul.bf16.gmra.mxu1 %v13535_v51  ;;  %v14713_v51 = vld [vmem:[#allocation8 + $0x68c] sm:$0xf] }
 0x9cb   :  { %8711 = vmatmul.bf16.gmra.mxu2 %v13539_v1  ;;  %v17624_v1 = vld [vmem:[#allocation39_spill] sm:$0xff]  ;;  %v13567_v0 = vor.u32 %v14713_v51, %v13564_v44 }
 0x9cc   :  { %v8002_v60 = vadd.f32 %v17624_v1, %v6485_v54  ;;  %v17626_v1 = vld [vmem:[#allocation40_spill] sm:$0xff] }
 0x9ce   :  { %v8672_v24 = vpop.f32.mrf.mxu2  ;;  %8790 = vmatmul.bf16.gmra.mxu3 %v12967_v61  ;;  %v8336_v32 = vpop.f32.mrf.mxu0  ;;  %v8171_v56 = vadd.f32 %v16106_v6, %v8002_v60 }
 0x9cf   :  { %v16279_v8 = vadd.f32 %v8672_v24, %v8504_v34  ;;  %v8505_v11 = vpop.f32.mrf.mxu1  ;;  %v8337_v23 = vadd.f32 %v8336_v32, %v8168_v58  ;;  %v13563_v34 = vor.u32 %v14717_v20, %v13562_v15  ;;  %v13571_v58 = vor.u32 %v14718_v63, %v13570_v42  ;;  %v14570_v24 = vld [vmem:[#allocation8 + $0x214] sm:$0xf]  ;;  %v6495_v63 = vpop.permute.xlu2 %6494 }
 0x9d0   :  { %v12996_v32 = vld [vmem:[#allocation8 + $0x230] sm:$0xf0] }
 0x9d1   :  { %17623 = vst [vmem:[#allocation80_spill] sm:$0xff] %v16279_v8  ;;  %v16281_v13 = vpop.f32.mrf.mxu3  ;;  %v8506_v10 = vadd.f32 %v8505_v11, %v8337_v23  ;;  %v6490_v23 = vpop.permute.xlu1 %6489  ;;  %v12999_v54 = vor.u32 %v14570_v24, %v12996_v32  ;;  %v17628_v24 = vld [vmem:[#allocation41_spill] sm:$0xff] }
 0x9d2   :  { %v8004_v6 = vadd.f32 %v17626_v1, %v6490_v23  ;;  %v13602_v32 = vld [vmem:[#allocation8 + $0x6d0] sm:$0xf] }
 0x9d4   :  { %v8173_v15 = vadd.f32 %v16113_v4, %v8004_v6  ;;  %v8007_v4 = vadd.f32 %v17628_v24, %v6495_v63 }
 0x9d6   :  { %v8674_v35 = vpop.f32.mrf.mxu2  ;;  %v8339_v38 = vpop.f32.mrf.mxu0 }
 0x9d7   :  { %v16285_v61 = vadd.f32 %v8674_v35, %v8506_v10  ;;  %v8508_v53 = vpop.f32.mrf.mxu1  ;;  %v8340_v11 = vadd.f32 %v8339_v38, %v8171_v56  ;;  %v6500_v10 = vpop.permute.xlu0 %6499  ;;  %v14725_v38 = vld [vmem:[#allocation8 + $0x6e4] sm:$0xf0] }
 0x9d9   :  { %17625 = vst [vmem:[#allocation19_spill] sm:$0xff] %v16285_v61  ;;  %v16287_v8 = vpop.f32.mrf.mxu3  ;;  %v8509_v36 = vadd.f32 %v8508_v53, %v8340_v11  ;;  %8378 = vmatmul.bf16.gmra.mxu0 %v13563_v34  ;;  %v14721_v53 = vld [vmem:[#allocation8 + $0x6cc] sm:$0xf]  ;;  %v14726_v11 = vld [vmem:[#allocation8 + $0x6ec] sm:$0xf0] }
 0x9da   :  { %8547 = vmatmul.bf16.gmra.mxu1 %v13567_v0  ;;  %v13594_v0 = vld [vmem:[#allocation8 + $0x6c8] sm:$0xf] }
 0x9db   :  { %8716 = vmatmul.bf16.gmra.mxu2 %v13571_v58  ;;  %v13596_v58 = vld [vmem:[#allocation8 + $0x6e8] sm:$0xf0] }
 0x9dc   :  { %v13599_v1 = vor.u32 %v14721_v53, %v13596_v58 }
 0x9de   :  { %v8677_v20 = vpop.f32.mrf.mxu2  ;;  %8795 = vmatmul.bf16.gmra.mxu3 %v12999_v54  ;;  %v8341_v44 = vpop.f32.mrf.mxu0  ;;  %v13595_v54 = vor.u32 %v14725_v38, %v13594_v0  ;;  %v17630_v0 = vld [vmem:[#allocation42_spill] sm:$0xff] }
 0x9df   :  { %v16291_v51 = vadd.f32 %v8677_v20, %v8509_v36  ;;  %v8510_v60 = vpop.f32.mrf.mxu1  ;;  %v8342_v42 = vadd.f32 %v8341_v44, %v8173_v15  ;;  %v8176_v36 = vadd.f32 %v16120_v21, %v8007_v4  ;;  %v14578_v44 = vld [vmem:[#allocation8 + $0x254] sm:$0xf]  ;;  %v6510_v38 = vpop.permute.xlu2 %6509 }
 0x9e1   :  { %17627 = vst [vmem:[#allocation71_spill] sm:$0xff] %v16291_v51  ;;  %v8756_v35 = vpop.f32.mrf.mxu3  ;;  %v8511_v34 = vadd.f32 %v8510_v60, %v8342_v42  ;;  %v13028_v60 = vld [vmem:[#allocation8 + $0x270] sm:$0xf0] }
 0x9e2   :  { %v16294_v56 = vadd.f32 %v8756_v35, %v16037_v14  ;;  %v13603_v14 = vor.u32 %v14726_v11, %v13602_v32  ;;  %v16300_v35 = vpop.permute.xlu0 %6514  ;;  %v13031_v21 = vor.u32 %v14578_v44, %v13028_v60 }
 0x9e6   :  { %v8679_v23 = vpop.f32.mrf.mxu2  ;;  %v8344_v15 = vpop.f32.mrf.mxu0 }
 0x9e7   :  { %v16298_v6 = vadd.f32 %v8679_v23, %v8511_v34  ;;  %v8513_v20 = vpop.f32.mrf.mxu1  ;;  %v8345_v42 = vadd.f32 %v8344_v15, %v8176_v36  ;;  %v8009_v34 = vadd.f32 %v17630_v0, %v6500_v10  ;;  %v6505_v36 = vpop.permute.xlu1 %6504  ;;  %v14733_v10 = vld [vmem:[#allocation8 + $0x724] sm:$0xf0] }
 0x9e8   :  { %v16315_v60 = vpop.permute.xlu2 %6539 }
 0x9e9   :  { %17629 = vst [vmem:[#allocation84_spill] sm:$0xff] %v16298_v6  ;;  %v8758_v51 = vpop.f32.mrf.mxu3  ;;  %v8514_v24 = vadd.f32 %v8513_v20, %v8345_v42  ;;  %8383 = vmatmul.bf16.gmra.mxu0 %v13595_v54  ;;  %v8178_v53 = vadd.f32 %v16127_v19, %v8009_v34  ;;  %v14729_v20 = vld [vmem:[#allocation8 + $0x70c] sm:$0xf]  ;;  %v17632_v19 = vld [vmem:[#allocation43_spill] sm:$0xff]  ;;  %v13634_v42 = vld [vmem:[#allocation8 + $0x710] sm:$0xf] }
 0x9ea   :  { %v16303_v63 = vadd.f32 %v8758_v51, %v16043_v40  ;;  %8552 = vmatmul.bf16.gmra.mxu1 %v13599_v1  ;;  %v13626_v1 = vld [vmem:[#allocation8 + $0x708] sm:$0xf]  ;;  %v16312_v15 = vpop.permute.xlu0 %6614  ;;  %v8012_v44 = vadd.f32 %v17632_v19, %v6505_v36 }
 0x9eb   :  { %8721 = vmatmul.bf16.gmra.mxu2 %v13603_v14  ;;  %v13628_v14 = vld [vmem:[#allocation8 + $0x728] sm:$0xf0]  ;;  %v13627_v34 = vor.u32 %v14733_v10, %v13626_v1 }
 0x9ec   :  { %v8181_v0 = vadd.f32 %v16134_v41, %v8012_v44  ;;  %v17633_v41 = vld [vmem:[#allocation44_spill] sm:$0xff] }
 0x9ed   :  { %v8014_v1 = vadd.f32 %v17633_v41, %v6510_v38  ;;  %v14741_v38 = vld [vmem:[#allocation8 + $0x764] sm:$0xf0] }
 0x9ee   :  { %v8682_v58 = vpop.f32.mrf.mxu2  ;;  %8800 = vmatmul.bf16.gmra.mxu3 %v13031_v21  ;;  %v8346_v32 = vpop.f32.mrf.mxu0 }
 0x9ef   :  { %v16307_v4 = vadd.f32 %v8682_v58, %v8514_v24  ;;  %v8515_v11 = vpop.f32.mrf.mxu1  ;;  %v8347_v23 = vadd.f32 %v8346_v32, %v8178_v53  ;;  %v14734_v24 = vld [vmem:[#allocation8 + $0x72c] sm:$0xf0]  ;;  %v13631_v53 = vor.u32 %v14729_v20, %v13628_v14 }
 0x9f0   :  { %v6525_v20 = vpop.permute.xlu2 %6524 }
 0x9f1   :  { %17631 = vst [vmem:[#allocation20_spill] sm:$0xff] %v16307_v4  ;;  %v8761_v40 = vpop.f32.mrf.mxu3  ;;  %v8516_v54 = vadd.f32 %v8515_v11, %v8347_v23  ;;  %v13635_v11 = vor.u32 %v14734_v24, %v13634_v42  ;;  %v14586_v23 = vld [vmem:[#allocation8 + $0x294] sm:$0xf] }
 0x9f2   :  { %v16310_v51 = vadd.f32 %v8761_v40, %v16052_v18  ;;  %v13060_v40 = vld [vmem:[#allocation8 + $0x2b0] sm:$0xf0]  ;;  %v16324_v10 = vpop.permute.xlu0 %6529 }
 0x9f3   :  { %v13063_v61 = vor.u32 %v14586_v23, %v13060_v40 }
 0x9f6   :  { %v8684_v21 = vpop.f32.mrf.mxu2  ;;  %v8349_v58 = vpop.f32.mrf.mxu0 }
 0x9f7   :  { %v16318_v18 = vadd.f32 %v8684_v21, %v8516_v54  ;;  %v8518_v32 = vpop.f32.mrf.mxu1  ;;  %v8350_v4 = vadd.f32 %v8349_v58, %v8181_v0  ;;  %v8183_v54 = vadd.f32 %v16141_v22, %v8014_v1  ;;  %v13658_v0 = vld [vmem:[#allocation8 + $0x748] sm:$0xf] }
 0x9f8   :  { %v17635_v22 = vld [vmem:[#allocation45_spill] sm:$0xff]  ;;  %v13659_v40 = vor.u32 %v14741_v38, %v13658_v0  ;;  %v6535_v38 = vpop.permute.xlu1 %6534 }
 0x9f9   :  { %v8763_v6 = vpop.f32.mrf.mxu3  ;;  %v8519_v19 = vadd.f32 %v8518_v32, %v8350_v4  ;;  %8388 = vmatmul.bf16.gmra.mxu0 %v13627_v34  ;;  %v14737_v34 = vld [vmem:[#allocation8 + $0x74c] sm:$0xf]  ;;  %v8017_v58 = vadd.f32 %v17635_v22, %v16300_v35  ;;  %v13666_v32 = vld [vmem:[#allocation8 + $0x750] sm:$0xf] }
 0x9fa   :  { %v16321_v36 = vadd.f32 %v8763_v6, %v16063_v59  ;;  %8557 = vmatmul.bf16.gmra.mxu1 %v13631_v53  ;;  %v13660_v53 = vld [vmem:[#allocation8 + $0x768] sm:$0xf0] }
 0x9fb   :  { %8726 = vmatmul.bf16.gmra.mxu2 %v13635_v11  ;;  %v8186_v23 = vadd.f32 %v16148_v31, %v8017_v58  ;;  %v17637_v31 = vld [vmem:[#allocation46_spill] sm:$0xff] }
 0x9fe   :  { %v8687_v14 = vpop.f32.mrf.mxu2  ;;  %8805 = vmatmul.bf16.gmra.mxu3 %v13063_v61  ;;  %v8351_v42 = vpop.f32.mrf.mxu0  ;;  %v14742_v61 = vld [vmem:[#allocation8 + $0x76c] sm:$0xf0] }
 0x9ff   :  { %v16327_v44 = vadd.f32 %v8687_v14, %v8519_v19  ;;  %v8520_v24 = vpop.f32.mrf.mxu1  ;;  %v8352_v59 = vadd.f32 %v8351_v42, %v8183_v54  ;;  %v13663_v19 = vor.u32 %v14737_v34, %v13660_v53  ;;  %v13667_v1 = vor.u32 %v14742_v61, %v13666_v32  ;;  %v14594_v54 = vld [vmem:[#allocation8 + $0x2d4] sm:$0xf]  ;;  %v16339_v42 = vpop.permute.xlu2 %6609 }
 0xa00   :  { %v13092_v14 = vld [vmem:[#allocation8 + $0x2f0] sm:$0xf0] }
 0xa01   :  { %v8766_v6 = vpop.f32.mrf.mxu3  ;;  %v16332_v21 = vadd.f32 %v8520_v24, %v8352_v59  ;;  %v6520_v59 = vpop.permute.xlu0 %6519 }
 0xa02   :  { %v16330_v4 = vadd.f32 %v8766_v6, %v16074_v55  ;;  %v8019_v0 = vadd.f32 %v17637_v31, %v6520_v59  ;;  %v14750_v59 = vld [vmem:[#allocation8 + $0x7ac] sm:$0xf0] }
 0xa03   :  { %17634 = vst [vmem:[#allocation73_spill] sm:$0xff] %v16332_v21 }
 0xa04   :  { %v8188_v34 = vadd.f32 %v16155_v33, %v8019_v0  ;;  %v17640_v33 = vld [vmem:[#allocation47_spill] sm:$0xff] }
 0xa06   :  { %v16336_v11 = vpop.f32.mrf.mxu2  ;;  %v8354_v41 = vpop.f32.mrf.mxu0 }
 0xa07   :  { %17636 = vst [vmem:[#allocation21_spill] sm:$0xff] %v16336_v11  ;;  %v8523_v55 = vpop.f32.mrf.mxu1  ;;  %v8355_v24 = vadd.f32 %v8354_v41, %v8186_v23  ;;  %v13095_v11 = vor.u32 %v14594_v54, %v13092_v14  ;;  %v14745_v54 = vld [vmem:[#allocation8 + $0x78c] sm:$0xf] }
 0xa08   :  { %v13692_v14 = vld [vmem:[#allocation8 + $0x7a8] sm:$0xf0] }
 0xa09   :  { %v8768_v6 = vpop.f32.mrf.mxu3  ;;  %v8524_v22 = vadd.f32 %v8523_v55, %v8355_v24  ;;  %8393 = vmatmul.bf16.gmra.mxu0 %v13659_v40  ;;  %v13690_v55 = vld [vmem:[#allocation8 + $0x788] sm:$0xf]  ;;  %v8022_v24 = vadd.f32 %v17640_v33, %v6525_v20  ;;  %v16361_v21 = vpop.permute.xlu0 %6584 }
 0xa0a   :  { %v16342_v35 = vadd.f32 %v8768_v6, %v16082_v25  ;;  %8562 = vmatmul.bf16.gmra.mxu1 %v13663_v19  ;;  %v16348_v25 = vpop.permute.xlu2 %6599  ;;  %v16356_v6 = vpop.permute.xlu1 %6619 }
 0xa0b   :  { %8731 = vmatmul.bf16.gmra.mxu2 %v13667_v1  ;;  %v14749_v1 = vld [vmem:[#allocation8 + $0x7a4] sm:$0xf0]  ;;  %v8191_v31 = vadd.f32 %v16161_v43, %v8022_v24 }
 0xa0c   :  { %v13691_v0 = vor.u32 %v14749_v1, %v13690_v55  ;;  %v17642_v43 = vld [vmem:[#allocation48_spill] sm:$0xff] }
 0xa0d   :  { %v8024_v55 = vadd.f32 %v17642_v43, %v16324_v10  ;;  %v13722_v10 = vld [vmem:[#allocation8 + $0x7c8] sm:$0xf] }
 0xa0e   :  { %v8692_v53 = vpop.f32.mrf.mxu2  ;;  %8810 = vmatmul.bf16.gmra.mxu3 %v13095_v11  ;;  %v8356_v32 = vpop.f32.mrf.mxu0  ;;  %v13698_v11 = vld [vmem:[#allocation8 + $0x790] sm:$0xf] }
 0xa0f   :  { %v16346_v58 = vadd.f32 %v8692_v53, %v8524_v22  ;;  %v8525_v61 = vpop.f32.mrf.mxu1  ;;  %v8357_v23 = vadd.f32 %v8356_v32, %v8188_v34  ;;  %v13695_v34 = vor.u32 %v14745_v54, %v13692_v14  ;;  %v13699_v32 = vor.u32 %v14750_v59, %v13698_v11 }
 0xa10   :  { %v8193_v54 = vadd.f32 %v16168_v49, %v8024_v55  ;;  %v17645_v49 = vld [vmem:[#allocation49_spill] sm:$0xff] }
 0xa11   :  { %17638 = vst [vmem:[#allocation76_spill] sm:$0xff] %v16346_v58  ;;  %v8771_v41 = vpop.f32.mrf.mxu3  ;;  %v16353_v19 = vadd.f32 %v8525_v61, %v8357_v23  ;;  %v14602_v61 = vld [vmem:[#allocation8 + $0x314] sm:$0xf] }
 0xa12   :  { %v16351_v40 = vadd.f32 %v8771_v41, %v16090_v30  ;;  %v13124_v23 = vld [vmem:[#allocation8 + $0x330] sm:$0xf0]  ;;  %v16368_v1 = vpop.permute.xlu2 %6574 }
 0xa13   :  { %17639 = vst [vmem:[#allocation22_spill] sm:$0xff] %v16353_v19 }
 0xa16   :  { %v16358_v22 = vpop.f32.mrf.mxu2  ;;  %v8359_v30 = vpop.f32.mrf.mxu0 }
 0xa17   :  { %17641 = vst [vmem:[#allocation78_spill] sm:$0xff] %v16358_v22  ;;  %v8528_v53 = vpop.f32.mrf.mxu1  ;;  %v8360_v41 = vadd.f32 %v8359_v30, %v8191_v31  ;;  %v13127_v22 = vor.u32 %v14602_v61, %v13124_v23  ;;  %v14757_v30 = vld [vmem:[#allocation8 + $0x7e4] sm:$0xf0]  ;;  %v8027_v61 = vadd.f32 %v17645_v49, %v6535_v38  ;;  %v13730_v23 = vld [vmem:[#allocation8 + $0x7d0] sm:$0xf] }
 0xa19   :  { %v8773_v19 = vpop.f32.mrf.mxu3  ;;  %v8529_v33 = vadd.f32 %v8528_v53, %v8360_v41  ;;  %8398 = vmatmul.bf16.gmra.mxu0 %v13691_v0  ;;  %v14753_v53 = vld [vmem:[#allocation8 + $0x7cc] sm:$0xf]  ;;  %v14758_v41 = vld [vmem:[#allocation8 + $0x7ec] sm:$0xf0]  ;;  %v8196_v55 = vadd.f32 %v16175_v47, %v8027_v61 }
 0xa1a   :  { %v16364_v20 = vadd.f32 %v8773_v19, %v16097_v29  ;;  %8567 = vmatmul.bf16.gmra.mxu1 %v13695_v34  ;;  %v16373_v29 = vpop.permute.xlu1 %6604  ;;  %v17647_v47 = vld [vmem:[#allocation50_spill] sm:$0xff] }
 0xa1b   :  { %8736 = vmatmul.bf16.gmra.mxu2 %v13699_v32  ;;  %v13724_v32 = vld [vmem:[#allocation8 + $0x7e8] sm:$0xf0] }
 0xa1e   :  { %v8697_v14 = vpop.f32.mrf.mxu2  ;;  %8815 = vmatmul.bf16.gmra.mxu3 %v13127_v22  ;;  %v8361_v11 = vpop.f32.mrf.mxu0 }
 0xa1f   :  { %v16371_v24 = vadd.f32 %v8697_v14, %v8529_v33  ;;  %v8530_v59 = vpop.f32.mrf.mxu1  ;;  %v8362_v19 = vadd.f32 %v8361_v11, %v8193_v54  ;;  %v16381_v22 = vpop.permute.xlu0 %6579  ;;  %v13727_v54 = vor.u32 %v14753_v53, %v13724_v32 }
 0xa20   :  { %v16383_v33 = vpop.permute.xlu2 %6569 }
 0xa21   :  { %17643 = vst [vmem:[#allocation100_spill] sm:$0xff] %v16371_v24  ;;  %v8776_v31 = vpop.f32.mrf.mxu3  ;;  %v16378_v34 = vadd.f32 %v8530_v59, %v8362_v19  ;;  %v13731_v59 = vor.u32 %v14758_v41, %v13730_v23  ;;  %v14610_v19 = vld [vmem:[#allocation8 + $0x354] sm:$0xf] }
 0xa22   :  { %v16376_v0 = vadd.f32 %v8776_v31, %v16104_v57  ;;  %v13723_v57 = vor.u32 %v14757_v30, %v13722_v10  ;;  %v13156_v31 = vld [vmem:[#allocation8 + $0x370] sm:$0xf0]  ;;  %v16388_v38 = vpop.permute.xlu1 %6594  ;;  %v8029_v10 = vadd.f32 %v17647_v47, %v16315_v60  ;;  %v14507_v60 = vld [vmem:[#allocation8 + $0x1c] sm:$0xf] }
 0xa23   :  { %17644 = vst [vmem:[#allocation23_spill] sm:$0xff] %v16378_v34 }
 0xa24   :  { %v8198_v30 = vadd.f32 %v16182_v3, %v8029_v10  ;;  %v17649_v3 = vld [vmem:[#allocation51_spill] sm:$0xff] }
 0xa26   :  { %v16385_v43 = vpop.f32.mrf.mxu2  ;;  %v8364_v14 = vpop.f32.mrf.mxu0 }
 0xa27   :  { %17646 = vst [vmem:[#allocation81_spill] sm:$0xff] %v16385_v43  ;;  %v8533_v11 = vpop.f32.mrf.mxu1  ;;  %v8365_v34 = vadd.f32 %v8364_v14, %v8196_v55  ;;  %v13159_v43 = vor.u32 %v14610_v19, %v13156_v31  ;;  %v6555_v53 = vpop.permute.xlu0 %6554  ;;  %v14511_v14 = vld [vmem:[#allocation8 + $0x34] sm:$0xf0] }
 0xa29   :  { %v8778_v24 = vpop.f32.mrf.mxu3  ;;  %v8534_v58 = vadd.f32 %v8533_v11, %v8365_v34  ;;  %8403 = vmatmul.bf16.gmra.mxu0 %v13723_v57  ;;  %v12748_v11 = vld [vmem:[#allocation8 + $0x38] sm:$0xf0] }
 0xa2a   :  { %v16391_v49 = vadd.f32 %v8778_v24, %v16111_v16  ;;  %8572 = vmatmul.bf16.gmra.mxu1 %v13727_v54  ;;  %v6545_v16 = vpop.permute.xlu2 %6544  ;;  %v12746_v54 = vld [vmem:[#allocation8 + $0x18] sm:$0xf]  ;;  %v16404_v19 = vpop.permute.xlu1 %6589  ;;  %v12751_v47 = vor.u32 %v14507_v60, %v12748_v11 }
 0xa2b   :  { %8741 = vmatmul.bf16.gmra.mxu2 %v13731_v59  ;;  %v8032_v59 = vadd.f32 %v17649_v3, %v6545_v16  ;;  %v12747_v31 = vor.u32 %v14511_v14, %v12746_v54  ;;  %v17651_v54 = vld [vmem:[#allocation52_spill] sm:$0xff] }
 0xa2e   :  { %v8702_v32 = vpop.f32.mrf.mxu2  ;;  %8820 = vmatmul.bf16.gmra.mxu3 %v13159_v43  ;;  %v8366_v23 = vpop.f32.mrf.mxu0  ;;  %v8201_v43 = vadd.f32 %v16189_v5, %v8032_v59 }
 0xa2f   :  { %v16396_v61 = vadd.f32 %v8702_v32, %v8534_v58  ;;  %v8535_v41 = vpop.f32.mrf.mxu1  ;;  %v8367_v55 = vadd.f32 %v8366_v23, %v8198_v30  ;;  %v14618_v32 = vld [vmem:[#allocation8 + $0x394] sm:$0xf] }
 0xa30   :  { %v13188_v23 = vld [vmem:[#allocation8 + $0x3b0] sm:$0xf0] }
 0xa31   :  { %v8781_v24 = vpop.f32.mrf.mxu3  ;;  %v16401_v57 = vadd.f32 %v8535_v41, %v8367_v55  ;;  %v6550_v55 = vpop.permute.xlu0 %6549  ;;  %v13191_v5 = vor.u32 %v14618_v32, %v13188_v23  ;;  %v12778_v23 = vld [vmem:[#allocation8 + $0x58] sm:$0xf] }
 0xa32   :  { %v16399_v34 = vadd.f32 %v8781_v24, %v16118_v48  ;;  %v9478_v48 = vld [vmem:[%s17260_s5] sm:$0xff]  ;;  %v8034_v14 = vadd.f32 %v17651_v54, %v6550_v55  ;;  %v6565_v11 = vpop.permute.xlu1 %6564 }
 0xa33   :  { %17648 = vst [vmem:[#allocation24_spill] sm:$0xff] %v16401_v57  ;;  %9512 = vperm.xlu1 %14839, %v9478_v48   ;;  %v14515_v55 = vld [vmem:[#allocation8 + $0x5c] sm:$0xf] }
 0xa34   :  { %v8203_v60 = vadd.f32 %v16196_v45, %v8034_v14 }
 0xa36   :  { %v16406_v58 = vpop.f32.mrf.mxu2  ;;  %v8369_v10 = vpop.f32.mrf.mxu0 }
 0xa37   :  { %17650 = vst [vmem:[#allocation82_spill] sm:$0xff] %v16406_v58  ;;  %v8538_v30 = vpop.f32.mrf.mxu1  ;;  %v8370_v41 = vadd.f32 %v8369_v10, %v8201_v43  ;;  %v9480_v43 = vld [vmem:[%s17260_s5 + $0x10] sm:$0xff] }
 0xa38   :  { %9522 = vperm.xlu0 %14838, %v9480_v43  }
 0xa39   :  { %v8783_v16 = vpop.f32.mrf.mxu3  ;;  %v8539_v3 = vadd.f32 %v8538_v30, %v8370_v41  ;;  %8924 = vmatmul.bf16.vlgmr.msrb.gmra.mxu0 %v12747_v31  ;;  %v14519_v41 = vld [vmem:[#allocation8 + $0x74] sm:$0xf0] }
 0xa3a   :  { %v16413_v24 = vadd.f32 %v8783_v16, %v16125_v52  ;;  %9093 = vmatmul.bf16.vlgmr.msrb.gmra.mxu1 %v12751_v47  ;;  %v9481_v52 = vld [vmem:[%s17260_s5 + $0x18] sm:$0xff] }
 0xa3b   :  { %9527 = vperm.xlu1 %14839, %v9481_v52   ;;  %v12780_v16 = vld [vmem:[#allocation8 + $0x78] sm:$0xf0] }
 0xa3c   :  { %v12783_v43 = vor.u32 %v14515_v55, %v12780_v16  ;;  %v17655_v55 = vld [vmem:[#allocation54_spill] sm:$0xff] }
 0xa3e   :  { %v8707_v59 = vpop.f32.mrf.mxu2  ;;  %8825 = vmatmul.bf16.gmra.mxu3 %v13191_v5  ;;  %v8371_v31 = vpop.f32.mrf.mxu0  ;;  %v17653_v5 = vld [vmem:[#allocation53_spill] sm:$0xff] }
 0xa3f   :  { %v16423_v48 = vadd.f32 %v8707_v59, %v8539_v3  ;;  %v8540_v47 = vpop.f32.mrf.mxu1  ;;  %v8372_v10 = vadd.f32 %v8371_v31, %v8203_v60  ;;  %v8037_v54 = vadd.f32 %v17653_v5, %v6555_v53  ;;  %v12779_v59 = vor.u32 %v14519_v41, %v12778_v23  ;;  %v9483_v60 = vld [vmem:[%s17260_s5 + $0x28] sm:$0xff] }
 0xa40   :  { %9537 = vperm.xlu0 %14838, %v9483_v60   ;;  %v9486_v60 = vld [vmem:[%s17260_s5 + $0x40] sm:$0xff] }
 0xa41   :  { %v8786_v30 = vpop.f32.mrf.mxu3  ;;  %v16428_v32 = vadd.f32 %v8540_v47, %v8372_v10  ;;  %v8206_v3 = vadd.f32 %v16203_v7, %v8037_v54  ;;  %v14626_v47 = vld [vmem:[#allocation8 + $0x3d4] sm:$0xf] }
 0xa42   :  { %v16426_v45 = vadd.f32 %v8786_v30, %v16132_v9  ;;  %v9484_v9 = vld [vmem:[%s17260_s5 + $0x30] sm:$0xff]  ;;  %v6560_v30 = vpop.permute.xlu1 %6559 }
 0xa43   :  { %17652 = vst [vmem:[#allocation94_spill] sm:$0xff] %v16428_v32  ;;  %v13220_v10 = vld [vmem:[#allocation8 + $0x3f0] sm:$0xf0]  ;;  %9542 = vperm.xlu1 %14839, %v9484_v9   ;;  %v8039_v16 = vadd.f32 %v17655_v55, %v6560_v30  ;;  %v12812_v30 = vld [vmem:[#allocation8 + $0xb8] sm:$0xf0]  ;;  %v17659_v55 = vld [vmem:[#allocation112_spill] sm:$0xff] }
 0xa44   :  { %v13223_v41 = vor.u32 %v14626_v47, %v13220_v10  ;;  %v12810_v47 = vld [vmem:[#allocation8 + $0x98] sm:$0xf] }
 0xa45   :  { %v8208_v54 = vadd.f32 %v16210_v2, %v8039_v16  ;;  %v14527_v10 = vld [vmem:[#allocation8 + $0xb4] sm:$0xf0] }
 0xa46   :  { %v16431_v14 = vpop.f32.mrf.mxu2  ;;  %v8374_v52 = vpop.f32.mrf.mxu0 }
 0xa47   :  { %17654 = vst [vmem:[#allocation25_spill] sm:$0xff] %v16431_v14  ;;  %v8543_v31 = vpop.f32.mrf.mxu1  ;;  %v8375_v53 = vadd.f32 %v8374_v52, %v8206_v3  ;;  %v9487_v3 = vld [vmem:[%s17260_s5 + $0x48] sm:$0xff] }
 0xa48   :  { %9552 = vperm.xlu0 %14838, %v9486_v60   ;;  %v9489_v60 = vld [vmem:[%s17260_s5 + $0x58] sm:$0xff] }
 0xa49   :  { %v8788_v5 = vpop.f32.mrf.mxu3  ;;  %v8544_v23 = vadd.f32 %v8543_v31, %v8375_v53  ;;  %8929 = vmatmul.bf16.gmra.mxu0 %v12779_v59  ;;  %v14523_v53 = vld [vmem:[#allocation8 + $0x9c] sm:$0xf] }
 0xa4a   :  { %v16441_v7 = vadd.f32 %v8788_v5, %v16139_v12  ;;  %9098 = vmatmul.bf16.gmra.mxu1 %v12783_v43  ;;  %v17657_v5 = vld [vmem:[#allocation55_spill] sm:$0xff] }
 0xa4b   :  { %9557 = vperm.xlu1 %14839, %v9487_v3   ;;  %v9490_v3 = vld [vmem:[%s17260_s5 + $0x60] sm:$0xff] }
 0xa4e   :  { %v8712_v14 = vpop.f32.mrf.mxu2  ;;  %8830 = vmatmul.bf16.gmra.mxu3 %v13223_v41  ;;  %v8376_v9 = vpop.f32.mrf.mxu0  ;;  %v8042_v41 = vadd.f32 %v17657_v5, %v6565_v11 }
 0xa4f   :  { %v16451_v12 = vadd.f32 %v8712_v14, %v8544_v23  ;;  %v8545_v59 = vpop.f32.mrf.mxu1  ;;  %v8377_v43 = vadd.f32 %v8376_v9, %v8208_v54  ;;  %v9479_v14 = vld [vmem:[%s17260_s5 + $0x8] sm:$0xff]  ;;  %v12811_v54 = vor.u32 %v14527_v10, %v12810_v47 }
 0xa50   :  { %9517 = vperm.xlu2 %14840, %v9479_v14   ;;  %v8211_v16 = vadd.f32 %v17659_v55, %v8042_v41  ;;  %9567 = vperm.xlu0 %14838, %v9489_v60   ;;  %v17660_v14 = vld [vmem:[#allocation101_spill] sm:$0xff]  ;;  %v9482_v55 = vld [vmem:[%s17260_s5 + $0x20] sm:$0xff] }
 0xa51   :  { %v8791_v52 = vpop.f32.mrf.mxu3  ;;  %v16456_v31 = vadd.f32 %v8545_v59, %v8377_v43  ;;  %v14634_v59 = vld [vmem:[#allocation8 + $0x414] sm:$0xf] }
 0xa52   :  { %v16454_v2 = vadd.f32 %v8791_v52, %v16146_v37  ;;  %v12815_v37 = vor.u32 %v14523_v53, %v12812_v30  ;;  %v13252_v43 = vld [vmem:[#allocation8 + $0x430] sm:$0xf0]  ;;  %v17661_v53 = vld [vmem:[#allocation56_spill] sm:$0xff] }
 0xa53   :  { %17656 = vst [vmem:[#allocation85_spill] sm:$0xff] %v16456_v31  ;;  %9572 = vperm.xlu1 %14839, %v9490_v3   ;;  %v13255_v10 = vor.u32 %v14634_v59, %v13252_v43  ;;  %v8044_v30 = vadd.f32 %v17661_v53, %v16383_v33  ;;  %v17662_v43 = vld [vmem:[#allocation103_spill] sm:$0xff]  ;;  %v17701_v31 = vld [vmem:[#allocation70_spill] sm:$0xff] }
 0xa54   :  { %v12844_v53 = vld [vmem:[#allocation8 + $0xf8] sm:$0xf0] }
 0xa55   :  { %v8213_v60 = vadd.f32 %v16224_v27, %v8044_v30  ;;  %v17664_v30 = vld [vmem:[#allocation57_spill] sm:$0xff] }
 0xa56   :  { %v16462_v23 = vpop.f32.mrf.mxu2  ;;  %v8379_v11 = vpop.f32.mrf.mxu0 }
 0xa57   :  { %17658 = vst [vmem:[#allocation97_spill] sm:$0xff] %v16462_v23  ;;  %v8548_v9 = vpop.f32.mrf.mxu1  ;;  %v8380_v52 = vadd.f32 %v8379_v11, %v8211_v16  ;;  %v9492_v16 = vld [vmem:[%s17260_s5 + $0x70] sm:$0xff] }
 0xa58   :  { %9532 = vperm.xlu2 %14840, %v9482_v55   ;;  %9582 = vperm.xlu0 %14838, %v9492_v16   ;;  %v8047_v55 = vadd.f32 %v17664_v30, %v16368_v1  ;;  %v14706_v23 = vld [vmem:[#allocation8 + $0x654] sm:$0xf] }
 0xa59   :  { %v8793_v5 = vpop.f32.mrf.mxu3  ;;  %v8549_v47 = vadd.f32 %v8548_v9, %v8380_v52  ;;  %8934 = vmatmul.bf16.gmra.mxu0 %v12811_v54  ;;  %v9493_v54 = vld [vmem:[%s17260_s5 + $0x78] sm:$0xff] }
 0xa5a   :  { %v16472_v41 = vadd.f32 %v8793_v5, %v17660_v14  ;;  %9103 = vmatmul.bf16.gmra.mxu1 %v12815_v37  ;;  %v12842_v5 = vld [vmem:[#allocation8 + $0xd8] sm:$0xf] }
 0xa5b   :  { %9587 = vperm.xlu1 %14839, %v9493_v54   ;;  %v14535_v14 = vld [vmem:[#allocation8 + $0xf4] sm:$0xf0] }
 0xa5c   :  { %v12843_v16 = vor.u32 %v14535_v14, %v12842_v5 }
 0xa5e   :  { %v8717_v3 = vpop.f32.mrf.mxu2  ;;  %8835 = vmatmul.bf16.gmra.mxu3 %v13255_v10  ;;  %v8381_v33 = vpop.f32.mrf.mxu0  ;;  %v14531_v10 = vld [vmem:[#allocation8 + $0xdc] sm:$0xf] }
 0xa5f   :  { %v16486_v37 = vadd.f32 %v8717_v3, %v8549_v47  ;;  %v8550_v11 = vpop.f32.mrf.mxu1  ;;  %v8382_v9 = vadd.f32 %v8381_v33, %v8213_v60  ;;  %v9485_v47 = vld [vmem:[%s17260_s5 + $0x38] sm:$0xff]  ;;  %v8216_v60 = vadd.f32 %v16231_v46, %v8047_v55  ;;  %v12847_v54 = vor.u32 %v14531_v10, %v12844_v53  ;;  %v9495_v33 = vld [vmem:[%s17260_s5 + $0x88] sm:$0xff]  ;;  %v9488_v55 = vld [vmem:[%s17260_s5 + $0x50] sm:$0xff] }
 0xa60   :  { %9547 = vperm.xlu2 %14840, %v9485_v47   ;;  %9597 = vperm.xlu0 %14838, %v9495_v33   ;;  %v17667_v10 = vld [vmem:[#allocation58_spill] sm:$0xff] }
 0xa61   :  { %v8796_v59 = vpop.f32.mrf.mxu3  ;;  %v16491_v52 = vadd.f32 %v8550_v11, %v8382_v9  ;;  %v9496_v11 = vld [vmem:[%s17260_s5 + $0x90] sm:$0xff]  ;;  %v8049_v53 = vadd.f32 %v17667_v10, %v16381_v22  ;;  %v12876_v10 = vld [vmem:[#allocation8 + $0x138] sm:$0xf0] }
 0xa62   :  { %v16489_v27 = vadd.f32 %v8796_v59, %v17662_v43  ;;  %v14642_v59 = vld [vmem:[#allocation8 + $0x454] sm:$0xf] }
 0xa63   :  { %17663 = vst [vmem:[#allocation26_spill] sm:$0xff] %v16491_v52  ;;  %v13284_v43 = vld [vmem:[#allocation8 + $0x470] sm:$0xf0]  ;;  %9602 = vperm.xlu1 %14839, %v9496_v11   ;;  %v8218_v33 = vadd.f32 %v16238_v62, %v8049_v53  ;;  %v17670_v53 = vld [vmem:[#allocation59_spill] sm:$0xff] }
 0xa64   :  { %v13287_v14 = vor.u32 %v14642_v59, %v13284_v43  ;;  %v17668_v59 = vld [vmem:[#allocation104_spill] sm:$0xff] }
 0xa66   :  { %v16498_v3 = vpop.f32.mrf.mxu2  ;;  %v8384_v1 = vpop.f32.mrf.mxu0 }
 0xa67   :  { %17665 = vst [vmem:[#allocation90_spill] sm:$0xff] %v16498_v3  ;;  %v8553_v9 = vpop.f32.mrf.mxu1  ;;  %v8385_v30 = vadd.f32 %v8384_v1, %v8216_v60  ;;  %v17666_v3 = vld [vmem:[#allocation105_spill] sm:$0xff] }
 0xa68   :  { %9562 = vperm.xlu2 %14840, %v9488_v55   ;;  %v9499_v60 = vld [vmem:[%s17260_s5 + $0xa8] sm:$0xff]  ;;  %v8052_v55 = vadd.f32 %v17670_v53, %v16361_v21 }
 0xa69   :  { %v8798_v47 = vpop.f32.mrf.mxu3  ;;  %v8554_v5 = vadd.f32 %v8553_v9, %v8385_v30  ;;  %8939 = vmatmul.bf16.gmra.mxu0 %v12843_v16  ;;  %v12874_v30 = vld [vmem:[#allocation8 + $0x118] sm:$0xf] }
 0xa6a   :  { %v16508_v46 = vadd.f32 %v8798_v47, %v17666_v3  ;;  %9108 = vmatmul.bf16.gmra.mxu1 %v12847_v54  ;;  %v9498_v3 = vld [vmem:[%s17260_s5 + $0xa0] sm:$0xff]  ;;  %v14543_v47 = vld [vmem:[#allocation8 + $0x134] sm:$0xf0] }
 0xa6b   :  { %9612 = vperm.xlu0 %14838, %v9498_v3   ;;  %9617 = vperm.xlu1 %14839, %v9499_v60   ;;  %v12875_v3 = vor.u32 %v14543_v47, %v12874_v30 }
 0xa6e   :  { %v8722_v11 = vpop.f32.mrf.mxu2  ;;  %8840 = vmatmul.bf16.gmra.mxu3 %v13287_v14  ;;  %v8386_v22 = vpop.f32.mrf.mxu0  ;;  %v14539_v14 = vld [vmem:[#allocation8 + $0x11c] sm:$0xf] }
 0xa6f   :  { %v16522_v16 = vadd.f32 %v8722_v11, %v8554_v5  ;;  %v8555_v54 = vpop.f32.mrf.mxu1  ;;  %v8387_v1 = vadd.f32 %v8386_v22, %v8218_v33  ;;  %v9491_v5 = vld [vmem:[%s17260_s5 + $0x68] sm:$0xff]  ;;  %v8221_v33 = vadd.f32 %v16245_v39, %v8052_v55  ;;  %v12879_v60 = vor.u32 %v14539_v14, %v12876_v10  ;;  %v9501_v22 = vld [vmem:[%s17260_s5 + $0xb8] sm:$0xff]  ;;  %v9494_v55 = vld [vmem:[%s17260_s5 + $0x80] sm:$0xff] }
 0xa70   :  { %9577 = vperm.xlu2 %14840, %v9491_v5   ;;  %v17673_v14 = vld [vmem:[#allocation60_spill] sm:$0xff] }
 0xa71   :  { %v8801_v9 = vpop.f32.mrf.mxu3  ;;  %v16527_v43 = vadd.f32 %v8555_v54, %v8387_v1  ;;  %v9502_v54 = vld [vmem:[%s17260_s5 + $0xc0] sm:$0xff]  ;;  %v8054_v10 = vadd.f32 %v17673_v14, %v16404_v19 }
 0xa72   :  { %v16525_v62 = vadd.f32 %v8801_v9, %v17668_v59  ;;  %v14650_v9 = vld [vmem:[#allocation8 + $0x494] sm:$0xf]  ;;  %v12908_v14 = vld [vmem:[#allocation8 + $0x178] sm:$0xf0] }
 0xa73   :  { %17669 = vst [vmem:[#allocation98_spill] sm:$0xff] %v16527_v43  ;;  %v13316_v59 = vld [vmem:[#allocation8 + $0x4b0] sm:$0xf0]  ;;  %9627 = vperm.xlu0 %14838, %v9501_v22   ;;  %9632 = vperm.xlu1 %14839, %v9502_v54   ;;  %v8223_v22 = vadd.f32 %v16252_v50, %v8054_v10  ;;  %v17676_v10 = vld [vmem:[#allocation61_spill] sm:$0xff] }
 0xa74   :  { %v13319_v47 = vor.u32 %v14650_v9, %v13316_v59  ;;  %v17674_v9 = vld [vmem:[#allocation108_spill] sm:$0xff] }
 0xa76   :  { %v16534_v11 = vpop.f32.mrf.mxu2  ;;  %v8389_v21 = vpop.f32.mrf.mxu0 }
 0xa77   :  { %17671 = vst [vmem:[#allocation27_spill] sm:$0xff] %v16534_v11  ;;  %v8558_v1 = vpop.f32.mrf.mxu1  ;;  %v8390_v53 = vadd.f32 %v8389_v21, %v8221_v33  ;;  %v17672_v11 = vld [vmem:[#allocation106_spill] sm:$0xff] }
 0xa78   :  { %9592 = vperm.xlu2 %14840, %v9494_v55   ;;  %v9505_v33 = vld [vmem:[%s17260_s5 + $0xd8] sm:$0xff]  ;;  %v8057_v55 = vadd.f32 %v17676_v10, %v16388_v38 }
 0xa79   :  { %v8803_v5 = vpop.f32.mrf.mxu3  ;;  %v8559_v30 = vadd.f32 %v8558_v1, %v8390_v53  ;;  %8944 = vmatmul.bf16.gmra.mxu0 %v12875_v3  ;;  %v12906_v53 = vld [vmem:[#allocation8 + $0x158] sm:$0xf] }
 0xa7a   :  { %v16544_v39 = vadd.f32 %v8803_v5, %v17672_v11  ;;  %9113 = vmatmul.bf16.gmra.mxu1 %v12879_v60  ;;  %v9504_v11 = vld [vmem:[%s17260_s5 + $0xd0] sm:$0xff]  ;;  %v14551_v5 = vld [vmem:[#allocation8 + $0x174] sm:$0xf0] }
 0xa7b   :  { %9642 = vperm.xlu0 %14838, %v9504_v11   ;;  %9647 = vperm.xlu1 %14839, %v9505_v33   ;;  %v12907_v11 = vor.u32 %v14551_v5, %v12906_v53 }
 0xa7e   :  { %v8727_v54 = vpop.f32.mrf.mxu2  ;;  %8845 = vmatmul.bf16.gmra.mxu3 %v13319_v47  ;;  %v8391_v19 = vpop.f32.mrf.mxu0  ;;  %v14547_v47 = vld [vmem:[#allocation8 + $0x15c] sm:$0xf] }
 0xa7f   :  { %v16558_v3 = vadd.f32 %v8727_v54, %v8559_v30  ;;  %v8560_v60 = vpop.f32.mrf.mxu1  ;;  %v8392_v21 = vadd.f32 %v8391_v19, %v8223_v22  ;;  %v9497_v30 = vld [vmem:[%s17260_s5 + $0x98] sm:$0xff]  ;;  %v8226_v22 = vadd.f32 %v16259_v26, %v8057_v55  ;;  %v12911_v33 = vor.u32 %v14547_v47, %v12908_v14  ;;  %v9507_v19 = vld [vmem:[%s17260_s5 + $0xe8] sm:$0xff]  ;;  %v9500_v55 = vld [vmem:[%s17260_s5 + $0xb0] sm:$0xff] }
 0xa80   :  { %9607 = vperm.xlu2 %14840, %v9497_v30   ;;  %v17679_v47 = vld [vmem:[#allocation62_spill] sm:$0xff] }
 0xa81   :  { %v8806_v1 = vpop.f32.mrf.mxu3  ;;  %v16563_v59 = vadd.f32 %v8560_v60, %v8392_v21  ;;  %v9508_v60 = vld [vmem:[%s17260_s5 + $0xf0] sm:$0xff]  ;;  %v8059_v14 = vadd.f32 %v17679_v47, %v16348_v25  ;;  %v12940_v47 = vld [vmem:[#allocation8 + $0x1b8] sm:$0xf0] }
 0xa82   :  { %v16561_v50 = vadd.f32 %v8806_v1, %v17674_v9  ;;  %v14658_v1 = vld [vmem:[#allocation8 + $0x4d4] sm:$0xf] }
 0xa83   :  { %17675 = vst [vmem:[#allocation91_spill] sm:$0xff] %v16563_v59  ;;  %v13348_v9 = vld [vmem:[#allocation8 + $0x4f0] sm:$0xf0]  ;;  %9657 = vperm.xlu0 %14838, %v9507_v19   ;;  %9662 = vperm.xlu1 %14839, %v9508_v60   ;;  %v8228_v19 = vadd.f32 %v16264_v17, %v8059_v14  ;;  %v17682_v14 = vld [vmem:[#allocation63_spill] sm:$0xff] }
 0xa84   :  { %v13351_v5 = vor.u32 %v14658_v1, %v13348_v9  ;;  %v17680_v1 = vld [vmem:[#allocation109_spill] sm:$0xff] }
 0xa86   :  { %v16570_v54 = vpop.f32.mrf.mxu2  ;;  %v8394_v38 = vpop.f32.mrf.mxu0 }
 0xa87   :  { %17677 = vst [vmem:[#allocation93_spill] sm:$0xff] %v16570_v54  ;;  %v8563_v21 = vpop.f32.mrf.mxu1  ;;  %v8395_v10 = vadd.f32 %v8394_v38, %v8226_v22  ;;  %v17678_v54 = vld [vmem:[#allocation107_spill] sm:$0xff]  ;;  %v10411_v22 = vld [vmem:[%s17261_s6 + $0x8] sm:$0xff] }
 0xa88   :  { %9622 = vperm.xlu2 %14840, %v9500_v55   ;;  %v8062_v55 = vadd.f32 %v17682_v14, %v16373_v29  ;;  %v13380_v14 = vld [vmem:[#allocation8 + $0x530] sm:$0xf0] }
 0xa89   :  { %v8808_v30 = vpop.f32.mrf.mxu3  ;;  %v8564_v53 = vadd.f32 %v8563_v21, %v8395_v10  ;;  %8949 = vmatmul.bf16.gmra.mxu0 %v12907_v11  ;;  %v12938_v10 = vld [vmem:[#allocation8 + $0x198] sm:$0xf] }
 0xa8a   :  { %v16580_v26 = vadd.f32 %v8808_v30, %v17678_v54  ;;  %9118 = vmatmul.bf16.gmra.mxu1 %v12911_v33  ;;  %v10410_v54 = vld [vmem:[%s17261_s6] sm:$0xff]  ;;  %v14559_v30 = vld [vmem:[#allocation8 + $0x1b4] sm:$0xf0] }
 0xa8b   :  { %10444 = vperm.xlu0 %14838, %v10410_v54   ;;  %10449 = vperm.xlu1 %14839, %v10411_v22   ;;  %v12939_v22 = vor.u32 %v14559_v30, %v12938_v10 }
 0xa8e   :  { %v8732_v60 = vpop.f32.mrf.mxu2  ;;  %8850 = vmatmul.bf16.gmra.mxu3 %v13351_v5  ;;  %v8396_v25 = vpop.f32.mrf.mxu0  ;;  %v14555_v5 = vld [vmem:[#allocation8 + $0x19c] sm:$0xf] }
 0xa8f   :  { %v16594_v11 = vadd.f32 %v8732_v60, %v8564_v53  ;;  %v8565_v33 = vpop.f32.mrf.mxu1  ;;  %v8397_v38 = vadd.f32 %v8396_v25, %v8228_v19  ;;  %v9503_v53 = vld [vmem:[%s17260_s5 + $0xc8] sm:$0xff]  ;;  %v17683_v60 = vld [vmem:[#allocation18_spill] sm:$0xff]  ;;  %v12943_v25 = vor.u32 %v14555_v5, %v12940_v47 }
 0xa90   :  { %9637 = vperm.xlu2 %14840, %v9503_v53   ;;  %v8231_v19 = vadd.f32 %v17683_v60, %v8062_v55  ;;  %v17685_v60 = vld [vmem:[#allocation110_spill] sm:$0xff]  ;;  %v17686_v5 = vld [vmem:[#allocation64_spill] sm:$0xff] }
 0xa91   :  { %v8811_v21 = vpop.f32.mrf.mxu3  ;;  %v16599_v9 = vadd.f32 %v8565_v33, %v8397_v38  ;;  %v10413_v33 = vld [vmem:[%s17261_s6 + $0x18] sm:$0xff]  ;;  %v10414_v38 = vld [vmem:[%s17261_s6 + $0x20] sm:$0xff]  ;;  %v8064_v47 = vadd.f32 %v17686_v5, %v16339_v42  ;;  %v17689_v5 = vld [vmem:[#allocation65_spill] sm:$0xff] }
 0xa92   :  { %v16597_v17 = vadd.f32 %v8811_v21, %v17680_v1  ;;  %v14666_v1 = vld [vmem:[#allocation8 + $0x514] sm:$0xf] }
 0xa93   :  { %17681 = vst [vmem:[#allocation28_spill] sm:$0xff] %v16599_v9  ;;  %10459 = vperm.xlu0 %14838, %v10413_v33   ;;  %10464 = vperm.xlu1 %14839, %v10414_v38   ;;  %v13383_v30 = vor.u32 %v14666_v1, %v13380_v14  ;;  %v9506_v9 = vld [vmem:[%s17260_s5 + $0xe0] sm:$0xff]  ;;  %v8233_v33 = vadd.f32 %v16275_v28, %v8064_v47 }
 0xa94   :  { %v17687_v1 = vld [vmem:[#allocation111_spill] sm:$0xff]  ;;  %v8067_v47 = vadd.f32 %v17689_v5, %v16312_v15 }
 0xa96   :  { %v16607_v54 = vpop.f32.mrf.mxu2  ;;  %v8399_v29 = vpop.f32.mrf.mxu0 }
 0xa97   :  { %17684 = vst [vmem:[#allocation92_spill] sm:$0xff] %v16607_v54  ;;  %v8568_v21 = vpop.f32.mrf.mxu1  ;;  %v8400_v53 = vadd.f32 %v8399_v29, %v8231_v19  ;;  %v10416_v19 = vld [vmem:[%s17261_s6 + $0x30] sm:$0xff] }
 0xa98   :  { %9652 = vperm.xlu2 %14840, %v9506_v9  }
 0xa99   :  { %v8813_v55 = vpop.f32.mrf.mxu3  ;;  %v8569_v10 = vadd.f32 %v8568_v21, %v8400_v53  ;;  %8954 = vmatmul.bf16.gmra.mxu0 %v12939_v22  ;;  %v10417_v22 = vld [vmem:[%s17261_s6 + $0x38] sm:$0xff] }
 0xa9a   :  { %v16616_v54 = vadd.f32 %v8813_v55, %v17685_v60  ;;  %9123 = vmatmul.bf16.gmra.mxu1 %v12943_v25  ;;  %v12970_v53 = vld [vmem:[#allocation8 + $0x1d8] sm:$0xf]  ;;  %v14563_v60 = vld [vmem:[#allocation8 + $0x1dc] sm:$0xf] }
 0xa9b   :  { %10474 = vperm.xlu0 %14838, %v10416_v19   ;;  %10479 = vperm.xlu1 %14839, %v10417_v22   ;;  %v14567_v55 = vld [vmem:[#allocation8 + $0x1f4] sm:$0xf0] }
 0xa9c   :  { %v12971_v19 = vor.u32 %v14567_v55, %v12970_v53 }
 0xa9e   :  { %v8737_v38 = vpop.f32.mrf.mxu2  ;;  %8855 = vmatmul.bf16.gmra.mxu3 %v13383_v30  ;;  %v8401_v42 = vpop.f32.mrf.mxu0  ;;  %v12972_v30 = vld [vmem:[#allocation8 + $0x1f8] sm:$0xf0] }
 0xa9f   :  { %v16630_v25 = vadd.f32 %v8737_v38, %v8569_v10  ;;  %v8570_v29 = vpop.f32.mrf.mxu1  ;;  %v8402_v21 = vadd.f32 %v8401_v42, %v8233_v33  ;;  %v9509_v10 = vld [vmem:[%s17260_s5 + $0xf8] sm:$0xff]  ;;  %v8236_v33 = vadd.f32 %v16281_v13, %v8067_v47  ;;  %v12975_v22 = vor.u32 %v14563_v60, %v12972_v30  ;;  %v10419_v42 = vld [vmem:[%s17261_s6 + $0x48] sm:$0xff] }
 0xaa0   :  { %9667 = vperm.xlu2 %14840, %v9509_v10   ;;  %v17691_v47 = vld [vmem:[#allocation67_spill] sm:$0xff]  ;;  %v17692_v60 = vld [vmem:[#allocation66_spill] sm:$0xff] }
 0xaa1   :  { %v8816_v9 = vpop.f32.mrf.mxu3  ;;  %v16635_v14 = vadd.f32 %v8570_v29, %v8402_v21  ;;  %v10420_v29 = vld [vmem:[%s17261_s6 + $0x50] sm:$0xff]  ;;  %v8069_v30 = vadd.f32 %v17692_v60, %v16356_v6 }
 0xaa2   :  { %v16633_v28 = vadd.f32 %v8816_v9, %v17687_v1  ;;  %v14674_v9 = vld [vmem:[#allocation8 + $0x554] sm:$0xf] }
 0xaa3   :  { %17688 = vst [vmem:[#allocation88_spill] sm:$0xff] %v16635_v14  ;;  %v13412_v1 = vld [vmem:[#allocation8 + $0x570] sm:$0xf0]  ;;  %10489 = vperm.xlu0 %14838, %v10419_v42   ;;  %10494 = vperm.xlu1 %14839, %v10420_v29   ;;  %v8238_v42 = vadd.f32 %v16287_v8, %v8069_v30 }
 0xaa4   :  { %v13415_v55 = vor.u32 %v14674_v9, %v13412_v1  ;;  %v17693_v9 = vld [vmem:[#allocation89_spill] sm:$0xff] }
 0xaa6   :  { %v16643_v38 = vpop.f32.mrf.mxu2  ;;  %v8404_v15 = vpop.f32.mrf.mxu0 }
 0xaa7   :  { %17690 = vst [vmem:[#allocation29_spill] sm:$0xff] %v16643_v38  ;;  %v8573_v21 = vpop.f32.mrf.mxu1  ;;  %v8405_v5 = vadd.f32 %v8404_v15, %v8236_v33  ;;  %v10412_v38 = vld [vmem:[%s17261_s6 + $0x10] sm:$0xff]  ;;  %v10422_v33 = vld [vmem:[%s17261_s6 + $0x60] sm:$0xff] }
 0xaa8   :  { %10454 = vperm.xlu2 %14840, %v10412_v38  }
 0xaa9   :  { %v8818_v13 = vpop.f32.mrf.mxu3  ;;  %v8574_v53 = vadd.f32 %v8573_v21, %v8405_v5  ;;  %8959 = vmatmul.bf16.gmra.mxu0 %v12971_v19  ;;  %v10423_v19 = vld [vmem:[%s17261_s6 + $0x68] sm:$0xff]  ;;  %v13002_v5 = vld [vmem:[#allocation8 + $0x218] sm:$0xf] }
 0xaaa   :  { %v16652_v10 = vadd.f32 %v8818_v13, %v17691_v47  ;;  %9128 = vmatmul.bf16.gmra.mxu1 %v12975_v22  ;;  %v14575_v13 = vld [vmem:[#allocation8 + $0x234] sm:$0xf0]  ;;  %v14571_v47 = vld [vmem:[#allocation8 + $0x21c] sm:$0xf] }
 0xaab   :  { %10504 = vperm.xlu0 %14838, %v10422_v33   ;;  %10509 = vperm.xlu1 %14839, %v10423_v19   ;;  %v13003_v60 = vor.u32 %v14575_v13, %v13002_v5 }
 0xaae   :  { %v8742_v29 = vpop.f32.mrf.mxu2  ;;  %8860 = vmatmul.bf16.gmra.mxu3 %v13415_v55  ;;  %v8406_v6 = vpop.f32.mrf.mxu0  ;;  %v13004_v55 = vld [vmem:[#allocation8 + $0x238] sm:$0xf0] }
 0xaaf   :  { %v16666_v22 = vadd.f32 %v8742_v29, %v8574_v53  ;;  %v8575_v15 = vpop.f32.mrf.mxu1  ;;  %v8407_v21 = vadd.f32 %v8406_v6, %v8238_v42  ;;  %v10415_v53 = vld [vmem:[%s17261_s6 + $0x28] sm:$0xff]  ;;  %v13007_v30 = vor.u32 %v14571_v47, %v13004_v55  ;;  %v10425_v42 = vld [vmem:[%s17261_s6 + $0x78] sm:$0xff]  ;;  %v10426_v29 = vld [vmem:[%s17261_s6 + $0x80] sm:$0xff] }
 0xab0   :  { %10469 = vperm.xlu2 %14840, %v10415_v53   ;;  %v14682_v6 = vld [vmem:[#allocation8 + $0x594] sm:$0xf]  ;;  %v10418_v55 = vld [vmem:[%s17261_s6 + $0x40] sm:$0xff] }
 0xab1   :  { %v8821_v38 = vpop.f32.mrf.mxu3  ;;  %v16671_v1 = vadd.f32 %v8575_v15, %v8407_v21  ;;  %v13444_v15 = vld [vmem:[#allocation8 + $0x5b0] sm:$0xf0] }
 0xab2   :  { %v16669_v8 = vadd.f32 %v8821_v38, %v17693_v9  ;;  %v17695_v9 = vld [vmem:[#allocation16_spill] sm:$0xff]  ;;  %v13447_v47 = vor.u32 %v14682_v6, %v13444_v15  ;;  %v10428_v53 = vld [vmem:[%s17261_s6 + $0x90] sm:$0xff] }
 0xab3   :  { %17694 = vst [vmem:[#allocation96_spill] sm:$0xff] %v16671_v1  ;;  %10519 = vperm.xlu0 %14838, %v10425_v42   ;;  %10524 = vperm.xlu1 %14839, %v10426_v29  }
 0xab6   :  { %v8925_v33 = vpop.f32.mrf.mxu0 }
 0xab7   :  { %v9094_v19 = vpop.f32.mrf.mxu1  ;;  %v8926_v21 = vadd.f32 %v8925_v33, %v16294_v56  ;;  %v10429_v56 = vld [vmem:[%s17261_s6 + $0x98] sm:$0xff] }
 0xab8   :  { %10484 = vperm.xlu2 %14840, %v10418_v55   ;;  %v10421_v55 = vld [vmem:[%s17261_s6 + $0x58] sm:$0xff] }
 0xab9   :  { %v8823_v38 = vpop.f32.mrf.mxu3  ;;  %v9095_v13 = vadd.f32 %v9094_v19, %v8926_v21  ;;  %8964 = vmatmul.bf16.gmra.mxu0 %v13003_v60  ;;  %v17696_v19 = vld [vmem:[#allocation68_spill] sm:$0xff]  ;;  %v13034_v21 = vld [vmem:[#allocation8 + $0x258] sm:$0xf] }
 0xaba   :  { %v16684_v5 = vadd.f32 %v8823_v38, %v17695_v9  ;;  %9133 = vmatmul.bf16.gmra.mxu1 %v13007_v30  ;;  %v14583_v38 = vld [vmem:[#allocation8 + $0x274] sm:$0xf0]  ;;  %v14579_v9 = vld [vmem:[#allocation8 + $0x25c] sm:$0xf] }
 0xabb   :  { %10534 = vperm.xlu0 %14838, %v10428_v53   ;;  %10539 = vperm.xlu1 %14839, %v10429_v56   ;;  %v9254_v33 = vmul.f32 0.2, %v9095_v13  ;;  %v13035_v56 = vor.u32 %v14583_v38, %v13034_v21 }
 0xabd   :  { %v9318_v14 = vmax.f32 %v9095_v13, %v9254_v33 }
 0xabe   :  { %8865 = vmatmul.bf16.gmra.mxu3 %v13447_v47  ;;  %v8927_v42 = vpop.f32.mrf.mxu0  ;;  %v13036_v47 = vld [vmem:[#allocation8 + $0x278] sm:$0xf0] }
 0xabf   :  { %v9096_v29 = vpop.f32.mrf.mxu1  ;;  %v8928_v60 = vadd.f32 %v8927_v42, %v16303_v63  ;;  %v13039_v59 = vor.u32 %v14579_v9, %v13036_v47  ;;  %v10431_v63 = vld [vmem:[%s17261_s6 + $0xa8] sm:$0xff]  ;;  %v10432_v42 = vld [vmem:[%s17261_s6 + $0xb0] sm:$0xff] }
 0xac0   :  { %10499 = vperm.xlu2 %14840, %v10421_v55   ;;  %v10424_v47 = vld [vmem:[%s17261_s6 + $0x70] sm:$0xff]  ;;  %v10434_v55 = vld [vmem:[%s17261_s6 + $0xc0] sm:$0xff] }
 0xac1   :  { %v8826_v30 = vpop.f32.mrf.mxu3  ;;  %v9097_v15 = vadd.f32 %v9096_v29, %v8928_v60 }
 0xac2   :  { %v16697_v6 = vadd.f32 %v8826_v30, %v17696_v19  ;;  %v14690_v30 = vld [vmem:[#allocation8 + $0x5d4] sm:$0xf] }
 0xac3   :  { %v9255_v1 = vmul.f32 0.2, %v9097_v15  ;;  %v13476_v19 = vld [vmem:[#allocation8 + $0x5f0] sm:$0xf0]  ;;  %10549 = vperm.xlu0 %14838, %v10431_v63   ;;  %10554 = vperm.xlu1 %14839, %v10432_v42   ;;  %v17698_v42 = vld [vmem:[#allocation17_spill] sm:$0xff] }
 0xac4   :  { %v13479_v9 = vor.u32 %v14690_v30, %v13476_v19  ;;  %v13066_v30 = vld [vmem:[#allocation8 + $0x298] sm:$0xf] }
 0xac5   :  { %v9319_v53 = vmax.f32 %v9097_v15, %v9255_v1  ;;  %v17697_v15 = vld [vmem:[#allocation74_spill] sm:$0xff] }
 0xac6   :  { %v8930_v29 = vpop.f32.mrf.mxu0  ;;  %v14591_v19 = vld [vmem:[#allocation8 + $0x2b4] sm:$0xf0] }
 0xac7   :  { %v9099_v60 = vpop.f32.mrf.mxu1  ;;  %v8931_v13 = vadd.f32 %v8930_v29, %v16310_v51  ;;  %v16709_v1 = vpack.c.bf16 %v9319_v53, %v9318_v14  ;;  %v10435_v51 = vld [vmem:[%s17261_s6 + $0xc8] sm:$0xff] }
 0xac8   :  { %10514 = vperm.xlu2 %14840, %v10424_v47  }
 0xac9   :  { %v8828_v33 = vpop.f32.mrf.mxu3  ;;  %v9100_v38 = vadd.f32 %v9099_v60, %v8931_v13  ;;  %8969 = vmatmul.bf16.gmra.mxu0 %v13035_v56  ;;  %v14587_v13 = vld [vmem:[#allocation8 + $0x29c] sm:$0xf] }
 0xaca   :  { %v16712_v21 = vadd.f32 %v8828_v33, %v17697_v15  ;;  %9138 = vmatmul.bf16.gmra.mxu1 %v13039_v59  ;;  %v13068_v33 = vld [vmem:[#allocation8 + $0x2b8] sm:$0xf0] }
 0xacb   :  { %10564 = vperm.xlu0 %14838, %v10434_v55   ;;  %10569 = vperm.xlu1 %14839, %v10435_v51   ;;  %v9256_v63 = vmul.f32 0.2, %v9100_v38  ;;  %v13067_v51 = vor.u32 %v14591_v19, %v13066_v30  ;;  %v13071_v43 = vor.u32 %v14587_v13, %v13068_v33  ;;  %v17699_v30 = vld [vmem:[#allocation69_spill] sm:$0xff] }
 0xacd   :  { %v9320_v47 = vmax.f32 %v9100_v38, %v9256_v63 }
 0xace   :  { %8870 = vmatmul.bf16.gmra.mxu3 %v13479_v9  ;;  %v8932_v14 = vpop.f32.mrf.mxu0  ;;  %v10427_v9 = vld [vmem:[%s17261_s6 + $0x88] sm:$0xff] }
 0xacf   :  { %v9101_v53 = vpop.f32.mrf.mxu1  ;;  %v8933_v59 = vadd.f32 %v8932_v14, %v16321_v36  ;;  %v10437_v36 = vld [vmem:[%s17261_s6 + $0xd8] sm:$0xff]  ;;  %v10438_v14 = vld [vmem:[%s17261_s6 + $0xe0] sm:$0xff] }
 0xad0   :  { %10529 = vperm.xlu2 %14840, %v10427_v9   ;;  %v10440_v9 = vld [vmem:[%s17261_s6 + $0xf0] sm:$0xff] }
 0xad1   :  { %v8831_v56 = vpop.f32.mrf.mxu3  ;;  %v9102_v60 = vadd.f32 %v9101_v53, %v8933_v59 }
 0xad2   :  { %v16725_v29 = vadd.f32 %v8831_v56, %v17698_v42  ;;  %v14698_v56 = vld [vmem:[#allocation8 + $0x614] sm:$0xf] }
 0xad3   :  { %v9257_v15 = vmul.f32 0.2, %v9102_v60  ;;  %v13508_v42 = vld [vmem:[#allocation8 + $0x630] sm:$0xf0]  ;;  %10579 = vperm.xlu0 %14838, %v10437_v36   ;;  %10584 = vperm.xlu1 %14839, %v10438_v14   ;;  %v17700_v14 = vld [vmem:[#allocation77_spill] sm:$0xff] }
 0xad4   :  { %v13511_v33 = vor.u32 %v14698_v56, %v13508_v42  ;;  %v13098_v56 = vld [vmem:[#allocation8 + $0x2d8] sm:$0xf] }
 0xad5   :  { %v9321_v55 = vmax.f32 %v9102_v60, %v9257_v15  ;;  %v10430_v15 = vld [vmem:[%s17261_s6 + $0xa0] sm:$0xff]  ;;  %v14599_v42 = vld [vmem:[#allocation8 + $0x2f4] sm:$0xf0] }
 0xad6   :  { %v8935_v53 = vpop.f32.mrf.mxu0 }
 0xad7   :  { %v9104_v59 = vpop.f32.mrf.mxu1  ;;  %v8936_v38 = vadd.f32 %v8935_v53, %v16330_v4  ;;  %v16737_v63 = vpack.c.bf16 %v9321_v55, %v9320_v47  ;;  %v10441_v4 = vld [vmem:[%s17261_s6 + $0xf8] sm:$0xff] }
 0xad8   :  { %10544 = vperm.xlu2 %14840, %v10430_v15  }
 0xad9   :  { %v8833_v60 = vpop.f32.mrf.mxu3  ;;  %v9105_v13 = vadd.f32 %v9104_v59, %v8936_v38  ;;  %8974 = vmatmul.bf16.gmra.mxu0 %v13067_v51  ;;  %v14595_v38 = vld [vmem:[#allocation8 + $0x2dc] sm:$0xf] }
 0xada   :  { %v16740_v19 = vadd.f32 %v8833_v60, %v17699_v30  ;;  %9143 = vmatmul.bf16.gmra.mxu1 %v13071_v43  ;;  %v13100_v60 = vld [vmem:[#allocation8 + $0x2f8] sm:$0xf0] }
 0xadb   :  { %10594 = vperm.xlu0 %14838, %v10440_v9   ;;  %10599 = vperm.xlu1 %14839, %v10441_v4   ;;  %v9258_v36 = vmul.f32 0.2, %v9105_v13  ;;  %v13099_v4 = vor.u32 %v14599_v42, %v13098_v56  ;;  %v13103_v52 = vor.u32 %v14595_v38, %v13100_v60  ;;  %v17702_v60 = vld [vmem:[#allocation80_spill] sm:$0xff] }
 0xadd   :  { %v9322_v15 = vmax.f32 %v9105_v13, %v9258_v36  ;;  %v10436_v36 = vld [vmem:[%s17261_s6 + $0xd0] sm:$0xff] }
 0xade   :  { %8875 = vmatmul.bf16.gmra.mxu3 %v13511_v33  ;;  %v8937_v47 = vpop.f32.mrf.mxu0  ;;  %v10433_v33 = vld [vmem:[%s17261_s6 + $0xb8] sm:$0xff] }
 0xadf   :  { %v9106_v55 = vpop.f32.mrf.mxu1  ;;  %v8938_v43 = vadd.f32 %v8937_v47, %v16342_v35 }
 0xae0   :  { %10559 = vperm.xlu2 %14840, %v10433_v33   ;;  %v13130_v33 = vld [vmem:[#allocation8 + $0x318] sm:$0xf] }
 0xae1   :  { %v8836_v51 = vpop.f32.mrf.mxu3  ;;  %v9107_v59 = vadd.f32 %v9106_v55, %v8938_v43 }
 0xae2   :  { %v16753_v53 = vadd.f32 %v8836_v51, %v17700_v14  ;;  %v13540_v51 = vld [vmem:[#allocation8 + $0x670] sm:$0xf0] }
 0xae3   :  { %v9259_v30 = vmul.f32 0.2, %v9107_v59  ;;  %v13543_v13 = vor.u32 %v14706_v23, %v13540_v51  ;;  %v13132_v23 = vld [vmem:[#allocation8 + $0x338] sm:$0xf0] }
 0xae5   :  { %v9323_v9 = vmax.f32 %v9107_v59, %v9259_v30 }
 0xae6   :  { %v8940_v35 = vpop.f32.mrf.mxu0 }
 0xae7   :  { %v9109_v47 = vpop.f32.mrf.mxu1  ;;  %v8941_v55 = vadd.f32 %v8940_v35, %v16351_v40  ;;  %v16759_v43 = vpack.c.bf16 %v9323_v9, %v9322_v15  ;;  %v14607_v15 = vld [vmem:[#allocation8 + $0x334] sm:$0xf0] }
 0xae8   :  { %10574 = vperm.xlu2 %14840, %v10436_v36   ;;  %v13131_v51 = vor.u32 %v14607_v15, %v13130_v33  ;;  %v13572_v36 = vld [vmem:[#allocation8 + $0x6b0] sm:$0xf0] }
 0xae9   :  { %v8838_v14 = vpop.f32.mrf.mxu3  ;;  %v9110_v58 = vadd.f32 %v9109_v47, %v8941_v55  ;;  %8979 = vmatmul.bf16.gmra.mxu0 %v13099_v4  ;;  %v10439_v4 = vld [vmem:[%s17261_s6 + $0xe8] sm:$0xff]  ;;  %s14986_s6 = smov [#allocation11]  }
 0xaea   :  { %v16762_v32 = vadd.f32 %v8838_v14, %v17701_v31  ;;  %9148 = vmatmul.bf16.gmra.mxu1 %v13103_v52  ;;  %v14603_v52 = vld [vmem:[#allocation8 + $0x31c] sm:$0xf]  ;;  %s10690_s14 = sshll.u32 %s14986_s6, 4  ;;  %s10691_s14 = int_to_ptr.vmem [resolvable:$true] %s10690_s14 }
 0xaeb   :  { %v9260_v38 = vmul.f32 0.2, %v9110_v58  ;;  %v13135_v55 = vor.u32 %v14603_v52, %v13132_v23 }
 0xaed   :  { %v9324_v35 = vmax.f32 %v9110_v58, %v9260_v38  ;;  %v10671_v38 = vld [vmem:[#allocation2] sm:$0x1] }
 0xaee   :  { %8880 = vmatmul.bf16.gmra.mxu3 %v13543_v13  ;;  %v8942_v59 = vpop.f32.mrf.mxu0  ;;  %v14714_v13 = vld [vmem:[#allocation8 + $0x694] sm:$0xf] }
 0xaef   :  { %v9111_v56 = vpop.f32.mrf.mxu1  ;;  %v8943_v40 = vadd.f32 %v8942_v59, %v16364_v20  ;;  %v13575_v58 = vor.u32 %v14714_v13, %v13572_v36 }
 0xaf0   :  { %10589 = vperm.xlu2 %14840, %v10439_v4  }
 0xaf1   :  { %v8841_v42 = vpop.f32.mrf.mxu3  ;;  %v9112_v31 = vadd.f32 %v9111_v56, %v8943_v40 }
 0xaf2   :  { %v16769_v30 = vadd.f32 %v8841_v42, %v17702_v60  ;;  %v17703_v42 = vld [vmem:[#allocation19_spill] sm:$0xff] }
 0xaf3   :  { %v9261_v9 = vmul.f32 0.2, %v9112_v31 }
 0xaf5   :  { %v9325_v47 = vmax.f32 %v9112_v31, %v9261_v9 }
 0xaf6   :  { %v8945_v20 = vpop.f32.mrf.mxu0 }
 0xaf7   :  { %v9114_v14 = vpop.f32.mrf.mxu1  ;;  %v8946_v59 = vadd.f32 %v8945_v20, %v16376_v0  ;;  %v16775_v56 = vpack.c.bf16 %v9325_v47, %v9324_v35  ;;  %v17704_v0 = vld [vmem:[#allocation71_spill] sm:$0xff] }
 0xaf8   :  { %10674 = vperm.xlu2 %14840, %v10671_v38   ;;  %v13162_v35 = vld [vmem:[#allocation8 + $0x358] sm:$0xf]  ;;  %v14611_v20 = vld [vmem:[#allocation8 + $0x35c] sm:$0xf]  ;;  %v13604_v38 = vld [vmem:[#allocation8 + $0x6f0] sm:$0xf0] }
 0xaf9   :  { %v8843_v40 = vpop.f32.mrf.mxu3  ;;  %v9115_v57 = vadd.f32 %v9114_v14, %v8946_v59  ;;  %8984 = vmatmul.bf16.gmra.mxu0 %v13131_v51  ;;  %v14615_v47 = vld [vmem:[#allocation8 + $0x374] sm:$0xf0]  ;;  %v13164_v14 = vld [vmem:[#allocation8 + $0x378] sm:$0xf0] }
 0xafa   :  { %v16778_v60 = vadd.f32 %v8843_v40, %v17703_v42  ;;  %9153 = vmatmul.bf16.gmra.mxu1 %v13135_v55  ;;  %v13163_v36 = vor.u32 %v14615_v47, %v13162_v35  ;;  %v13167_v59 = vor.u32 %v14611_v20, %v13164_v14  ;;  %v17707_v20 = vld [vmem:[#allocation20_spill] sm:$0xff] }
 0xafb   :  { %v9262_v23 = vmul.f32 0.2, %v9115_v57 }
 0xafd   :  { %v9326_v55 = vmax.f32 %v9115_v57, %v9262_v23 }
 0xafe   :  { %8885 = vmatmul.bf16.gmra.mxu3 %v13575_v58  ;;  %v8947_v31 = vpop.f32.mrf.mxu0  ;;  %v14722_v58 = vld [vmem:[#allocation8 + $0x6d4] sm:$0xf] }
 0xaff   :  { %v9116_v33 = vpop.f32.mrf.mxu1  ;;  %v8948_v15 = vadd.f32 %v8947_v31, %v16391_v49 }
 0xb01   :  { %v8846_v52 = vpop.f32.mrf.mxu3  ;;  %v9117_v4 = vadd.f32 %v9116_v33, %v8948_v15  ;;  %v13607_v15 = vor.u32 %v14722_v58, %v13604_v38 }
 0xb02   :  { %v16782_v9 = vadd.f32 %v8846_v52, %v17704_v0  ;;  %v17706_v0 = vld [vmem:[#allocation84_spill] sm:$0xff] }
 0xb03   :  { %v9263_v51 = vmul.f32 0.2, %v9117_v4 }
 0xb04   :  { %17705 = vst [vmem:[#allocation95_spill] sm:$0xff] %v16782_v9 }
 0xb05   :  { %v9327_v13 = vmax.f32 %v9117_v4, %v9263_v51 }
 0xb06   :  { %v8950_v40 = vpop.f32.mrf.mxu0 }
 0xb07   :  { %v9119_v42 = vpop.f32.mrf.mxu1  ;;  %v16784_v49 = vpack.c.bf16 %v9327_v13, %v9326_v55  ;;  %v8951_v52 = vadd.f32 %v8950_v40, %v16399_v34  ;;  %v13194_v55 = vld [vmem:[#allocation8 + $0x398] sm:$0xf]  ;;  %v14619_v13 = vld [vmem:[#allocation8 + $0x39c] sm:$0xf] }
 0xb08   :  { %v14623_v34 = vld [vmem:[#allocation8 + $0x3b4] sm:$0xf0]  ;;  %v13196_v40 = vld [vmem:[#allocation8 + $0x3b8] sm:$0xf0] }
 0xb09   :  { %v8848_v31 = vpop.f32.mrf.mxu3  ;;  %8989 = vmatmul.bf16.gmra.mxu0 %v13163_v36  ;;  %v9120_v9 = vadd.f32 %v9119_v42, %v8951_v52  ;;  %v13195_v58 = vor.u32 %v14623_v34, %v13194_v55  ;;  %v13199_v42 = vor.u32 %v14619_v13, %v13196_v40 }
 0xb0a   :  { %v16788_v33 = vadd.f32 %v8848_v31, %v17706_v0  ;;  %9158 = vmatmul.bf16.gmra.mxu1 %v13167_v59  ;;  %v14730_v0 = vld [vmem:[#allocation8 + $0x714] sm:$0xf] }
 0xb0b   :  { %v9264_v47 = vmul.f32 0.2, %v9120_v9 }
 0xb0d   :  { %v9328_v36 = vmax.f32 %v9120_v9, %v9264_v47 }
 0xb0e   :  { %8890 = vmatmul.bf16.gmra.mxu3 %v13607_v15  ;;  %v8952_v57 = vpop.f32.mrf.mxu0  ;;  %v13636_v15 = vld [vmem:[#allocation8 + $0x730] sm:$0xf0] }
 0xb0f   :  { %v9121_v23 = vpop.f32.mrf.mxu1  ;;  %v8953_v4 = vadd.f32 %v8952_v57, %v16413_v24 }
 0xb11   :  { %v8851_v35 = vpop.f32.mrf.mxu3  ;;  %v9122_v51 = vadd.f32 %v9121_v23, %v8953_v4  ;;  %v13639_v4 = vor.u32 %v14730_v0, %v13636_v15 }
 0xb12   :  { %v16792_v14 = vadd.f32 %v8851_v35, %v17707_v20 }
 0xb13   :  { %v9265_v31 = vmul.f32 0.2, %v9122_v51 }
 0xb15   :  { %v9329_v59 = vmax.f32 %v9122_v51, %v9265_v31  ;;  %v13226_v31 = vld [vmem:[#allocation8 + $0x3d8] sm:$0xf] }
 0xb16   :  { %v8955_v38 = vpop.f32.mrf.mxu0 }
 0xb17   :  { %v9124_v52 = vpop.f32.mrf.mxu1  ;;  %v16794_v24 = vpack.c.bf16 %v9329_v59, %v9328_v36  ;;  %v8956_v35 = vadd.f32 %v8955_v38, %v16426_v45  ;;  %v14631_v45 = vld [vmem:[#allocation8 + $0x3f4] sm:$0xf0]  ;;  %v14627_v36 = vld [vmem:[#allocation8 + $0x3dc] sm:$0xf] }
 0xb18   :  { %v13227_v38 = vor.u32 %v14631_v45, %v13226_v31  ;;  %v17709_v31 = vld [vmem:[#allocation76_spill] sm:$0xff] }
 0xb19   :  { %v8853_v57 = vpop.f32.mrf.mxu3  ;;  %8994 = vmatmul.bf16.gmra.mxu0 %v13195_v58  ;;  %v9125_v20 = vadd.f32 %v9124_v52, %v8956_v35  ;;  %v13668_v35 = vld [vmem:[#allocation8 + $0x770] sm:$0xf0] }
 0xb1a   :  { %v16798_v23 = vadd.f32 %v8853_v57, %v16318_v18  ;;  %9163 = vmatmul.bf16.gmra.mxu1 %v13199_v42  ;;  %v13228_v18 = vld [vmem:[#allocation8 + $0x3f8] sm:$0xf0]  ;;  %v14738_v57 = vld [vmem:[#allocation8 + $0x754] sm:$0xf] }
 0xb1b   :  { %v9266_v34 = vmul.f32 0.2, %v9125_v20  ;;  %v13231_v52 = vor.u32 %v14627_v36, %v13228_v18  ;;  %v13258_v18 = vld [vmem:[#allocation8 + $0x418] sm:$0xf] }
 0xb1d   :  { %v9330_v58 = vmax.f32 %v9125_v20, %v9266_v34 }
 0xb1e   :  { %8895 = vmatmul.bf16.gmra.mxu3 %v13639_v4  ;;  %v8957_v9 = vpop.f32.mrf.mxu0 }
 0xb1f   :  { %v9126_v47 = vpop.f32.mrf.mxu1  ;;  %v8958_v51 = vadd.f32 %v8957_v9, %v16441_v7  ;;  %v13671_v9 = vor.u32 %v14738_v57, %v13668_v35 }
 0xb21   :  { %v8856_v55 = vpop.f32.mrf.mxu3  ;;  %v9127_v40 = vadd.f32 %v9126_v47, %v8958_v51 }
 0xb22   :  { %v16802_v13 = vadd.f32 %v8856_v55, %v16327_v44 }
 0xb23   :  { %v9267_v59 = vmul.f32 0.2, %v9127_v40 }
 0xb25   :  { %v9331_v42 = vmax.f32 %v9127_v40, %v9267_v59  ;;  %v14639_v59 = vld [vmem:[#allocation8 + $0x434] sm:$0xf0] }
 0xb26   :  { %v8960_v0 = vpop.f32.mrf.mxu0 }
 0xb27   :  { %v9129_v15 = vpop.f32.mrf.mxu1  ;;  %v9452_v7 = vpack.c.bf16 %v9331_v42, %v9330_v58  ;;  %v8961_v44 = vadd.f32 %v8960_v0, %v16454_v2  ;;  %v14635_v42 = vld [vmem:[#allocation8 + $0x41c] sm:$0xf]  ;;  %v13259_v0 = vor.u32 %v14639_v59, %v13258_v18  ;;  %v17710_v18 = vld [vmem:[#allocation100_spill] sm:$0xff] }
 0xb28   :  { %v13260_v2 = vld [vmem:[#allocation8 + $0x438] sm:$0xf0] }
 0xb29   :  { %v16804_v4 = vpop.f32.mrf.mxu3  ;;  %8999 = vmatmul.bf16.gmra.mxu0 %v13227_v38  ;;  %v9130_v47 = vadd.f32 %v9129_v15, %v8961_v44  ;;  %v13263_v35 = vor.u32 %v14635_v42, %v13260_v2  ;;  %v14746_v44 = vld [vmem:[#allocation8 + $0x794] sm:$0xf]  ;;  %v14647_v42 = vld [vmem:[#allocation8 + $0x474] sm:$0xf0] }
 0xb2a   :  { %17708 = vst [vmem:[#allocation30_spill] sm:$0xff] %v16804_v4  ;;  %9168 = vmatmul.bf16.gmra.mxu1 %v13231_v52 }
 0xb2b   :  { %v9268_v40 = vmul.f32 0.2, %v9130_v47 }
 0xb2d   :  { %v9332_v38 = vmax.f32 %v9130_v47, %v9268_v40 }
 0xb2e   :  { %8900 = vmatmul.bf16.gmra.mxu3 %v13671_v9  ;;  %v8962_v51 = vpop.f32.mrf.mxu0  ;;  %v13700_v9 = vld [vmem:[#allocation8 + $0x7b0] sm:$0xf0] }
 0xb2f   :  { %v9131_v55 = vpop.f32.mrf.mxu1  ;;  %v8963_v20 = vadd.f32 %v8962_v51, %v16472_v41 }
 0xb31   :  { %v8861_v34 = vpop.f32.mrf.mxu3  ;;  %v9132_v36 = vadd.f32 %v9131_v55, %v8963_v20  ;;  %v13703_v55 = vor.u32 %v14746_v44, %v13700_v9  ;;  %v14754_v44 = vld [vmem:[#allocation8 + $0x7d4] sm:$0xf] }
 0xb32   :  { %v16809_v45 = vadd.f32 %v8861_v34, %v17709_v31  ;;  %v13732_v9 = vld [vmem:[#allocation8 + $0x7f0] sm:$0xf0] }
 0xb33   :  { %v9269_v58 = vmul.f32 0.2, %v9132_v36 }
 0xb35   :  { %v9333_v52 = vmax.f32 %v9132_v36, %v9269_v58 }
 0xb36   :  { %v8965_v15 = vpop.f32.mrf.mxu0 }
 0xb37   :  { %v9134_v57 = vpop.f32.mrf.mxu1  ;;  %v9453_v41 = vpack.c.bf16 %v9333_v52, %v9332_v38  ;;  %v8966_v51 = vadd.f32 %v8965_v15, %v16489_v27  ;;  %v13290_v27 = vld [vmem:[#allocation8 + $0x458] sm:$0xf]  ;;  %v14643_v38 = vld [vmem:[#allocation8 + $0x45c] sm:$0xf] }
 0xb38   :  { %v13292_v52 = vld [vmem:[#allocation8 + $0x478] sm:$0xf0] }
 0xb39   :  { %v16812_v4 = vpop.f32.mrf.mxu3  ;;  %v9135_v34 = vadd.f32 %v9134_v57, %v8966_v51  ;;  %9004 = vmatmul.bf16.gmra.mxu0 %v13259_v0  ;;  %9990 = vmatpush.bf16.msrb.mxu2 %v9453_v41 }
 0xb3a   :  { %9173 = vmatmul.bf16.gmra.mxu1 %v13263_v35  ;;  %v13295_v35 = vor.u32 %v14643_v38, %v13292_v52  ;;  %v13324_v38 = vld [vmem:[#allocation8 + $0x4b8] sm:$0xf0] }
 0xb3b   :  { %v9270_v36 = vmul.f32 0.2, %v9135_v34 }
 0xb3d   :  { %9991 = vmatpush.bf16.msrb.mxu2 %v9452_v7  ;;  %v9334_v0 = vmax.f32 %v9135_v34, %v9270_v36  ;;  %v13291_v7 = vor.u32 %v14647_v42, %v13290_v27  ;;  %v13735_v34 = vor.u32 %v14754_v44, %v13732_v9  ;;  %v14655_v27 = vld [vmem:[#allocation8 + $0x4b4] sm:$0xf0] }
 0xb3e   :  { %8905 = vmatmul.bf16.gmra.mxu3 %v13703_v55  ;;  %v8967_v47 = vpop.f32.mrf.mxu0 }
 0xb3f   :  { %v9136_v20 = vpop.f32.mrf.mxu1  ;;  %v8968_v40 = vadd.f32 %v8967_v47, %v16508_v46 }
 0xb41   :  { %v8866_v31 = vpop.f32.mrf.mxu3  ;;  %v9137_v58 = vadd.f32 %v9136_v20, %v8968_v40  ;;  %9992 = vmatpush.bf16.msrb.mxu2 %v16794_v24 }
 0xb42   :  { %v16816_v59 = vadd.f32 %v8866_v31, %v17710_v18  ;;  %v13746_v18 = vld [vmem:[#allocation9] sm:$0xf] }
 0xb43   :  { %v9271_v2 = vmul.f32 0.2, %v9137_v58 }
 0xb45   :  { %v9335_v15 = vmax.f32 %v9137_v58, %v9271_v2  ;;  %9993 = vmatpush.bf16.msrb.mxu2 %v16784_v49  ;;  %v14762_v58 = vld [vmem:[#allocation9 + $0xc] sm:$0xf0]  ;;  %v14651_v2 = vld [vmem:[#allocation8 + $0x49c] sm:$0xf] }
 0xb46   :  { %v8970_v57 = vpop.f32.mrf.mxu0 }
 0xb47   :  { %v9139_v46 = vpop.f32.mrf.mxu1  ;;  %v8971_v41 = vadd.f32 %v8970_v57, %v16525_v62  ;;  %v16821_v51 = vpack.c.bf16 %v9335_v15, %v9334_v0 }
 0xb49   :  { %v16823_v24 = vpop.f32.mrf.mxu3  ;;  %v9140_v55 = vadd.f32 %v9139_v46, %v8971_v41  ;;  %9009 = vmatmul.bf16.gmra.mxu0 %v13291_v7  ;;  %9994 = vmatpush.bf16.msrb.mxu2 %v16775_v56  ;;  %v13322_v56 = vld [vmem:[#allocation8 + $0x498] sm:$0xf] }
 0xb4a   :  { %9178 = vmatmul.bf16.gmra.mxu1 %v13295_v35 }
 0xb4b   :  { %v9272_v31 = vmul.f32 0.2, %v9140_v55 }
 0xb4d   :  { %9995 = vmatpush.bf16.msrb.mxu2 %v16759_v43  ;;  %v13747_v43 = vor.u32 %v14762_v58, %v13746_v18  ;;  %v9336_v52 = vmax.f32 %v9140_v55, %v9272_v31  ;;  %v13356_v18 = vld [vmem:[#allocation8 + $0x4f8] sm:$0xf0] }
 0xb4e   :  { %8910 = vmatmul.bf16.gmra.mxu3 %v13735_v34  ;;  %v8972_v49 = vpop.f32.mrf.mxu0 }
 0xb4f   :  { %v9141_v47 = vpop.f32.mrf.mxu1  ;;  %v8973_v20 = vadd.f32 %v8972_v49, %v16544_v39  ;;  %v13323_v39 = vor.u32 %v14655_v27, %v13322_v56 }
 0xb51   :  { %v8871_v40 = vpop.f32.mrf.mxu3  ;;  %v9142_v36 = vadd.f32 %v9141_v47, %v8973_v20  ;;  %9996 = vmatpush.bf16.msrb.mxu2 %v16737_v63  ;;  %v13762_v47 = vld [vmem:[#allocation9 + $0x20] sm:$0xf]  ;;  %v13354_v20 = vld [vmem:[#allocation8 + $0x4d8] sm:$0xf] }
 0xb52   :  { %v16829_v62 = vadd.f32 %v8871_v40, %v16396_v61  ;;  %v13327_v61 = vor.u32 %v14651_v2, %v13324_v38  ;;  %v14663_v40 = vld [vmem:[#allocation8 + $0x4f4] sm:$0xf0] }
 0xb53   :  { %v9273_v42 = vmul.f32 0.2, %v9142_v36 }
 0xb55   :  { %v9337_v0 = vmax.f32 %v9142_v36, %v9273_v42  ;;  %9997 = vmatpush.bf16.msrb.mxu2 %v16709_v1  ;;  %v14659_v36 = vld [vmem:[#allocation8 + $0x4dc] sm:$0xf]  ;;  %v13355_v42 = vor.u32 %v14663_v40, %v13354_v20 }
 0xb56   :  { %v8975_v15 = vpop.f32.mrf.mxu0 }
 0xb57   :  { %v9144_v7 = vpop.f32.mrf.mxu1  ;;  %v8976_v57 = vadd.f32 %v8975_v15, %v16561_v50  ;;  %v16834_v46 = vpack.c.bf16 %v9337_v0, %v9336_v52  ;;  %v14766_v50 = vld [vmem:[#allocation9 + $0x2c] sm:$0xf0] }
 0xb58   :  { %9998 = vmatmul.bf16.vlgmr.msrb.gmra.mxu2 %v13747_v43  ;;  %v13763_v58 = vor.u32 %v14766_v50, %v13762_v47  ;;  %v13388_v47 = vld [vmem:[#allocation8 + $0x538] sm:$0xf0] }
 0xb59   :  { %v16836_v63 = vpop.f32.mrf.mxu3  ;;  %v9145_v35 = vadd.f32 %v9144_v7, %v8976_v57  ;;  %9014 = vmatmul.bf16.gmra.mxu0 %v13323_v39 }
 0xb5a   :  { %9183 = vmatmul.bf16.gmra.mxu1 %v13327_v61 }
 0xb5b   :  { %v9274_v1 = vmul.f32 0.2, %v9145_v35 }
 0xb5d   :  { %v9338_v56 = vmax.f32 %v9145_v35, %v9274_v1 }
 0xb5e   :  { %v8977_v44 = vpop.f32.mrf.mxu0 }
 0xb5f   :  { %v9146_v9 = vpop.f32.mrf.mxu1  ;;  %v8978_v41 = vadd.f32 %v8977_v44, %v16580_v26  ;;  %v13359_v26 = vor.u32 %v14659_v36, %v13356_v18 }
 0xb61   :  { %v8876_v55 = vpop.f32.mrf.mxu3  ;;  %v9147_v49 = vadd.f32 %v9146_v9, %v8978_v41  ;;  %v13778_v9 = vld [vmem:[#allocation9 + $0x40] sm:$0xf]  ;;  %v13386_v41 = vld [vmem:[#allocation8 + $0x518] sm:$0xf] }
 0xb62   :  { %v16840_v34 = vadd.f32 %v8876_v55, %v16423_v48  ;;  %v14671_v55 = vld [vmem:[#allocation8 + $0x534] sm:$0xf0] }
 0xb63   :  { %v9275_v31 = vmul.f32 0.2, %v9147_v49 }
 0xb65   :  { %v9339_v27 = vmax.f32 %v9147_v49, %v9275_v31  ;;  %v14667_v49 = vld [vmem:[#allocation8 + $0x51c] sm:$0xf]  ;;  %v13387_v31 = vor.u32 %v14671_v55, %v13386_v41 }
 0xb66   :  { %v8980_v2 = vpop.f32.mrf.mxu0 }
 0xb67   :  { %v9149_v38 = vpop.f32.mrf.mxu1  ;;  %v8981_v43 = vadd.f32 %v8980_v2, %v16597_v17  ;;  %v16843_v52 = vpack.c.bf16 %v9339_v27, %v9338_v56  ;;  %v14770_v17 = vld [vmem:[#allocation9 + $0x4c] sm:$0xf0] }
 0xb68   :  { %10003 = vmatmul.bf16.gmra.mxu2 %v13763_v58  ;;  %v13779_v50 = vor.u32 %v14770_v17, %v13778_v9  ;;  %v13420_v9 = vld [vmem:[#allocation8 + $0x578] sm:$0xf0] }
 0xb69   :  { %v16845_v48 = vpop.f32.mrf.mxu3  ;;  %v9150_v0 = vadd.f32 %v9149_v38, %v8981_v43  ;;  %9019 = vmatmul.bf16.gmra.mxu0 %v13355_v42 }
 0xb6a   :  { %9188 = vmatmul.bf16.gmra.mxu1 %v13359_v26 }
 0xb6b   :  { %v9276_v57 = vmul.f32 0.2, %v9150_v0 }
 0xb6d   :  { %v9340_v20 = vmax.f32 %v9150_v0, %v9276_v57 }
 0xb6e   :  { %v8982_v39 = vpop.f32.mrf.mxu0 }
 0xb6f   :  { %v9151_v15 = vpop.f32.mrf.mxu1  ;;  %v8983_v7 = vadd.f32 %v8982_v39, %v16616_v54  ;;  %v13391_v54 = vor.u32 %v14667_v49, %v13388_v47 }
 0xb71   :  { %v8881_v61 = vpop.f32.mrf.mxu3  ;;  %v9152_v44 = vadd.f32 %v9151_v15, %v8983_v7  ;;  %v13794_v15 = vld [vmem:[#allocation9 + $0x60] sm:$0xf]  ;;  %v13418_v7 = vld [vmem:[#allocation8 + $0x558] sm:$0xf] }
 0xb72   :  { %v16849_v35 = vadd.f32 %v8881_v61, %v16451_v12  ;;  %v14679_v61 = vld [vmem:[#allocation8 + $0x574] sm:$0xf0] }
 0xb73   :  { %v9277_v1 = vmul.f32 0.2, %v9152_v44 }
 0xb75   :  { %v9341_v40 = vmax.f32 %v9152_v44, %v9277_v1  ;;  %v14675_v44 = vld [vmem:[#allocation8 + $0x55c] sm:$0xf]  ;;  %v13419_v1 = vor.u32 %v14679_v61, %v13418_v7 }
 0xb76   :  { %v8985_v36 = vpop.f32.mrf.mxu0 }
 0xb77   :  { %v9154_v18 = vpop.f32.mrf.mxu1  ;;  %v8986_v58 = vadd.f32 %v8985_v36, %v16633_v28  ;;  %v16852_v56 = vpack.c.bf16 %v9341_v40, %v9340_v20  ;;  %v14774_v28 = vld [vmem:[#allocation9 + $0x6c] sm:$0xf0] }
 0xb78   :  { %10008 = vmatmul.bf16.gmra.mxu2 %v13779_v50  ;;  %v13795_v17 = vor.u32 %v14774_v28, %v13794_v15  ;;  %v14683_v15 = vld [vmem:[#allocation8 + $0x59c] sm:$0xf] }
 0xb79   :  { %v16854_v12 = vpop.f32.mrf.mxu3  ;;  %v9155_v27 = vadd.f32 %v9154_v18, %v8986_v58  ;;  %9024 = vmatmul.bf16.gmra.mxu0 %v13387_v31 }
 0xb7a   :  { %9193 = vmatmul.bf16.gmra.mxu1 %v13391_v54 }
 0xb7b   :  { %v9278_v43 = vmul.f32 0.2, %v9155_v27 }
 0xb7d   :  { %v9342_v41 = vmax.f32 %v9155_v27, %v9278_v43  ;;  %v14687_v43 = vld [vmem:[#allocation8 + $0x5b4] sm:$0xf0] }
 0xb7e   :  { %v8987_v42 = vpop.f32.mrf.mxu0 }
 0xb7f   :  { %v9156_v2 = vpop.f32.mrf.mxu1  ;;  %v8988_v38 = vadd.f32 %v8987_v42, %v16652_v10  ;;  %v13423_v10 = vor.u32 %v14675_v44, %v13420_v9 }
 0xb81   :  { %v8886_v26 = vpop.f32.mrf.mxu3  ;;  %v9157_v39 = vadd.f32 %v9156_v2, %v8988_v38  ;;  %v13810_v2 = vld [vmem:[#allocation9 + $0x80] sm:$0xf]  ;;  %v14778_v38 = vld [vmem:[#allocation9 + $0x8c] sm:$0xf0] }
 0xb82   :  { %v16858_v0 = vadd.f32 %v8886_v26, %v16486_v37  ;;  %v13450_v26 = vld [vmem:[#allocation8 + $0x598] sm:$0xf]  ;;  %v13811_v28 = vor.u32 %v14778_v38, %v13810_v2  ;;  %v14691_v2 = vld [vmem:[#allocation8 + $0x5dc] sm:$0xf] }
 0xb83   :  { %v9279_v57 = vmul.f32 0.2, %v9157_v39 }
 0xb85   :  { %v9343_v55 = vmax.f32 %v9157_v39, %v9279_v57  ;;  %v13451_v57 = vor.u32 %v14687_v43, %v13450_v26 }
 0xb86   :  { %v8990_v49 = vpop.f32.mrf.mxu0 }
 0xb87   :  { %v9159_v47 = vpop.f32.mrf.mxu1  ;;  %v16860_v50 = vpack.c.bf16 %v9343_v55, %v9342_v41  ;;  %v8991_v37 = vadd.f32 %v8990_v49, %v16669_v8  ;;  %v13452_v8 = vld [vmem:[#allocation8 + $0x5b8] sm:$0xf0] }
 0xb88   :  { %10013 = vmatmul.bf16.gmra.mxu2 %v13795_v17 }
 0xb89   :  { %v16862_v20 = vpop.f32.mrf.mxu3  ;;  %9029 = vmatmul.bf16.gmra.mxu0 %v13419_v1  ;;  %v9160_v40 = vadd.f32 %v9159_v47, %v8991_v37 }
 0xb8a   :  { %9198 = vmatmul.bf16.gmra.mxu1 %v13423_v10 }
 0xb8b   :  { %v9280_v58 = vmul.f32 0.2, %v9160_v40 }
 0xb8d   :  { %v9344_v7 = vmax.f32 %v9160_v40, %v9280_v58  ;;  %v14695_v58 = vld [vmem:[#allocation8 + $0x5f4] sm:$0xf0] }
 0xb8e   :  { %v8992_v31 = vpop.f32.mrf.mxu0 }
 0xb8f   :  { %v9161_v36 = vpop.f32.mrf.mxu1  ;;  %v8993_v18 = vadd.f32 %v8992_v31, %v16684_v5  ;;  %v13455_v5 = vor.u32 %v14683_v15, %v13452_v8 }
 0xb91   :  { %v8891_v54 = vpop.f32.mrf.mxu3  ;;  %v9162_v42 = vadd.f32 %v9161_v36, %v8993_v18  ;;  %v13826_v36 = vld [vmem:[#allocation9 + $0xa0] sm:$0xf]  ;;  %v14782_v18 = vld [vmem:[#allocation9 + $0xac] sm:$0xf0] }
 0xb92   :  { %v16867_v27 = vadd.f32 %v8891_v54, %v16522_v16  ;;  %v13482_v54 = vld [vmem:[#allocation8 + $0x5d8] sm:$0xf]  ;;  %v13827_v38 = vor.u32 %v14782_v18, %v13826_v36  ;;  %v14699_v36 = vld [vmem:[#allocation8 + $0x61c] sm:$0xf] }
 0xb93   :  { %v9281_v39 = vmul.f32 0.2, %v9162_v42 }
 0xb95   :  { %v9345_v61 = vmax.f32 %v9162_v42, %v9281_v39  ;;  %v13483_v39 = vor.u32 %v14695_v58, %v13482_v54 }
 0xb96   :  { %v8995_v44 = vpop.f32.mrf.mxu0 }
 0xb97   :  { %v9164_v9 = vpop.f32.mrf.mxu1  ;;  %v16869_v17 = vpack.c.bf16 %v9345_v61, %v9344_v7  ;;  %v8996_v16 = vadd.f32 %v8995_v44, %v16697_v6  ;;  %v13484_v6 = vld [vmem:[#allocation8 + $0x5f8] sm:$0xf0] }
 0xb98   :  { %10018 = vmatmul.bf16.gmra.mxu2 %v13811_v28 }
 0xb99   :  { %v16871_v41 = vpop.f32.mrf.mxu3  ;;  %9034 = vmatmul.bf16.gmra.mxu0 %v13451_v57  ;;  %v9165_v55 = vadd.f32 %v9164_v9, %v8996_v16 }
 0xb9a   :  { %9203 = vmatmul.bf16.gmra.mxu1 %v13455_v5 }
 0xb9b   :  { %v9282_v37 = vmul.f32 0.2, %v9165_v55 }
 0xb9d   :  { %v9346_v26 = vmax.f32 %v9165_v55, %v9282_v37  ;;  %v14703_v37 = vld [vmem:[#allocation8 + $0x634] sm:$0xf0] }
 0xb9e   :  { %v8997_v1 = vpop.f32.mrf.mxu0 }
 0xb9f   :  { %v9166_v49 = vpop.f32.mrf.mxu1  ;;  %v8998_v47 = vadd.f32 %v8997_v1, %v16712_v21  ;;  %v13487_v21 = vor.u32 %v14691_v2, %v13484_v6 }
 0xba1   :  { %v8896_v10 = vpop.f32.mrf.mxu3  ;;  %v9167_v31 = vadd.f32 %v9166_v49, %v8998_v47  ;;  %v13842_v49 = vld [vmem:[#allocation9 + $0xc0] sm:$0xf]  ;;  %v14786_v47 = vld [vmem:[#allocation9 + $0xcc] sm:$0xf0] }
 0xba2   :  { %v16876_v40 = vadd.f32 %v8896_v10, %v16558_v3  ;;  %v13514_v10 = vld [vmem:[#allocation8 + $0x618] sm:$0xf]  ;;  %v13843_v18 = vor.u32 %v14786_v47, %v13842_v49  ;;  %v13548_v49 = vld [vmem:[#allocation8 + $0x678] sm:$0xf0] }
 0xba3   :  { %v9283_v42 = vmul.f32 0.2, %v9167_v31 }
 0xba5   :  { %v9347_v43 = vmax.f32 %v9167_v31, %v9283_v42  ;;  %v13515_v42 = vor.u32 %v14703_v37, %v13514_v10 }
 0xba6   :  { %v9000_v15 = vpop.f32.mrf.mxu0 }
 0xba7   :  { %v9169_v8 = vpop.f32.mrf.mxu1  ;;  %v9460_v28 = vpack.c.bf16 %v9347_v43, %v9346_v26  ;;  %v9001_v3 = vadd.f32 %v9000_v15, %v16725_v29  ;;  %v13516_v29 = vld [vmem:[#allocation8 + $0x638] sm:$0xf0] }
 0xba8   :  { %10023 = vmatmul.bf16.gmra.mxu2 %v13827_v38  ;;  %v13519_v6 = vor.u32 %v14699_v36, %v13516_v29 }
 0xba9   :  { %v16878_v7 = vpop.f32.mrf.mxu3  ;;  %9039 = vmatmul.bf16.gmra.mxu0 %v13483_v39  ;;  %v9170_v61 = vadd.f32 %v9169_v8, %v9001_v3 }
 0xbaa   :  { %9208 = vmatmul.bf16.gmra.mxu1 %v13487_v21 }
 0xbab   :  { %v9284_v16 = vmul.f32 0.2, %v9170_v61 }
 0xbad   :  { %v9348_v54 = vmax.f32 %v9170_v61, %v9284_v16 }
 0xbae   :  { %v9002_v57 = vpop.f32.mrf.mxu0 }
 0xbaf   :  { %v9171_v44 = vpop.f32.mrf.mxu1  ;;  %v9003_v9 = vadd.f32 %v9002_v57, %v16740_v19 }
 0xbb1   :  { %v8901_v5 = vpop.f32.mrf.mxu3  ;;  %v9172_v1 = vadd.f32 %v9171_v44, %v9003_v9  ;;  %v14790_v44 = vld [vmem:[#allocation9 + $0xec] sm:$0xf0]  ;;  %v13546_v9 = vld [vmem:[#allocation8 + $0x658] sm:$0xf] }
 0xbb2   :  { %v16883_v55 = vadd.f32 %v8901_v5, %v16594_v11  ;;  %v14711_v5 = vld [vmem:[#allocation8 + $0x674] sm:$0xf0] }
 0xbb3   :  { %v9285_v31 = vmul.f32 0.2, %v9172_v1 }
 0xbb5   :  { %v9349_v58 = vmax.f32 %v9172_v1, %v9285_v31  ;;  %v14707_v1 = vld [vmem:[#allocation8 + $0x65c] sm:$0xf] }
 0xbb6   :  { %v9005_v2 = vpop.f32.mrf.mxu0  ;;  %v13551_v31 = vor.u32 %v14707_v1, %v13548_v49 }
 0xbb7   :  { %v9461_v19 = vpack.c.bf16 %v9349_v58, %v9348_v54  ;;  %v9006_v38 = vadd.f32 %v9005_v2, %v16753_v53  ;;  %v9174_v26 = vpop.f32.mrf.mxu1  ;;  %v13858_v53 = vld [vmem:[#allocation9 + $0xe0] sm:$0xf] }
 0xbb8   :  { %10028 = vmatmul.bf16.gmra.mxu2 %v13843_v18  ;;  %v13874_v2 = vld [vmem:[#allocation9 + $0x100] sm:$0xf] }
 0xbb9   :  { %v16886_v11 = vpop.f32.mrf.mxu3  ;;  %v9175_v43 = vadd.f32 %v9174_v26, %v9006_v38  ;;  %9044 = vmatmul.bf16.gmra.mxu0 %v13515_v42  ;;  %10079 = vmatpush.bf16.msra.mxu3 %v9461_v19  ;;  %v14760_v26 = vld [vmem:[#allocation9 + $0x4] sm:$0xf] }
 0xbba   :  { %9213 = vmatmul.bf16.gmra.mxu1 %v13519_v6 }
 0xbbb   :  { %v9286_v3 = vmul.f32 0.2, %v9175_v43 }
 0xbbd   :  { %10080 = vmatpush.bf16.msra.mxu3 %v9460_v28  ;;  %v13859_v28 = vor.u32 %v14790_v44, %v13858_v53  ;;  %v9350_v47 = vmax.f32 %v9175_v43, %v9286_v3  ;;  %v13748_v43 = vld [vmem:[#allocation9 + $0x10] sm:$0xf0] }
 0xbbe   :  { %v9007_v39 = vpop.f32.mrf.mxu0  ;;  %v13751_v3 = vor.u32 %v14760_v26, %v13748_v43 }
 0xbbf   :  { %v9008_v15 = vadd.f32 %v9007_v39, %v16762_v32  ;;  %v9176_v8 = vpop.f32.mrf.mxu1  ;;  %v13547_v32 = vor.u32 %v14711_v5, %v13546_v9  ;;  %v14719_v39 = vld [vmem:[#allocation8 + $0x6b4] sm:$0xf0] }
 0xbc0   :  { %v17711_v5 = vld [vmem:[#allocation95_spill] sm:$0xff] }
 0xbc1   :  { %v8906_v21 = vpop.f32.mrf.mxu3  ;;  %v9177_v57 = vadd.f32 %v9176_v8, %v9008_v15  ;;  %10081 = vmatpush.bf16.msra.mxu3 %v16869_v17  ;;  %v16906_v15 = vpop.f32.mrf.mxu2  ;;  %v14715_v8 = vld [vmem:[#allocation8 + $0x69c] sm:$0xf] }
 0xbc2   :  { %v16890_v61 = vadd.f32 %v8906_v21, %v16630_v25 }
 0xbc3   :  { %v9287_v16 = vmul.f32 0.2, %v9177_v57 }
 0xbc5   :  { %v9351_v10 = vmax.f32 %v9177_v57, %v9287_v16  ;;  %10082 = vmatpush.bf16.msra.mxu3 %v16860_v50 }
 0xbc6   :  { %v9010_v37 = vpop.f32.mrf.mxu0 }
 0xbc7   :  { %v9011_v25 = vadd.f32 %v9010_v37, %v16769_v30  ;;  %v9179_v36 = vpop.f32.mrf.mxu1  ;;  %v16895_v29 = vpack.c.bf16 %v9351_v10, %v9350_v47  ;;  %v14794_v30 = vld [vmem:[#allocation9 + $0x10c] sm:$0xf0] }
 0xbc8   :  { %10033 = vmatmul.bf16.gmra.mxu2 %v13859_v28  ;;  %v13875_v21 = vor.u32 %v14794_v30, %v13874_v2  ;;  %v14798_v37 = vld [vmem:[#allocation9 + $0x12c] sm:$0xf0]  ;;  %v14723_v2 = vld [vmem:[#allocation8 + $0x6dc] sm:$0xf] }
 0xbc9   :  { %v16897_v17 = vpop.f32.mrf.mxu3  ;;  %v9180_v18 = vadd.f32 %v9179_v36, %v9011_v25  ;;  %9049 = vmatmul.bf16.gmra.mxu0 %v13547_v32  ;;  %10083 = vmatpush.bf16.msra.mxu3 %v16852_v56  ;;  %v13578_v56 = vld [vmem:[#allocation8 + $0x698] sm:$0xf]  ;;  %v14764_v36 = vld [vmem:[#allocation9 + $0x24] sm:$0xf]  ;;  %v13612_v30 = vld [vmem:[#allocation8 + $0x6f8] sm:$0xf0] }
 0xbca   :  { %9218 = vmatmul.bf16.gmra.mxu1 %v13551_v31 }
 0xbcb   :  { %v9288_v6 = vmul.f32 0.2, %v9180_v18 }
 0xbcd   :  { %10084 = vmatpush.bf16.msra.mxu3 %v16843_v52  ;;  %v9352_v57 = vmax.f32 %v9180_v18, %v9288_v6  ;;  %v13764_v18 = vld [vmem:[#allocation9 + $0x30] sm:$0xf0] }
 0xbce   :  { %v9012_v54 = vpop.f32.mrf.mxu0 }
 0xbcf   :  { %v9013_v50 = vadd.f32 %v9012_v54, %v16778_v60  ;;  %v9181_v58 = vpop.f32.mrf.mxu1  ;;  %v13580_v60 = vld [vmem:[#allocation8 + $0x6b8] sm:$0xf0]  ;;  %v13610_v54 = vld [vmem:[#allocation8 + $0x6d8] sm:$0xf] }
 0xbd0   :  { %v13583_v9 = vor.u32 %v14715_v8, %v13580_v60 }
 0xbd1   :  { %v8911_v42 = vpop.f32.mrf.mxu3  ;;  %v9182_v38 = vadd.f32 %v9181_v58, %v9013_v50  ;;  %10085 = vmatpush.bf16.msra.mxu3 %v16834_v46  ;;  %v14727_v50 = vld [vmem:[#allocation8 + $0x6f4] sm:$0xf0] }
 0xbd2   :  { %v16903_v19 = vadd.f32 %v8911_v42, %v16666_v22  ;;  %v13579_v22 = vor.u32 %v14719_v39, %v13578_v56  ;;  %v13611_v56 = vor.u32 %v14727_v50, %v13610_v54  ;;  %v13615_v39 = vor.u32 %v14723_v2, %v13612_v30 }
 0xbd3   :  { %v9289_v52 = vmul.f32 0.2, %v9182_v38 }
 0xbd5   :  { %v9353_v53 = vmax.f32 %v9182_v38, %v9289_v52  ;;  %10086 = vmatpush.bf16.msra.mxu3 %v16821_v51  ;;  %v13890_v51 = vld [vmem:[#allocation9 + $0x120] sm:$0xf]  ;;  %v13767_v38 = vor.u32 %v14764_v36, %v13764_v18 }
 0xbd6   :  { %v9015_v44 = vpop.f32.mrf.mxu0  ;;  %v13891_v6 = vor.u32 %v14798_v37, %v13890_v51  ;;  %v14731_v51 = vld [vmem:[#allocation8 + $0x71c] sm:$0xf] }
 0xbd7   :  { %v9016_v46 = vadd.f32 %v9015_v44, %v17711_v5  ;;  %v9184_v16 = vpop.f32.mrf.mxu1  ;;  %v16910_v1 = vpack.c.bf16 %v9353_v53, %v9352_v57  ;;  %v13906_v44 = vld [vmem:[#allocation9 + $0x140] sm:$0xf]  ;;  %v13644_v37 = vld [vmem:[#allocation8 + $0x738] sm:$0xf0] }
 0xbd8   :  { %10038 = vmatmul.bf16.gmra.mxu2 %v13875_v21  ;;  %10087 = vmatmul.bf16.vlgmr.msra.gmra.mxu3 %v13751_v3  ;;  %v13647_v50 = vor.u32 %v14731_v51, %v13644_v37 }
 0xbd9   :  { %v9185_v49 = vadd.f32 %v9184_v16, %v9016_v46  ;;  %9054 = vmatmul.bf16.gmra.mxu0 %v13579_v22  ;;  %v14768_v16 = vld [vmem:[#allocation9 + $0x44] sm:$0xf] }
 0xbda   :  { %9223 = vmatmul.bf16.gmra.mxu1 %v13583_v9  ;;  %v14802_v9 = vld [vmem:[#allocation9 + $0x14c] sm:$0xf0] }
 0xbdb   :  { %v16912_v28 = vpop.f32.mrf.mxu2  ;;  %v9290_v31 = vmul.f32 0.2, %v9185_v49 }
 0xbdd   :  { %v9354_v26 = vmax.f32 %v9185_v49, %v9290_v31  ;;  %v13642_v49 = vld [vmem:[#allocation8 + $0x718] sm:$0xf]  ;;  %v13907_v31 = vor.u32 %v14802_v9, %v13906_v44  ;;  %v14772_v44 = vld [vmem:[#allocation9 + $0x64] sm:$0xf]  ;;  %v13796_v9 = vld [vmem:[#allocation9 + $0x70] sm:$0xf0] }
 0xbde   :  { %v9017_v47 = vpop.f32.mrf.mxu0  ;;  %v13799_v51 = vor.u32 %v14772_v44, %v13796_v9  ;;  %v14751_v44 = vld [vmem:[#allocation8 + $0x7b4] sm:$0xf0] }
 0xbdf   :  { %v9018_v10 = vadd.f32 %v9017_v47, %v16788_v33  ;;  %v9186_v32 = vpop.f32.mrf.mxu1  ;;  %v14735_v47 = vld [vmem:[#allocation8 + $0x734] sm:$0xf0] }
 0xbe0   :  { %v13643_v54 = vor.u32 %v14735_v47, %v13642_v49  ;;  %v14739_v49 = vld [vmem:[#allocation8 + $0x75c] sm:$0xf] }
 0xbe1   :  { %v9187_v25 = vadd.f32 %v9186_v32, %v9018_v10  ;;  %v13676_v47 = vld [vmem:[#allocation8 + $0x778] sm:$0xf0] }
 0xbe3   :  { %v9291_v58 = vmul.f32 0.2, %v9187_v25  ;;  %v16915_v42 = vpop.f32.mrf.mxu2 }
 0xbe5   :  { %v9355_v43 = vmax.f32 %v9187_v25, %v9291_v58 }
 0xbe6   :  { %v9020_v33 = vpop.f32.mrf.mxu0 }
 0xbe7   :  { %v9021_v52 = vadd.f32 %v9020_v33, %v16792_v14  ;;  %v9189_v8 = vpop.f32.mrf.mxu1  ;;  %v16918_v60 = vpack.c.bf16 %v9355_v43, %v9354_v26  ;;  %v13780_v14 = vld [vmem:[#allocation9 + $0x50] sm:$0xf0]  ;;  %v17713_v26 = vld [vmem:[#allocation21_spill] sm:$0xff] }
 0xbe8   :  { %10043 = vmatmul.bf16.gmra.mxu2 %v13891_v6  ;;  %10092 = vmatmul.bf16.gmra.mxu3 %v13767_v38  ;;  %v13783_v25 = vor.u32 %v14768_v16, %v13780_v14  ;;  %v17712_v38 = vld [vmem:[#allocation73_spill] sm:$0xff]  ;;  %v17714_v33 = vld [vmem:[#allocation30_spill] sm:$0xff] }
 0xbe9   :  { %v9190_v21 = vadd.f32 %v9189_v8, %v9021_v52  ;;  %9059 = vmatmul.bf16.gmra.mxu0 %v13611_v56  ;;  %v8690_v43 = vadd.f32 %v17713_v26, %v17712_v38 }
 0xbea   :  { %9228 = vmatmul.bf16.gmra.mxu1 %v13615_v39 }
 0xbeb   :  { %v16920_v3 = vpop.f32.mrf.mxu2  ;;  %v9292_v5 = vmul.f32 0.2, %v9190_v21  ;;  %v8859_v39 = vadd.f32 %v17714_v33, %v8690_v43 }
 0xbed   :  { %v9356_v36 = vmax.f32 %v9190_v21, %v9292_v5  ;;  %v13674_v5 = vld [vmem:[#allocation8 + $0x758] sm:$0xf] }
 0xbee   :  { %v9022_v57 = vpop.f32.mrf.mxu0 }
 0xbef   :  { %v9023_v53 = vadd.f32 %v9022_v57, %v16798_v23  ;;  %v9191_v22 = vpop.f32.mrf.mxu1  ;;  %v13922_v57 = vld [vmem:[#allocation9 + $0x160] sm:$0xf] }
 0xbf1   :  { %v9192_v46 = vadd.f32 %v9191_v22, %v9023_v53 }
 0xbf3   :  { %v9293_v10 = vmul.f32 0.2, %v9192_v46  ;;  %v16923_v32 = vpop.f32.mrf.mxu2 }
 0xbf5   :  { %v9357_v18 = vmax.f32 %v9192_v46, %v9293_v10  ;;  %v14743_v46 = vld [vmem:[#allocation8 + $0x774] sm:$0xf0] }
 0xbf6   :  { %v9025_v23 = vpop.f32.mrf.mxu0 }
 0xbf7   :  { %v9026_v58 = vadd.f32 %v9025_v23, %v16802_v13  ;;  %v9194_v2 = vpop.f32.mrf.mxu1  ;;  %v16926_v30 = vpack.c.bf16 %v9357_v18, %v9356_v36  ;;  %v14806_v13 = vld [vmem:[#allocation9 + $0x16c] sm:$0xf0]  ;;  %v13679_v18 = vor.u32 %v14739_v49, %v13676_v47 }
 0xbf8   :  { %10048 = vmatmul.bf16.gmra.mxu2 %v13907_v31  ;;  %10097 = vmatmul.bf16.gmra.mxu3 %v13783_v25  ;;  %v13923_v10 = vor.u32 %v14806_v13, %v13922_v57  ;;  %v13675_v25 = vor.u32 %v14743_v46, %v13674_v5  ;;  %v14747_v46 = vld [vmem:[#allocation8 + $0x79c] sm:$0xf] }
 0xbf9   :  { %v9195_v6 = vadd.f32 %v9194_v2, %v9026_v58  ;;  %9064 = vmatmul.bf16.gmra.mxu0 %v13643_v54  ;;  %v17715_v58 = vld [vmem:[#allocation22_spill] sm:$0xff] }
 0xbfa   :  { %9233 = vmatmul.bf16.gmra.mxu1 %v13647_v50  ;;  %v17716_v2 = vld [vmem:[#allocation78_spill] sm:$0xff] }
 0xbfb   :  { %v16930_v56 = vpop.f32.mrf.mxu2  ;;  %v9294_v53 = vmul.f32 0.2, %v9195_v6  ;;  %v8695_v38 = vadd.f32 %v17716_v2, %v17715_v58 }
 0xbfd   :  { %v9358_v37 = vmax.f32 %v9195_v6, %v9294_v53  ;;  %v8864_v6 = vadd.f32 %v16812_v4, %v8695_v38  ;;  %v14776_v53 = vld [vmem:[#allocation9 + $0x84] sm:$0xf] }
 0xbfe   :  { %v9027_v52 = vpop.f32.mrf.mxu0 }
 0xbff   :  { %v9028_v8 = vadd.f32 %v9027_v52, %v8859_v39  ;;  %v9196_v21 = vpop.f32.mrf.mxu1 }
 0xc01   :  { %v9197_v22 = vadd.f32 %v9196_v21, %v9028_v8  ;;  %v13938_v8 = vld [vmem:[#allocation9 + $0x180] sm:$0xf]  ;;  %v14810_v21 = vld [vmem:[#allocation9 + $0x18c] sm:$0xf0] }
 0xc02   :  { %v13939_v49 = vor.u32 %v14810_v21, %v13938_v8  ;;  %v14814_v8 = vld [vmem:[#allocation9 + $0x1ac] sm:$0xf0] }
 0xc03   :  { %v9295_v16 = vmul.f32 0.2, %v9197_v22  ;;  %v16933_v14 = vpop.f32.mrf.mxu2 }
 0xc05   :  { %v9359_v31 = vmax.f32 %v9197_v22, %v9295_v16  ;;  %v13812_v22 = vld [vmem:[#allocation9 + $0x90] sm:$0xf0]  ;;  %v13708_v16 = vld [vmem:[#allocation8 + $0x7b8] sm:$0xf0] }
 0xc06   :  { %v9030_v36 = vpop.f32.mrf.mxu0  ;;  %v13815_v47 = vor.u32 %v14776_v53, %v13812_v22  ;;  %v13828_v53 = vld [vmem:[#allocation9 + $0xb0] sm:$0xf0]  ;;  %v14759_v22 = vld [vmem:[#allocation8 + $0x7f4] sm:$0xf0] }
 0xc07   :  { %v9199_v54 = vpop.f32.mrf.mxu1  ;;  %v16935_v23 = vpack.c.bf16 %v9359_v31, %v9358_v37  ;;  %v9031_v50 = vadd.f32 %v9030_v36, %v16809_v45  ;;  %v13706_v45 = vld [vmem:[#allocation8 + $0x798] sm:$0xf]  ;;  %v13711_v31 = vor.u32 %v14747_v46, %v13708_v16  ;;  %v13740_v46 = vld [vmem:[#allocation8 + $0x7f8] sm:$0xf0] }
 0xc08   :  { %10053 = vmatmul.bf16.gmra.mxu2 %v13923_v10  ;;  %10102 = vmatmul.bf16.gmra.mxu3 %v13799_v51  ;;  %v13707_v51 = vor.u32 %v14751_v44, %v13706_v45 }
 0xc09   :  { %9069 = vmatmul.bf16.gmra.mxu0 %v13675_v25  ;;  %v9200_v43 = vadd.f32 %v9199_v54, %v9031_v50  ;;  %v17717_v54 = vld [vmem:[#allocation23_spill] sm:$0xff]  ;;  %v17718_v50 = vld [vmem:[#allocation81_spill] sm:$0xff] }
 0xc0a   :  { %9238 = vmatmul.bf16.gmra.mxu1 %v13679_v18  ;;  %v8700_v58 = vadd.f32 %v17718_v50, %v17717_v54  ;;  %v17720_v54 = vld [vmem:[#allocation82_spill] sm:$0xff] }
 0xc0b   :  { %v16940_v26 = vpop.f32.mrf.mxu2  ;;  %v9296_v57 = vmul.f32 0.2, %v9200_v43 }
 0xc0c   :  { %v8869_v38 = vadd.f32 %v16823_v24, %v8700_v58 }
 0xc0d   :  { %v9360_v4 = vmax.f32 %v9200_v43, %v9296_v57 }
 0xc0e   :  { %v9032_v33 = vpop.f32.mrf.mxu0 }
 0xc0f   :  { %v9033_v39 = vadd.f32 %v9032_v33, %v8864_v6  ;;  %v9201_v52 = vpop.f32.mrf.mxu1 }
 0xc11   :  { %v9202_v13 = vadd.f32 %v9201_v52, %v9033_v39  ;;  %v13954_v52 = vld [vmem:[#allocation9 + $0x1a0] sm:$0xf] }
 0xc12   :  { %v13955_v16 = vor.u32 %v14814_v8, %v13954_v52  ;;  %v13970_v52 = vld [vmem:[#allocation9 + $0x1c0] sm:$0xf]  ;;  %v14818_v8 = vld [vmem:[#allocation9 + $0x1cc] sm:$0xf0] }
 0xc13   :  { %v9297_v9 = vmul.f32 0.2, %v9202_v13  ;;  %v16943_v5 = vpop.f32.mrf.mxu2 }
 0xc15   :  { %v9361_v10 = vmax.f32 %v9202_v13, %v9297_v9  ;;  %v14780_v13 = vld [vmem:[#allocation9 + $0xa4] sm:$0xf]  ;;  %v14755_v9 = vld [vmem:[#allocation8 + $0x7dc] sm:$0xf] }
 0xc16   :  { %v9035_v37 = vpop.f32.mrf.mxu0 }
 0xc17   :  { %v9204_v25 = vpop.f32.mrf.mxu1  ;;  %v16945_v36 = vpack.c.bf16 %v9361_v10, %v9360_v4  ;;  %v9036_v18 = vadd.f32 %v9035_v37, %v16816_v59  ;;  %v13738_v59 = vld [vmem:[#allocation8 + $0x7d8] sm:$0xf] }
 0xc18   :  { %10058 = vmatmul.bf16.gmra.mxu2 %v13939_v49  ;;  %10107 = vmatmul.bf16.gmra.mxu3 %v13815_v47  ;;  %v13831_v49 = vor.u32 %v14780_v13, %v13828_v53  ;;  %v13739_v4 = vor.u32 %v14759_v22, %v13738_v59  ;;  %v14784_v13 = vld [vmem:[#allocation9 + $0xc4] sm:$0xf]  ;;  %v13844_v53 = vld [vmem:[#allocation9 + $0xd0] sm:$0xf0]  ;;  %v13971_v22 = vor.u32 %v14818_v8, %v13970_v52 }
 0xc19   :  { %9074 = vmatmul.bf16.gmra.mxu0 %v13707_v51  ;;  %v9205_v6 = vadd.f32 %v9204_v25, %v9036_v18  ;;  %v13743_v51 = vor.u32 %v14755_v9, %v13740_v46  ;;  %v17719_v18 = vld [vmem:[#allocation24_spill] sm:$0xff] }
 0xc1a   :  { %9243 = vmatmul.bf16.gmra.mxu1 %v13711_v31  ;;  %v8705_v50 = vadd.f32 %v17720_v54, %v17719_v18 }
 0xc1b   :  { %v16950_v2 = vpop.f32.mrf.mxu2  ;;  %v9298_v21 = vmul.f32 0.2, %v9205_v6 }
 0xc1d   :  { %v9362_v24 = vmax.f32 %v9205_v6, %v9298_v21 }
 0xc1e   :  { %v9037_v43 = vpop.f32.mrf.mxu0 }
 0xc1f   :  { %v9038_v33 = vadd.f32 %v9037_v43, %v8869_v38  ;;  %v9206_v39 = vpop.f32.mrf.mxu1  ;;  %v8874_v38 = vadd.f32 %v16836_v63, %v8705_v50 }
 0xc21   :  { %v9207_v57 = vadd.f32 %v9206_v39, %v9038_v33 }
 0xc23   :  { %v9299_v45 = vmul.f32 0.2, %v9207_v57  ;;  %v16953_v44 = vpop.f32.mrf.mxu2 }
 0xc25   :  { %v9363_v47 = vmax.f32 %v9207_v57, %v9299_v45  ;;  %v13847_v45 = vor.u32 %v14784_v13, %v13844_v53 }
 0xc26   :  { %v9040_v10 = vpop.f32.mrf.mxu0 }
 0xc27   :  { %v9209_v37 = vpop.f32.mrf.mxu1  ;;  %v9468_v31 = vpack.c.bf16 %v9363_v47, %v9362_v24  ;;  %v9041_v25 = vadd.f32 %v9040_v10, %v16829_v62  ;;  %v17722_v10 = vld [vmem:[#allocation25_spill] sm:$0xff] }
 0xc28   :  { %10063 = vmatmul.bf16.gmra.mxu2 %v13955_v16  ;;  %10112 = vmatmul.bf16.gmra.mxu3 %v13831_v49 }
 0xc29   :  { %9079 = vmatmul.bf16.gmra.mxu0 %v13739_v4  ;;  %v9210_v6 = vadd.f32 %v9209_v37, %v9041_v25  ;;  %v17721_v4 = vld [vmem:[#allocation94_spill] sm:$0xff] }
 0xc2a   :  { %9248 = vmatmul.bf16.gmra.mxu1 %v13743_v51  ;;  %v8710_v51 = vadd.f32 %v17722_v10, %v17721_v4 }
 0xc2b   :  { %v16958_v58 = vpop.f32.mrf.mxu2  ;;  %v9300_v21 = vmul.f32 0.2, %v9210_v6 }
 0xc2c   :  { %v8879_v25 = vadd.f32 %v16845_v48, %v8710_v51  ;;  %v13754_v51 = vld [vmem:[#allocation9 + $0x8] sm:$0xf] }
 0xc2d   :  { %v9364_v9 = vmax.f32 %v9210_v6, %v9300_v21  ;;  %v14822_v6 = vld [vmem:[#allocation9 + $0x1ec] sm:$0xf0] }
 0xc2e   :  { %v9042_v43 = vpop.f32.mrf.mxu0 }
 0xc2f   :  { %v9043_v33 = vadd.f32 %v9042_v43, %v8874_v38  ;;  %v9211_v39 = vpop.f32.mrf.mxu1  ;;  %v13986_v38 = vld [vmem:[#allocation9 + $0x1e0] sm:$0xf] }
 0xc30   :  { %v13987_v21 = vor.u32 %v14822_v6, %v13986_v38 }
 0xc31   :  { %v9212_v57 = vadd.f32 %v9211_v39, %v9043_v33  ;;  %v14788_v33 = vld [vmem:[#allocation9 + $0xe4] sm:$0xf]  ;;  %v13860_v39 = vld [vmem:[#allocation9 + $0xf0] sm:$0xf0] }
 0xc33   :  { %v9301_v62 = vmul.f32 0.2, %v9212_v57  ;;  %v16961_v59 = vpop.f32.mrf.mxu2 }
 0xc35   :  { %v9365_v46 = vmax.f32 %v9212_v57, %v9301_v62  ;;  %v13863_v57 = vor.u32 %v14788_v33, %v13860_v39  ;;  %v9513_v39 = vpop.permute.xlu1 %9512 }
 0xc36   :  { %v9045_v16 = vpop.f32.mrf.mxu0 }
 0xc37   :  { %v9469_v49 = vpack.c.bf16 %v9365_v46, %v9364_v9  ;;  %v9046_v63 = vadd.f32 %v9045_v16, %v16840_v34  ;;  %v9214_v24 = vpop.f32.mrf.mxu1  ;;  %v17724_v9 = vld [vmem:[#allocation97_spill] sm:$0xff] }
 0xc38   :  { %10068 = vmatmul.bf16.gmra.mxu2 %v13971_v22  ;;  %10117 = vmatmul.bf16.gmra.mxu3 %v13847_v45  ;;  %v17723_v45 = vld [vmem:[#allocation85_spill] sm:$0xff] }
 0xc39   :  { %v9215_v47 = vadd.f32 %v9214_v24, %v9046_v63  ;;  %10168 = vmatpush.bf16.msra.mxu2 %v9469_v49  ;;  %v8715_v46 = vadd.f32 %v17724_v9, %v17723_v45  ;;  %v14792_v24 = vld [vmem:[#allocation9 + $0x104] sm:$0xf]  ;;  %v13892_v9 = vld [vmem:[#allocation9 + $0x130] sm:$0xf0] }
 0xc3a   :  { %v14796_v45 = vld [vmem:[#allocation9 + $0x124] sm:$0xf] }
 0xc3b   :  { %v16966_v37 = vpop.f32.mrf.mxu2  ;;  %v9302_v43 = vmul.f32 0.2, %v9215_v47  ;;  %v8884_v49 = vadd.f32 %v16854_v12, %v8715_v46 }
 0xc3d   :  { %10169 = vmatpush.bf16.msra.mxu2 %v9468_v31  ;;  %v9366_v13 = vmax.f32 %v9215_v47, %v9302_v43  ;;  %v13876_v47 = vld [vmem:[#allocation9 + $0x110] sm:$0xf0] }
 0xc3e   :  { %v9047_v18 = vpop.f32.mrf.mxu0 }
 0xc3f   :  { %v9048_v54 = vadd.f32 %v9047_v18, %v8879_v25  ;;  %v9216_v50 = vpop.f32.mrf.mxu1  ;;  %v16984_v25 = vpop.f32.mrf.mxu3 }
 0xc41   :  { %v9217_v34 = vadd.f32 %v9216_v50, %v9048_v54  ;;  %10170 = vmatpush.bf16.msra.mxu2 %v16945_v36  ;;  %v13879_v50 = vor.u32 %v14792_v24, %v13876_v47 }
 0xc43   :  { %v9303_v52 = vmul.f32 0.2, %v9217_v34  ;;  %v16970_v8 = vpop.f32.mrf.mxu2 }
 0xc45   :  { %v9367_v53 = vmax.f32 %v9217_v34, %v9303_v52  ;;  %10171 = vmatpush.bf16.msra.mxu2 %v16935_v23  ;;  %v10000_v52 = vadd.f32 %v16912_v28, %v9513_v39  ;;  %v9518_v28 = vpop.permute.xlu2 %9517  ;;  %v17728_v39 = vld [vmem:[#allocation27_spill] sm:$0xff] }
 0xc46   :  { %v9050_v48 = vpop.f32.mrf.mxu0 }
 0xc47   :  { %v9051_v31 = vadd.f32 %v9050_v48, %v16849_v35  ;;  %v9219_v62 = vpop.f32.mrf.mxu1  ;;  %v16974_v22 = vpack.c.bf16 %v9367_v53, %v9366_v13 }
 0xc48   :  { %10073 = vmatmul.bf16.gmra.mxu2 %v13987_v21  ;;  %10122 = vmatmul.bf16.gmra.mxu3 %v13863_v57  ;;  %v17725_v21 = vld [vmem:[#allocation26_spill] sm:$0xff] }
 0xc49   :  { %v9220_v36 = vadd.f32 %v9219_v62, %v9051_v31  ;;  %10172 = vmatpush.bf16.msra.mxu2 %v16926_v30  ;;  %v14763_v30 = vld [vmem:[#allocation9 + $0x14] sm:$0xf0] }
 0xc4a   :  { %v13755_v12 = vor.u32 %v14763_v30, %v13754_v51  ;;  %v17726_v57 = vld [vmem:[#allocation90_spill] sm:$0xff] }
 0xc4b   :  { %v16979_v16 = vpop.f32.mrf.mxu2  ;;  %v9304_v4 = vmul.f32 0.2, %v9220_v36  ;;  %v8720_v13 = vadd.f32 %v17726_v57, %v17725_v21 }
 0xc4d   :  { %10173 = vmatpush.bf16.msra.mxu2 %v16918_v60  ;;  %v9368_v38 = vmax.f32 %v9220_v36, %v9304_v4 }
 0xc4e   :  { %v9052_v23 = vpop.f32.mrf.mxu0 }
 0xc4f   :  { %v9053_v63 = vadd.f32 %v9052_v23, %v8884_v49  ;;  %v9221_v35 = vpop.f32.mrf.mxu1  ;;  %v13770_v23 = vld [vmem:[#allocation9 + $0x28] sm:$0xf] }
 0xc51   :  { %v9222_v10 = vadd.f32 %v9221_v35, %v9053_v63  ;;  %10174 = vmatpush.bf16.msra.mxu2 %v16910_v1  ;;  %v14767_v63 = vld [vmem:[#allocation9 + $0x34] sm:$0xf0]  ;;  %v10002_v35 = vadd.f32 %v16915_v42, %v9518_v28  ;;  %v9523_v42 = vpop.permute.xlu0 %9522 }
 0xc52   :  { %v13771_v51 = vor.u32 %v14767_v63, %v13770_v23 }
 0xc53   :  { %v9305_v18 = vmul.f32 0.2, %v9222_v10  ;;  %v16986_v54 = vpop.f32.mrf.mxu2 }
 0xc55   :  { %v9369_v60 = vmax.f32 %v9222_v10, %v9305_v18  ;;  %10175 = vmatpush.bf16.msra.mxu2 %v16895_v29  ;;  %v8889_v29 = vadd.f32 %v16862_v20, %v8720_v13  ;;  %v13895_v10 = vor.u32 %v14796_v45, %v13892_v9  ;;  %v13786_v9 = vld [vmem:[#allocation9 + $0x48] sm:$0xf] }
 0xc56   :  { %v9055_v6 = vpop.f32.mrf.mxu0 }
 0xc57   :  { %v9056_v43 = vadd.f32 %v9055_v6, %v16858_v0  ;;  %v9224_v34 = vpop.f32.mrf.mxu1  ;;  %v16990_v33 = vpack.c.bf16 %v9369_v60, %v9368_v38 }
 0xc58   :  { %10127 = vmatmul.bf16.gmra.mxu3 %v13879_v50  ;;  %10176 = vmatmul.bf16.vlgmr.msra.gmra.mxu2 %v13755_v12 }
 0xc59   :  { %v9225_v1 = vadd.f32 %v9224_v34, %v9056_v43  ;;  %v10005_v43 = vadd.f32 %v16920_v3, %v9523_v42  ;;  %v17727_v34 = vld [vmem:[#allocation98_spill] sm:$0xff]  ;;  %v9528_v3 = vpop.permute.xlu1 %9527  ;;  %v17729_v42 = vld [vmem:[#allocation91_spill] sm:$0xff] }
 0xc5b   :  { %v16995_v53 = vpop.f32.mrf.mxu2  ;;  %v10088_v48 = vpop.f32.mrf.mxu3  ;;  %v9306_v46 = vmul.f32 0.2, %v9225_v1 }
 0xc5c   :  { %v16997_v31 = vadd.f32 %v10088_v48, %v10000_v52  ;;  %v8725_v52 = vadd.f32 %v17728_v39, %v17727_v34 }
 0xc5d   :  { %v9370_v20 = vmax.f32 %v9225_v1, %v9306_v46  ;;  %v14771_v46 = vld [vmem:[#allocation9 + $0x54] sm:$0xf0] }
 0xc5e   :  { %v9057_v0 = vpop.f32.mrf.mxu0  ;;  %v8894_v13 = vadd.f32 %v16871_v41, %v8725_v52 }
 0xc5f   :  { %v9058_v62 = vadd.f32 %v9057_v0, %v8889_v29  ;;  %v9226_v36 = vpop.f32.mrf.mxu1  ;;  %v14800_v0 = vld [vmem:[#allocation9 + $0x144] sm:$0xf] }
 0xc61   :  { %v9227_v49 = vadd.f32 %v9226_v36, %v9058_v62  ;;  %v13908_v62 = vld [vmem:[#allocation9 + $0x150] sm:$0xf0] }
 0xc63   :  { %v9307_v24 = vmul.f32 0.2, %v9227_v49  ;;  %v17001_v47 = vpop.f32.mrf.mxu2  ;;  %v10090_v4 = vpop.f32.mrf.mxu3 }
 0xc64   :  { %v17003_v30 = vadd.f32 %v10090_v4, %v10002_v35  ;;  %v13911_v35 = vor.u32 %v14800_v0, %v13908_v62 }
 0xc65   :  { %v9371_v18 = vmax.f32 %v9227_v49, %v9307_v24  ;;  %v10007_v49 = vadd.f32 %v16923_v32, %v9528_v3  ;;  %v13787_v24 = vor.u32 %v14771_v46, %v13786_v9  ;;  %v9533_v32 = vpop.permute.xlu2 %9532 }
 0xc66   :  { %v9060_v50 = vpop.f32.mrf.mxu0 }
 0xc67   :  { %v9061_v12 = vadd.f32 %v9060_v50, %v16867_v27  ;;  %v9229_v38 = vpop.f32.mrf.mxu1  ;;  %v17006_v60 = vpack.c.bf16 %v9371_v18, %v9370_v20 }
 0xc68   :  { %10132 = vmatmul.bf16.gmra.mxu3 %v13895_v10  ;;  %10181 = vmatmul.bf16.gmra.mxu2 %v13771_v51 }
 0xc69   :  { %v9230_v6 = vadd.f32 %v9229_v38, %v9061_v12  ;;  %v10010_v38 = vadd.f32 %v16930_v56, %v9533_v32  ;;  %v14775_v56 = vld [vmem:[#allocation9 + $0x74] sm:$0xf0]  ;;  %v17731_v32 = vld [vmem:[#allocation28_spill] sm:$0xff] }
 0xc6b   :  { %v17011_v21 = vpop.f32.mrf.mxu2  ;;  %v10093_v57 = vpop.f32.mrf.mxu3  ;;  %v9308_v36 = vmul.f32 0.2, %v9230_v6 }
 0xc6c   :  { %v17013_v1 = vadd.f32 %v10093_v57, %v10005_v43  ;;  %v17730_v43 = vld [vmem:[#allocation93_spill] sm:$0xff] }
 0xc6d   :  { %v9372_v41 = vmax.f32 %v9230_v6, %v9308_v36  ;;  %v8730_v34 = vadd.f32 %v17730_v43, %v17729_v42  ;;  %v9538_v36 = vpop.permute.xlu0 %9537 }
 0xc6e   :  { %v9062_v27 = vpop.f32.mrf.mxu0  ;;  %v10012_v9 = vadd.f32 %v16933_v14, %v9538_v36  ;;  %v9548_v36 = vpop.permute.xlu2 %9547 }
 0xc6f   :  { %v9063_v48 = vadd.f32 %v9062_v27, %v8894_v13  ;;  %v9231_v29 = vpop.f32.mrf.mxu1  ;;  %v8899_v57 = vadd.f32 %v16878_v7, %v8730_v34 }
 0xc71   :  { %v9232_v45 = vadd.f32 %v9231_v29, %v9063_v48  ;;  %v14804_v48 = vld [vmem:[#allocation9 + $0x164] sm:$0xf]  ;;  %v13924_v29 = vld [vmem:[#allocation9 + $0x170] sm:$0xf0] }
 0xc73   :  { %v9309_v23 = vmul.f32 0.2, %v9232_v45  ;;  %v17017_v63 = vpop.f32.mrf.mxu2  ;;  %v10095_v28 = vpop.f32.mrf.mxu3 }
 0xc74   :  { %v17019_v4 = vadd.f32 %v10095_v28, %v10007_v49  ;;  %v13927_v28 = vor.u32 %v14804_v48, %v13924_v29  ;;  %v14808_v48 = vld [vmem:[#allocation9 + $0x184] sm:$0xf]  ;;  %v13940_v29 = vld [vmem:[#allocation9 + $0x190] sm:$0xf0] }
 0xc75   :  { %v9373_v10 = vmax.f32 %v9232_v45, %v9309_v23  ;;  %v13802_v45 = vld [vmem:[#allocation9 + $0x68] sm:$0xf] }
 0xc76   :  { %v9065_v51 = vpop.f32.mrf.mxu0  ;;  %v13803_v7 = vor.u32 %v14775_v56, %v13802_v45  ;;  %v10017_v45 = vadd.f32 %v16943_v5, %v9548_v36 }
 0xc77   :  { %v9066_v20 = vadd.f32 %v9065_v51, %v16876_v40  ;;  %v9234_v18 = vpop.f32.mrf.mxu1  ;;  %v17022_v50 = vpack.c.bf16 %v9373_v10, %v9372_v41 }
 0xc78   :  { %10137 = vmatmul.bf16.gmra.mxu3 %v13911_v35  ;;  %10186 = vmatmul.bf16.gmra.mxu2 %v13787_v24 }
 0xc79   :  { %v9235_v12 = vadd.f32 %v9234_v18, %v9066_v20  ;;  %v9543_v20 = vpop.permute.xlu1 %9542 }
 0xc7a   :  { %v10015_v14 = vadd.f32 %v16940_v26, %v9543_v20  ;;  %v14779_v26 = vld [vmem:[#allocation9 + $0x94] sm:$0xf0]  ;;  %v9553_v20 = vpop.permute.xlu0 %9552 }
 0xc7b   :  { %v17027_v39 = vpop.f32.mrf.mxu2  ;;  %v10098_v52 = vpop.f32.mrf.mxu3  ;;  %v9310_v0 = vmul.f32 0.2, %v9235_v12  ;;  %v10020_v5 = vadd.f32 %v16950_v2, %v9553_v20  ;;  %v13834_v2 = vld [vmem:[#allocation9 + $0xa8] sm:$0xf] }
 0xc7c   :  { %v17029_v6 = vadd.f32 %v10098_v52, %v10010_v38  ;;  %v17732_v38 = vld [vmem:[#allocation92_spill] sm:$0xff] }
 0xc7d   :  { %v9374_v35 = vmax.f32 %v9235_v12, %v9310_v0  ;;  %v8735_v42 = vadd.f32 %v17732_v38, %v17731_v32  ;;  %v17734_v32 = vld [vmem:[#allocation29_spill] sm:$0xff] }
 0xc7e   :  { %v9067_v40 = vpop.f32.mrf.mxu0 }
 0xc7f   :  { %v9068_v13 = vadd.f32 %v9067_v40, %v8899_v57  ;;  %v9236_v27 = vpop.f32.mrf.mxu1  ;;  %v8904_v12 = vadd.f32 %v16886_v11, %v8735_v42 }
 0xc81   :  { %v9237_v62 = vadd.f32 %v9236_v27, %v9068_v13 }
 0xc83   :  { %v9311_v46 = vmul.f32 0.2, %v9237_v62  ;;  %v17033_v3 = vpop.f32.mrf.mxu2  ;;  %v10100_v49 = vpop.f32.mrf.mxu3 }
 0xc84   :  { %v17035_v23 = vadd.f32 %v10100_v49, %v10012_v9  ;;  %v13943_v49 = vor.u32 %v14808_v48, %v13940_v29  ;;  %v14812_v29 = vld [vmem:[#allocation9 + $0x1a4] sm:$0xf] }
 0xc85   :  { %v9375_v24 = vmax.f32 %v9237_v62, %v9311_v46  ;;  %v13818_v62 = vld [vmem:[#allocation9 + $0x88] sm:$0xf] }
 0xc86   :  { %v9070_v41 = vpop.f32.mrf.mxu0 }
 0xc87   :  { %v9239_v10 = vpop.f32.mrf.mxu1  ;;  %v17037_v51 = vpack.c.bf16 %v9375_v24, %v9374_v35  ;;  %v9071_v18 = vadd.f32 %v9070_v41, %v16883_v55 }
 0xc88   :  { %10142 = vmatmul.bf16.gmra.mxu3 %v13927_v28  ;;  %10191 = vmatmul.bf16.gmra.mxu2 %v13803_v7  ;;  %v13819_v28 = vor.u32 %v14779_v26, %v13818_v62  ;;  %v14783_v26 = vld [vmem:[#allocation9 + $0xb4] sm:$0xf0] }
 0xc89   :  { %v9240_v57 = vadd.f32 %v9239_v10, %v9071_v18 }
 0xc8b   :  { %v17043_v43 = vpop.f32.mrf.mxu2  ;;  %v10103_v34 = vpop.f32.mrf.mxu3  ;;  %v9312_v0 = vmul.f32 0.2, %v9240_v57 }
 0xc8c   :  { %v17045_v52 = vadd.f32 %v10103_v34, %v10015_v14  ;;  %v17733_v14 = vld [vmem:[#allocation88_spill] sm:$0xff] }
 0xc8d   :  { %v9376_v7 = vmax.f32 %v9240_v57, %v9312_v0  ;;  %v8740_v38 = vadd.f32 %v17734_v32, %v17733_v14  ;;  %v13956_v0 = vld [vmem:[#allocation9 + $0x1b0] sm:$0xf0]  ;;  %v17735_v14 = vld [vmem:[#allocation96_spill] sm:$0xff] }
 0xc8e   :  { %v9072_v40 = vpop.f32.mrf.mxu0  ;;  %v8745_v32 = vadd.f32 %v16906_v15, %v17735_v14  ;;  %v13988_v14 = vld [vmem:[#allocation9 + $0x1f0] sm:$0xf0] }
 0xc8f   :  { %v9073_v13 = vadd.f32 %v9072_v40, %v8904_v12  ;;  %v9241_v27 = vpop.f32.mrf.mxu1  ;;  %v8909_v57 = vadd.f32 %v16897_v17, %v8740_v38  ;;  %v13959_v17 = vor.u32 %v14812_v29, %v13956_v0  ;;  %v14816_v0 = vld [vmem:[#allocation9 + $0x1c4] sm:$0xf] }
 0xc91   :  { %v9242_v55 = vadd.f32 %v9241_v27, %v9073_v13 }
 0xc93   :  { %v9313_v56 = vmul.f32 0.2, %v9242_v55  ;;  %v17049_v9 = vpop.f32.mrf.mxu2  ;;  %v10105_v46 = vpop.f32.mrf.mxu3 }
 0xc94   :  { %v17051_v11 = vadd.f32 %v10105_v46, %v10017_v45 }
 0xc95   :  { %v9377_v35 = vmax.f32 %v9242_v55, %v9313_v56  ;;  %v9558_v55 = vpop.permute.xlu1 %9557 }
 0xc96   :  { %v9075_v24 = vpop.f32.mrf.mxu0  ;;  %v10022_v36 = vadd.f32 %v16953_v44, %v9558_v55  ;;  %v13972_v55 = vld [vmem:[#allocation9 + $0x1d0] sm:$0xf0] }
 0xc97   :  { %v9244_v41 = vpop.f32.mrf.mxu1  ;;  %v17053_v10 = vpack.c.bf16 %v9377_v35, %v9376_v7  ;;  %v9076_v18 = vadd.f32 %v9075_v24, %v16890_v61 }
 0xc98   :  { %10147 = vmatmul.bf16.gmra.mxu3 %v13943_v49  ;;  %10196 = vmatmul.bf16.gmra.mxu2 %v13819_v28  ;;  %v13835_v28 = vor.u32 %v14783_v26, %v13834_v2  ;;  %v14787_v2 = vld [vmem:[#allocation9 + $0xd4] sm:$0xf0] }
 0xc99   :  { %v9245_v40 = vadd.f32 %v9244_v41, %v9076_v18 }
 0xc9b   :  { %v17059_v42 = vpop.f32.mrf.mxu2  ;;  %v10108_v34 = vpop.f32.mrf.mxu3  ;;  %v9314_v61 = vmul.f32 0.2, %v9245_v40 }
 0xc9c   :  { %v17061_v12 = vadd.f32 %v10108_v34, %v10020_v5  ;;  %v9563_v5 = vpop.permute.xlu2 %9562 }
 0xc9d   :  { %v9378_v7 = vmax.f32 %v9245_v40, %v9314_v61  ;;  %v10025_v44 = vadd.f32 %v16958_v58, %v9563_v5  ;;  %v8914_v40 = vadd.f32 %v16984_v25, %v8745_v32  ;;  %v13850_v58 = vld [vmem:[#allocation9 + $0xc8] sm:$0xf]  ;;  %v13975_v25 = vor.u32 %v14816_v0, %v13972_v55 }
 0xc9e   :  { %v9077_v13 = vpop.f32.mrf.mxu0  ;;  %v13866_v32 = vld [vmem:[#allocation9 + $0xe8] sm:$0xf] }
 0xc9f   :  { %v9078_v27 = vadd.f32 %v9077_v13, %v8909_v57  ;;  %v9246_v48 = vpop.f32.mrf.mxu1 }
 0xca1   :  { %v9247_v62 = vadd.f32 %v9246_v48, %v9078_v27 }
 0xca3   :  { %v9315_v45 = vmul.f32 0.2, %v9247_v62  ;;  %v17065_v56 = vpop.f32.mrf.mxu2  ;;  %v10110_v46 = vpop.f32.mrf.mxu3 }
 0xca4   :  { %v17067_v49 = vadd.f32 %v10110_v46, %v10022_v36 }
 0xca5   :  { %v9379_v35 = vmax.f32 %v9247_v62, %v9315_v45 }
 0xca6   :  { %v9080_v24 = vpop.f32.mrf.mxu0 }
 0xca7   :  { %v9249_v41 = vpop.f32.mrf.mxu1  ;;  %v9476_v20 = vpack.c.bf16 %v9379_v35, %v9378_v7  ;;  %v9081_v18 = vadd.f32 %v9080_v24, %v16903_v19  ;;  %v9568_v19 = vpop.permute.xlu0 %9567 }
 0xca8   :  { %10152 = vmatmul.bf16.gmra.mxu3 %v13959_v17  ;;  %10201 = vmatmul.bf16.gmra.mxu2 %v13835_v28  ;;  %v10027_v15 = vadd.f32 %v16961_v59, %v9568_v19  ;;  %v13851_v17 = vor.u32 %v14787_v2, %v13850_v58  ;;  %v9573_v24 = vpop.permute.xlu1 %9572  ;;  %v14795_v58 = vld [vmem:[#allocation9 + $0x114] sm:$0xf0]  ;;  %v13756_v2 = vld [vmem:[#allocation9 + $0x18] sm:$0xf0] }
 0xca9   :  { %v9250_v13 = vadd.f32 %v9249_v41, %v9081_v18  ;;  %v10030_v41 = vadd.f32 %v16966_v37, %v9573_v24 }
 0xcab   :  { %v17073_v38 = vpop.f32.mrf.mxu2  ;;  %v10113_v34 = vpop.f32.mrf.mxu3  ;;  %v9316_v61 = vmul.f32 0.2, %v9250_v13 }
 0xcac   :  { %v17075_v57 = vadd.f32 %v10113_v34, %v10025_v44  ;;  %v14820_v44 = vld [vmem:[#allocation9 + $0x1e4] sm:$0xf]  ;;  %v14791_v34 = vld [vmem:[#allocation9 + $0xf4] sm:$0xf0] }
 0xcad   :  { %v9380_v28 = vmax.f32 %v9250_v13, %v9316_v61  ;;  %v13867_v37 = vor.u32 %v14791_v34, %v13866_v32  ;;  %v13882_v61 = vld [vmem:[#allocation9 + $0x108] sm:$0xf] }
 0xcae   :  { %v9082_v27 = vpop.f32.mrf.mxu0 }
 0xcaf   :  { %v9083_v48 = vadd.f32 %v9082_v27, %v8914_v40  ;;  %v9251_v29 = vpop.f32.mrf.mxu1  ;;  %v9578_v40 = vpop.permute.xlu2 %9577 }
 0xcb0   :  { %v10032_v13 = vadd.f32 %v16970_v8, %v9578_v40 }
 0xcb1   :  { %v9252_v62 = vadd.f32 %v9251_v29, %v9083_v48  ;;  %v13991_v29 = vor.u32 %v14820_v44, %v13988_v14  ;;  %v13772_v44 = vld [vmem:[#allocation9 + $0x38] sm:$0xf0] }
 0xcb3   :  { %v9317_v26 = vmul.f32 0.2, %v9252_v62  ;;  %v17079_v36 = vpop.f32.mrf.mxu2  ;;  %v10115_v45 = vpop.f32.mrf.mxu3 }
 0xcb4   :  { %v17081_v46 = vadd.f32 %v10115_v45, %v10027_v15  ;;  %v13883_v45 = vor.u32 %v14795_v58, %v13882_v61  ;;  %v14803_v61 = vld [vmem:[#allocation9 + $0x154] sm:$0xf0] }
 0xcb5   :  { %v9381_v7 = vmax.f32 %v9252_v62, %v9317_v26  ;;  %v9588_v62 = vpop.permute.xlu1 %9587 }
 0xcb6   :  { %v10037_v15 = vadd.f32 %v16986_v54, %v9588_v62  ;;  %v14769_v62 = vld [vmem:[#allocation9 + $0x4c] sm:$0xf] }
 0xcb7   :  { %v9477_v35 = vpack.c.bf16 %v9381_v7, %v9380_v28 }
 0xcb8   :  { %10157 = vmatmul.bf16.gmra.mxu3 %v13975_v25  ;;  %10206 = vmatmul.bf16.gmra.mxu2 %v13851_v17 }
 0xcb9   :  { %10257 = vmatpush.bf16.msrb.mxu3 %v9477_v35  ;;  %v13898_v35 = vld [vmem:[#allocation9 + $0x128] sm:$0xf] }
 0xcbb   :  { %v17084_v18 = vpop.f32.mrf.mxu2  ;;  %v10118_v59 = vpop.f32.mrf.mxu3 }
 0xcbc   :  { %v17086_v5 = vadd.f32 %v10118_v59, %v10030_v41  ;;  %v14799_v41 = vld [vmem:[#allocation9 + $0x134] sm:$0xf0]  ;;  %v14765_v59 = vld [vmem:[#allocation9 + $0x2c] sm:$0xf] }
 0xcbd   :  { %10258 = vmatpush.bf16.msrb.mxu3 %v9476_v20  ;;  %v9583_v20 = vpop.permute.xlu0 %9582  ;;  %v13899_v40 = vor.u32 %v14799_v41, %v13898_v35  ;;  %v14773_v41 = vld [vmem:[#allocation9 + $0x6c] sm:$0xf] }
 0xcc1   :  { %10259 = vmatpush.bf16.msrb.mxu3 %v17053_v10  ;;  %v10035_v10 = vadd.f32 %v16979_v16, %v9583_v20 }
 0xcc3   :  { %v17090_v27 = vpop.f32.mrf.mxu2  ;;  %v10120_v48 = vpop.f32.mrf.mxu3 }
 0xcc4   :  { %v17092_v0 = vadd.f32 %v10120_v48, %v10032_v13  ;;  %v13775_v13 = vor.u32 %v14765_v59, %v13772_v44 }
 0xcc5   :  { %10260 = vmatpush.bf16.msrb.mxu3 %v17037_v51  ;;  %v14761_v51 = vld [vmem:[#allocation9 + $0xc] sm:$0xf]  ;;  %v9598_v24 = vpop.permute.xlu0 %9597 }
 0xcc6   :  { %v13759_v25 = vor.u32 %v14761_v51, %v13756_v2  ;;  %v10042_v14 = vadd.f32 %v17001_v47, %v9598_v24  ;;  %v14807_v24 = vld [vmem:[#allocation9 + $0x174] sm:$0xf0] }
 0xcc8   :  { %10162 = vmatmul.bf16.gmra.mxu3 %v13991_v29  ;;  %10211 = vmatmul.bf16.gmra.mxu2 %v13867_v37 }
 0xcc9   :  { %10261 = vmatpush.bf16.msrb.mxu3 %v17022_v50 }
 0xccb   :  { %v17097_v55 = vpop.f32.mrf.mxu2  ;;  %v10123_v19 = vpop.f32.mrf.mxu3 }
 0xccc   :  { %v17099_v8 = vadd.f32 %v10123_v19, %v10035_v10  ;;  %v13914_v10 = vld [vmem:[#allocation9 + $0x148] sm:$0xf] }
 0xccd   :  { %10262 = vmatpush.bf16.msrb.mxu3 %v17006_v60  ;;  %v9593_v60 = vpop.permute.xlu2 %9592 }
 0xcce   :  { %v10040_v17 = vadd.f32 %v16995_v53, %v9593_v60 }
 0xcd1   :  { %10263 = vmatpush.bf16.msrb.mxu3 %v16990_v33 }
 0xcd3   :  { %v17104_v26 = vpop.f32.mrf.mxu2  ;;  %v10125_v50 = vpop.f32.mrf.mxu3 }
 0xcd4   :  { %v17106_v16 = vadd.f32 %v10125_v50, %v10037_v15  ;;  %v13915_v50 = vor.u32 %v14803_v61, %v13914_v10  ;;  %v14777_v61 = vld [vmem:[#allocation9 + $0x8c] sm:$0xf] }
 0xcd5   :  { %10264 = vmatpush.bf16.msrb.mxu3 %v16974_v22  ;;  %v9608_v19 = vpop.permute.xlu2 %9607 }
 0xcd6   :  { %v10047_v58 = vadd.f32 %v17017_v63, %v9608_v19  ;;  %v14811_v19 = vld [vmem:[#allocation9 + $0x194] sm:$0xf0] }
 0xcd8   :  { %10216 = vmatmul.bf16.gmra.mxu2 %v13883_v45  ;;  %10265 = vmatmul.bf16.vlgmr.msrb.gmra.mxu3 %v13759_v25 }
 0xcdb   :  { %v10128_v33 = vpop.f32.mrf.mxu3  ;;  %v10177_v28 = vpop.f32.mrf.mxu2 }
 0xcdc   :  { %v17111_v7 = vadd.f32 %v10177_v28, %v16997_v31  ;;  %v17113_v54 = vadd.f32 %v10128_v33, %v10040_v17  ;;  %v9603_v31 = vpop.permute.xlu1 %9602  ;;  %v13930_v28 = vld [vmem:[#allocation9 + $0x168] sm:$0xf] }
 0xcdd   :  { %v10045_v48 = vadd.f32 %v17011_v21, %v9603_v31 }
 0xce3   :  { %v10130_v22 = vpop.f32.mrf.mxu3  ;;  %v10179_v32 = vpop.f32.mrf.mxu2 }
 0xce4   :  { %v17116_v34 = vadd.f32 %v10130_v22, %v10042_v14  ;;  %v17119_v53 = vadd.f32 %v10179_v32, %v17003_v30  ;;  %v13788_v30 = vld [vmem:[#allocation9 + $0x58] sm:$0xf0]  ;;  %v9618_v35 = vpop.permute.xlu1 %9617  ;;  %v13931_v32 = vor.u32 %v14807_v24, %v13930_v28  ;;  %v14781_v24 = vld [vmem:[#allocation9 + $0xac] sm:$0xf] }
 0xce5   :  { %v13791_v45 = vor.u32 %v14769_v62, %v13788_v30  ;;  %v10052_v59 = vadd.f32 %v17033_v3, %v9618_v35  ;;  %v14815_v35 = vld [vmem:[#allocation9 + $0x1b4] sm:$0xf0] }
 0xce8   :  { %10221 = vmatmul.bf16.gmra.mxu2 %v13899_v40  ;;  %10270 = vmatmul.bf16.gmra.mxu3 %v13775_v13 }
 0xceb   :  { %v10133_v29 = vpop.f32.mrf.mxu3  ;;  %v10182_v37 = vpop.f32.mrf.mxu2 }
 0xcec   :  { %v17122_v20 = vadd.f32 %v10133_v29, %v10045_v48  ;;  %v17125_v47 = vadd.f32 %v10182_v37, %v17013_v1  ;;  %v9613_v1 = vpop.permute.xlu0 %9612  ;;  %v13946_v37 = vld [vmem:[#allocation9 + $0x188] sm:$0xf] }
 0xced   :  { %v10050_v25 = vadd.f32 %v17027_v39, %v9613_v1 }
 0xcf3   :  { %v10135_v51 = vpop.f32.mrf.mxu3  ;;  %v10184_v2 = vpop.f32.mrf.mxu2 }
 0xcf4   :  { %v17128_v15 = vadd.f32 %v10135_v51, %v10047_v58  ;;  %v17131_v21 = vadd.f32 %v10184_v2, %v17019_v4  ;;  %v13804_v4 = vld [vmem:[#allocation9 + $0x78] sm:$0xf0]  ;;  %v9628_v10 = vpop.permute.xlu0 %9627  ;;  %v13947_v2 = vor.u32 %v14811_v19, %v13946_v37  ;;  %v14785_v19 = vld [vmem:[#allocation9 + $0xcc] sm:$0xf] }
 0xcf5   :  { %v13807_v40 = vor.u32 %v14773_v41, %v13804_v4  ;;  %v10057_v62 = vadd.f32 %v17049_v9, %v9628_v10  ;;  %v14819_v10 = vld [vmem:[#allocation9 + $0x1d4] sm:$0xf0] }
 0xcf8   :  { %10226 = vmatmul.bf16.gmra.mxu2 %v13915_v50  ;;  %10275 = vmatmul.bf16.gmra.mxu3 %v13791_v45 }
 0xcfb   :  { %v10138_v60 = vpop.f32.mrf.mxu3  ;;  %v10187_v17 = vpop.f32.mrf.mxu2 }
 0xcfc   :  { %v17134_v33 = vadd.f32 %v10138_v60, %v10050_v25  ;;  %v17137_v63 = vadd.f32 %v10187_v17, %v17029_v6  ;;  %v9623_v6 = vpop.permute.xlu2 %9622  ;;  %v13962_v17 = vld [vmem:[#allocation9 + $0x1a8] sm:$0xf] }
 0xcfd   :  { %v10055_v13 = vadd.f32 %v17043_v43, %v9623_v6 }
 0xd03   :  { %v10140_v44 = vpop.f32.mrf.mxu3  ;;  %v10189_v14 = vpop.f32.mrf.mxu2 }
 0xd04   :  { %v17140_v22 = vadd.f32 %v10140_v44, %v10052_v59  ;;  %v17143_v39 = vadd.f32 %v10189_v14, %v17035_v23  ;;  %v13820_v23 = vld [vmem:[#allocation9 + $0x98] sm:$0xf0]  ;;  %v9638_v28 = vpop.permute.xlu2 %9637  ;;  %v13963_v14 = vor.u32 %v14815_v35, %v13962_v17  ;;  %v14789_v35 = vld [vmem:[#allocation9 + $0xec] sm:$0xf] }
 0xd05   :  { %v13823_v50 = vor.u32 %v14777_v61, %v13820_v23  ;;  %v10062_v41 = vadd.f32 %v17065_v56, %v9638_v28  ;;  %v14823_v28 = vld [vmem:[#allocation9 + $0x1f4] sm:$0xf0] }
 0xd08   :  { %10231 = vmatmul.bf16.gmra.mxu2 %v13931_v32  ;;  %10280 = vmatmul.bf16.gmra.mxu3 %v13807_v40 }
 0xd0b   :  { %v10143_v31 = vpop.f32.mrf.mxu3  ;;  %v10192_v48 = vpop.f32.mrf.mxu2 }
 0xd0c   :  { %v17146_v29 = vadd.f32 %v10143_v31, %v10055_v13  ;;  %v17149_v3 = vadd.f32 %v10192_v48, %v17045_v52  ;;  %v9633_v52 = vpop.permute.xlu1 %9632  ;;  %v13978_v48 = vld [vmem:[#allocation9 + $0x1c8] sm:$0xf] }
 0xd0d   :  { %v10060_v45 = vadd.f32 %v17059_v42, %v9633_v52 }
 0xd13   :  { %v10145_v30 = vpop.f32.mrf.mxu3  ;;  %v10194_v58 = vpop.f32.mrf.mxu2 }
 0xd14   :  { %v17152_v51 = vadd.f32 %v10145_v30, %v10057_v62  ;;  %v17155_v43 = vadd.f32 %v10194_v58, %v17051_v11  ;;  %v13836_v11 = vld [vmem:[#allocation9 + $0xb8] sm:$0xf0]  ;;  %v9648_v37 = vpop.permute.xlu1 %9647  ;;  %v13979_v58 = vor.u32 %v14819_v10, %v13978_v48  ;;  %v14793_v48 = vld [vmem:[#allocation9 + $0x10c] sm:$0xf] }
 0xd15   :  { %v13839_v32 = vor.u32 %v14781_v24, %v13836_v11  ;;  %v10067_v61 = vadd.f32 %v17079_v36, %v9648_v37  ;;  %v13884_v37 = vld [vmem:[#allocation9 + $0x118] sm:$0xf0] }
 0xd18   :  { %10236 = vmatmul.bf16.gmra.mxu2 %v13947_v2  ;;  %10285 = vmatmul.bf16.gmra.mxu3 %v13823_v50 }
 0xd1b   :  { %v10148_v1 = vpop.f32.mrf.mxu3  ;;  %v10197_v25 = vpop.f32.mrf.mxu2 }
 0xd1c   :  { %v17158_v60 = vadd.f32 %v10148_v1, %v10060_v45  ;;  %v17161_v9 = vadd.f32 %v10197_v25, %v17061_v12  ;;  %v9643_v12 = vpop.permute.xlu0 %9642  ;;  %v13994_v25 = vld [vmem:[#allocation9 + $0x1e8] sm:$0xf] }
 0xd1d   :  { %v10065_v40 = vadd.f32 %v17073_v38, %v9643_v12 }
 0xd23   :  { %v10150_v4 = vpop.f32.mrf.mxu3  ;;  %v10199_v59 = vpop.f32.mrf.mxu2 }
 0xd24   :  { %v17164_v44 = vadd.f32 %v10150_v4, %v10062_v41  ;;  %v17167_v42 = vadd.f32 %v10199_v59, %v17067_v49  ;;  %v13852_v49 = vld [vmem:[#allocation9 + $0xd8] sm:$0xf0]  ;;  %v9658_v17 = vpop.permute.xlu0 %9657  ;;  %v13995_v59 = vor.u32 %v14823_v28, %v13994_v25 }
 0xd25   :  { %v13855_v2 = vor.u32 %v14785_v19, %v13852_v49  ;;  %v10072_v24 = vadd.f32 %v17090_v27, %v9658_v17 }
 0xd28   :  { %10241 = vmatmul.bf16.gmra.mxu2 %v13963_v14  ;;  %10290 = vmatmul.bf16.gmra.mxu3 %v13839_v32 }
 0xd2b   :  { %v10153_v6 = vpop.f32.mrf.mxu3  ;;  %v10202_v13 = vpop.f32.mrf.mxu2 }
 0xd2c   :  { %v17170_v31 = vadd.f32 %v10153_v6, %v10065_v40  ;;  %v17173_v56 = vadd.f32 %v10202_v13, %v17075_v57  ;;  %v9653_v57 = vpop.permute.xlu2 %9652 }
 0xd2d   :  { %v10070_v50 = vadd.f32 %v17084_v18, %v9653_v57  ;;  %v13900_v57 = vld [vmem:[#allocation9 + $0x138] sm:$0xf0] }
 0xd33   :  { %v10155_v23 = vpop.f32.mrf.mxu3  ;;  %v10204_v62 = vpop.f32.mrf.mxu2 }
 0xd34   :  { %v17176_v30 = vadd.f32 %v10155_v23, %v10067_v61  ;;  %v17179_v38 = vadd.f32 %v10204_v62, %v17081_v46  ;;  %v13868_v46 = vld [vmem:[#allocation9 + $0xf8] sm:$0xf0]  ;;  %v9668_v13 = vpop.permute.xlu2 %9667 }
 0xd35   :  { %v13871_v14 = vor.u32 %v14789_v35, %v13868_v46  ;;  %v10445_v46 = vpop.permute.xlu0 %10444 }
 0xd38   :  { %10246 = vmatmul.bf16.gmra.mxu2 %v13979_v58  ;;  %10295 = vmatmul.bf16.gmra.mxu3 %v13855_v2  ;;  %v14797_v2 = vld [vmem:[#allocation9 + $0x12c] sm:$0xf] }
 0xd39   :  { %v13903_v25 = vor.u32 %v14797_v2, %v13900_v57 }
 0xd3b   :  { %v10158_v52 = vpop.f32.mrf.mxu3  ;;  %v10207_v45 = vpop.f32.mrf.mxu2 }
 0xd3c   :  { %v17182_v1 = vadd.f32 %v10158_v52, %v10070_v50  ;;  %v17185_v36 = vadd.f32 %v10207_v45, %v17086_v5  ;;  %v9663_v5 = vpop.permute.xlu1 %9662 }
 0xd3d   :  { %v10075_v32 = vadd.f32 %v17097_v55, %v9663_v5  ;;  %v13887_v55 = vor.u32 %v14793_v48, %v13884_v37 }
 0xd43   :  { %v10160_v11 = vpop.f32.mrf.mxu3  ;;  %v10209_v41 = vpop.f32.mrf.mxu2 }
 0xd44   :  { %v17188_v4 = vadd.f32 %v10160_v11, %v10072_v24  ;;  %v17191_v18 = vadd.f32 %v10209_v41, %v17092_v0  ;;  %v10077_v0 = vadd.f32 %v17104_v26, %v9668_v13 }
 0xd48   :  { %10251 = vmatmul.bf16.gmra.mxu2 %v13995_v59  ;;  %10300 = vmatmul.bf16.gmra.mxu3 %v13871_v14 }
 0xd4b   :  { %v10163_v12 = vpop.f32.mrf.mxu3  ;;  %v10212_v40 = vpop.f32.mrf.mxu2 }
 0xd4c   :  { %v17194_v6 = vadd.f32 %v10163_v12, %v10075_v32  ;;  %v17197_v27 = vadd.f32 %v10212_v40, %v17099_v8  ;;  %v14801_v12 = vld [vmem:[#allocation9 + $0x14c] sm:$0xf]  ;;  %v13916_v40 = vld [vmem:[#allocation9 + $0x158] sm:$0xf0] }
 0xd53   :  { %v10165_v10 = vpop.f32.mrf.mxu3  ;;  %v10214_v19 = vpop.f32.mrf.mxu2 }
 0xd54   :  { %v17200_v49 = vadd.f32 %v10165_v10, %v10077_v0  ;;  %v17203_v61 = vadd.f32 %v10214_v19, %v17106_v16 }
 0xd58   :  { %10305 = vmatmul.bf16.gmra.mxu3 %v13887_v55  ;;  %v13919_v55 = vor.u32 %v14801_v12, %v13916_v40  ;;  %v13948_v12 = vld [vmem:[#allocation9 + $0x198] sm:$0xf0] }
 0xd5b   :  { %v10217_v23 = vpop.f32.mrf.mxu2  ;;  %v10266_v62 = vpop.f32.mrf.mxu3 }
 0xd5c   :  { %v17206_v58 = vadd.f32 %v10217_v23, %v17113_v54  ;;  %v10267_v8 = vadd.f32 %v10266_v62, %v17111_v7  ;;  %v10450_v54 = vpop.permute.xlu1 %10449  ;;  %v10460_v62 = vpop.permute.xlu0 %10459 }
 0xd5e   :  { %v10346_v50 = vmul.f32 0.2, %v10267_v8 }
 0xd60   :  { %v10378_v17 = vmax.f32 %v10267_v8, %v10346_v50 }
 0xd62   :  { %v10602_v24 = vmul.f32 %v10445_v46, %v10378_v17  ;;  %v13932_v17 = vld [vmem:[#allocation9 + $0x178] sm:$0xf0] }
 0xd63   :  { %v10219_v26 = vpop.f32.mrf.mxu2  ;;  %v10268_v52 = vpop.f32.mrf.mxu3 }
 0xd64   :  { %v17210_v45 = vadd.f32 %v10219_v26, %v17116_v34  ;;  %v10269_v16 = vadd.f32 %v10268_v52, %v17119_v53  ;;  %v10455_v53 = vpop.permute.xlu2 %10454 }
 0xd66   :  { %v10347_v28 = vmul.f32 0.2, %v10269_v16 }
 0xd68   :  { %v10379_v35 = vmax.f32 %v10269_v16, %v10347_v28  ;;  %10310 = vmatmul.bf16.gmra.mxu3 %v13903_v25  ;;  %v14805_v25 = vld [vmem:[#allocation9 + $0x16c] sm:$0xf] }
 0xd6a   :  { %v10603_v11 = vmul.f32 %v10450_v54, %v10379_v35  ;;  %v13935_v54 = vor.u32 %v14805_v25, %v13932_v17 }
 0xd6b   :  { %v10222_v7 = vpop.f32.mrf.mxu2  ;;  %v10271_v41 = vpop.f32.mrf.mxu3 }
 0xd6c   :  { %v10634_v59 = vadd.f32 %v10603_v11, %v10602_v24  ;;  %v17214_v14 = vadd.f32 %v10222_v7, %v17122_v20  ;;  %v10272_v34 = vadd.f32 %v10271_v41, %v17125_v47  ;;  %v10470_v7 = vpop.permute.xlu2 %10469 }
 0xd6e   :  { %v10348_v5 = vmul.f32 0.2, %v10272_v34 }
 0xd70   :  { %v10380_v32 = vmax.f32 %v10272_v34, %v10348_v5 }
 0xd72   :  { %v10604_v13 = vmul.f32 %v10455_v53, %v10380_v32  ;;  %v10475_v32 = vpop.permute.xlu0 %10474  ;;  %v14809_v53 = vld [vmem:[#allocation9 + $0x18c] sm:$0xf] }
 0xd73   :  { %v10224_v48 = vpop.f32.mrf.mxu2  ;;  %v10273_v37 = vpop.f32.mrf.mxu3 }
 0xd74   :  { %v10635_v0 = vadd.f32 %v10634_v59, %v10604_v13  ;;  %v17218_v10 = vadd.f32 %v10224_v48, %v17128_v15  ;;  %v10274_v19 = vadd.f32 %v10273_v37, %v17131_v21  ;;  %v10465_v15 = vpop.permute.xlu1 %10464  ;;  %v13951_v37 = vor.u32 %v14809_v53, %v13948_v12 }
 0xd76   :  { %v10349_v23 = vmul.f32 0.2, %v10274_v19 }
 0xd78   :  { %v10381_v20 = vmax.f32 %v10274_v19, %v10349_v23  ;;  %10315 = vmatmul.bf16.gmra.mxu3 %v13919_v55 }
 0xd7a   :  { %v10605_v47 = vmul.f32 %v10460_v62, %v10381_v20 }
 0xd7b   :  { %v10227_v8 = vpop.f32.mrf.mxu2  ;;  %v10276_v2 = vpop.f32.mrf.mxu3 }
 0xd7c   :  { %v10636_v57 = vadd.f32 %v10635_v0, %v10605_v47  ;;  %v17222_v50 = vadd.f32 %v10227_v8, %v17134_v33  ;;  %v10277_v26 = vadd.f32 %v10276_v2, %v17137_v63  ;;  %v10480_v55 = vpop.permute.xlu1 %10479  ;;  %v10485_v2 = vpop.permute.xlu2 %10484 }
 0xd7e   :  { %v10350_v52 = vmul.f32 0.2, %v10277_v26 }
 0xd80   :  { %v10382_v16 = vmax.f32 %v10277_v26, %v10350_v52  ;;  %v13964_v26 = vld [vmem:[#allocation9 + $0x1b8] sm:$0xf0] }
 0xd82   :  { %v10606_v21 = vmul.f32 %v10465_v15, %v10382_v16 }
 0xd83   :  { %v10278_v28 = vpop.f32.mrf.mxu3 }
 0xd84   :  { %v10637_v35 = vadd.f32 %v10636_v57, %v10606_v21  ;;  %v10279_v46 = vadd.f32 %v10278_v28, %v17143_v39  ;;  %v14813_v57 = vld [vmem:[#allocation9 + $0x1ac] sm:$0xf]  ;;  %v10490_v28 = vpop.permute.xlu0 %10489  ;;  %v10500_v12 = vpop.permute.xlu2 %10499 }
 0xd85   :  { %v13967_v25 = vor.u32 %v14813_v57, %v13964_v26 }
 0xd86   :  { %v10351_v24 = vmul.f32 0.2, %v10279_v46 }
 0xd88   :  { %v10383_v11 = vmax.f32 %v10279_v46, %v10351_v24  ;;  %10320 = vmatmul.bf16.gmra.mxu3 %v13935_v54 }
 0xd8a   :  { %v10607_v41 = vmul.f32 %v10470_v7, %v10383_v11  ;;  %v10495_v7 = vpop.permute.xlu1 %10494 }
 0xd8b   :  { %v10281_v33 = vpop.f32.mrf.mxu3 }
 0xd8c   :  { %v10638_v59 = vadd.f32 %v10637_v35, %v10607_v41  ;;  %v10282_v63 = vadd.f32 %v10281_v33, %v17149_v3  ;;  %v14817_v41 = vld [vmem:[#allocation9 + $0x1cc] sm:$0xf]  ;;  %v13980_v33 = vld [vmem:[#allocation9 + $0x1d8] sm:$0xf0] }
 0xd8e   :  { %v10352_v34 = vmul.f32 0.2, %v10282_v63 }
 0xd90   :  { %v10384_v5 = vmax.f32 %v10282_v63, %v10352_v34 }
 0xd92   :  { %v10608_v40 = vmul.f32 %v10475_v32, %v10384_v5  ;;  %v13983_v5 = vor.u32 %v14817_v41, %v13980_v33 }
 0xd93   :  { %v10283_v13 = vpop.f32.mrf.mxu3 }
 0xd94   :  { %v10639_v48 = vadd.f32 %v10638_v59, %v10608_v40  ;;  %v10284_v39 = vadd.f32 %v10283_v13, %v17155_v43 }
 0xd96   :  { %v10353_v0 = vmul.f32 0.2, %v10284_v39 }
 0xd98   :  { %v10385_v19 = vmax.f32 %v10284_v39, %v10353_v0  ;;  %10325 = vmatmul.bf16.gmra.mxu3 %v13951_v37  ;;  %v10505_v0 = vpop.permute.xlu0 %10504 }
 0xd9a   :  { %v10609_v23 = vmul.f32 %v10480_v55, %v10385_v19  ;;  %v14821_v19 = vld [vmem:[#allocation9 + $0x1ec] sm:$0xf]  ;;  %v13996_v55 = vld [vmem:[#allocation9 + $0x1f8] sm:$0xf0] }
 0xd9b   :  { %v10286_v20 = vpop.f32.mrf.mxu3 }
 0xd9c   :  { %v10640_v62 = vadd.f32 %v10639_v48, %v10609_v23  ;;  %v10287_v3 = vadd.f32 %v10286_v20, %v17161_v9 }
 0xd9e   :  { %v10354_v47 = vmul.f32 0.2, %v10287_v3 }
 0xda0   :  { %v10386_v8 = vmax.f32 %v10287_v3, %v10354_v47  ;;  %v13999_v3 = vor.u32 %v14821_v19, %v13996_v55 }
 0xda2   :  { %v10610_v52 = vmul.f32 %v10485_v2, %v10386_v8  ;;  %v10510_v2 = vpop.permute.xlu1 %10509 }
 0xda3   :  { %v10288_v16 = vpop.f32.mrf.mxu3 }
 0xda4   :  { %v10641_v15 = vadd.f32 %v10640_v62, %v10610_v52  ;;  %v10289_v43 = vadd.f32 %v10288_v16, %v17167_v42 }
 0xda6   :  { %v10355_v17 = vmul.f32 0.2, %v10289_v43 }
 0xda8   :  { %v10387_v21 = vmax.f32 %v10289_v43, %v10355_v17  ;;  %10330 = vmatmul.bf16.gmra.mxu3 %v13967_v25  ;;  %v10515_v43 = vpop.permute.xlu2 %10514 }
 0xdaa   :  { %v10611_v35 = vmul.f32 %v10490_v28, %v10387_v21  ;;  %v10525_v33 = vpop.permute.xlu1 %10524 }
 0xdab   :  { %v10291_v46 = vpop.f32.mrf.mxu3 }
 0xdac   :  { %v10642_v54 = vadd.f32 %v10641_v15, %v10611_v35  ;;  %v10292_v9 = vadd.f32 %v10291_v46, %v17173_v56  ;;  %v10520_v46 = vpop.permute.xlu0 %10519 }
 0xdae   :  { %v10356_v24 = vmul.f32 0.2, %v10292_v9 }
 0xdb0   :  { %v10388_v11 = vmax.f32 %v10292_v9, %v10356_v24 }
 0xdb2   :  { %v10612_v59 = vmul.f32 %v10495_v7, %v10388_v11 }
 0xdb3   :  { %v10293_v63 = vpop.f32.mrf.mxu3 }
 0xdb4   :  { %v10643_v34 = vadd.f32 %v10642_v54, %v10612_v59  ;;  %v10294_v42 = vadd.f32 %v10293_v63, %v17179_v38 }
 0xdb6   :  { %v10357_v32 = vmul.f32 0.2, %v10294_v42 }
 0xdb8   :  { %v10389_v53 = vmax.f32 %v10294_v42, %v10357_v32  ;;  %10335 = vmatmul.bf16.gmra.mxu3 %v13983_v5  ;;  %v10530_v32 = vpop.permute.xlu2 %10529 }
 0xdba   :  { %v10613_v40 = vmul.f32 %v10500_v12, %v10389_v53  ;;  %v10229_v53 = vpop.f32.mrf.mxu2 }
 0xdbb   :  { %v10296_v13 = vpop.f32.mrf.mxu3 }
 0xdbc   :  { %v10644_v48 = vadd.f32 %v10643_v34, %v10613_v40  ;;  %v10297_v56 = vadd.f32 %v10296_v13, %v17185_v36 }
 0xdbe   :  { %v10358_v39 = vmul.f32 0.2, %v10297_v56 }
 0xdc0   :  { %v10390_v37 = vmax.f32 %v10297_v56, %v10358_v39 }
 0xdc2   :  { %v10614_v23 = vmul.f32 %v10505_v0, %v10390_v37  ;;  %v10232_v55 = vpop.f32.mrf.mxu2 }
 0xdc3   :  { %v10298_v20 = vpop.f32.mrf.mxu3 }
 0xdc4   :  { %v10645_v62 = vadd.f32 %v10644_v48, %v10614_v23  ;;  %v10299_v38 = vadd.f32 %v10298_v20, %v17191_v18  ;;  %v10540_v20 = vpop.permute.xlu1 %10539 }
 0xdc6   :  { %v10359_v47 = vmul.f32 0.2, %v10299_v38 }
 0xdc8   :  { %v10391_v8 = vmax.f32 %v10299_v38, %v10359_v47  ;;  %10340 = vmatmul.bf16.gmra.mxu3 %v13999_v3 }
 0xdca   :  { %v10615_v57 = vmul.f32 %v10510_v2, %v10391_v8  ;;  %v10234_v2 = vpop.f32.mrf.mxu2 }
 0xdcb   :  { %v10301_v26 = vpop.f32.mrf.mxu3 }
 0xdcc   :  { %v10646_v52 = vadd.f32 %v10645_v62, %v10615_v57  ;;  %v10302_v36 = vadd.f32 %v10301_v26, %v17197_v27  ;;  %v10545_v57 = vpop.permute.xlu2 %10544  ;;  %v10230_v26 = vadd.f32 %v10229_v53, %v17140_v22 }
 0xdce   :  { %v10360_v16 = vmul.f32 0.2, %v10302_v36 }
 0xdd0   :  { %v10392_v15 = vmax.f32 %v10302_v36, %v10360_v16 }
 0xdd2   :  { %v10616_v25 = vmul.f32 %v10515_v43, %v10392_v15 }
 0xdd3   :  { %v10303_v17 = vpop.f32.mrf.mxu3 }
 0xdd4   :  { %v10647_v21 = vadd.f32 %v10646_v52, %v10616_v25  ;;  %v10304_v28 = vadd.f32 %v10303_v17, %v17203_v61  ;;  %v10237_v17 = vpop.f32.mrf.mxu2 }
 0xdd6   :  { %v10361_v35 = vmul.f32 0.2, %v10304_v28 }
 0xdd8   :  { %v10393_v18 = vmax.f32 %v10304_v28, %v10361_v35 }
 0xdda   :  { %v10617_v54 = vmul.f32 %v10520_v46, %v10393_v18 }
 0xddb   :  { %v10306_v9 = vpop.f32.mrf.mxu3 }
 0xddc   :  { %v10648_v24 = vadd.f32 %v10647_v21, %v10617_v54  ;;  %v10307_v11 = vadd.f32 %v10306_v9, %v17206_v58  ;;  %v10535_v58 = vpop.permute.xlu0 %10534  ;;  %v10233_v21 = vadd.f32 %v10232_v55, %v17146_v29  ;;  %v10555_v9 = vpop.permute.xlu1 %10554 }
 0xdde   :  { %v10362_v7 = vmul.f32 0.2, %v10307_v11 }
 0xde0   :  { %v10394_v41 = vmax.f32 %v10307_v11, %v10362_v7  ;;  %v10239_v11 = vpop.f32.mrf.mxu2 }
 0xde2   :  { %v10618_v27 = vmul.f32 %v10525_v33, %v10394_v41 }
 0xde3   :  { %v10308_v59 = vpop.f32.mrf.mxu3 }
 0xde4   :  { %v10649_v63 = vadd.f32 %v10648_v24, %v10618_v27  ;;  %v10309_v34 = vadd.f32 %v10308_v59, %v17210_v45  ;;  %v10550_v25 = vpop.permute.xlu0 %10549  ;;  %v10235_v24 = vadd.f32 %v10234_v2, %v17152_v51  ;;  %v10240_v51 = vadd.f32 %v10239_v11, %v17164_v44 }
 0xde6   :  { %v10363_v42 = vmul.f32 0.2, %v10309_v34 }
 0xde8   :  { %v10395_v5 = vmax.f32 %v10309_v34, %v10363_v42  ;;  %v10238_v34 = vadd.f32 %v10237_v17, %v17158_v60 }
 0xdea   :  { %v10619_v61 = vmul.f32 %v10530_v32, %v10395_v5 }
 0xdeb   :  { %v10311_v12 = vpop.f32.mrf.mxu3 }
 0xdec   :  { %v10650_v40 = vadd.f32 %v10649_v63, %v10619_v61  ;;  %v10312_v13 = vadd.f32 %v10311_v12, %v17214_v14  ;;  %v10560_v63 = vpop.permute.xlu2 %10559  ;;  %v10242_v61 = vpop.f32.mrf.mxu2 }
 0xded   :  { %v10243_v60 = vadd.f32 %v10242_v61, %v17170_v31 }
 0xdee   :  { %v10364_v48 = vmul.f32 0.2, %v10312_v13 }
 0xdf0   :  { %v10396_v56 = vmax.f32 %v10312_v13, %v10364_v48 }
 0xdf2   :  { %v10620_v39 = vmul.f32 %v10535_v58, %v10396_v56 }
 0xdf3   :  { %v10313_v37 = vpop.f32.mrf.mxu3 }
 0xdf4   :  { %v10651_v0 = vadd.f32 %v10650_v40, %v10620_v39  ;;  %v10314_v19 = vadd.f32 %v10313_v37, %v17218_v10  ;;  %v10565_v40 = vpop.permute.xlu0 %10564  ;;  %v10244_v37 = vpop.f32.mrf.mxu2 }
 0xdf5   :  { %v10245_v44 = vadd.f32 %v10244_v37, %v17176_v30 }
 0xdf6   :  { %v10365_v23 = vmul.f32 0.2, %v10314_v19 }
 0xdf8   :  { %v10397_v45 = vmax.f32 %v10314_v19, %v10365_v23  ;;  %v10570_v19 = vpop.permute.xlu1 %10569 }
 0xdfa   :  { %v10621_v62 = vmul.f32 %v10540_v20, %v10397_v45 }
 0xdfb   :  { %v10316_v38 = vpop.f32.mrf.mxu3 }
 0xdfc   :  { %v10652_v3 = vadd.f32 %v10651_v0, %v10621_v62  ;;  %v10317_v47 = vadd.f32 %v10316_v38, %v17222_v50 }
 0xdfe   :  { %v10366_v8 = vmul.f32 0.2, %v10317_v47 }
 0xe00   :  { %v10398_v14 = vmax.f32 %v10317_v47, %v10366_v8  ;;  %v10247_v47 = vpop.f32.mrf.mxu2 }
 0xe02   :  { %v10622_v52 = vmul.f32 %v10545_v57, %v10398_v14 }
 0xe03   :  { %v10318_v36 = vpop.f32.mrf.mxu3 }
 0xe04   :  { %v10653_v16 = vadd.f32 %v10652_v3, %v10622_v52  ;;  %v10319_v15 = vadd.f32 %v10318_v36, %v10230_v26  ;;  %v10575_v3 = vpop.permute.xlu2 %10574  ;;  %v10580_v36 = vpop.permute.xlu0 %10579 }
 0xe06   :  { %v10367_v10 = vmul.f32 0.2, %v10319_v15 }
 0xe08   :  { %v10399_v43 = vmax.f32 %v10319_v15, %v10367_v10  ;;  %v10249_v15 = vpop.f32.mrf.mxu2 }
 0xe0a   :  { %v10623_v28 = vmul.f32 %v10550_v25, %v10399_v43 }
 0xe0b   :  { %v10321_v35 = vpop.f32.mrf.mxu3 }
 0xe0c   :  { %v10654_v18 = vadd.f32 %v10653_v16, %v10623_v28  ;;  %v10322_v50 = vadd.f32 %v10321_v35, %v10233_v21  ;;  %v10248_v16 = vadd.f32 %v10247_v47, %v17182_v1  ;;  %v10585_v28 = vpop.permute.xlu1 %10584  ;;  %v10250_v35 = vadd.f32 %v10249_v15, %v17188_v4 }
 0xe0e   :  { %v10368_v46 = vmul.f32 0.2, %v10322_v50 }
 0xe10   :  { %v10400_v54 = vmax.f32 %v10322_v50, %v10368_v46 }
 0xe12   :  { %v10624_v22 = vmul.f32 %v10555_v9, %v10400_v54  ;;  %v10252_v54 = vpop.f32.mrf.mxu2 }
 0xe13   :  { %v10323_v7 = vpop.f32.mrf.mxu3  ;;  %v10253_v1 = vadd.f32 %v10252_v54, %v17194_v6 }
 0xe14   :  { %v10655_v41 = vadd.f32 %v10654_v18, %v10624_v22  ;;  %v10324_v33 = vadd.f32 %v10323_v7, %v10235_v24  ;;  %v10590_v22 = vpop.permute.xlu2 %10589 }
 0xe16   :  { %v10369_v27 = vmul.f32 0.2, %v10324_v33 }
 0xe18   :  { %v10401_v59 = vmax.f32 %v10324_v33, %v10369_v27 }
 0xe1a   :  { %v10625_v29 = vmul.f32 %v10560_v63, %v10401_v59  ;;  %v10254_v59 = vpop.f32.mrf.mxu2 }
 0xe1b   :  { %v10326_v42 = vpop.f32.mrf.mxu3  ;;  %v10255_v4 = vadd.f32 %v10254_v59, %v17200_v49 }
 0xe1c   :  { %v10656_v5 = vadd.f32 %v10655_v41, %v10625_v29  ;;  %v10327_v32 = vadd.f32 %v10326_v42, %v10238_v34  ;;  %v10595_v34 = vpop.permute.xlu0 %10594 }
 0xe1e   :  { %v10370_v53 = vmul.f32 0.2, %v10327_v32 }
 0xe20   :  { %v10402_v12 = vmax.f32 %v10327_v32, %v10370_v53 }
 0xe22   :  { %v10626_v13 = vmul.f32 %v10565_v40, %v10402_v12  ;;  %v10600_v12 = vpop.permute.xlu1 %10599 }
 0xe23   :  { %v10328_v48 = vpop.f32.mrf.mxu3 }
 0xe24   :  { %v10657_v56 = vadd.f32 %v10656_v5, %v10626_v13  ;;  %v10329_v58 = vadd.f32 %v10328_v48, %v10240_v51 }
 0xe26   :  { %v10371_v39 = vmul.f32 0.2, %v10329_v58 }
 0xe28   :  { %v10403_v0 = vmax.f32 %v10329_v58, %v10371_v39  ;;  %v10675_v58 = vpop.permute.xlu2 %10674 }
 0xe29   :  { %v10677_v37 = vperm.slane %v10675_v58, 0 }
 0xe2a   :  { %v10627_v55 = vmul.f32 %v10570_v19, %v10403_v0 }
 0xe2b   :  { %v10331_v23 = vpop.f32.mrf.mxu3 }
 0xe2c   :  { %v10658_v45 = vadd.f32 %v10657_v56, %v10627_v55  ;;  %v10332_v20 = vadd.f32 %v10331_v23, %v10243_v60 }
 0xe2e   :  { %v10372_v62 = vmul.f32 0.2, %v10332_v20 }
 0xe30   :  { %v10404_v38 = vmax.f32 %v10332_v20, %v10372_v62 }
 0xe32   :  { %v10628_v8 = vmul.f32 %v10575_v3, %v10404_v38 }
 0xe33   :  { %v10333_v2 = vpop.f32.mrf.mxu3 }
 0xe34   :  { %v10659_v14 = vadd.f32 %v10658_v45, %v10628_v8  ;;  %v10334_v57 = vadd.f32 %v10333_v2, %v10245_v44 }
 0xe36   :  { %v10373_v26 = vmul.f32 0.2, %v10334_v57 }
 0xe38   :  { %v10405_v52 = vmax.f32 %v10334_v57, %v10373_v26 }
 0xe3a   :  { %v10629_v31 = vmul.f32 %v10580_v36, %v10405_v52 }
 0xe3b   :  { %v10336_v10 = vpop.f32.mrf.mxu3 }
 0xe3c   :  { %v10660_v43 = vadd.f32 %v10659_v14, %v10629_v31  ;;  %v10337_v25 = vadd.f32 %v10336_v10, %v10248_v16 }
 0xe3e   :  { %v10374_v17 = vmul.f32 0.2, %v10337_v25 }
 0xe40   :  { %v10406_v21 = vmax.f32 %v10337_v25, %v10374_v17 }
 0xe42   :  { %v10630_v30 = vmul.f32 %v10585_v28, %v10406_v21 }
 0xe43   :  { %v10338_v18 = vpop.f32.mrf.mxu3 }
 0xe44   :  { %v10661_v50 = vadd.f32 %v10660_v43, %v10630_v30  ;;  %v10339_v46 = vadd.f32 %v10338_v18, %v10250_v35 }
 0xe46   :  { %v10375_v9 = vmul.f32 0.2, %v10339_v46 }
 0xe48   :  { %v10407_v24 = vmax.f32 %v10339_v46, %v10375_v9 }
 0xe4a   :  { %v10631_v11 = vmul.f32 %v10590_v22, %v10407_v24 }
 0xe4b   :  { %v10341_v7 = vpop.f32.mrf.mxu3 }
 0xe4c   :  { %v10662_v41 = vadd.f32 %v10661_v50, %v10631_v11  ;;  %v10342_v33 = vadd.f32 %v10341_v7, %v10253_v1 }
 0xe4e   :  { %v10376_v27 = vmul.f32 0.2, %v10342_v33 }
 0xe50   :  { %v10408_v63 = vmax.f32 %v10342_v33, %v10376_v27 }
 0xe52   :  { %v10632_v29 = vmul.f32 %v10595_v34, %v10408_v63 }
 0xe53   :  { %v10343_v42 = vpop.f32.mrf.mxu3 }
 0xe54   :  { %v10663_v5 = vadd.f32 %v10662_v41, %v10632_v29  ;;  %v10344_v32 = vadd.f32 %v10343_v42, %v10255_v4 }
 0xe56   :  { %v10377_v61 = vmul.f32 0.2, %v10344_v32 }
 0xe58   :  { %v10409_v53 = vmax.f32 %v10344_v32, %v10377_v61 }
 0xe5a   :  { %v10633_v40 = vmul.f32 %v10600_v12, %v10409_v53 }
 0xe5c   :  { %v10664_v51 = vadd.f32 %v10663_v5, %v10633_v40 }
 0xe5e   :  { %v10665_v6 = vrot.slane %v10664_v51, 4 }
 0xe60   :  { %v10666_v13 = vadd.f32 %v10665_v6, %v10664_v51 }
 0xe62   :  { %v10667_v48 = vrot.slane %v10666_v13, 2 }
 0xe64   :  { %v10668_v56 = vadd.f32 %v10667_v48, %v10666_v13 }
 0xe66   :  { %v10669_v39 = vrot.slane %v10668_v56, 1 }
 0xe68   :  { %v10670_v0 = vadd.f32 %v10669_v39, %v10668_v56 }
 0xe6a   :  { %v10678_v19 = vadd.f32 %v10677_v37, %v10670_v0 }
 0xe6c   :  { %v10679_v60 = vsub.f32 0.0, %v10678_v19 }
 0xe6e   :  { %v10680_v49 = vmul.f32 1.442695, %v10679_v60 }
 0xe70   :  { %14841 = vpow2.f32 %v10680_v49 }
 0xe76   :  { %v14842_v55 = vpop.eup %14841 }
 0xe77   :  { %v10682_v23 = vadd.f32 1.0, %v14842_v55 }
 0xe79   :  { %14843 = vrcp.f32 %v10682_v23 }
 0xe7f   :  { %v14844_v45 = vpop.eup %14843 }
 0xe80   :  { %10684 = vst [vmem:[#allocation11] sm:$0x1] %v14844_v45 }
 0xe81   :  { %10695 = dma.vmem_to_hbm [thread:$0]  %s10691_s14, 16, %s10693_s7, [#allocation5]  }
 0xe82   :  { %14971 = dma.done.wait [#allocation5], 16  }
 0xe83   :  { %14972 = vsyncadd [#allocation5], 4294967280 }
 0xe84   :  { %10700 = vsyncpa [#allocation4], 1 }
 0xe85   :  { %10701 = vsyncpa [#allocation7], 1 }
 0xe86   :  { %10702 = vsyncpa [#allocation10], 1 }
 0xe87   :  { %10703 = vsyncpa [#allocation5], 1 }

</bundles_post_ra>
